<compile_context>
chip_gen: v7x
topology: tpu7x:2x2x1
jax: 0.10.0
libtpu: 0.0.40
codegen_flags: <defaults>
</compile_context>

<pallas_src>
import jax
import jax.numpy as jnp
from jax.experimental import pallas as pl
from jax.experimental.pallas import tpu as pltpu


NEG_SLOPE = 0.2  # matches nn.LeakyReLU(0.2) in the reference module


def _leaky_relu(y):
    return jnp.where(y >= 0, y, NEG_SLOPE * y)


# --------------------------------------------------------------------------
# Prologue kernel: the three small hidden layers, fully resident in VMEM.
# --------------------------------------------------------------------------
def _hidden_stack_kernel(x_ref, w0_ref, b0_ref, w1_ref, b1_ref,
                         w2_ref, b2_ref, h_ref):
    h = jnp.dot(x_ref[...].astype(w0_ref.dtype), w0_ref[...],
                preferred_element_type=jnp.float32) + b0_ref[...]
    h = _leaky_relu(h)

    h = jnp.dot(h.astype(w1_ref.dtype), w1_ref[...],
                preferred_element_type=jnp.float32) + b1_ref[...]
    h = _leaky_relu(h)

    h = jnp.dot(h.astype(w2_ref.dtype), w2_ref[...],
                preferred_element_type=jnp.float32) + b2_ref[...]
    h = _leaky_relu(h)

    h_ref[...] = h.astype(h_ref.dtype)


def _hidden_stack(prepared, x):
    w0, b0 = prepared["w0"], prepared["b0"]
    w1, b1 = prepared["w1"], prepared["b1"]
    w2, b2 = prepared["w2"], prepared["b2"]
    B = x.shape[0]
    K2 = w2.shape[1]  # 2048

    grid_spec = pltpu.PrefetchScalarGridSpec(
        num_scalar_prefetch=0,
        grid=(1,),
        in_specs=[
            pl.BlockSpec(x.shape, lambda i: (0, 0)),
            pl.BlockSpec(w0.shape, lambda i: (0, 0)),
            pl.BlockSpec(b0.shape, lambda i: (0, 0)),
            pl.BlockSpec(w1.shape, lambda i: (0, 0)),
            pl.BlockSpec(b1.shape, lambda i: (0, 0)),
            pl.BlockSpec(w2.shape, lambda i: (0, 0)),
            pl.BlockSpec(b2.shape, lambda i: (0, 0)),
        ],
        out_specs=pl.BlockSpec((B, K2), lambda i: (0, 0)),
    )

    return pl.pallas_call(
        _hidden_stack_kernel,
        out_shape=jax.ShapeDtypeStruct((B, K2), w2.dtype),  # bf16 h
        grid_spec=grid_spec,
        compiler_params=pltpu.CompilerParams(
            dimension_semantics=("arbitrary",),
            vmem_limit_bytes=32 << 20,
        ),
    )(x, w0, b0, w1, b1, w2, b2)


# --------------------------------------------------------------------------
# Streaming kernel: final 2048 -> 65536 layer + tanh, tiled over output cols.
# --------------------------------------------------------------------------
def _out_layer_kernel(h_ref, w3_ref, b3_ref, o_ref):
    y = jnp.dot(h_ref[...], w3_ref[...],
                preferred_element_type=jnp.float32) + b3_ref[...]
    o_ref[...] = jnp.tanh(y).astype(o_ref.dtype)


def _out_layer(prepared, h):
    w3_tiled = prepared["w3_tiled"]          # (n_tiles, K3, tile_n) bf16, contiguous tiles
    b3 = prepared["b3"]                      # (1, N) f32
    tile_n = prepared["tile_n"]
    N = prepared["n_out"]
    n_tiles, K3, _ = w3_tiled.shape
    B = h.shape[0]

    # VMEM budget derived from the double-buffered streamed weight tile.
    w3_block_bytes = K3 * tile_n * w3_tiled.dtype.itemsize
    vmem_limit = 2 * w3_block_bytes + (16 << 20)   # 48 MiB at tile_n=4096 (fits v7x 64 MiB)

    bytes_accessed = (w3_tiled.size * w3_tiled.dtype.itemsize
                      + b3.size * b3.dtype.itemsize
                      + h.size * h.dtype.itemsize
                      + B * N * 4)
    cost = pl.CostEstimate(
        flops=2 * B * K3 * N,
        transcendentals=B * N,
        bytes_accessed=bytes_accessed,
    )

    grid_spec = pltpu.PrefetchScalarGridSpec(
        num_scalar_prefetch=0,
        grid=(n_tiles,),
        in_specs=[
            # h (B, 2048) bf16: constant block index -> resident across all steps.
            pl.BlockSpec((B, K3), lambda j: (0, 0)),
            # Pre-tiled w3: one fully contiguous (K3, tile_n) block per step
            # (leading tile dim squeezed out of the kernel ref).
            pl.BlockSpec((None, K3, tile_n), lambda j: (j, 0, 0)),
            pl.BlockSpec((1, tile_n), lambda j: (0, j)),
        ],
        out_specs=pl.BlockSpec((B, tile_n), lambda j: (0, j)),
    )

    return pl.pallas_call(
        _out_layer_kernel,
        out_shape=jax.ShapeDtypeStruct((B, N), jnp.float32),
        grid_spec=grid_spec,
        compiler_params=pltpu.CompilerParams(
            # "parallel" lets the independent N-tiles shard across v7x's 2 TCs;
            # no-op on single-TC v5e/v6e.
            dimension_semantics=("parallel",),
            vmem_limit_bytes=vmem_limit,
        ),
        cost_estimate=cost,
    )(h, w3_tiled, b3)


def generator_forward(prepared, x):
    """y = Tanh(L3(LReLU(L2(LReLU(L1(LReLU(L0(x)))))))) via the two kernels."""
    h = _hidden_stack(prepared, x)
    return _out_layer(prepared, h)


# --------------------------------------------------------------------------
# Parameter construction / preparation (done once, outside the hot path).
# --------------------------------------------------------------------------
def init_generator_params(key, weight_dtype=jnp.bfloat16):
    """nn.Linear-style U(-1/sqrt(fan_in), 1/sqrt(fan_in)) init.

    Weights stored bf16 (halves the dominant HBM weight stream), biases f32.
    """
    dims = [(32, 512), (512, 1024), (1024, 2048), (2048, 65536)]
    params = []
    for fan_in, fan_out in dims:
        key, kw, kb = jax.random.split(key, 3)
        bound = 1.0 / float(fan_in) ** 0.5
        w = jax.random.uniform(kw, (fan_in, fan_out), dtype=jnp.float32,
                               minval=-bound, maxval=bound).astype(weight_dtype)
        b = jax.random.uniform(kb, (fan_out,), dtype=jnp.float32,
                               minval=-bound, maxval=bound)
        params.append((w, b))
    return params


def prepare_params(params, *, tile_n=4096):
    """Pre-tile the dominant output weight and reshape biases, once.

    tile_n=4096 -> 16 MiB bf16 w3 block (32 MiB double-buffered): safe on v7x's
    64 MiB per-TC VMEM.  On v5e/v6e (128 MiB) tile_n=8192 cuts grid steps further.
    """
    (w0, b0), (w1, b1), (w2, b2), (w3, b3) = params
    K3, N = w3.shape
    assert N % tile_n == 0
    n_tiles = N // tile_n
    # (K3, N) -> (n_tiles, K3, tile_n): tile j == w3[:, j*tile_n:(j+1)*tile_n],
    # stored contiguously so each grid step's DMA is one dense block.
    w3_tiled = jnp.transpose(w3.reshape(K3, n_tiles, tile_n), (1, 0, 2))
    return {
        "w0": w0, "b0": b0.reshape(1, -1).astype(jnp.float32),
        "w1": w1, "b1": b1.reshape(1, -1).astype(jnp.float32),
        "w2": w2, "b2": b2.reshape(1, -1).astype(jnp.float32),
        "w3_tiled": w3_tiled,
        "b3": b3.reshape(1, -1).astype(jnp.float32),
        "tile_n": tile_n,
        "n_out": N,
    }


def generator_reference(params, x):
    """Pure-JAX reference with identical numerics (bf16 matmul inputs, f32 acc)."""
    h = x.astype(jnp.float32)
    for i, (w, b) in enumerate(params):
        y = jnp.dot(h.astype(w.dtype), w,
                    preferred_element_type=jnp.float32) + b.astype(jnp.float32)
        h = _leaky_relu(y) if i < 3 else jnp.tanh(y)
    return h


# TODO(synk): train_generator / the Adam optimizer step is training logic, not
# part of the forward pass, and is not implemented here.
# TODO(synk): optional ~2x lever — quantize w3 (int8 on v5e/v6e, fp8 on v7x)
# with per-column scales; omitted to keep numerics identical to the reference.


if __name__ == "__main__":
    key = jax.random.PRNGKey(0)
    kp, kx = jax.random.split(key)

    params = init_generator_params(kp)
    prepared = prepare_params(params, tile_n=4096)

    batch = 2
    n_features = 32
    x = jax.random.normal(kx, (batch, n_features), dtype=jnp.float32)

    y = generator_forward(prepared, x)
    y = jax.block_until_ready(y)

    assert y.shape == (batch, 65536), y.shape
    assert bool(jnp.all(jnp.isfinite(y)))
    assert bool(jnp.all(jnp.abs(y) <= 1.0 + 1e-6))  # tanh output range

    y_ref = generator_reference(params, x)
    max_err = float(jnp.max(jnp.abs(y - y_ref)))
    assert max_err < 2e-2, max_err

    print("KERNEL_OK")
</pallas_src>

<mosaic_0001>
module attributes {stable_mosaic.version = 11 : i64} {
  func.func @_hidden_stack_kernel(%arg0: i32, %arg1: memref<2x32xf32, #tpu.memory_space<vmem>>, %arg2: memref<32x512xbf16, #tpu.memory_space<vmem>>, %arg3: memref<1x512xf32, #tpu.memory_space<vmem>>, %arg4: memref<512x1024xbf16, #tpu.memory_space<vmem>>, %arg5: memref<1x1024xf32, #tpu.memory_space<vmem>>, %arg6: memref<1024x2048xbf16, #tpu.memory_space<vmem>>, %arg7: memref<1x2048xf32, #tpu.memory_space<vmem>>, %arg8: memref<2x2048xbf16, #tpu.memory_space<vmem>>) attributes {dimension_semantics = [#tpu.dimension_semantics<arbitrary>], iteration_bounds = array<i64: 1>, scalar_prefetch = 0 : i64, scratch_operands = 0 : i64, tpu.core_type = #tpu.core_type<tc>, window_params = [{pipeline_mode = #tpu.pipeline_mode<synchronous>, transform_indices = @transform_0, window_bounds = array<i64: 2, 32>}, {pipeline_mode = #tpu.pipeline_mode<synchronous>, transform_indices = @transform_1, window_bounds = array<i64: 32, 512>}, {pipeline_mode = #tpu.pipeline_mode<synchronous>, transform_indices = @transform_2, window_bounds = array<i64: 1, 512>}, {pipeline_mode = #tpu.pipeline_mode<synchronous>, transform_indices = @transform_3, window_bounds = array<i64: 512, 1024>}, {pipeline_mode = #tpu.pipeline_mode<synchronous>, transform_indices = @transform_4, window_bounds = array<i64: 1, 1024>}, {pipeline_mode = #tpu.pipeline_mode<synchronous>, transform_indices = @transform_5, window_bounds = array<i64: 1024, 2048>}, {pipeline_mode = #tpu.pipeline_mode<synchronous>, transform_indices = @transform_6, window_bounds = array<i64: 1, 2048>}, {pipeline_mode = #tpu.pipeline_mode<synchronous>, transform_indices = @transform_7, window_bounds = array<i64: 2, 2048>}]} {
    %c0 = arith.constant 0 : index
    %c0_0 = arith.constant 0 : index
    %0 = vector.load %arg1[%c0, %c0_0] : memref<2x32xf32, #tpu.memory_space<vmem>>, vector<2x32xf32>
    %1 = arith.truncf %0 : vector<2x32xf32> to vector<2x32xbf16>
    %c0_1 = arith.constant 0 : index
    %c0_2 = arith.constant 0 : index
    %2 = vector.load %arg2[%c0_1, %c0_2] : memref<32x512xbf16, #tpu.memory_space<vmem>>, vector<32x512xbf16>
    %cst = arith.constant dense<0.000000e+00> : vector<2x512xf32>
    %3 = tpu.matmul %1, %2, %cst {dimension_numbers = #tpu.dot_dimension_numbers<[1], [0], [0], [1], [0, 0, 1, 1], [], []>} : vector<2x32xbf16>, vector<32x512xbf16>, vector<2x512xf32> -> vector<2x512xf32>
    %c0_3 = arith.constant 0 : index
    %c0_4 = arith.constant 0 : index
    %4 = vector.load %arg3[%c0_3, %c0_4] : memref<1x512xf32, #tpu.memory_space<vmem>>, vector<1x512xf32>
    %5 = vector.broadcast %4 : vector<1x512xf32> to vector<2x512xf32>
    %6 = arith.addf %3, %5 : vector<2x512xf32>
    %cst_5 = arith.constant 0.000000e+00 : f32
    %7 = vector.broadcast %cst_5 : f32 to vector<2x512xf32>
    %8 = arith.cmpf oge, %6, %7 : vector<2x512xf32>
    %cst_6 = arith.constant 2.000000e-01 : f32
    %9 = vector.broadcast %cst_6 : f32 to vector<2x512xf32>
    %10 = arith.mulf %9, %6 : vector<2x512xf32>
    %11 = arith.select %8, %6, %10 : vector<2x512xi1>, vector<2x512xf32>
    %12 = arith.truncf %11 : vector<2x512xf32> to vector<2x512xbf16>
    %c0_7 = arith.constant 0 : index
    %c0_8 = arith.constant 0 : index
    %13 = vector.load %arg4[%c0_7, %c0_8] : memref<512x1024xbf16, #tpu.memory_space<vmem>>, vector<512x1024xbf16>
    %cst_9 = arith.constant dense<0.000000e+00> : vector<2x1024xf32>
    %14 = tpu.matmul %12, %13, %cst_9 {dimension_numbers = #tpu.dot_dimension_numbers<[1], [0], [0], [1], [0, 0, 1, 1], [], []>} : vector<2x512xbf16>, vector<512x1024xbf16>, vector<2x1024xf32> -> vector<2x1024xf32>
    %c0_10 = arith.constant 0 : index
    %c0_11 = arith.constant 0 : index
    %15 = vector.load %arg5[%c0_10, %c0_11] : memref<1x1024xf32, #tpu.memory_space<vmem>>, vector<1x1024xf32>
    %16 = vector.broadcast %15 : vector<1x1024xf32> to vector<2x1024xf32>
    %17 = arith.addf %14, %16 : vector<2x1024xf32>
    %cst_12 = arith.constant 0.000000e+00 : f32
    %18 = vector.broadcast %cst_12 : f32 to vector<2x1024xf32>
    %19 = arith.cmpf oge, %17, %18 : vector<2x1024xf32>
    %cst_13 = arith.constant 2.000000e-01 : f32
    %20 = vector.broadcast %cst_13 : f32 to vector<2x1024xf32>
    %21 = arith.mulf %20, %17 : vector<2x1024xf32>
    %22 = arith.select %19, %17, %21 : vector<2x1024xi1>, vector<2x1024xf32>
    %23 = arith.truncf %22 : vector<2x1024xf32> to vector<2x1024xbf16>
    %c0_14 = arith.constant 0 : index
    %c0_15 = arith.constant 0 : index
    %24 = vector.load %arg6[%c0_14, %c0_15] : memref<1024x2048xbf16, #tpu.memory_space<vmem>>, vector<1024x2048xbf16>
    %cst_16 = arith.constant dense<0.000000e+00> : vector<2x2048xf32>
    %25 = tpu.matmul %23, %24, %cst_16 {dimension_numbers = #tpu.dot_dimension_numbers<[1], [0], [0], [1], [0, 0, 1, 1], [], []>} : vector<2x1024xbf16>, vector<1024x2048xbf16>, vector<2x2048xf32> -> vector<2x2048xf32>
    %c0_17 = arith.constant 0 : index
    %c0_18 = arith.constant 0 : index
    %26 = vector.load %arg7[%c0_17, %c0_18] : memref<1x2048xf32, #tpu.memory_space<vmem>>, vector<1x2048xf32>
    %27 = vector.broadcast %26 : vector<1x2048xf32> to vector<2x2048xf32>
    %28 = arith.addf %25, %27 : vector<2x2048xf32>
    %cst_19 = arith.constant 0.000000e+00 : f32
    %29 = vector.broadcast %cst_19 : f32 to vector<2x2048xf32>
    %30 = arith.cmpf oge, %28, %29 : vector<2x2048xf32>
    %cst_20 = arith.constant 2.000000e-01 : f32
    %31 = vector.broadcast %cst_20 : f32 to vector<2x2048xf32>
    %32 = arith.mulf %31, %28 : vector<2x2048xf32>
    %33 = arith.select %30, %28, %32 : vector<2x2048xi1>, vector<2x2048xf32>
    %34 = arith.truncf %33 : vector<2x2048xf32> to vector<2x2048xbf16>
    %c0_21 = arith.constant 0 : index
    %c0_22 = arith.constant 0 : index
    %35 = vector.load %arg8[%c0_21, %c0_22] : memref<2x2048xbf16, #tpu.memory_space<vmem>>, vector<2x2048xbf16>
    tpu.vector_store %arg8[%c0_21, %c0_22], %34 {strides = array<i32>} : memref<2x2048xbf16, #tpu.memory_space<vmem>>, vector<2x2048xbf16>,
    return
  }
  func.func @transform_0(%arg0: i32) -> (i32, i32) {
    %c0_i32 = arith.constant 0 : i32
    %c0_i32_0 = arith.constant 0 : i32
    %c0_i32_1 = arith.constant 0 : i32
    return %c0_i32, %c0_i32_0 : i32, i32
  }
  func.func @transform_1(%arg0: i32) -> (i32, i32) {
    %c0_i32 = arith.constant 0 : i32
    %c0_i32_0 = arith.constant 0 : i32
    %c0_i32_1 = arith.constant 0 : i32
    return %c0_i32, %c0_i32_0 : i32, i32
  }
  func.func @transform_2(%arg0: i32) -> (i32, i32) {
    %c0_i32 = arith.constant 0 : i32
    %c0_i32_0 = arith.constant 0 : i32
    %c0_i32_1 = arith.constant 0 : i32
    return %c0_i32, %c0_i32_0 : i32, i32
  }
  func.func @transform_3(%arg0: i32) -> (i32, i32) {
    %c0_i32 = arith.constant 0 : i32
    %c0_i32_0 = arith.constant 0 : i32
    %c0_i32_1 = arith.constant 0 : i32
    return %c0_i32, %c0_i32_0 : i32, i32
  }
  func.func @transform_4(%arg0: i32) -> (i32, i32) {
    %c0_i32 = arith.constant 0 : i32
    %c0_i32_0 = arith.constant 0 : i32
    %c0_i32_1 = arith.constant 0 : i32
    return %c0_i32, %c0_i32_0 : i32, i32
  }
  func.func @transform_5(%arg0: i32) -> (i32, i32) {
    %c0_i32 = arith.constant 0 : i32
    %c0_i32_0 = arith.constant 0 : i32
    %c0_i32_1 = arith.constant 0 : i32
    return %c0_i32, %c0_i32_0 : i32, i32
  }
  func.func @transform_6(%arg0: i32) -> (i32, i32) {
    %c0_i32 = arith.constant 0 : i32
    %c0_i32_0 = arith.constant 0 : i32
    %c0_i32_1 = arith.constant 0 : i32
    return %c0_i32, %c0_i32_0 : i32, i32
  }
  func.func @transform_7(%arg0: i32) -> (i32, i32) {
    %c0_i32 = arith.constant 0 : i32
    %c0_i32_0 = arith.constant 0 : i32
    %c0_i32_1 = arith.constant 0 : i32
    return %c0_i32, %c0_i32_0 : i32, i32
  }
}

</mosaic_0001>

<bundles_post_ra>
// kernel: tpu_custom_call.1
= control target key start
LH: loop header
LB: loop body
LE: loop exit
PB: predicated region body
PF: predicated region fallthrough
CT: control target
= control target key end

     0   :  { %12 = vsyncpa [#allocation3], 0  ;;  %s12000_s0 = inlined_call_operand.hbm [shape: f32[2,32], index: 0, kind: input, shape index: {}]   ;;  %s12001_s1 = inlined_call_operand.hbm [shape: bf16[32,512], index: 1, kind: input, shape index: {}]   ;;  %s12002_s2 = inlined_call_operand.hbm [shape: f32[1,512], index: 2, kind: input, shape index: {}]   ;;  %s12003_s3 = inlined_call_operand.hbm [shape: bf16[512,1024], index: 3, kind: input, shape index: {}]   ;;  %s12004_s4 = inlined_call_operand.hbm [shape: f32[1,1024], index: 4, kind: input, shape index: {}]   ;;  %s12005_s5 = inlined_call_operand.hbm [shape: bf16[1024,2048], index: 5, kind: input, shape index: {}]   ;;  %s12006_s6 = inlined_call_operand.hbm [shape: f32[1,2048], index: 6, kind: input, shape index: {}]   ;;  %s12007_s7 = inlined_call_operand.hbm [shape: bf16[2,2048], index: 7, kind: output, shape index: {}]  }
   0x1   :  { %13 = vsyncpa [#allocation6], 0 }
   0x2   :  { %14 = vsyncpa [#allocation9], 0 }
   0x3   :  { %15 = vsyncpa [#allocation12], 0 }
   0x4   :  { %16 = vsyncpa [#allocation4], 0  ;;  %s11617_s24 = smov [#allocation5]   ;;  %s11431_s28 = scalar_lea.hbm %s12001_s1, 1024 }
   0x5   :  { %s32_s25 = sshll.u32 %s11617_s24, 4  ;;  %p11432_p0 = scmp.ne.s32.totalorder %s12001_s1, %s11431_s28  ;;  %s33_s25 = int_to_ptr.vmem [resolvable:$true] %s32_s25 }
   0x6   :  { %p11435_p1 = scmp.lt.u32.totalorder %s11431_s28, %s12001_s1 }
   0x8   :  { %p11437_p2 = pnand %p11435_p1, %p11432_p0 }
   0xa   :  { %11440 = shalt.err (!%p11437_p2)
}
   0xb   :  { %s11441_s10 = scalar_lea.vmem %s33_s25, 1024  ;;  %p11446_p4 = scmp.lt.s32.totalorder %s33_s25, %s33_s25 }
   0xc   :  { %p11442_p3 = scmp.ne.s32.totalorder %s33_s25, %s11441_s10  ;;  %p11447_p5 = scmp.lt.s32.totalorder %s11441_s10, %s11441_s10 }
   0xe   :  { %p11448_p6 = por %p11447_p5, %p11446_p4 }
  0x10   :  { %p11449_p7 = pnand %p11448_p6, %p11442_p3 }
  0x12   :  { %11452 = shalt.err (!%p11449_p7)
}
  0x13   :  { %s11618_s11 = smov 256   ;;  %s11619_s12 = smov 16  }
  0x14   :  { %38 = dma.hbm_to_vmem [thread:$0]  %s12001_s1, 1024, %s33_s25, [#allocation6], %s11618_s11, %s11618_s11, %s11619_s12  }
  0x15   :  { %s11620_s15 = smov [#allocation8]   ;;  %s11453_s19 = scalar_lea.hbm %s12003_s3, 32768 }
  0x16   :  { %s54_s16 = sshll.u32 %s11620_s15, 4  ;;  %p11454_p8 = scmp.ne.s32.totalorder %s12003_s3, %s11453_s19  ;;  %s55_s16 = int_to_ptr.vmem [resolvable:$true] %s54_s16 }
  0x17   :  { %p11457_p9 = scmp.lt.u32.totalorder %s11453_s19, %s12003_s3 }
  0x19   :  { %p11459_p10 = pnand %p11457_p9, %p11454_p8 }
  0x1b   :  { %11462 = shalt.err (!%p11459_p10)
}
  0x1c   :  { %s11463_s24 = scalar_lea.vmem %s55_s16, 32768  ;;  %p11468_p12 = scmp.lt.s32.totalorder %s55_s16, %s55_s16 }
  0x1d   :  { %p11464_p11 = scmp.ne.s32.totalorder %s55_s16, %s11463_s24  ;;  %p11469_p13 = scmp.lt.s32.totalorder %s11463_s24, %s11463_s24 }
  0x1f   :  { %p11470_p0 = por %p11469_p13, %p11468_p12 }
  0x21   :  { %p11471_p1 = pnand %p11470_p0, %p11464_p11 }
  0x23   :  { %11474 = shalt.err (!%p11471_p1)
}
  0x24   :  { %s11621_s1 = smov 512   ;;  %s11622_s25 = smov 32  }
  0x25   :  { %60 = dma.hbm_to_vmem [thread:$0]  %s12003_s3, 32768, %s55_s16, [#allocation9], %s11621_s1, %s11621_s1, %s11622_s25  }
  0x26   :  { %s11623_s28 = smov [#allocation11]   ;;  %s11475_s9 = scalar_lea.hbm %s12005_s5, 131072 }
  0x27   :  { %s76_s29 = sshll.u32 %s11623_s28, 4  ;;  %p11476_p2 = scmp.ne.s32.totalorder %s12005_s5, %s11475_s9  ;;  %s77_s29 = int_to_ptr.vmem [resolvable:$true] %s76_s29 }
  0x28   :  { %p11479_p3 = scmp.lt.u32.totalorder %s11475_s9, %s12005_s5 }
  0x2a   :  { %p11481_p4 = pnand %p11479_p3, %p11476_p2 }
  0x2c   :  { %11484 = shalt.err (!%p11481_p4)
}
  0x2d   :  { %s11485_s14 = scalar_lea.vmem %s77_s29, 131072  ;;  %p11490_p6 = scmp.lt.s32.totalorder %s77_s29, %s77_s29 }
  0x2e   :  { %p11486_p5 = scmp.ne.s32.totalorder %s77_s29, %s11485_s14  ;;  %p11491_p7 = scmp.lt.s32.totalorder %s11485_s14, %s11485_s14 }
  0x30   :  { %p11492_p8 = por %p11491_p7, %p11490_p6 }
  0x32   :  { %p11493_p9 = pnand %p11492_p8, %p11486_p5 }
  0x34   :  { %11496 = shalt.err (!%p11493_p9)
}
  0x35   :  { %s11624_s3 = smov 1024   ;;  %s11625_s15 = smov 64  }
  0x36   :  { %82 = dma.hbm_to_vmem [thread:$0]  %s12005_s5, 131072, %s77_s29, [#allocation12], %s11624_s3, %s11624_s3, %s11625_s15  }
  0x37   :  { %s11626_s18 = smov [#allocation2]   ;;  %s11627_s20 = smov [#allocation7]  }
  0x38   :  { %s23_s19 = sshll.u32 %s11626_s18, 4  ;;  %s45_s21 = sshll.u32 %s11627_s20, 4  ;;  %s24_s19 = int_to_ptr.vmem [resolvable:$true] %s23_s19  ;;  %s46_s21 = int_to_ptr.vmem [resolvable:$true] %s45_s21 }
  0x39   :  { %s11497_s24 = scalar_lea.hbm %s12000_s0, 32 }
  0x3a   :  { %p11498_p10 = scmp.ne.s32.totalorder %s12000_s0, %s11497_s24  ;;  %p11501_p11 = scmp.lt.u32.totalorder %s11497_s24, %s12000_s0 }
  0x3c   :  { %p11503_p12 = pnand %p11501_p11, %p11498_p10 }
  0x3e   :  { %11506 = shalt.err (!%p11503_p12)
}
  0x3f   :  { %s11507_s5 = scalar_lea.vmem %s24_s19, 32  ;;  %p11512_p0 = scmp.lt.s32.totalorder %s24_s19, %s24_s19 }
  0x40   :  { %p11508_p13 = scmp.ne.s32.totalorder %s24_s19, %s11507_s5  ;;  %p11513_p1 = scmp.lt.s32.totalorder %s11507_s5, %s11507_s5 }
  0x42   :  { %p11514_p2 = por %p11513_p1, %p11512_p0 }
  0x44   :  { %p11515_p3 = pnand %p11514_p2, %p11508_p13 }
  0x46   :  { %11518 = shalt.err (!%p11515_p3)
}
  0x47   :  { %26 = dma.hbm_to_vmem [thread:$0]  %s12000_s0, 32, %s24_s19, [#allocation3]  }
  0x48   :  { %s11519_s9 = scalar_lea.hbm %s12002_s2, 64 }
  0x49   :  { %p11520_p4 = scmp.ne.s32.totalorder %s12002_s2, %s11519_s9  ;;  %p11523_p5 = scmp.lt.u32.totalorder %s11519_s9, %s12002_s2 }
  0x4b   :  { %p11525_p6 = pnand %p11523_p5, %p11520_p4 }
  0x4d   :  { %11528 = shalt.err (!%p11525_p6)
}
  0x4e   :  { %s11529_s14 = scalar_lea.vmem %s46_s21, 64  ;;  %p11534_p8 = scmp.lt.s32.totalorder %s46_s21, %s46_s21 }
  0x4f   :  { %p11530_p7 = scmp.ne.s32.totalorder %s46_s21, %s11529_s14  ;;  %p11535_p9 = scmp.lt.s32.totalorder %s11529_s14, %s11529_s14 }
  0x51   :  { %p11536_p10 = por %p11535_p9, %p11534_p8 }
  0x53   :  { %p11537_p11 = pnand %p11536_p10, %p11530_p7 }
  0x55   :  { %11540 = shalt.err (!%p11537_p11)
}
  0x56   :  { %48 = dma.hbm_to_vmem [thread:$0]  %s12002_s2, 64, %s46_s21, [#allocation6]  }
  0x57   :  { %s11628_s15 = smov [#allocation10]   ;;  %s11629_s17 = smov [#allocation13]  }
  0x58   :  { %s67_s16 = sshll.u32 %s11628_s15, 4  ;;  %s89_s18 = sshll.u32 %s11629_s17, 4  ;;  %s68_s16 = int_to_ptr.vmem [resolvable:$true] %s67_s16  ;;  %s90_s18 = int_to_ptr.vmem [resolvable:$true] %s89_s18 }
  0x59   :  { %s11541_s22 = scalar_lea.hbm %s12004_s4, 128 }
  0x5a   :  { %p11542_p12 = scmp.ne.s32.totalorder %s12004_s4, %s11541_s22  ;;  %p11545_p13 = scmp.lt.u32.totalorder %s11541_s22, %s12004_s4 }
  0x5c   :  { %p11547_p0 = pnand %p11545_p13, %p11542_p12 }
  0x5e   :  { %11550 = shalt.err (!%p11547_p0)
}
  0x5f   :  { %s11551_s2 = scalar_lea.vmem %s68_s16, 128  ;;  %p11556_p2 = scmp.lt.s32.totalorder %s68_s16, %s68_s16 }
  0x60   :  { %p11552_p1 = scmp.ne.s32.totalorder %s68_s16, %s11551_s2  ;;  %p11557_p3 = scmp.lt.s32.totalorder %s11551_s2, %s11551_s2 }
  0x62   :  { %p11558_p4 = por %p11557_p3, %p11556_p2 }
  0x64   :  { %p11559_p5 = pnand %p11558_p4, %p11552_p1 }
  0x66   :  { %11562 = shalt.err (!%p11559_p5)
}
  0x67   :  { %70 = dma.hbm_to_vmem [thread:$0]  %s12004_s4, 128, %s68_s16, [#allocation9]  }
  0x68   :  { %s11563_s28 = scalar_lea.hbm %s12006_s6, 256 }
  0x69   :  { %p11564_p6 = scmp.ne.s32.totalorder %s12006_s6, %s11563_s28  ;;  %p11567_p7 = scmp.lt.u32.totalorder %s11563_s28, %s12006_s6 }
  0x6b   :  { %p11569_p8 = pnand %p11567_p7, %p11564_p6 }
  0x6d   :  { %11572 = shalt.err (!%p11569_p8)
}
  0x6e   :  { %s11573_s10 = scalar_lea.vmem %s90_s18, 256  ;;  %p11578_p10 = scmp.lt.s32.totalorder %s90_s18, %s90_s18 }
  0x6f   :  { %p11574_p9 = scmp.ne.s32.totalorder %s90_s18, %s11573_s10  ;;  %p11579_p11 = scmp.lt.s32.totalorder %s11573_s10, %s11573_s10 }
  0x71   :  { %p11580_p12 = por %p11579_p11, %p11578_p10 }
  0x73   :  { %p11581_p13 = pnand %p11580_p12, %p11574_p9 }
  0x75   :  { %11584 = shalt.err (!%p11581_p13)
}
  0x76   :  { %92 = dma.hbm_to_vmem [thread:$0]  %s12006_s6, 256, %s90_s18, [#allocation12]  }
  0x77   :  { %11607 = dma.done.wait [#allocation3], 32  }
  0x78   :  { %11608 = vsyncadd [#allocation3], 4294967264 }
  0x79   :  { %11609 = dma.done.wait [#allocation6], 1088  }
  0x7a   :  { %11610 = vsyncadd [#allocation6], 4294966208 }
  0x7b   :  { %11611 = dma.done.wait [#allocation9], 32896  }
  0x7c   :  { %11612 = vsyncadd [#allocation9], 4294934400 }
  0x7d   :  { %11613 = dma.done.wait [#allocation12], 131328  }
  0x7e   :  { %11614 = vsyncadd [#allocation12], 4294835968  ;;  %v11630_v0 = vmov 0   ;;  %v11417_v1 = vld [vmem:[#allocation5 + $0x4] ss:$16 sps:$4 sm:$0xff]   ;;  %v290_v13 = vld [vmem:[#allocation8 + $0x8] sm:$0xff] }
  0x7f   :  { %223 = vmatprep.mubr.bf16.mxu0 %v11630_v0  ;;  %264 = vmatprep.mubr.bf16.mxu1 %v11630_v0  ;;  %v11419_v2 = vld [vmem:[#allocation5] ss:$16 sps:$4 sm:$0xff]   ;;  %v11420_v3 = vld [vmem:[#allocation5 + $0x24] ss:$16 sps:$4 sm:$0xff]   ;;  %v115_v5 = vld [vmem:[#allocation2] sm:$0x3] }
  0x80   :  { %191 = vmatprep.subr.bf16.mxu0 %v11417_v1  ;;  %v11422_v4 = vld [vmem:[#allocation5 + $0x20] ss:$16 sps:$4 sm:$0xff]   ;;  %v11423_v6 = vld [vmem:[#allocation5 + $0xc] ss:$16 sps:$4 sm:$0xff]   ;;  %v11425_v7 = vld [vmem:[#allocation5 + $0x8] ss:$16 sps:$4 sm:$0xff]   ;;  %v116_v11 = vpack.c.bf16 %v115_v5, %v115_v5 }
  0x81   :  { %192 = vmatpush1.bf16.msra.mxu0 %v11419_v2  ;;  %232 = vmatprep.subr.bf16.mxu1 %v11423_v6  ;;  %v11426_v8 = vld [vmem:[#allocation5 + $0x2c] ss:$16 sps:$4 sm:$0xff]   ;;  %v11428_v9 = vld [vmem:[#allocation5 + $0x28] ss:$16 sps:$4 sm:$0xff]   ;;  %vm187_vm0 = vcmask 261120   ;;  %s11632_s6 = smov [#allocation14]  }
  0x82   :  { %193 = vmatprep.subr.bf16.mxu0 %v11420_v3  ;;  %v289_v10 = vld [vmem:[#allocation8] sm:$0xff]  ;;  %233 = vmatpush1.bf16.msra.mxu1 %v11425_v7  ;;  %v294_v14 = vld [vmem:[#allocation8 + $0x28] sm:$0xff]  ;;  %s9955_s12 = sshll.u32 %s11632_s6, 4  ;;  %s9956_s12 = int_to_ptr.vmem [resolvable:$true] %s9955_s12 }
  0x83   :  { %v293_v12 = vld [vmem:[#allocation8 + $0x20] sm:$0xff]  ;;  %234 = vmatprep.subr.bf16.mxu1 %v11426_v8  ;;  %v9980_v19 = vcombine.high %v290_v13, %v294_v14  ;;  %v298_v21 = vld [vmem:[#allocation8 + $0x48] sm:$0xff]  ;;  %v9979_v25 = vcombine.low %v290_v13, %v294_v14  ;;  %s11585_s13 = scalar_lea.vmem %s9956_s12, 256  ;;  %p11590_p1 = scmp.lt.s32.totalorder %s9956_s12, %s9956_s12 }
  0x84   :  { %v9977_v15 = vcombine.low %v289_v10, %v293_v12  ;;  %v9978_v16 = vcombine.high %v289_v10, %v293_v12  ;;  %v297_v17 = vld [vmem:[#allocation8 + $0x40] sm:$0xff]  ;;  %v302_v22 = vld [vmem:[#allocation8 + $0x68] sm:$0xff]  ;;  %p11586_p0 = scmp.ne.s32.totalorder %s9956_s12, %s11585_s13  ;;  %p11591_p2 = scmp.lt.s32.totalorder %s11585_s13, %s11585_s13 }
  0x85   :  { %194 = vmatpush1.bf16.msra.mxu0 %v11422_v4  ;;  %v301_v18 = vld [vmem:[#allocation8 + $0x60] sm:$0xff]  ;;  %v9988_v27 = vcombine.high %v298_v21, %v302_v22  ;;  %v306_v29 = vld [vmem:[#allocation8 + $0x88] sm:$0xff]  ;;  %v9987_v33 = vcombine.low %v298_v21, %v302_v22 }
  0x86   :  { %v9986_v20 = vcombine.high %v297_v17, %v301_v18  ;;  %1867 = vmatprep.subr.bf16.mxu0 %v9978_v16  ;;  %v305_v23 = vld [vmem:[#allocation8 + $0x80] sm:$0xff]  ;;  %235 = vmatpush1.bf16.msra.mxu1 %v11428_v9  ;;  %v9985_v26 = vcombine.low %v297_v17, %v301_v18  ;;  %v310_v30 = vld [vmem:[#allocation8 + $0xa8] sm:$0xff]  ;;  %p11592_p3 = por %p11591_p2, %p11590_p1 }
  0x87   :  { %v309_v24 = vld [vmem:[#allocation8 + $0xa0] sm:$0xff]  ;;  %1949 = vmatprep.subr.bf16.mxu1 %v9980_v19  ;;  %v9996_v35 = vcombine.high %v306_v29, %v310_v30  ;;  %v314_v37 = vld [vmem:[#allocation8 + $0xc8] sm:$0xff]  ;;  %v9995_v41 = vcombine.low %v306_v29, %v310_v30 }
  0x88   :  { %9975 = vmatmul.mubr.msk.bf16.vlgmr.msra.gmra.mrb[0].mxu0 %vm187_vm0, %v116_v11  ;;  %v9994_v28 = vcombine.high %v305_v23, %v309_v24  ;;  %v313_v31 = vld [vmem:[#allocation8 + $0xc0] sm:$0xff]  ;;  %v9993_v34 = vcombine.low %v305_v23, %v309_v24  ;;  %v318_v38 = vld [vmem:[#allocation8 + $0xe8] sm:$0xff]  ;;  %p11593_p4 = pnand %p11592_p3, %p11586_p0 }
  0x89   :  { %1868 = vmatpush1.bf16.msra.mxu0 %v9977_v15  ;;  %9976 = vmatmul.mubr.msk.bf16.vlgmr.msra.gmra.mrb[0].mxu1 %vm187_vm0, %v116_v11  ;;  %v317_v32 = vld [vmem:[#allocation8 + $0xe0] sm:$0xff]  ;;  %v10004_v43 = vcombine.high %v314_v37, %v318_v38  ;;  %v322_v45 = vld [vmem:[#allocation8 + $0x108] sm:$0xff]  ;;  %v10003_v49 = vcombine.low %v314_v37, %v318_v38 }
  0x8a   :  { %1869 = vmatprep.subr.bf16.mxu0 %v9986_v20  ;;  %1950 = vmatpush1.bf16.msra.mxu1 %v9979_v25  ;;  %v10002_v36 = vcombine.high %v313_v31, %v317_v32  ;;  %v321_v39 = vld [vmem:[#allocation8 + $0x100] sm:$0xff]  ;;  %v10001_v42 = vcombine.low %v313_v31, %v317_v32  ;;  %v326_v46 = vld [vmem:[#allocation8 + $0x128] sm:$0xff] }
  0x8b   :  { %1951 = vmatprep.subr.bf16.mxu1 %v9988_v27  ;;  %v325_v40 = vld [vmem:[#allocation8 + $0x120] sm:$0xff]  ;;  %v10012_v51 = vcombine.high %v322_v45, %v326_v46  ;;  %v330_v53 = vld [vmem:[#allocation8 + $0x148] sm:$0xff]  ;;  %v10011_v57 = vcombine.low %v322_v45, %v326_v46 }
  0x8c   :  { %v10010_v44 = vcombine.high %v321_v39, %v325_v40  ;;  %v329_v47 = vld [vmem:[#allocation8 + $0x140] sm:$0xff]  ;;  %v10009_v50 = vcombine.low %v321_v39, %v325_v40  ;;  %v334_v54 = vld [vmem:[#allocation8 + $0x168] sm:$0xff] }
  0x8d   :  { %1870 = vmatpush1.bf16.msra.mxu0 %v9985_v26  ;;  %v333_v48 = vld [vmem:[#allocation8 + $0x160] sm:$0xff]  ;;  %v10020_v59 = vcombine.high %v330_v53, %v334_v54  ;;  %v338_v61 = vld [vmem:[#allocation8 + $0x188] sm:$0xff]  ;;  %v10019_v1 = vcombine.low %v330_v53, %v334_v54 }
  0x8e   :  { %1871 = vmatprep.subr.bf16.mxu0 %v9994_v28  ;;  %1952 = vmatpush1.bf16.msra.mxu1 %v9987_v33  ;;  %v10018_v52 = vcombine.high %v329_v47, %v333_v48  ;;  %v337_v55 = vld [vmem:[#allocation8 + $0x180] sm:$0xff]  ;;  %v10017_v58 = vcombine.low %v329_v47, %v333_v48  ;;  %v342_v62 = vld [vmem:[#allocation8 + $0x1a8] sm:$0xff] }
  0x8f   :  { %1953 = vmatprep.subr.bf16.mxu1 %v9996_v35  ;;  %v341_v56 = vld [vmem:[#allocation8 + $0x1a0] sm:$0xff]  ;;  %v10028_v3 = vcombine.high %v338_v61, %v342_v62  ;;  %v346_v5 = vld [vmem:[#allocation8 + $0x1c8] sm:$0xff]  ;;  %v10027_v9 = vcombine.low %v338_v61, %v342_v62 }
  0x90   :  { %v10026_v60 = vcombine.high %v337_v55, %v341_v56  ;;  %v345_v63 = vld [vmem:[#allocation8 + $0x1c0] sm:$0xff]  ;;  %v10025_v2 = vcombine.low %v337_v55, %v341_v56  ;;  %v350_v6 = vld [vmem:[#allocation8 + $0x1e8] sm:$0xff] }
  0x91   :  { %1872 = vmatpush1.bf16.msra.mxu0 %v9993_v34  ;;  %v349_v0 = vld [vmem:[#allocation8 + $0x1e0] sm:$0xff]  ;;  %v10036_v11 = vcombine.high %v346_v5, %v350_v6  ;;  %v354_v13 = vld [vmem:[#allocation8 + $0x208] sm:$0xff]  ;;  %v10035_v17 = vcombine.low %v346_v5, %v350_v6 }
  0x92   :  { %1873 = vmatprep.subr.bf16.mxu0 %v10002_v36  ;;  %1954 = vmatpush1.bf16.msra.mxu1 %v9995_v41  ;;  %v10034_v4 = vcombine.high %v345_v63, %v349_v0  ;;  %v353_v7 = vld [vmem:[#allocation8 + $0x200] sm:$0xff]  ;;  %v10033_v10 = vcombine.low %v345_v63, %v349_v0  ;;  %v358_v14 = vld [vmem:[#allocation8 + $0x228] sm:$0xff] }
  0x93   :  { %1955 = vmatprep.subr.bf16.mxu1 %v10004_v43  ;;  %v357_v8 = vld [vmem:[#allocation8 + $0x220] sm:$0xff]  ;;  %v10044_v19 = vcombine.high %v354_v13, %v358_v14  ;;  %v362_v21 = vld [vmem:[#allocation8 + $0x248] sm:$0xff]  ;;  %v10043_v25 = vcombine.low %v354_v13, %v358_v14 }
  0x94   :  { %v10042_v12 = vcombine.high %v353_v7, %v357_v8  ;;  %v361_v15 = vld [vmem:[#allocation8 + $0x240] sm:$0xff]  ;;  %v10041_v18 = vcombine.low %v353_v7, %v357_v8  ;;  %v366_v22 = vld [vmem:[#allocation8 + $0x268] sm:$0xff] }
  0x95   :  { %1874 = vmatpush1.bf16.msra.mxu0 %v10001_v42  ;;  %v365_v16 = vld [vmem:[#allocation8 + $0x260] sm:$0xff]  ;;  %v10052_v27 = vcombine.high %v362_v21, %v366_v22  ;;  %v370_v29 = vld [vmem:[#allocation8 + $0x288] sm:$0xff]  ;;  %v10051_v33 = vcombine.low %v362_v21, %v366_v22  ;;  %v11764_v22 = vld [vmem:[#allocation7] sm:$0xf] }
  0x96   :  { %1875 = vmatprep.subr.bf16.mxu0 %v10010_v44  ;;  %1956 = vmatpush1.bf16.msra.mxu1 %v10003_v49  ;;  %v10050_v20 = vcombine.high %v361_v15, %v365_v16  ;;  %v369_v23 = vld [vmem:[#allocation8 + $0x280] sm:$0xff]  ;;  %v10049_v26 = vcombine.low %v361_v15, %v365_v16  ;;  %v374_v30 = vld [vmem:[#allocation8 + $0x2a8] sm:$0xff] }
  0x97   :  { %1957 = vmatprep.subr.bf16.mxu1 %v10012_v51  ;;  %v373_v24 = vld [vmem:[#allocation8 + $0x2a0] sm:$0xff]  ;;  %v10060_v35 = vcombine.high %v370_v29, %v374_v30  ;;  %v378_v37 = vld [vmem:[#allocation8 + $0x2c8] sm:$0xff]  ;;  %v10059_v41 = vcombine.low %v370_v29, %v374_v30 }
  0x98   :  { %v10058_v28 = vcombine.high %v369_v23, %v373_v24  ;;  %v377_v31 = vld [vmem:[#allocation8 + $0x2c0] sm:$0xff]  ;;  %v10057_v34 = vcombine.low %v369_v23, %v373_v24  ;;  %v382_v38 = vld [vmem:[#allocation8 + $0x2e8] sm:$0xff] }
  0x99   :  { %1876 = vmatpush1.bf16.msra.mxu0 %v10009_v50  ;;  %v381_v32 = vld [vmem:[#allocation8 + $0x2e0] sm:$0xff]  ;;  %v10068_v43 = vcombine.high %v378_v37, %v382_v38  ;;  %v386_v45 = vld [vmem:[#allocation8 + $0x308] sm:$0xff]  ;;  %v10067_v49 = vcombine.low %v378_v37, %v382_v38 }
  0x9a   :  { %1877 = vmatprep.subr.bf16.mxu0 %v10018_v52  ;;  %1958 = vmatpush1.bf16.msra.mxu1 %v10011_v57  ;;  %v10066_v36 = vcombine.high %v377_v31, %v381_v32  ;;  %v385_v39 = vld [vmem:[#allocation8 + $0x300] sm:$0xff]  ;;  %v10065_v42 = vcombine.low %v377_v31, %v381_v32  ;;  %v390_v46 = vld [vmem:[#allocation8 + $0x328] sm:$0xff] }
  0x9b   :  { %1959 = vmatprep.subr.bf16.mxu1 %v10020_v59  ;;  %v389_v40 = vld [vmem:[#allocation8 + $0x320] sm:$0xff]  ;;  %v10076_v51 = vcombine.high %v386_v45, %v390_v46  ;;  %v394_v53 = vld [vmem:[#allocation8 + $0x348] sm:$0xff]  ;;  %v10075_v55 = vcombine.low %v386_v45, %v390_v46 }
  0x9c   :  { %v10074_v44 = vcombine.high %v385_v39, %v389_v40  ;;  %v393_v47 = vld [vmem:[#allocation8 + $0x340] sm:$0xff]  ;;  %v10073_v50 = vcombine.low %v385_v39, %v389_v40  ;;  %v398_v54 = vld [vmem:[#allocation8 + $0x368] sm:$0xff] }
  0x9d   :  { %1878 = vmatpush1.bf16.msra.mxu0 %v10017_v58  ;;  %v397_v48 = vld [vmem:[#allocation8 + $0x360] sm:$0xff]  ;;  %v10084_v57 = vcombine.high %v394_v53, %v398_v54  ;;  %v10083_v58 = vcombine.low %v394_v53, %v398_v54  ;;  %v402_v61 = vld [vmem:[#allocation8 + $0x388] sm:$0xff] }
  0x9e   :  { %1879 = vmatprep.subr.bf16.mxu0 %v10026_v60  ;;  %1960 = vmatpush1.bf16.msra.mxu1 %v10019_v1  ;;  %v10082_v52 = vcombine.high %v393_v47, %v397_v48  ;;  %v10081_v56 = vcombine.low %v393_v47, %v397_v48  ;;  %v401_v59 = vld [vmem:[#allocation8 + $0x380] sm:$0xff]  ;;  %v406_v63 = vld [vmem:[#allocation8 + $0x3a8] sm:$0xff] }
  0x9f   :  { %1961 = vmatprep.subr.bf16.mxu1 %v10028_v3  ;;  %v405_v60 = vld [vmem:[#allocation8 + $0x3a0] sm:$0xff]  ;;  %v10091_v1 = vcombine.low %v402_v61, %v406_v63  ;;  %v410_v5 = vld [vmem:[#allocation8 + $0x3c8] sm:$0xff] }
  0xa0   :  { %v10090_v62 = vcombine.high %v401_v59, %v405_v60  ;;  %v10089_v0 = vcombine.low %v401_v59, %v405_v60  ;;  %v409_v3 = vld [vmem:[#allocation8 + $0x3c0] sm:$0xff]  ;;  %v414_v7 = vld [vmem:[#allocation8 + $0x3e8] sm:$0xff] }
  0xa1   :  { %1880 = vmatpush1.bf16.msra.mxu0 %v10025_v2  ;;  %v10092_v2 = vcombine.high %v402_v61, %v406_v63  ;;  %v418_v13 = vld [vmem:[#allocation8 + $0x408] sm:$0xff]  ;;  %v425_v37 = vld [vmem:[#allocation8 + $0x440] sm:$0xff] }
  0xa2   :  { %1881 = vmatprep.subr.bf16.mxu0 %v10034_v4  ;;  %1962 = vmatpush1.bf16.msra.mxu1 %v10027_v9  ;;  %v413_v4 = vld [vmem:[#allocation8 + $0x3e0] sm:$0xff]  ;;  %v10099_v9 = vcombine.low %v410_v5, %v414_v7  ;;  %v422_v15 = vld [vmem:[#allocation8 + $0x428] sm:$0xff] }
  0xa3   :  { %1963 = vmatprep.subr.bf16.mxu1 %v10036_v11  ;;  %v10098_v6 = vcombine.high %v409_v3, %v413_v4  ;;  %v10097_v8 = vcombine.low %v409_v3, %v413_v4  ;;  %v417_v11 = vld [vmem:[#allocation8 + $0x400] sm:$0xff]  ;;  %v434_v54 = vld [vmem:[#allocation8 + $0x488] sm:$0xff] }
  0xa4   :  { %v429_v40 = vld [vmem:[#allocation8 + $0x460] sm:$0xff] }
  0xa5   :  { %1882 = vmatpush1.bf16.msra.mxu0 %v10033_v10  ;;  %v10100_v10 = vcombine.high %v410_v5, %v414_v7  ;;  %v437_v53 = vld [vmem:[#allocation8 + $0x4a0] sm:$0xff] }
  0xa6   :  { %1883 = vmatprep.subr.bf16.mxu0 %v10042_v12  ;;  %1964 = vmatpush1.bf16.msra.mxu1 %v10035_v17  ;;  %v421_v12 = vld [vmem:[#allocation8 + $0x420] sm:$0xff]  ;;  %v10107_v17 = vcombine.low %v418_v13, %v422_v15 }
  0xa7   :  { %1965 = vmatprep.subr.bf16.mxu1 %v10044_v19  ;;  %v10106_v14 = vcombine.high %v417_v11, %v421_v12  ;;  %v10105_v16 = vcombine.low %v417_v11, %v421_v12  ;;  %v127_v19 = vlaneseq  ;;  %v445_v63 = vld [vmem:[#allocation8 + $0x4e0] sm:$0xff] }
  0xa8   :  { %v453_v7 = vld [vmem:[#allocation8 + $0x520] sm:$0xff] }
  0xa9   :  { %1884 = vmatpush1.bf16.msra.mxu0 %v10041_v18  ;;  %v10108_v18 = vcombine.high %v418_v13, %v422_v15  ;;  %v461_v15 = vld [vmem:[#allocation8 + $0x560] sm:$0xff] }
  0xaa   :  { %1885 = vmatprep.subr.bf16.mxu0 %v10050_v20  ;;  %1966 = vmatpush1.bf16.msra.mxu1 %v10043_v25  ;;  %v11759_v20 = vshrl.u32 %v127_v19, 7 }
  0xab   :  { %1967 = vmatprep.subr.bf16.mxu1 %v10052_v27 }
  0xac   :  { %v11762_v21 = vsub.s32 0, %v11759_v20  ;;  %v11767_v23 = vsub.s32 1, %v11759_v20  ;;  %v11772_v25 = vsub.s32 3, %v11759_v20 }
  0xad   :  { %1886 = vmatpush1.bf16.msra.mxu0 %v10049_v26 }
  0xae   :  { %1887 = vmatprep.subr.bf16.mxu0 %v10058_v28  ;;  %1968 = vmatpush1.bf16.msra.mxu1 %v10051_v33  ;;  %v130_v24 = vrot.slane %v11764_v22, %v11762_v21  ;;  %v134_v26 = vrot.slane %v11764_v22, %v11767_v23  ;;  %v142_v30 = vrot.slane %v11764_v22, %v11772_v25 }
  0xaf   :  { %1969 = vmatprep.subr.bf16.mxu1 %v10060_v35 }
  0xb1   :  { %1888 = vmatpush1.bf16.msra.mxu0 %v10057_v34 }
  0xb2   :  { %1889 = vmatprep.subr.bf16.mxu0 %v10066_v36  ;;  %1970 = vmatpush1.bf16.msra.mxu1 %v10059_v41  ;;  %v426_v41 = vld [vmem:[#allocation8 + $0x448] sm:$0xff] }
  0xb3   :  { %1971 = vmatprep.subr.bf16.mxu1 %v10068_v43 }
  0xb5   :  { %1890 = vmatpush1.bf16.msra.mxu0 %v10065_v42  ;;  %v430_v42 = vld [vmem:[#allocation8 + $0x468] sm:$0xff] }
  0xb6   :  { %1891 = vmatprep.subr.bf16.mxu0 %v10074_v44  ;;  %1972 = vmatpush1.bf16.msra.mxu1 %v10067_v49  ;;  %v10115_v59 = vcombine.low %v426_v41, %v430_v42 }
  0xb7   :  { %1973 = vmatprep.subr.bf16.mxu1 %v10076_v51  ;;  %v10116_v51 = vcombine.high %v426_v41, %v430_v42 }
  0xb9   :  { %1892 = vmatpush1.bf16.msra.mxu0 %v10073_v50  ;;  %v10114_v50 = vcombine.high %v425_v37, %v429_v40 }
  0xba   :  { %1893 = vmatprep.subr.bf16.mxu0 %v10082_v52  ;;  %1974 = vmatpush1.bf16.msra.mxu1 %v10075_v55  ;;  %v433_v52 = vld [vmem:[#allocation8 + $0x480] sm:$0xff]  ;;  %v438_v55 = vld [vmem:[#allocation8 + $0x4a8] sm:$0xff] }
  0xbb   :  { %1975 = vmatprep.subr.bf16.mxu1 %v10084_v57  ;;  %v10122_v60 = vcombine.high %v433_v52, %v437_v53  ;;  %v10124_v61 = vcombine.high %v434_v54, %v438_v55  ;;  %v10123_v3 = vcombine.low %v434_v54, %v438_v55  ;;  %v489_v54 = vld [vmem:[#allocation8 + $0x640] sm:$0xff] }
  0xbc   :  { %v493_v55 = vld [vmem:[#allocation8 + $0x660] sm:$0xff] }
  0xbd   :  { %1894 = vmatpush1.bf16.msra.mxu0 %v10081_v56 }
  0xbe   :  { %1976 = vmatpush1.bf16.msra.mxu1 %v10083_v58  ;;  %1895 = vmatprep.subr.bf16.mxu0 %v10090_v62  ;;  %v10113_v58 = vcombine.low %v425_v37, %v429_v40  ;;  %v441_v62 = vld [vmem:[#allocation8 + $0x4c0] sm:$0xff] }
  0xbf   :  { %1977 = vmatprep.subr.bf16.mxu1 %v10092_v2  ;;  %v10121_v2 = vcombine.low %v433_v52, %v437_v53  ;;  %v10130_v4 = vcombine.high %v441_v62, %v445_v63  ;;  %v477_v37 = vld [vmem:[#allocation8 + $0x5e0] sm:$0xff] }
  0xc1   :  { %1896 = vmatpush1.bf16.msra.mxu0 %v10089_v0  ;;  %v442_v0 = vld [vmem:[#allocation8 + $0x4c8] sm:$0xff] }
  0xc2   :  { %1978 = vmatpush1.bf16.msra.mxu1 %v10091_v1  ;;  %1897 = vmatprep.subr.bf16.mxu0 %v10098_v6  ;;  %v446_v1 = vld [vmem:[#allocation8 + $0x4e8] sm:$0xff]  ;;  %v449_v6 = vld [vmem:[#allocation8 + $0x500] sm:$0xff] }
  0xc3   :  { %1979 = vmatprep.subr.bf16.mxu1 %v10100_v10  ;;  %v10132_v5 = vcombine.high %v442_v0, %v446_v1  ;;  %v10129_v10 = vcombine.low %v441_v62, %v445_v63  ;;  %v10131_v11 = vcombine.low %v442_v0, %v446_v1  ;;  %v10138_v12 = vcombine.high %v449_v6, %v453_v7  ;;  %v497_v63 = vld [vmem:[#allocation8 + $0x680] sm:$0xff]  ;;  %v498_v1 = vld [vmem:[#allocation8 + $0x688] sm:$0xff] }
  0xc4   :  { %v501_v0 = vld [vmem:[#allocation8 + $0x6a0] sm:$0xff] }
  0xc5   :  { %1898 = vmatpush1.bf16.msra.mxu0 %v10097_v8  ;;  %v450_v8 = vld [vmem:[#allocation8 + $0x508] sm:$0xff] }
  0xc6   :  { %1980 = vmatpush1.bf16.msra.mxu1 %v10099_v9  ;;  %1908 = vmatprep.subr.bf16.mxu0 %v10106_v14  ;;  %v454_v9 = vld [vmem:[#allocation8 + $0x528] sm:$0xff]  ;;  %v457_v14 = vld [vmem:[#allocation8 + $0x540] sm:$0xff] }
  0xc7   :  { %1990 = vmatprep.subr.bf16.mxu1 %v10108_v18  ;;  %v10140_v13 = vcombine.high %v450_v8, %v454_v9  ;;  %v10137_v18 = vcombine.low %v449_v6, %v453_v7  ;;  %v10139_v19 = vcombine.low %v450_v8, %v454_v9  ;;  %v505_v7 = vld [vmem:[#allocation8 + $0x6c0] sm:$0xff]  ;;  %v506_v9 = vld [vmem:[#allocation8 + $0x6c8] sm:$0xff] }
  0xc8   :  { %v509_v8 = vld [vmem:[#allocation8 + $0x6e0] sm:$0xff] }
 0x15b   :  { %v225_v27 = vpop.f32.mrb[0].mxu0 }
 0x15c   :  { %v226_v28 = vadd.f32 %v225_v27, %v130_v24  ;;  %v227_v29 = vpop.f32.mrb[1].mxu0  ;;  %v11778_v35 = vpop.f32.mrb[0].mxu1  ;;  %v10146_v24 = vcombine.high %v457_v14, %v461_v15  ;;  %v465_v27 = vld [vmem:[#allocation8 + $0x580] sm:$0xff] }
 0x15d   :  { %v228_v31 = vadd.f32 %v227_v29, %v134_v26  ;;  %v229_v32 = vpop.f32.mrb[2].mxu0  ;;  %v268_v38 = vpop.f32.mrb[1].mxu1  ;;  %v466_v29 = vld [vmem:[#allocation8 + $0x588] sm:$0xff] }
 0x15e   :  { %vm273_vm1 = vcmp.ge.f32.partialorder %v226_v28, 0.0  ;;  %v277_v33 = vmul.f32 0.2, %v226_v28  ;;  %v230_v34 = vpop.f32.mrb[3].mxu0  ;;  %v269_v43 = vadd.f32 %v268_v38, %v142_v30  ;;  %v270_v44 = vpop.f32.mrb[2].mxu1  ;;  %v470_v30 = vld [vmem:[#allocation8 + $0x5a8] sm:$0xff] }
 0x15f   :  { %vm274_vm2 = vcmp.ge.f32.partialorder %v228_v31, 0.0  ;;  %v278_v36 = vmul.f32 0.2, %v228_v31  ;;  %v271_v46 = vpop.f32.mrb[3].mxu1  ;;  %v10156_v34 = vcombine.high %v466_v29, %v470_v30  ;;  %v474_v38 = vld [vmem:[#allocation8 + $0x5c8] sm:$0xff]  ;;  %v10155_v41 = vcombine.low %v466_v29, %v470_v30  ;;  %v481_v44 = vld [vmem:[#allocation8 + $0x600] sm:$0xff] }
 0x160   :  { %v281_v39 = vsel %vm273_vm1, %v226_v28, %v277_v33  ;;  %vm276_vm3 = vcmp.ge.f32.partialorder %v269_v43, 0.0  ;;  %v280_v48 = vmul.f32 0.2, %v269_v43  ;;  %v469_v28 = vld [vmem:[#allocation8 + $0x5a0] sm:$0xff]  ;;  %v482_v46 = vld [vmem:[#allocation8 + $0x608] sm:$0xff]  ;;  %v11793_v29 = vsub.s32 2, %v11759_v20 }
 0x161   :  { %v282_v45 = vsel %vm274_vm2, %v228_v31, %v278_v36  ;;  %v11782_v49 = vpack.c.bf16 %v281_v39, %v281_v39  ;;  %v10145_v31 = vcombine.low %v457_v14, %v461_v15  ;;  %v10154_v33 = vcombine.high %v465_v27, %v469_v28  ;;  %v473_v36 = vld [vmem:[#allocation8 + $0x5c0] sm:$0xff]  ;;  %v478_v39 = vld [vmem:[#allocation8 + $0x5e8] sm:$0xff] }
 0x162   :  { %v11780_v47 = vpack.c.bf16 %v282_v45, %v282_v45  ;;  %v284_v56 = vsel %vm276_vm3, %v269_v43, %v280_v48  ;;  %v10153_v40 = vcombine.low %v465_v27, %v469_v28  ;;  %v10162_v42 = vcombine.high %v473_v36, %v477_v37  ;;  %v485_v45 = vld [vmem:[#allocation8 + $0x620] sm:$0xff]  ;;  %v486_v48 = vld [vmem:[#allocation8 + $0x628] sm:$0xff] }
 0x163   :  { %v11788_v57 = vpack.c.bf16 %v284_v56, %v284_v56  ;;  %v10164_v43 = vcombine.high %v474_v38, %v478_v39  ;;  %v10170_v52 = vcombine.high %v481_v44, %v485_v45  ;;  %v10172_v53 = vcombine.high %v482_v46, %v486_v48  ;;  %v490_v56 = vld [vmem:[#allocation8 + $0x648] sm:$0xff]  ;;  %v513_v15 = vld [vmem:[#allocation8 + $0x700] sm:$0xff] }
 0x164   :  { %1899 = vmatprep.mubr.bf16.mxu0 %v11780_v47  ;;  %1981 = vmatprep.mubr.bf16.mxu1 %v11780_v47  ;;  %v521_v28 = vld [vmem:[#allocation8 + $0x740] sm:$0xff] }
 0x165   :  { %1900 = vmatmul.mubr.bf16.vlgmr.msra.gmra.mrb[4].mxu0 %v11782_v49  ;;  %1982 = vmatmul.mubr.bf16.vlgmr.msra.gmra.mrb[4].mxu1 %v11782_v49  ;;  %v525_v30 = vld [vmem:[#allocation8 + $0x760] sm:$0xff] }
 0x166   :  { %1909 = vmatpush1.bf16.msra.mxu0 %v10105_v16  ;;  %1991 = vmatpush1.bf16.msra.mxu1 %v10107_v17  ;;  %v458_v16 = vld [vmem:[#allocation8 + $0x548] sm:$0xff] }
 0x167   :  { %1910 = vmatprep.subr.bf16.mxu0 %v10114_v50  ;;  %1992 = vmatprep.subr.bf16.mxu1 %v10116_v51  ;;  %v462_v17 = vld [vmem:[#allocation8 + $0x568] sm:$0xff]  ;;  %v10161_v50 = vcombine.low %v473_v36, %v477_v37  ;;  %v10163_v51 = vcombine.low %v474_v38, %v478_v39  ;;  %v10210_v36 = vcombine.high %v521_v28, %v525_v30  ;;  %v529_v38 = vld [vmem:[#allocation8 + $0x780] sm:$0xff] }
 0x168   :  { %1940 = vmatprep.mubr.bf16.mxu0 %v11788_v57  ;;  %2022 = vmatprep.mubr.bf16.mxu1 %v11788_v57  ;;  %v10148_v26 = vcombine.high %v458_v16, %v462_v17  ;;  %v10147_v32 = vcombine.low %v458_v16, %v462_v17  ;;  %v517_v16 = vld [vmem:[#allocation8 + $0x720] sm:$0xff]  ;;  %v514_v17 = vld [vmem:[#allocation8 + $0x708] sm:$0xff]  ;;  %v138_v39 = vrot.slane %v11764_v22, %v11793_v29 }
 0x16a   :  { %1911 = vmatpush1.bf16.msra.mxu0 %v10113_v58  ;;  %1993 = vmatpush1.bf16.msra.mxu1 %v10115_v59  ;;  %v494_v58 = vld [vmem:[#allocation8 + $0x668] sm:$0xff]  ;;  %v10169_v59 = vcombine.low %v481_v44, %v485_v45 }
 0x16b   :  { %1912 = vmatprep.subr.bf16.mxu0 %v10122_v60  ;;  %1994 = vmatprep.subr.bf16.mxu1 %v10124_v61  ;;  %v10171_v60 = vcombine.low %v482_v46, %v486_v48  ;;  %v10178_v61 = vcombine.high %v489_v54, %v493_v55  ;;  %v10180_v62 = vcombine.high %v490_v56, %v494_v58  ;;  %v537_v48 = vld [vmem:[#allocation8 + $0x7c0] sm:$0xff] }
 0x16e   :  { %1913 = vmatpush1.bf16.msra.mxu0 %v10121_v2  ;;  %1995 = vmatpush1.bf16.msra.mxu1 %v10123_v3  ;;  %v502_v2 = vld [vmem:[#allocation8 + $0x6a8] sm:$0xff]  ;;  %v10177_v3 = vcombine.low %v489_v54, %v493_v55 }
 0x16f   :  { %1914 = vmatprep.subr.bf16.mxu0 %v10130_v4  ;;  %1996 = vmatprep.subr.bf16.mxu1 %v10132_v5  ;;  %v10179_v4 = vcombine.low %v490_v56, %v494_v58  ;;  %v10186_v5 = vcombine.high %v497_v63, %v501_v0  ;;  %v10188_v6 = vcombine.high %v498_v1, %v502_v2  ;;  %v291_v58 = vld [vmem:[#allocation8 + $0x10] sm:$0xff] }
 0x172   :  { %1915 = vmatpush1.bf16.msra.mxu0 %v10129_v10  ;;  %1997 = vmatpush1.bf16.msra.mxu1 %v10131_v11  ;;  %v510_v10 = vld [vmem:[#allocation8 + $0x6e8] sm:$0xff]  ;;  %v10185_v11 = vcombine.low %v497_v63, %v501_v0 }
 0x173   :  { %1916 = vmatprep.subr.bf16.mxu0 %v10138_v12  ;;  %1998 = vmatprep.subr.bf16.mxu1 %v10140_v13  ;;  %v10187_v12 = vcombine.low %v498_v1, %v502_v2  ;;  %v10194_v13 = vcombine.high %v505_v7, %v509_v8  ;;  %v10196_v14 = vcombine.high %v506_v9, %v510_v10 }
 0x176   :  { %1917 = vmatpush1.bf16.msra.mxu0 %v10137_v18  ;;  %1999 = vmatpush1.bf16.msra.mxu1 %v10139_v19  ;;  %v518_v18 = vld [vmem:[#allocation8 + $0x728] sm:$0xff]  ;;  %v10193_v19 = vcombine.low %v505_v7, %v509_v8 }
 0x177   :  { %1918 = vmatprep.subr.bf16.mxu0 %v10146_v24  ;;  %2000 = vmatprep.subr.bf16.mxu1 %v10148_v26  ;;  %v10195_v24 = vcombine.low %v506_v9, %v510_v10  ;;  %v10202_v26 = vcombine.high %v513_v15, %v517_v16  ;;  %v10204_v27 = vcombine.high %v514_v17, %v518_v18 }
 0x17a   :  { %1919 = vmatpush1.bf16.msra.mxu0 %v10145_v31  ;;  %2001 = vmatpush1.bf16.msra.mxu1 %v10147_v32  ;;  %v522_v31 = vld [vmem:[#allocation8 + $0x748] sm:$0xff] }
 0x17b   :  { %1920 = vmatprep.subr.bf16.mxu0 %v10154_v33  ;;  %2002 = vmatprep.subr.bf16.mxu1 %v10156_v34  ;;  %v526_v32 = vld [vmem:[#allocation8 + $0x768] sm:$0xff]  ;;  %v10201_v33 = vcombine.low %v513_v15, %v517_v16  ;;  %v10203_v34 = vcombine.low %v514_v17, %v518_v18  ;;  %v312_v15 = vld [vmem:[#allocation8 + $0xb8] sm:$0xff] }
 0x17c   :  { %v10212_v37 = vcombine.high %v522_v31, %v526_v32  ;;  %v10211_v44 = vcombine.low %v522_v31, %v526_v32 }
 0x17e   :  { %1921 = vmatpush1.bf16.msra.mxu0 %v10153_v40  ;;  %2003 = vmatpush1.bf16.msra.mxu1 %v10155_v41  ;;  %v533_v40 = vld [vmem:[#allocation8 + $0x7a0] sm:$0xff]  ;;  %v530_v41 = vld [vmem:[#allocation8 + $0x788] sm:$0xff] }
 0x17f   :  { %1922 = vmatprep.subr.bf16.mxu0 %v10162_v42  ;;  %2004 = vmatprep.subr.bf16.mxu1 %v10164_v43  ;;  %v534_v42 = vld [vmem:[#allocation8 + $0x7a8] sm:$0xff]  ;;  %v10209_v43 = vcombine.low %v521_v28, %v525_v30  ;;  %v10218_v45 = vcombine.high %v529_v38, %v533_v40  ;;  %v10217_v22 = vcombine.low %v529_v38, %v533_v40  ;;  %v320_v28 = vld [vmem:[#allocation8 + $0xf8] sm:$0xff] }
 0x180   :  { %v10220_v46 = vcombine.high %v530_v41, %v534_v42  ;;  %v10219_v54 = vcombine.low %v530_v41, %v534_v42  ;;  %v331_v42 = vld [vmem:[#allocation8 + $0x150] sm:$0xff] }
 0x182   :  { %1923 = vmatpush1.bf16.msra.mxu0 %v10161_v50  ;;  %2005 = vmatpush1.bf16.msra.mxu1 %v10163_v51  ;;  %v267_v50 = vadd.f32 %v11778_v35, %v138_v39  ;;  %v541_v51 = vld [vmem:[#allocation8 + $0x7e0] sm:$0xff] }
 0x183   :  { %1924 = vmatprep.subr.bf16.mxu0 %v10170_v52  ;;  %2006 = vmatprep.subr.bf16.mxu1 %v10172_v53  ;;  %v538_v52 = vld [vmem:[#allocation8 + $0x7c8] sm:$0xff]  ;;  %v10226_v55 = vcombine.high %v537_v48, %v541_v51  ;;  %v10225_v35 = vcombine.low %v537_v48, %v541_v51 }
 0x184   :  { %v542_v53 = vld [vmem:[#allocation8 + $0x7e8] sm:$0xff]  ;;  %vm275_vm4 = vcmp.ge.f32.partialorder %v267_v50, 0.0 }
 0x185   :  { %v10228_v56 = vcombine.high %v538_v52, %v542_v53  ;;  %v10227_v63 = vcombine.low %v538_v52, %v542_v53  ;;  %v339_v52 = vld [vmem:[#allocation8 + $0x190] sm:$0xff] }
 0x186   :  { %1925 = vmatpush1.bf16.msra.mxu0 %v10169_v59  ;;  %2007 = vmatpush1.bf16.msra.mxu1 %v10171_v60  ;;  %v279_v59 = vmul.f32 0.2, %v267_v50  ;;  %v295_v60 = vld [vmem:[#allocation8 + $0x30] sm:$0xff] }
 0x187   :  { %1926 = vmatprep.subr.bf16.mxu0 %v10178_v61  ;;  %2008 = vmatprep.subr.bf16.mxu1 %v10180_v62  ;;  %v292_v61 = vld [vmem:[#allocation8 + $0x18] sm:$0xff]  ;;  %v9982_v0 = vcombine.high %v291_v58, %v295_v60  ;;  %v9981_v7 = vcombine.low %v291_v58, %v295_v60  ;;  %v343_v53 = vld [vmem:[#allocation8 + $0x1b0] sm:$0xff] }
 0x188   :  { %v296_v62 = vld [vmem:[#allocation8 + $0x38] sm:$0xff]  ;;  %v283_v2 = vsel %vm275_vm4, %v267_v50, %v279_v59  ;;  %v10030_v58 = vcombine.high %v339_v52, %v343_v53  ;;  %v347_v60 = vld [vmem:[#allocation8 + $0x1d0] sm:$0xff] }
 0x189   :  { %v9984_v1 = vcombine.high %v292_v61, %v296_v62  ;;  %v11798_v8 = vpack.c.bf16 %v283_v2, %v283_v2  ;;  %v9983_v9 = vcombine.low %v292_v61, %v296_v62  ;;  %v351_v61 = vld [vmem:[#allocation8 + $0x1f0] sm:$0xff]  ;;  %v348_v62 = vld [vmem:[#allocation8 + $0x1d8] sm:$0xff] }
 0x18a   :  { %1927 = vmatpush1.bf16.msra.mxu0 %v10177_v3  ;;  %2009 = vmatpush1.bf16.msra.mxu1 %v10179_v4  ;;  %v299_v3 = vld [vmem:[#allocation8 + $0x50] sm:$0xff] }
 0x18b   :  { %1928 = vmatprep.subr.bf16.mxu0 %v10186_v5  ;;  %2010 = vmatprep.subr.bf16.mxu1 %v10188_v6  ;;  %v303_v4 = vld [vmem:[#allocation8 + $0x70] sm:$0xff]  ;;  %v300_v5 = vld [vmem:[#allocation8 + $0x58] sm:$0xff] }
 0x18c   :  { %v304_v6 = vld [vmem:[#allocation8 + $0x78] sm:$0xff]  ;;  %v9990_v10 = vcombine.high %v299_v3, %v303_v4  ;;  %v9989_v16 = vcombine.low %v299_v3, %v303_v4  ;;  %v355_v3 = vld [vmem:[#allocation8 + $0x210] sm:$0xff] }
 0x18d   :  { %v9991_v17 = vcombine.low %v300_v5, %v304_v6  ;;  %v359_v4 = vld [vmem:[#allocation8 + $0x230] sm:$0xff] }
 0x18e   :  { %1929 = vmatpush1.bf16.msra.mxu0 %v10185_v11  ;;  %2011 = vmatpush1.bf16.msra.mxu1 %v10187_v12  ;;  %v9992_v11 = vcombine.high %v300_v5, %v304_v6  ;;  %v307_v12 = vld [vmem:[#allocation8 + $0x90] sm:$0xff]  ;;  %v356_v5 = vld [vmem:[#allocation8 + $0x218] sm:$0xff] }
 0x18f   :  { %1930 = vmatprep.subr.bf16.mxu0 %v10194_v13  ;;  %2012 = vmatprep.subr.bf16.mxu1 %v10196_v14  ;;  %v311_v13 = vld [vmem:[#allocation8 + $0xb0] sm:$0xff]  ;;  %v308_v14 = vld [vmem:[#allocation8 + $0x98] sm:$0xff] }
 0x190   :  { %v9998_v18 = vcombine.high %v307_v12, %v311_v13  ;;  %v9997_v30 = vcombine.low %v307_v12, %v311_v13  ;;  %v9999_v31 = vcombine.low %v308_v14, %v312_v15  ;;  %v360_v6 = vld [vmem:[#allocation8 + $0x238] sm:$0xff]  ;;  %v363_v12 = vld [vmem:[#allocation8 + $0x250] sm:$0xff] }
 0x191   :  { %v367_v13 = vld [vmem:[#allocation8 + $0x270] sm:$0xff] }
 0x192   :  { %1931 = vmatpush1.bf16.msra.mxu0 %v10193_v19  ;;  %2013 = vmatpush1.bf16.msra.mxu1 %v10195_v24  ;;  %v10000_v19 = vcombine.high %v308_v14, %v312_v15  ;;  %v315_v24 = vld [vmem:[#allocation8 + $0xd0] sm:$0xff]  ;;  %v364_v14 = vld [vmem:[#allocation8 + $0x258] sm:$0xff] }
 0x193   :  { %1932 = vmatprep.subr.bf16.mxu0 %v10202_v26  ;;  %2014 = vmatprep.subr.bf16.mxu1 %v10204_v27  ;;  %v319_v26 = vld [vmem:[#allocation8 + $0xf0] sm:$0xff]  ;;  %v316_v27 = vld [vmem:[#allocation8 + $0xd8] sm:$0xff] }
 0x194   :  { %v10006_v32 = vcombine.high %v315_v24, %v319_v26  ;;  %v10005_v38 = vcombine.low %v315_v24, %v319_v26  ;;  %v10007_v39 = vcombine.low %v316_v27, %v320_v28  ;;  %v368_v15 = vld [vmem:[#allocation8 + $0x278] sm:$0xff]  ;;  %v371_v24 = vld [vmem:[#allocation8 + $0x290] sm:$0xff] }
 0x195   :  { %v375_v26 = vld [vmem:[#allocation8 + $0x2b0] sm:$0xff] }
 0x196   :  { %1933 = vmatpush1.bf16.msra.mxu0 %v10201_v33  ;;  %2015 = vmatpush1.bf16.msra.mxu1 %v10203_v34  ;;  %v10008_v33 = vcombine.high %v316_v27, %v320_v28  ;;  %v323_v34 = vld [vmem:[#allocation8 + $0x110] sm:$0xff]  ;;  %v372_v27 = vld [vmem:[#allocation8 + $0x298] sm:$0xff] }
 0x197   :  { %1934 = vmatprep.subr.bf16.mxu0 %v10210_v36  ;;  %2016 = vmatprep.subr.bf16.mxu1 %v10212_v37  ;;  %v327_v36 = vld [vmem:[#allocation8 + $0x130] sm:$0xff]  ;;  %v328_v37 = vld [vmem:[#allocation8 + $0x138] sm:$0xff] }
 0x198   :  { %v10014_v40 = vcombine.high %v323_v34, %v327_v36  ;;  %v376_v28 = vld [vmem:[#allocation8 + $0x2b8] sm:$0xff] }
 0x19a   :  { %1935 = vmatpush1.bf16.msra.mxu0 %v10209_v43  ;;  %2017 = vmatpush1.bf16.msra.mxu1 %v10211_v44  ;;  %v335_v43 = vld [vmem:[#allocation8 + $0x170] sm:$0xff]  ;;  %v332_v44 = vld [vmem:[#allocation8 + $0x158] sm:$0xff] }
 0x19b   :  { %1936 = vmatprep.subr.bf16.mxu0 %v10218_v45  ;;  %2018 = vmatprep.subr.bf16.mxu1 %v10220_v46  ;;  %v336_v45 = vld [vmem:[#allocation8 + $0x178] sm:$0xff]  ;;  %v10013_v46 = vcombine.low %v323_v34, %v327_v36  ;;  %v10022_v50 = vcombine.high %v331_v42, %v335_v43  ;;  %v379_v34 = vld [vmem:[#allocation8 + $0x2d0] sm:$0xff] }
 0x19c   :  { %v10024_v51 = vcombine.high %v332_v44, %v336_v45  ;;  %v383_v36 = vld [vmem:[#allocation8 + $0x2f0] sm:$0xff] }
 0x19e   :  { %1937 = vmatpush1.bf16.msra.mxu0 %v10217_v22  ;;  %2019 = vmatpush1.bf16.msra.mxu1 %v10219_v54  ;;  %v340_v22 = vld [vmem:[#allocation8 + $0x198] sm:$0xff] }
 0x19f   :  { %1938 = vmatprep.subr.bf16.mxu0 %v10226_v55  ;;  %2020 = vmatprep.subr.bf16.mxu1 %v10228_v56  ;;  %v344_v54 = vld [vmem:[#allocation8 + $0x1b8] sm:$0xff]  ;;  %v10021_v55 = vcombine.low %v331_v42, %v335_v43  ;;  %v10023_v56 = vcombine.low %v332_v44, %v336_v45  ;;  %v387_v42 = vld [vmem:[#allocation8 + $0x310] sm:$0xff] }
 0x1a0   :  { %v10032_v59 = vcombine.high %v340_v22, %v344_v54  ;;  %v391_v43 = vld [vmem:[#allocation8 + $0x330] sm:$0xff]  ;;  %v388_v44 = vld [vmem:[#allocation8 + $0x318] sm:$0xff] }
 0x1a1   :  { %v392_v45 = vld [vmem:[#allocation8 + $0x338] sm:$0xff] }
 0x1a2   :  { %1939 = vmatpush1.bf16.msra.mxu0 %v10225_v35  ;;  %2021 = vmatpush1.bf16.msra.mxu1 %v10227_v63  ;;  %v352_v35 = vld [vmem:[#allocation8 + $0x1f8] sm:$0xff]  ;;  %v10029_v63 = vcombine.low %v339_v52, %v343_v53  ;;  %v395_v52 = vld [vmem:[#allocation8 + $0x350] sm:$0xff] }
 0x1a3   :  { %2031 = vmatprep.subr.bf16.mxu0 %v9982_v0  ;;  %2113 = vmatprep.subr.bf16.mxu1 %v9984_v1  ;;  %v10031_v0 = vcombine.low %v340_v22, %v344_v54  ;;  %v10038_v1 = vcombine.high %v347_v60, %v351_v61  ;;  %v10040_v2 = vcombine.high %v348_v62, %v352_v35  ;;  %v399_v53 = vld [vmem:[#allocation8 + $0x370] sm:$0xff]  ;;  %v396_v22 = vld [vmem:[#allocation8 + $0x358] sm:$0xff] }
 0x1a4   :  { %v400_v54 = vld [vmem:[#allocation8 + $0x378] sm:$0xff] }
 0x1a5   :  { %1941 = vmatmul.mubr.bf16.vlgmr.msra.gmra.mrb[4].mxu0 %v11798_v8  ;;  %2023 = vmatmul.mubr.bf16.vlgmr.msra.gmra.mrb[4].mxu1 %v11798_v8 }
 0x1a6   :  { %2032 = vmatpush1.bf16.msra.mxu0 %v9981_v7  ;;  %2063 = vmatprep.mubr.bf16.mxu0 %v11780_v47  ;;  %v10037_v7 = vcombine.low %v347_v60, %v351_v61  ;;  %v403_v60 = vld [vmem:[#allocation8 + $0x390] sm:$0xff] }
 0x1a7   :  { %2114 = vmatpush1.bf16.msra.mxu1 %v9983_v9  ;;  %2145 = vmatprep.mubr.bf16.mxu1 %v11780_v47  ;;  %v324_v47 = vld [vmem:[#allocation8 + $0x118] sm:$0xff]  ;;  %v10039_v9 = vcombine.low %v348_v62, %v352_v35  ;;  %v407_v61 = vld [vmem:[#allocation8 + $0x3b0] sm:$0xff] }
 0x1a8   :  { %2033 = vmatprep.subr.bf16.mxu0 %v9990_v10  ;;  %2115 = vmatprep.subr.bf16.mxu1 %v9992_v11  ;;  %v10016_v41 = vcombine.high %v324_v47, %v328_v37  ;;  %v10015_v48 = vcombine.low %v324_v47, %v328_v37  ;;  %v10046_v10 = vcombine.high %v355_v3, %v359_v4  ;;  %v380_v47 = vld [vmem:[#allocation8 + $0x2d8] sm:$0xff] }
 0x1a9   :  { %v10048_v11 = vcombine.high %v356_v5, %v360_v6  ;;  %v384_v37 = vld [vmem:[#allocation8 + $0x2f8] sm:$0xff] }
 0x1aa   :  { %2034 = vmatpush1.bf16.msra.mxu0 %v9989_v16  ;;  %v10045_v16 = vcombine.low %v355_v3, %v359_v4  ;;  %v404_v62 = vld [vmem:[#allocation8 + $0x398] sm:$0xff]  ;;  %v411_v3 = vld [vmem:[#allocation8 + $0x3d0] sm:$0xff] }
 0x1ab   :  { %2116 = vmatpush1.bf16.msra.mxu1 %v9991_v17  ;;  %2035 = vmatprep.subr.bf16.mxu0 %v9998_v18  ;;  %v10047_v17 = vcombine.low %v356_v5, %v360_v6  ;;  %v10054_v18 = vcombine.high %v363_v12, %v367_v13  ;;  %v408_v35 = vld [vmem:[#allocation8 + $0x3b8] sm:$0xff]  ;;  %v415_v4 = vld [vmem:[#allocation8 + $0x3f0] sm:$0xff] }
 0x1ac   :  { %2117 = vmatprep.subr.bf16.mxu1 %v10000_v19  ;;  %v10056_v19 = vcombine.high %v364_v14, %v368_v15  ;;  %v412_v5 = vld [vmem:[#allocation8 + $0x3d8] sm:$0xff] }
 0x1ad   :  { %v416_v6 = vld [vmem:[#allocation8 + $0x3f8] sm:$0xff] }
 0x1ae   :  { %2036 = vmatpush1.bf16.msra.mxu0 %v9997_v30  ;;  %v10053_v30 = vcombine.low %v363_v12, %v367_v13  ;;  %v419_v12 = vld [vmem:[#allocation8 + $0x410] sm:$0xff] }
 0x1af   :  { %2118 = vmatpush1.bf16.msra.mxu1 %v9999_v31  ;;  %2037 = vmatprep.subr.bf16.mxu0 %v10006_v32  ;;  %v10055_v31 = vcombine.low %v364_v14, %v368_v15  ;;  %v10062_v32 = vcombine.high %v371_v24, %v375_v26  ;;  %v423_v13 = vld [vmem:[#allocation8 + $0x430] sm:$0xff]  ;;  %v420_v14 = vld [vmem:[#allocation8 + $0x418] sm:$0xff] }
 0x1b0   :  { %2119 = vmatprep.subr.bf16.mxu1 %v10008_v33  ;;  %v10064_v33 = vcombine.high %v372_v27, %v376_v28  ;;  %v424_v15 = vld [vmem:[#allocation8 + $0x438] sm:$0xff] }
 0x1b2   :  { %2038 = vmatpush1.bf16.msra.mxu0 %v10005_v38  ;;  %v10061_v38 = vcombine.low %v371_v24, %v375_v26  ;;  %v427_v24 = vld [vmem:[#allocation8 + $0x450] sm:$0xff] }
 0x1b3   :  { %2120 = vmatpush1.bf16.msra.mxu1 %v10007_v39  ;;  %2039 = vmatprep.subr.bf16.mxu0 %v10014_v40  ;;  %v10063_v39 = vcombine.low %v372_v27, %v376_v28  ;;  %v10070_v40 = vcombine.high %v379_v34, %v383_v36  ;;  %v431_v26 = vld [vmem:[#allocation8 + $0x470] sm:$0xff]  ;;  %v10109_v27 = vcombine.low %v419_v12, %v423_v13  ;;  %v428_v28 = vld [vmem:[#allocation8 + $0x458] sm:$0xff] }
 0x1b4   :  { %2121 = vmatprep.subr.bf16.mxu1 %v10016_v41  ;;  %v10072_v41 = vcombine.high %v380_v47, %v384_v37 }
 0x1b6   :  { %2040 = vmatpush1.bf16.msra.mxu0 %v10013_v46  ;;  %v10069_v46 = vcombine.low %v379_v34, %v383_v36  ;;  %v439_v34 = vld [vmem:[#allocation8 + $0x4b0] sm:$0xff] }
 0x1b7   :  { %2122 = vmatpush1.bf16.msra.mxu1 %v10015_v48  ;;  %2041 = vmatprep.subr.bf16.mxu0 %v10022_v50  ;;  %v10071_v48 = vcombine.low %v380_v47, %v384_v37  ;;  %v10078_v50 = vcombine.high %v387_v42, %v391_v43  ;;  %v436_v47 = vld [vmem:[#allocation8 + $0x498] sm:$0xff] }
 0x1b8   :  { %2123 = vmatprep.subr.bf16.mxu1 %v10024_v51  ;;  %v10080_v51 = vcombine.high %v388_v44, %v392_v45  ;;  %v440_v37 = vld [vmem:[#allocation8 + $0x4b8] sm:$0xff] }
 0x1ba   :  { %2042 = vmatpush1.bf16.msra.mxu0 %v10021_v55  ;;  %v10077_v55 = vcombine.low %v387_v42, %v391_v43  ;;  %v443_v42 = vld [vmem:[#allocation8 + $0x4d0] sm:$0xff] }
 0x1bb   :  { %2124 = vmatpush1.bf16.msra.mxu1 %v10023_v56  ;;  %2043 = vmatprep.subr.bf16.mxu0 %v10030_v58  ;;  %v10079_v56 = vcombine.low %v388_v44, %v392_v45  ;;  %v10086_v58 = vcombine.high %v395_v52, %v399_v53  ;;  %v447_v43 = vld [vmem:[#allocation8 + $0x4f0] sm:$0xff]  ;;  %v444_v44 = vld [vmem:[#allocation8 + $0x4d8] sm:$0xff] }
 0x1bc   :  { %2125 = vmatprep.subr.bf16.mxu1 %v10032_v59  ;;  %v10088_v59 = vcombine.high %v396_v22, %v400_v54  ;;  %v448_v45 = vld [vmem:[#allocation8 + $0x4f8] sm:$0xff] }
 0x1be   :  { %2044 = vmatpush1.bf16.msra.mxu0 %v10029_v63  ;;  %v10085_v63 = vcombine.low %v395_v52, %v399_v53  ;;  %v455_v52 = vld [vmem:[#allocation8 + $0x530] sm:$0xff]  ;;  %v452_v53 = vld [vmem:[#allocation8 + $0x518] sm:$0xff] }
 0x1bf   :  { %2126 = vmatpush1.bf16.msra.mxu1 %v10031_v0  ;;  %2045 = vmatprep.subr.bf16.mxu0 %v10038_v1  ;;  %v10087_v0 = vcombine.low %v396_v22, %v400_v54  ;;  %v10094_v1 = vcombine.high %v403_v60, %v407_v61  ;;  %v456_v22 = vld [vmem:[#allocation8 + $0x538] sm:$0xff]  ;;  %v10135_v54 = vcombine.low %v444_v44, %v448_v45 }
 0x1c0   :  { %2127 = vmatprep.subr.bf16.mxu1 %v10040_v2  ;;  %v10096_v2 = vcombine.high %v404_v62, %v408_v35 }
 0x1c2   :  { %2046 = vmatpush1.bf16.msra.mxu0 %v10037_v7  ;;  %v10093_v7 = vcombine.low %v403_v60, %v407_v61  ;;  %v460_v60 = vld [vmem:[#allocation8 + $0x558] sm:$0xff] }
 0x1c3   :  { %2128 = vmatpush1.bf16.msra.mxu1 %v10039_v9  ;;  %2047 = vmatprep.subr.bf16.mxu0 %v10046_v10  ;;  %v10095_v9 = vcombine.low %v404_v62, %v408_v35  ;;  %v10102_v10 = vcombine.high %v411_v3, %v415_v4  ;;  %v464_v61 = vld [vmem:[#allocation8 + $0x578] sm:$0xff]  ;;  %v10143_v35 = vcombine.low %v452_v53, %v456_v22 }
 0x1c4   :  { %2129 = vmatprep.subr.bf16.mxu1 %v10048_v11  ;;  %v10104_v11 = vcombine.high %v412_v5, %v416_v6 }
 0x1c6   :  { %2048 = vmatpush1.bf16.msra.mxu0 %v10045_v16  ;;  %v10101_v16 = vcombine.low %v411_v3, %v415_v4  ;;  %v468_v3 = vld [vmem:[#allocation8 + $0x598] sm:$0xff] }
 0x1c7   :  { %2130 = vmatpush1.bf16.msra.mxu1 %v10047_v17  ;;  %2049 = vmatprep.subr.bf16.mxu0 %v10054_v18  ;;  %v10103_v17 = vcombine.low %v412_v5, %v416_v6  ;;  %v10110_v18 = vcombine.high %v419_v12, %v423_v13  ;;  %v472_v4 = vld [vmem:[#allocation8 + $0x5b8] sm:$0xff]  ;;  %v10151_v6 = vcombine.low %v460_v60, %v464_v61 }
 0x1c8   :  { %2131 = vmatprep.subr.bf16.mxu1 %v10056_v19  ;;  %v10112_v19 = vcombine.high %v420_v14, %v424_v15  ;;  %v476_v12 = vld [vmem:[#allocation8 + $0x5d8] sm:$0xff] }
 0x1c9   :  { %v480_v13 = vld [vmem:[#allocation8 + $0x5f8] sm:$0xff] }
 0x1ca   :  { %2050 = vmatpush1.bf16.msra.mxu0 %v10053_v30  ;;  %v432_v30 = vld [vmem:[#allocation8 + $0x478] sm:$0xff] }
 0x1cb   :  { %2132 = vmatpush1.bf16.msra.mxu1 %v10055_v31  ;;  %2051 = vmatprep.subr.bf16.mxu0 %v10062_v32  ;;  %v10111_v31 = vcombine.low %v420_v14, %v424_v15  ;;  %v10118_v32 = vcombine.high %v427_v24, %v431_v26  ;;  %v10120_v36 = vcombine.high %v428_v28, %v432_v30 }
 0x1cc   :  { %2133 = vmatprep.subr.bf16.mxu1 %v10064_v33  ;;  %v435_v33 = vld [vmem:[#allocation8 + $0x490] sm:$0xff]  ;;  %v10159_v15 = vcombine.low %v468_v3, %v472_v4 }
 0x1ce   :  { %2052 = vmatpush1.bf16.msra.mxu0 %v10061_v38  ;;  %v10117_v38 = vcombine.low %v427_v24, %v431_v26  ;;  %v484_v24 = vld [vmem:[#allocation8 + $0x618] sm:$0xff] }
 0x1cf   :  { %2134 = vmatpush1.bf16.msra.mxu1 %v10063_v39  ;;  %2053 = vmatprep.subr.bf16.mxu0 %v10070_v40  ;;  %v10119_v39 = vcombine.low %v428_v28, %v432_v30  ;;  %v10126_v40 = vcombine.high %v435_v33, %v439_v34  ;;  %v488_v26 = vld [vmem:[#allocation8 + $0x638] sm:$0xff]  ;;  %v10167_v28 = vcombine.low %v476_v12, %v480_v13 }
 0x1d0   :  { %2135 = vmatprep.subr.bf16.mxu1 %v10072_v41  ;;  %v10128_v41 = vcombine.high %v436_v47, %v440_v37 }
 0x1d2   :  { %2054 = vmatpush1.bf16.msra.mxu0 %v10069_v46  ;;  %v10125_v46 = vcombine.low %v435_v33, %v439_v34  ;;  %v495_v33 = vld [vmem:[#allocation8 + $0x670] sm:$0xff]  ;;  %v492_v34 = vld [vmem:[#allocation8 + $0x658] sm:$0xff] }
 0x1d3   :  { %2136 = vmatpush1.bf16.msra.mxu1 %v10071_v48  ;;  %2055 = vmatprep.subr.bf16.mxu0 %v10078_v50  ;;  %v10134_v48 = vcombine.high %v443_v42, %v447_v43  ;;  %v10136_v50 = vcombine.high %v444_v44, %v448_v45 }
 0x1d4   :  { %2137 = vmatprep.subr.bf16.mxu1 %v10080_v51  ;;  %v451_v51 = vld [vmem:[#allocation8 + $0x510] sm:$0xff] }
 0x1d5   :  { %v10141_v62 = vcombine.low %v451_v51, %v455_v52 }
 0x1d6   :  { %2056 = vmatpush1.bf16.msra.mxu0 %v10077_v55  ;;  %v10142_v55 = vcombine.high %v451_v51, %v455_v52  ;;  %v508_v51 = vld [vmem:[#allocation8 + $0x6d8] sm:$0xff] }
 0x1d7   :  { %2138 = vmatpush1.bf16.msra.mxu1 %v10079_v56  ;;  %2057 = vmatprep.subr.bf16.mxu0 %v10086_v58  ;;  %v10144_v56 = vcombine.high %v452_v53, %v456_v22  ;;  %v459_v58 = vld [vmem:[#allocation8 + $0x550] sm:$0xff]  ;;  %v512_v52 = vld [vmem:[#allocation8 + $0x6f8] sm:$0xff] }
 0x1d8   :  { %2139 = vmatprep.subr.bf16.mxu1 %v10088_v59  ;;  %v463_v59 = vld [vmem:[#allocation8 + $0x570] sm:$0xff] }
 0x1d9   :  { %v10149_v5 = vcombine.low %v459_v58, %v463_v59 }
 0x1da   :  { %2058 = vmatpush1.bf16.msra.mxu0 %v10085_v63  ;;  %v10150_v63 = vcombine.high %v459_v58, %v463_v59  ;;  %v516_v58 = vld [vmem:[#allocation8 + $0x718] sm:$0xff] }
 0x1db   :  { %2140 = vmatpush1.bf16.msra.mxu1 %v10087_v0  ;;  %2059 = vmatprep.subr.bf16.mxu0 %v10094_v1  ;;  %v10152_v0 = vcombine.high %v460_v60, %v464_v61  ;;  %v467_v1 = vld [vmem:[#allocation8 + $0x590] sm:$0xff]  ;;  %v520_v59 = vld [vmem:[#allocation8 + $0x738] sm:$0xff]  ;;  %v10199_v61 = vcombine.low %v508_v51, %v512_v52 }
 0x1dc   :  { %2141 = vmatprep.subr.bf16.mxu1 %v10096_v2  ;;  %v471_v2 = vld [vmem:[#allocation8 + $0x5b0] sm:$0xff] }
 0x1dd   :  { %v10157_v14 = vcombine.low %v467_v1, %v471_v2 }
 0x1de   :  { %2060 = vmatpush1.bf16.msra.mxu0 %v10093_v7  ;;  %v10158_v7 = vcombine.high %v467_v1, %v471_v2  ;;  %v524_v1 = vld [vmem:[#allocation8 + $0x758] sm:$0xff] }
 0x1df   :  { %2142 = vmatpush1.bf16.msra.mxu1 %v10095_v9  ;;  %2061 = vmatprep.subr.bf16.mxu0 %v10102_v10  ;;  %v10160_v9 = vcombine.high %v468_v3, %v472_v4  ;;  %v475_v10 = vld [vmem:[#allocation8 + $0x5d0] sm:$0xff]  ;;  %v528_v2 = vld [vmem:[#allocation8 + $0x778] sm:$0xff]  ;;  %v10207_v4 = vcombine.low %v516_v58, %v520_v59 }
 0x1e0   :  { %2143 = vmatprep.subr.bf16.mxu1 %v10104_v11  ;;  %v479_v11 = vld [vmem:[#allocation8 + $0x5f0] sm:$0xff] }
 0x1e2   :  { %2062 = vmatpush1.bf16.msra.mxu0 %v10101_v16  ;;  %v10166_v16 = vcombine.high %v475_v10, %v479_v11 }
 0x1e3   :  { %2144 = vmatpush1.bf16.msra.mxu1 %v10103_v17  ;;  %2072 = vmatprep.subr.bf16.mxu0 %v10110_v18  ;;  %v10168_v17 = vcombine.high %v476_v12, %v480_v13  ;;  %v483_v18 = vld [vmem:[#allocation8 + $0x610] sm:$0xff]  ;;  %v10215_v13 = vcombine.low %v524_v1, %v528_v2 }
 0x1e4   :  { %2154 = vmatprep.subr.bf16.mxu1 %v10112_v19  ;;  %v487_v19 = vld [vmem:[#allocation8 + $0x630] sm:$0xff] }
 0x1e5   :  { %2064 = vmatmul.mubr.bf16.vlgmr.msra.gmra.mrb[8].mxu0 %v11782_v49  ;;  %v10174_v30 = vcombine.high %v483_v18, %v487_v19 }
 0x1e6   :  { %2146 = vmatmul.mubr.bf16.vlgmr.msra.gmra.mrb[8].mxu1 %v11782_v49  ;;  %2073 = vmatpush1.bf16.msra.mxu0 %v10109_v27  ;;  %v10127_v49 = vcombine.low %v436_v47, %v440_v37  ;;  %v10165_v27 = vcombine.low %v475_v10, %v479_v11  ;;  %v10173_v47 = vcombine.low %v483_v18, %v487_v19  ;;  %v532_v10 = vld [vmem:[#allocation8 + $0x798] sm:$0xff] }
 0x1e7   :  { %2104 = vmatprep.mubr.bf16.mxu0 %v11788_v57  ;;  %2155 = vmatpush1.bf16.msra.mxu1 %v10111_v31  ;;  %v10176_v31 = vcombine.high %v484_v24, %v488_v26  ;;  %v10175_v37 = vcombine.low %v484_v24, %v488_v26  ;;  %v536_v11 = vld [vmem:[#allocation8 + $0x7b8] sm:$0xff] }
 0x1e8   :  { %2186 = vmatprep.mubr.bf16.mxu1 %v11788_v57  ;;  %2074 = vmatprep.subr.bf16.mxu0 %v10118_v32  ;;  %v10133_v57 = vcombine.low %v443_v42, %v447_v43  ;;  %v491_v32 = vld [vmem:[#allocation8 + $0x650] sm:$0xff]  ;;  %v500_v42 = vld [vmem:[#allocation8 + $0x698] sm:$0xff]  ;;  %v10223_v26 = vcombine.low %v532_v10, %v536_v11 }
 0x1e9   :  { %2156 = vmatprep.subr.bf16.mxu1 %v10120_v36  ;;  %v496_v36 = vld [vmem:[#allocation8 + $0x678] sm:$0xff]  ;;  %v10181_v44 = vcombine.low %v491_v32, %v495_v33 }
 0x1ea   :  { %2075 = vmatpush1.bf16.msra.mxu0 %v10117_v38  ;;  %v10182_v38 = vcombine.high %v491_v32, %v495_v33  ;;  %v504_v43 = vld [vmem:[#allocation8 + $0x6b8] sm:$0xff]  ;;  %v10183_v45 = vcombine.low %v492_v34, %v496_v36  ;;  %v2228_v32 = vld [vmem:[#allocation11 + $0x8] sm:$0xff] }
 0x1eb   :  { %2157 = vmatpush1.bf16.msra.mxu1 %v10119_v39  ;;  %2076 = vmatprep.subr.bf16.mxu0 %v10126_v40  ;;  %v10184_v39 = vcombine.high %v492_v34, %v496_v36  ;;  %v499_v40 = vld [vmem:[#allocation8 + $0x690] sm:$0xff]  ;;  %v10191_v22 = vcombine.low %v500_v42, %v504_v43  ;;  %v540_v18 = vld [vmem:[#allocation8 + $0x7d8] sm:$0xff] }
 0x1ec   :  { %2158 = vmatprep.subr.bf16.mxu1 %v10128_v41  ;;  %v503_v41 = vld [vmem:[#allocation8 + $0x6b0] sm:$0xff]  ;;  %v544_v19 = vld [vmem:[#allocation8 + $0x7f8] sm:$0xff] }
 0x1ed   :  { %v10189_v53 = vcombine.low %v499_v40, %v503_v41  ;;  %v2236_v33 = vld [vmem:[#allocation11 + $0x48] sm:$0xff]  ;;  %v10231_v36 = vcombine.low %v540_v18, %v544_v19 }
 0x1ee   :  { %2077 = vmatpush1.bf16.msra.mxu0 %v10125_v46  ;;  %v10190_v46 = vcombine.high %v499_v40, %v503_v41  ;;  %v2244_v40 = vld [vmem:[#allocation11 + $0x88] sm:$0xff] }
 0x1ef   :  { %2159 = vmatpush1.bf16.msra.mxu1 %v10127_v49  ;;  %2078 = vmatprep.subr.bf16.mxu0 %v10134_v48  ;;  %v10192_v49 = vcombine.high %v500_v42, %v504_v43  ;;  %v507_v48 = vld [vmem:[#allocation8 + $0x6d0] sm:$0xff]  ;;  %v10235_v43 = vcombine.low %v2228_v32, %v2236_v33 }
 0x1f0   :  { %2160 = vmatprep.subr.bf16.mxu1 %v10136_v50  ;;  %v511_v50 = vld [vmem:[#allocation8 + $0x6f0] sm:$0xff] }
 0x1f1   :  { %v10197_v60 = vcombine.low %v507_v48, %v511_v50  ;;  %v2252_v41 = vld [vmem:[#allocation11 + $0xc8] sm:$0xff] }
 0x1f2   :  { %2079 = vmatpush1.bf16.msra.mxu0 %v10133_v57  ;;  %v10198_v57 = vcombine.high %v507_v48, %v511_v50  ;;  %v2260_v48 = vld [vmem:[#allocation11 + $0x108] sm:$0xff] }
 0x1f3   :  { %2161 = vmatpush1.bf16.msra.mxu1 %v10135_v54  ;;  %2080 = vmatprep.subr.bf16.mxu0 %v10142_v55  ;;  %v10200_v54 = vcombine.high %v508_v51, %v512_v52  ;;  %v515_v55 = vld [vmem:[#allocation8 + $0x710] sm:$0xff]  ;;  %v10251_v52 = vcombine.low %v2244_v40, %v2252_v41 }
 0x1f4   :  { %2162 = vmatprep.subr.bf16.mxu1 %v10144_v56  ;;  %v519_v56 = vld [vmem:[#allocation8 + $0x730] sm:$0xff] }
 0x1f5   :  { %v10205_v3 = vcombine.low %v515_v55, %v519_v56  ;;  %v2268_v50 = vld [vmem:[#allocation11 + $0x148] sm:$0xff] }
 0x1f6   :  { %2081 = vmatpush1.bf16.msra.mxu0 %v10141_v62  ;;  %v10206_v62 = vcombine.high %v515_v55, %v519_v56  ;;  %v2276_v55 = vld [vmem:[#allocation11 + $0x188] sm:$0xff] }
 0x1f7   :  { %2163 = vmatpush1.bf16.msra.mxu1 %v10143_v35  ;;  %2082 = vmatprep.subr.bf16.mxu0 %v10150_v63  ;;  %v10208_v35 = vcombine.high %v516_v58, %v520_v59  ;;  %v523_v63 = vld [vmem:[#allocation8 + $0x750] sm:$0xff]  ;;  %v10267_v59 = vcombine.low %v2260_v48, %v2268_v50 }
 0x1f8   :  { %2164 = vmatprep.subr.bf16.mxu1 %v10152_v0  ;;  %v527_v0 = vld [vmem:[#allocation8 + $0x770] sm:$0xff] }
 0x1f9   :  { %v10213_v12 = vcombine.low %v523_v63, %v527_v0  ;;  %v2284_v56 = vld [vmem:[#allocation11 + $0x1c8] sm:$0xff] }
 0x1fa   :  { %2083 = vmatpush1.bf16.msra.mxu0 %v10149_v5  ;;  %v10214_v5 = vcombine.high %v523_v63, %v527_v0  ;;  %v2300_v63 = vld [vmem:[#allocation11 + $0x248] sm:$0xff] }
 0x1fb   :  { %2165 = vmatpush1.bf16.msra.mxu1 %v10151_v6  ;;  %2084 = vmatprep.subr.bf16.mxu0 %v10158_v7  ;;  %v10216_v6 = vcombine.high %v524_v1, %v528_v2  ;;  %v531_v7 = vld [vmem:[#allocation8 + $0x790] sm:$0xff]  ;;  %v10283_v1 = vcombine.low %v2276_v55, %v2284_v56 }
 0x1fc   :  { %2166 = vmatprep.subr.bf16.mxu1 %v10160_v9  ;;  %v535_v9 = vld [vmem:[#allocation8 + $0x7b0] sm:$0xff] }
 0x1fd   :  { %v10221_v24 = vcombine.low %v531_v7, %v535_v9 }
 0x1fe   :  { %2085 = vmatpush1.bf16.msra.mxu0 %v10157_v14  ;;  %v10222_v14 = vcombine.high %v531_v7, %v535_v9  ;;  %v2316_v7 = vld [vmem:[#allocation11 + $0x2c8] sm:$0xff] }
 0x1ff   :  { %2167 = vmatpush1.bf16.msra.mxu1 %v10159_v15  ;;  %2086 = vmatprep.subr.bf16.mxu0 %v10166_v16  ;;  %v10224_v15 = vcombine.high %v532_v10, %v536_v11  ;;  %v539_v16 = vld [vmem:[#allocation8 + $0x7d0] sm:$0xff] }
 0x200   :  { %2168 = vmatprep.subr.bf16.mxu1 %v10168_v17  ;;  %v543_v17 = vld [vmem:[#allocation8 + $0x7f0] sm:$0xff] }
 0x201   :  { %v10229_v34 = vcombine.low %v539_v16, %v543_v17 }
 0x202   :  { %2087 = vmatpush1.bf16.msra.mxu0 %v10165_v27  ;;  %v10230_v27 = vcombine.high %v539_v16, %v543_v17  ;;  %v2332_v16 = vld [vmem:[#allocation11 + $0x348] sm:$0xff] }
 0x203   :  { %2169 = vmatpush1.bf16.msra.mxu1 %v10167_v28  ;;  %2088 = vmatprep.subr.bf16.mxu0 %v10174_v30  ;;  %v10232_v28 = vcombine.high %v540_v18, %v544_v19  ;;  %v2227_v30 = vld [vmem:[#allocation11] sm:$0xff] }
 0x204   :  { %2170 = vmatprep.subr.bf16.mxu1 %v10176_v31  ;;  %v2235_v31 = vld [vmem:[#allocation11 + $0x40] sm:$0xff] }
 0x205   :  { %v10233_v42 = vcombine.low %v2227_v30, %v2235_v31 }
 0x206   :  { %2089 = vmatpush1.bf16.msra.mxu0 %v10173_v47  ;;  %v10234_v47 = vcombine.high %v2227_v30, %v2235_v31  ;;  %v2348_v30 = vld [vmem:[#allocation11 + $0x3c8] sm:$0xff] }
 0x207   :  { %2171 = vmatpush1.bf16.msra.mxu1 %v10175_v37  ;;  %2090 = vmatprep.subr.bf16.mxu0 %v10182_v38  ;;  %v10236_v37 = vcombine.high %v2228_v32, %v2236_v33  ;;  %v2243_v38 = vld [vmem:[#allocation11 + $0x80] sm:$0xff] }
 0x208   :  { %2172 = vmatprep.subr.bf16.mxu1 %v10184_v39  ;;  %v2251_v39 = vld [vmem:[#allocation11 + $0xc0] sm:$0xff] }
 0x209   :  { %v10249_v51 = vcombine.low %v2243_v38, %v2251_v39 }
 0x20a   :  { %2091 = vmatpush1.bf16.msra.mxu0 %v10181_v44  ;;  %v10250_v44 = vcombine.high %v2243_v38, %v2251_v39  ;;  %v2364_v38 = vld [vmem:[#allocation11 + $0x448] sm:$0xff] }
 0x20b   :  { %2173 = vmatpush1.bf16.msra.mxu1 %v10183_v45  ;;  %2092 = vmatprep.subr.bf16.mxu0 %v10190_v46  ;;  %v10252_v45 = vcombine.high %v2244_v40, %v2252_v41  ;;  %v2259_v46 = vld [vmem:[#allocation11 + $0x100] sm:$0xff] }
 0x20c   :  { %2174 = vmatprep.subr.bf16.mxu1 %v10192_v49  ;;  %v2267_v49 = vld [vmem:[#allocation11 + $0x140] sm:$0xff] }
 0x20d   :  { %v10265_v58 = vcombine.low %v2259_v46, %v2267_v49 }
 0x20e   :  { %2093 = vmatpush1.bf16.msra.mxu0 %v10189_v53  ;;  %v10266_v53 = vcombine.high %v2259_v46, %v2267_v49  ;;  %v2380_v46 = vld [vmem:[#allocation11 + $0x4c8] sm:$0xff] }
 0x20f   :  { %2175 = vmatpush1.bf16.msra.mxu1 %v10191_v22  ;;  %2094 = vmatprep.subr.bf16.mxu0 %v10198_v57  ;;  %v10268_v22 = vcombine.high %v2260_v48, %v2268_v50  ;;  %v2275_v57 = vld [vmem:[#allocation11 + $0x180] sm:$0xff] }
 0x210   :  { %2176 = vmatprep.subr.bf16.mxu1 %v10200_v54  ;;  %v2283_v54 = vld [vmem:[#allocation11 + $0x1c0] sm:$0xff] }
 0x211   :  { %v10281_v0 = vcombine.low %v2275_v57, %v2283_v54 }
 0x212   :  { %2095 = vmatpush1.bf16.msra.mxu0 %v10197_v60  ;;  %v10282_v60 = vcombine.high %v2275_v57, %v2283_v54  ;;  %v2396_v57 = vld [vmem:[#allocation11 + $0x548] sm:$0xff] }
 0x213   :  { %2177 = vmatpush1.bf16.msra.mxu1 %v10199_v61  ;;  %2096 = vmatprep.subr.bf16.mxu0 %v10206_v62  ;;  %v2291_v61 = vld [vmem:[#allocation11 + $0x200] sm:$0xff] }
 0x214   :  { %2178 = vmatprep.subr.bf16.mxu1 %v10208_v35  ;;  %v2299_v62 = vld [vmem:[#allocation11 + $0x240] sm:$0xff]  ;;  %v2292_v35 = vld [vmem:[#allocation11 + $0x208] sm:$0xff] }
 0x215   :  { %v10298_v2 = vcombine.high %v2291_v61, %v2299_v62  ;;  %v10297_v9 = vcombine.low %v2291_v61, %v2299_v62  ;;  %v10299_v10 = vcombine.low %v2292_v35, %v2300_v63  ;;  %v2412_v61 = vld [vmem:[#allocation11 + $0x5c8] sm:$0xff] }
 0x216   :  { %2097 = vmatpush1.bf16.msra.mxu0 %v10205_v3  ;;  %v10300_v3 = vcombine.high %v2292_v35, %v2300_v63 }
 0x217   :  { %2179 = vmatpush1.bf16.msra.mxu1 %v10207_v4  ;;  %2098 = vmatprep.subr.bf16.mxu0 %v10214_v5  ;;  %v2307_v4 = vld [vmem:[#allocation11 + $0x280] sm:$0xff] }
 0x218   :  { %2180 = vmatprep.subr.bf16.mxu1 %v10216_v6  ;;  %v2315_v5 = vld [vmem:[#allocation11 + $0x2c0] sm:$0xff]  ;;  %v2308_v6 = vld [vmem:[#allocation11 + $0x288] sm:$0xff] }
 0x219   :  { %v10314_v11 = vcombine.high %v2307_v4, %v2315_v5  ;;  %v10313_v17 = vcombine.low %v2307_v4, %v2315_v5  ;;  %v10315_v18 = vcombine.low %v2308_v6, %v2316_v7  ;;  %v2428_v4 = vld [vmem:[#allocation11 + $0x648] sm:$0xff] }
 0x21a   :  { %2099 = vmatpush1.bf16.msra.mxu0 %v10213_v12  ;;  %v10316_v12 = vcombine.high %v2308_v6, %v2316_v7 }
 0x21b   :  { %2181 = vmatpush1.bf16.msra.mxu1 %v10215_v13  ;;  %2100 = vmatprep.subr.bf16.mxu0 %v10222_v14  ;;  %v2323_v13 = vld [vmem:[#allocation11 + $0x300] sm:$0xff] }
 0x21c   :  { %2182 = vmatprep.subr.bf16.mxu1 %v10224_v15  ;;  %v2331_v14 = vld [vmem:[#allocation11 + $0x340] sm:$0xff]  ;;  %v2324_v15 = vld [vmem:[#allocation11 + $0x308] sm:$0xff] }
 0x21d   :  { %v10330_v19 = vcombine.high %v2323_v13, %v2331_v14  ;;  %v10329_v31 = vcombine.low %v2323_v13, %v2331_v14  ;;  %v10331_v32 = vcombine.low %v2324_v15, %v2332_v16  ;;  %v2444_v13 = vld [vmem:[#allocation11 + $0x6c8] sm:$0xff] }
 0x21e   :  { %2101 = vmatpush1.bf16.msra.mxu0 %v10221_v24  ;;  %v10332_v24 = vcombine.high %v2324_v15, %v2332_v16 }
 0x21f   :  { %2183 = vmatpush1.bf16.msra.mxu1 %v10223_v26  ;;  %2102 = vmatprep.subr.bf16.mxu0 %v10230_v27  ;;  %v2339_v26 = vld [vmem:[#allocation11 + $0x380] sm:$0xff] }
 0x220   :  { %2184 = vmatprep.subr.bf16.mxu1 %v10232_v28  ;;  %v2347_v27 = vld [vmem:[#allocation11 + $0x3c0] sm:$0xff]  ;;  %v2340_v28 = vld [vmem:[#allocation11 + $0x388] sm:$0xff] }
 0x221   :  { %v10346_v33 = vcombine.high %v2339_v26, %v2347_v27  ;;  %v10345_v39 = vcombine.low %v2339_v26, %v2347_v27  ;;  %v10347_v40 = vcombine.low %v2340_v28, %v2348_v30  ;;  %v2460_v26 = vld [vmem:[#allocation11 + $0x748] sm:$0xff] }
 0x222   :  { %2103 = vmatpush1.bf16.msra.mxu0 %v10229_v34  ;;  %v10348_v34 = vcombine.high %v2340_v28, %v2348_v30 }
 0x223   :  { %2185 = vmatpush1.bf16.msra.mxu1 %v10231_v36  ;;  %8455 = vmatprep.subr.bf16.mxu0 %v10234_v47  ;;  %v2355_v36 = vld [vmem:[#allocation11 + $0x400] sm:$0xff] }
 0x224   :  { %8619 = vmatprep.subr.bf16.mxu1 %v10236_v37  ;;  %v2363_v47 = vld [vmem:[#allocation11 + $0x440] sm:$0xff]  ;;  %v2356_v37 = vld [vmem:[#allocation11 + $0x408] sm:$0xff] }
 0x225   :  { %2105 = vmatmul.mubr.bf16.vlgmr.msra.gmra.mrb[8].mxu0 %v11798_v8  ;;  %v10362_v41 = vcombine.high %v2355_v36, %v2363_v47  ;;  %v10361_v49 = vcombine.low %v2355_v36, %v2363_v47  ;;  %v10363_v48 = vcombine.low %v2356_v37, %v2364_v38  ;;  %v2476_v36 = vld [vmem:[#allocation11 + $0x7c8] sm:$0xff] }
 0x226   :  { %2187 = vmatmul.mubr.bf16.vlgmr.msra.gmra.mrb[8].mxu1 %v11798_v8  ;;  %8456 = vmatpush1.bf16.msra.mxu0 %v10233_v42  ;;  %v10284_v8 = vcombine.high %v2276_v55, %v2284_v56  ;;  %v10364_v42 = vcombine.high %v2356_v37, %v2364_v38 }
 0x227   :  { %8620 = vmatpush1.bf16.msra.mxu1 %v10235_v43  ;;  %8457 = vmatprep.subr.bf16.mxu0 %v10250_v44  ;;  %v2371_v43 = vld [vmem:[#allocation11 + $0x480] sm:$0xff] }
 0x228   :  { %8621 = vmatprep.subr.bf16.mxu1 %v10252_v45  ;;  %v2379_v44 = vld [vmem:[#allocation11 + $0x4c0] sm:$0xff]  ;;  %v2372_v45 = vld [vmem:[#allocation11 + $0x488] sm:$0xff] }
 0x229   :  { %v10378_v50 = vcombine.high %v2371_v43, %v2379_v44  ;;  %v10377_v54 = vcombine.low %v2371_v43, %v2379_v44  ;;  %v10379_v55 = vcombine.low %v2372_v45, %v2380_v46  ;;  %v2492_v43 = vld [vmem:[#allocation11 + $0x848] sm:$0xff] }
 0x22a   :  { %8458 = vmatpush1.bf16.msra.mxu0 %v10249_v51  ;;  %v10380_v51 = vcombine.high %v2372_v45, %v2380_v46 }
 0x22b   :  { %8622 = vmatpush1.bf16.msra.mxu1 %v10251_v52  ;;  %8459 = vmatprep.subr.bf16.mxu0 %v10266_v53  ;;  %v2387_v52 = vld [vmem:[#allocation11 + $0x500] sm:$0xff] }
 0x22c   :  { %8623 = vmatprep.subr.bf16.mxu1 %v10268_v22  ;;  %v2395_v53 = vld [vmem:[#allocation11 + $0x540] sm:$0xff]  ;;  %v2388_v22 = vld [vmem:[#allocation11 + $0x508] sm:$0xff] }
 0x22d   :  { %v10394_v56 = vcombine.high %v2387_v52, %v2395_v53  ;;  %v10393_v62 = vcombine.low %v2387_v52, %v2395_v53  ;;  %v10395_v35 = vcombine.low %v2388_v22, %v2396_v57 }
 0x22e   :  { %8460 = vmatpush1.bf16.msra.mxu0 %v10265_v58  ;;  %v10396_v58 = vcombine.high %v2388_v22, %v2396_v57 }
 0x22f   :  { %8624 = vmatpush1.bf16.msra.mxu1 %v10267_v59  ;;  %8461 = vmatprep.subr.bf16.mxu0 %v10282_v60  ;;  %v2403_v59 = vld [vmem:[#allocation11 + $0x580] sm:$0xff] }
 0x230   :  { %8625 = vmatprep.subr.bf16.mxu1 %v10284_v8  ;;  %v2411_v60 = vld [vmem:[#allocation11 + $0x5c0] sm:$0xff]  ;;  %v2404_v8 = vld [vmem:[#allocation11 + $0x588] sm:$0xff] }
 0x231   :  { %v10410_v63 = vcombine.high %v2403_v59, %v2411_v60  ;;  %v10409_v5 = vcombine.low %v2403_v59, %v2411_v60  ;;  %v10411_v6 = vcombine.low %v2404_v8, %v2412_v61 }
 0x232   :  { %8462 = vmatpush1.bf16.msra.mxu0 %v10281_v0  ;;  %v10412_v0 = vcombine.high %v2404_v8, %v2412_v61 }
 0x233   :  { %8626 = vmatpush1.bf16.msra.mxu1 %v10283_v1  ;;  %8463 = vmatprep.subr.bf16.mxu0 %v10298_v2  ;;  %v2419_v1 = vld [vmem:[#allocation11 + $0x600] sm:$0xff] }
 0x234   :  { %8627 = vmatprep.subr.bf16.mxu1 %v10300_v3  ;;  %v2427_v2 = vld [vmem:[#allocation11 + $0x640] sm:$0xff]  ;;  %v2420_v3 = vld [vmem:[#allocation11 + $0x608] sm:$0xff] }
 0x235   :  { %v10426_v7 = vcombine.high %v2419_v1, %v2427_v2  ;;  %v10425_v14 = vcombine.low %v2419_v1, %v2427_v2  ;;  %v10427_v15 = vcombine.low %v2420_v3, %v2428_v4  ;;  %v2499_v1 = vld [vmem:[#allocation11 + $0x880] sm:$0xff] }
 0x236   :  { %8464 = vmatpush1.bf16.msra.mxu0 %v10297_v9  ;;  %v10428_v9 = vcombine.high %v2420_v3, %v2428_v4  ;;  %v2507_v3 = vld [vmem:[#allocation11 + $0x8c0] sm:$0xff]  ;;  %v2500_v4 = vld [vmem:[#allocation11 + $0x888] sm:$0xff] }
 0x237   :  { %8628 = vmatpush1.bf16.msra.mxu1 %v10299_v10  ;;  %8465 = vmatprep.subr.bf16.mxu0 %v10314_v11  ;;  %v2435_v10 = vld [vmem:[#allocation11 + $0x680] sm:$0xff] }
 0x238   :  { %8629 = vmatprep.subr.bf16.mxu1 %v10316_v12  ;;  %v2443_v11 = vld [vmem:[#allocation11 + $0x6c0] sm:$0xff]  ;;  %v2436_v12 = vld [vmem:[#allocation11 + $0x688] sm:$0xff] }
 0x239   :  { %v10442_v16 = vcombine.high %v2435_v10, %v2443_v11  ;;  %v10441_v27 = vcombine.low %v2435_v10, %v2443_v11  ;;  %v10443_v28 = vcombine.low %v2436_v12, %v2444_v13 }
 0x23a   :  { %8466 = vmatpush1.bf16.msra.mxu0 %v10313_v17  ;;  %v10444_v17 = vcombine.high %v2436_v12, %v2444_v13  ;;  %v2515_v12 = vld [vmem:[#allocation11 + $0x900] sm:$0xff]  ;;  %v10506_v13 = vcombine.high %v2499_v1, %v2507_v3 }
 0x23b   :  { %8630 = vmatpush1.bf16.msra.mxu1 %v10315_v18  ;;  %8467 = vmatprep.subr.bf16.mxu0 %v10330_v19  ;;  %v2451_v18 = vld [vmem:[#allocation11 + $0x700] sm:$0xff] }
 0x23c   :  { %8631 = vmatprep.subr.bf16.mxu1 %v10332_v24  ;;  %v2459_v19 = vld [vmem:[#allocation11 + $0x740] sm:$0xff]  ;;  %v2452_v24 = vld [vmem:[#allocation11 + $0x708] sm:$0xff] }
 0x23d   :  { %v10458_v30 = vcombine.high %v2451_v18, %v2459_v19  ;;  %v10457_v47 = vcombine.low %v2451_v18, %v2459_v19  ;;  %v10459_v37 = vcombine.low %v2452_v24, %v2460_v26  ;;  %v10505_v19 = vcombine.low %v2499_v1, %v2507_v3 }
 0x23e   :  { %8468 = vmatpush1.bf16.msra.mxu0 %v10329_v31  ;;  %v10460_v31 = vcombine.high %v2452_v24, %v2460_v26 }
 0x23f   :  { %8632 = vmatpush1.bf16.msra.mxu1 %v10331_v32  ;;  %8469 = vmatprep.subr.bf16.mxu0 %v10346_v33  ;;  %v2467_v32 = vld [vmem:[#allocation11 + $0x780] sm:$0xff] }
 0x240   :  { %8633 = vmatprep.subr.bf16.mxu1 %v10348_v34  ;;  %v2475_v33 = vld [vmem:[#allocation11 + $0x7c0] sm:$0xff]  ;;  %v2468_v34 = vld [vmem:[#allocation11 + $0x788] sm:$0xff] }
 0x241   :  { %v10474_v38 = vcombine.high %v2467_v32, %v2475_v33  ;;  %v10473_v44 = vcombine.low %v2467_v32, %v2475_v33  ;;  %v10475_v45 = vcombine.low %v2468_v34, %v2476_v36  ;;  %v2540_v32 = vld [vmem:[#allocation11 + $0x9c8] sm:$0xff] }
 0x242   :  { %8470 = vmatpush1.bf16.msra.mxu0 %v10345_v39  ;;  %v10476_v39 = vcombine.high %v2468_v34, %v2476_v36 }
 0x243   :  { %8634 = vmatpush1.bf16.msra.mxu1 %v10347_v40  ;;  %8471 = vmatprep.subr.bf16.mxu0 %v10362_v41  ;;  %v2483_v40 = vld [vmem:[#allocation11 + $0x800] sm:$0xff] }
 0x244   :  { %8635 = vmatprep.subr.bf16.mxu1 %v10364_v42  ;;  %v2491_v41 = vld [vmem:[#allocation11 + $0x840] sm:$0xff]  ;;  %v2484_v42 = vld [vmem:[#allocation11 + $0x808] sm:$0xff] }
 0x245   :  { %v10490_v46 = vcombine.high %v2483_v40, %v2491_v41  ;;  %v10491_v10 = vcombine.low %v2484_v42, %v2492_v43 }
 0x246   :  { %8472 = vmatpush1.bf16.msra.mxu0 %v10361_v49  ;;  %v10492_v49 = vcombine.high %v2484_v42, %v2492_v43 }
 0x247   :  { %8636 = vmatpush1.bf16.msra.mxu1 %v10363_v48  ;;  %8473 = vmatprep.subr.bf16.mxu0 %v10378_v50  ;;  %v11810_v48 = vld [vmem:[#allocation10] sm:$0xff] }
 0x248   :  { %8637 = vmatprep.subr.bf16.mxu1 %v10380_v51  ;;  %v550_v50 = vrot.slane %v11810_v48, %v11762_v21  ;;  %v554_v51 = vrot.slane %v11810_v48, %v11767_v23  ;;  %v562_v52 = vrot.slane %v11810_v48, %v11772_v25 }
 0x24a   :  { %8474 = vmatpush1.bf16.msra.mxu0 %v10377_v54 }
 0x24b   :  { %8638 = vmatpush1.bf16.msra.mxu1 %v10379_v55  ;;  %8475 = vmatprep.subr.bf16.mxu0 %v10394_v56 }
 0x24c   :  { %8639 = vmatprep.subr.bf16.mxu1 %v10396_v58 }
 0x24e   :  { %8476 = vmatpush1.bf16.msra.mxu0 %v10393_v62 }
 0x24f   :  { %8640 = vmatpush1.bf16.msra.mxu1 %v10395_v35  ;;  %8477 = vmatprep.subr.bf16.mxu0 %v10410_v63 }
 0x250   :  { %8641 = vmatprep.subr.bf16.mxu1 %v10412_v0 }
 0x252   :  { %8478 = vmatpush1.bf16.msra.mxu0 %v10409_v5  ;;  %v2508_v5 = vld [vmem:[#allocation11 + $0x8c8] sm:$0xff] }
 0x253   :  { %8642 = vmatpush1.bf16.msra.mxu1 %v10411_v6  ;;  %8479 = vmatprep.subr.bf16.mxu0 %v10426_v7  ;;  %v10507_v24 = vcombine.low %v2500_v4, %v2508_v5 }
 0x254   :  { %8643 = vmatprep.subr.bf16.mxu1 %v10428_v9  ;;  %v10489_v9 = vcombine.low %v2483_v40, %v2491_v41  ;;  %v2556_v40 = vld [vmem:[#allocation11 + $0xa48] sm:$0xff] }
 0x256   :  { %8480 = vmatpush1.bf16.msra.mxu0 %v10425_v14  ;;  %v10508_v14 = vcombine.high %v2500_v4, %v2508_v5  ;;  %v2611_v5 = vld [vmem:[#allocation11 + $0xc00] sm:$0xff] }
 0x257   :  { %8644 = vmatpush1.bf16.msra.mxu1 %v10427_v15  ;;  %8481 = vmatprep.subr.bf16.mxu0 %v10442_v16  ;;  %v2523_v15 = vld [vmem:[#allocation11 + $0x940] sm:$0xff]  ;;  %v2516_v16 = vld [vmem:[#allocation11 + $0x908] sm:$0xff] }
 0x258   :  { %8645 = vmatprep.subr.bf16.mxu1 %v10444_v17  ;;  %v2524_v17 = vld [vmem:[#allocation11 + $0x948] sm:$0xff]  ;;  %v10522_v26 = vcombine.high %v2515_v12, %v2523_v15  ;;  %v10521_v33 = vcombine.low %v2515_v12, %v2523_v15 }
 0x259   :  { %v10523_v34 = vcombine.low %v2516_v16, %v2524_v17 }
 0x25a   :  { %8482 = vmatpush1.bf16.msra.mxu0 %v10441_v27  ;;  %v10524_v27 = vcombine.high %v2516_v16, %v2524_v17  ;;  %v2627_v16 = vld [vmem:[#allocation11 + $0xc80] sm:$0xff] }
 0x25b   :  { %8646 = vmatpush1.bf16.msra.mxu1 %v10443_v28  ;;  %8483 = vmatprep.subr.bf16.mxu0 %v10458_v30  ;;  %v2531_v28 = vld [vmem:[#allocation11 + $0x980] sm:$0xff] }
 0x25c   :  { %8647 = vmatprep.subr.bf16.mxu1 %v10460_v31  ;;  %v2539_v30 = vld [vmem:[#allocation11 + $0x9c0] sm:$0xff]  ;;  %v2532_v31 = vld [vmem:[#allocation11 + $0x988] sm:$0xff] }
 0x25d   :  { %v10538_v36 = vcombine.high %v2531_v28, %v2539_v30  ;;  %v10537_v41 = vcombine.low %v2531_v28, %v2539_v30  ;;  %v10539_v42 = vcombine.low %v2532_v31, %v2540_v32  ;;  %v2635_v17 = vld [vmem:[#allocation11 + $0xcc0] sm:$0xff] }
 0x25e   :  { %8484 = vmatpush1.bf16.msra.mxu0 %v10457_v47  ;;  %v10540_v47 = vcombine.high %v2532_v31, %v2540_v32  ;;  %v10634_v28 = vcombine.high %v2627_v16, %v2635_v17  ;;  %v2643_v31 = vld [vmem:[#allocation11 + $0xd00] sm:$0xff] }
 0x25f   :  { %8648 = vmatpush1.bf16.msra.mxu1 %v10459_v37  ;;  %8485 = vmatprep.subr.bf16.mxu0 %v10474_v38  ;;  %v2547_v37 = vld [vmem:[#allocation11 + $0xa00] sm:$0xff] }
 0x260   :  { %8649 = vmatprep.subr.bf16.mxu1 %v10476_v39  ;;  %v2555_v38 = vld [vmem:[#allocation11 + $0xa40] sm:$0xff]  ;;  %v2548_v39 = vld [vmem:[#allocation11 + $0xa08] sm:$0xff] }
 0x261   :  { %v10554_v43 = vcombine.high %v2547_v37, %v2555_v38  ;;  %v2651_v32 = vld [vmem:[#allocation11 + $0xd40] sm:$0xff] }
 0x262   :  { %8486 = vmatpush1.bf16.msra.mxu0 %v10473_v44  ;;  %v10556_v44 = vcombine.high %v2548_v39, %v2556_v40 }
 0x263   :  { %8650 = vmatpush1.bf16.msra.mxu1 %v10475_v45  ;;  %8496 = vmatprep.subr.bf16.mxu0 %v10490_v46  ;;  %v2563_v45 = vld [vmem:[#allocation11 + $0xa80] sm:$0xff] }
 0x264   :  { %8660 = vmatprep.subr.bf16.mxu1 %v10492_v49  ;;  %v2571_v46 = vld [vmem:[#allocation11 + $0xac0] sm:$0xff]  ;;  %v2564_v49 = vld [vmem:[#allocation11 + $0xa88] sm:$0xff] }
 0x278   :  { %v1942_v53 = vpop.f32.mrb[4].mxu0  ;;  %v11818_v22 = vpop.f32.mrb[4].mxu1 }
 0x279   :  { %v11265_v57 = vadd.f32 %v1942_v53, %v550_v50  ;;  %v1944_v54 = vpop.f32.mrb[5].mxu0  ;;  %v2026_v55 = vpop.f32.mrb[5].mxu1  ;;  %v2572_v50 = vld [vmem:[#allocation11 + $0xac8] sm:$0xff]  ;;  %v10570_v53 = vcombine.high %v2563_v45, %v2571_v46 }
 0x27a   :  { %v11266_v56 = vadd.f32 %v1944_v54, %v554_v51  ;;  %v11268_v58 = vadd.f32 %v2026_v55, %v562_v52  ;;  %v1946_v59 = vpop.f32.mrb[6].mxu0  ;;  %v2028_v60 = vpop.f32.mrb[6].mxu1  ;;  %v10553_v51 = vcombine.low %v2547_v37, %v2555_v38  ;;  %v10555_v52 = vcombine.low %v2548_v39, %v2556_v40  ;;  %v2579_v54 = vld [vmem:[#allocation11 + $0xb00] sm:$0xff] }
 0x27b   :  { %vm2195_vm5 = vcmp.ge.f32.partialorder %v11265_v57, 0.0  ;;  %v2203_v8 = vmul.f32 0.2, %v11265_v57  ;;  %v1947_v63 = vpop.f32.mrb[7].mxu0  ;;  %v2029_v0 = vpop.f32.mrb[7].mxu1  ;;  %v2587_v55 = vld [vmem:[#allocation11 + $0xb40] sm:$0xff]  ;;  %v10569_v59 = vcombine.low %v2563_v45, %v2571_v46  ;;  %v10571_v60 = vcombine.low %v2564_v49, %v2572_v50 }
 0x27c   :  { %vm2196_vm6 = vcmp.ge.f32.partialorder %v11266_v56, 0.0  ;;  %v2204_v61 = vmul.f32 0.2, %v11266_v56  ;;  %vm2198_vm7 = vcmp.ge.f32.partialorder %v11268_v58, 0.0  ;;  %v2206_v62 = vmul.f32 0.2, %v11268_v58 }
 0x27d   :  { %v2211_v35 = vsel %vm2195_vm5, %v11265_v57, %v2203_v8  ;;  %v10572_v57 = vcombine.high %v2564_v49, %v2572_v50  ;;  %v10586_v8 = vcombine.high %v2579_v54, %v2587_v55  ;;  %v2596_v63 = vld [vmem:[#allocation11 + $0xb88] sm:$0xff]  ;;  %v10585_v1 = vcombine.low %v2579_v54, %v2587_v55  ;;  %v2659_v39 = vld [vmem:[#allocation11 + $0xd80] sm:$0xff] }
 0x27e   :  { %v2212_v2 = vsel %vm2196_vm6, %v11266_v56, %v2204_v61  ;;  %v2214_v7 = vsel %vm2198_vm7, %v11268_v58, %v2206_v62  ;;  %v11822_v11 = vpack.c.bf16 %v2211_v35, %v2211_v35  ;;  %v2580_v56 = vld [vmem:[#allocation11 + $0xb08] sm:$0xff]  ;;  %v2595_v62 = vld [vmem:[#allocation11 + $0xb80] sm:$0xff]  ;;  %v10650_v37 = vcombine.high %v2643_v31, %v2651_v32 }
 0x27f   :  { %v11820_v6 = vpack.c.bf16 %v2212_v2, %v2212_v2  ;;  %v11826_v18 = vpack.c.bf16 %v2214_v7, %v2214_v7  ;;  %v2588_v58 = vld [vmem:[#allocation11 + $0xb48] sm:$0xff]  ;;  %v2603_v35 = vld [vmem:[#allocation11 + $0xbc0] sm:$0xff] }
 0x280   :  { %v10588_v61 = vcombine.high %v2580_v56, %v2588_v58  ;;  %v2604_v0 = vld [vmem:[#allocation11 + $0xbc8] sm:$0xff]  ;;  %v10587_v2 = vcombine.low %v2580_v56, %v2588_v58  ;;  %v10602_v3 = vcombine.high %v2595_v62, %v2603_v35  ;;  %v2619_v7 = vld [vmem:[#allocation11 + $0xc40] sm:$0xff]  ;;  %v10601_v12 = vcombine.low %v2595_v62, %v2603_v35 }
 0x281   :  { %8487 = vmatprep.mubr.bf16.mxu0 %v11820_v6  ;;  %8651 = vmatprep.mubr.bf16.mxu1 %v11820_v6  ;;  %v10604_v4 = vcombine.high %v2596_v63, %v2604_v0  ;;  %v2667_v40 = vld [vmem:[#allocation11 + $0xdc0] sm:$0xff] }
 0x282   :  { %8488 = vmatmul.mubr.bf16.vlgmr.msra.gmra.mrb[12].mxu0 %v11822_v11  ;;  %8652 = vmatmul.mubr.bf16.vlgmr.msra.gmra.mrb[12].mxu1 %v11822_v11  ;;  %v10666_v45 = vcombine.high %v2659_v39, %v2667_v40  ;;  %v2675_v49 = vld [vmem:[#allocation11 + $0xe00] sm:$0xff] }
 0x283   :  { %8497 = vmatpush1.bf16.msra.mxu0 %v10489_v9  ;;  %8661 = vmatpush1.bf16.msra.mxu1 %v10491_v10  ;;  %v2612_v9 = vld [vmem:[#allocation11 + $0xc08] sm:$0xff]  ;;  %v2683_v50 = vld [vmem:[#allocation11 + $0xe40] sm:$0xff] }
 0x284   :  { %8528 = vmatprep.mubr.bf16.mxu0 %v11826_v18  ;;  %8692 = vmatprep.mubr.bf16.mxu1 %v11826_v18  ;;  %v2620_v10 = vld [vmem:[#allocation11 + $0xc48] sm:$0xff]  ;;  %v10682_v54 = vcombine.high %v2675_v49, %v2683_v50  ;;  %v2691_v56 = vld [vmem:[#allocation11 + $0xe80] sm:$0xff] }
 0x285   :  { %8498 = vmatprep.subr.bf16.mxu0 %v10506_v13  ;;  %8662 = vmatprep.subr.bf16.mxu1 %v10508_v14  ;;  %v10603_v13 = vcombine.low %v2596_v63, %v2604_v0  ;;  %v10618_v14 = vcombine.high %v2611_v5, %v2619_v7  ;;  %v10620_v15 = vcombine.high %v2612_v9, %v2620_v10  ;;  %v2699_v58 = vld [vmem:[#allocation11 + $0xec0] sm:$0xff] }
 0x286   :  { %v10698_v62 = vcombine.high %v2691_v56, %v2699_v58  ;;  %v2707_v63 = vld [vmem:[#allocation11 + $0xf00] sm:$0xff]  ;;  %v558_v0 = vrot.slane %v11810_v48, %v11793_v29 }
 0x287   :  { %8499 = vmatpush1.bf16.msra.mxu0 %v10505_v19  ;;  %8663 = vmatpush1.bf16.msra.mxu1 %v10507_v24  ;;  %v2628_v19 = vld [vmem:[#allocation11 + $0xc88] sm:$0xff] }
 0x288   :  { %8500 = vmatprep.subr.bf16.mxu0 %v10522_v26  ;;  %8664 = vmatprep.subr.bf16.mxu1 %v10524_v27  ;;  %v2636_v24 = vld [vmem:[#allocation11 + $0xcc8] sm:$0xff]  ;;  %v10617_v26 = vcombine.low %v2611_v5, %v2619_v7  ;;  %v10619_v27 = vcombine.low %v2612_v9, %v2620_v10  ;;  %v2723_v10 = vld [vmem:[#allocation11 + $0xf80] sm:$0xff] }
 0x289   :  { %v10636_v30 = vcombine.high %v2628_v19, %v2636_v24 }
 0x28b   :  { %8501 = vmatpush1.bf16.msra.mxu0 %v10521_v33  ;;  %8665 = vmatpush1.bf16.msra.mxu1 %v10523_v34  ;;  %v2644_v33 = vld [vmem:[#allocation11 + $0xd08] sm:$0xff] }
 0x28c   :  { %8502 = vmatprep.subr.bf16.mxu0 %v10538_v36  ;;  %8666 = vmatprep.subr.bf16.mxu1 %v10540_v47  ;;  %v2652_v34 = vld [vmem:[#allocation11 + $0xd48] sm:$0xff]  ;;  %v10633_v36 = vcombine.low %v2627_v16, %v2635_v17  ;;  %v10635_v47 = vcombine.low %v2628_v19, %v2636_v24 }
 0x28d   :  { %v10652_v38 = vcombine.high %v2644_v33, %v2652_v34 }
 0x28f   :  { %8503 = vmatpush1.bf16.msra.mxu0 %v10537_v41  ;;  %8667 = vmatpush1.bf16.msra.mxu1 %v10539_v42  ;;  %v2660_v41 = vld [vmem:[#allocation11 + $0xd88] sm:$0xff] }
 0x290   :  { %8504 = vmatprep.subr.bf16.mxu0 %v10554_v43  ;;  %8668 = vmatprep.subr.bf16.mxu1 %v10556_v44  ;;  %v2668_v42 = vld [vmem:[#allocation11 + $0xdc8] sm:$0xff]  ;;  %v10649_v43 = vcombine.low %v2643_v31, %v2651_v32  ;;  %v10651_v44 = vcombine.low %v2644_v33, %v2652_v34 }
 0x291   :  { %v10668_v46 = vcombine.high %v2660_v41, %v2668_v42  ;;  %v2748_v31 = vld [vmem:[#allocation11 + $0x1048] sm:$0xff] }
 0x293   :  { %8505 = vmatpush1.bf16.msra.mxu0 %v10553_v51  ;;  %8669 = vmatpush1.bf16.msra.mxu1 %v10555_v52  ;;  %v2676_v51 = vld [vmem:[#allocation11 + $0xe08] sm:$0xff] }
 0x294   :  { %8506 = vmatprep.subr.bf16.mxu0 %v10570_v53  ;;  %8670 = vmatprep.subr.bf16.mxu1 %v10572_v57  ;;  %v2684_v52 = vld [vmem:[#allocation11 + $0xe48] sm:$0xff]  ;;  %v10665_v53 = vcombine.low %v2659_v39, %v2667_v40  ;;  %v10667_v57 = vcombine.low %v2660_v41, %v2668_v42 }
 0x295   :  { %v10684_v55 = vcombine.high %v2676_v51, %v2684_v52  ;;  %v2764_v39 = vld [vmem:[#allocation11 + $0x10c8] sm:$0xff] }
 0x297   :  { %8507 = vmatpush1.bf16.msra.mxu0 %v10569_v59  ;;  %8671 = vmatpush1.bf16.msra.mxu1 %v10571_v60  ;;  %v2692_v59 = vld [vmem:[#allocation11 + $0xe88] sm:$0xff] }
 0x298   :  { %8508 = vmatprep.subr.bf16.mxu0 %v10586_v8  ;;  %8672 = vmatprep.subr.bf16.mxu1 %v10588_v61  ;;  %v2700_v60 = vld [vmem:[#allocation11 + $0xec8] sm:$0xff]  ;;  %v10681_v8 = vcombine.low %v2675_v49, %v2683_v50  ;;  %v10683_v61 = vcombine.low %v2676_v51, %v2684_v52 }
 0x299   :  { %v10700_v35 = vcombine.high %v2692_v59, %v2700_v60  ;;  %v10699_v5 = vcombine.low %v2692_v59, %v2700_v60  ;;  %v2772_v49 = vld [vmem:[#allocation11 + $0x1108] sm:$0xff] }
 0x29a   :  { %v2780_v50 = vld [vmem:[#allocation11 + $0x1148] sm:$0xff] }
 0x29b   :  { %8509 = vmatpush1.bf16.msra.mxu0 %v10585_v1  ;;  %8673 = vmatpush1.bf16.msra.mxu1 %v10587_v2  ;;  %v2715_v1 = vld [vmem:[#allocation11 + $0xf40] sm:$0xff]  ;;  %v2708_v2 = vld [vmem:[#allocation11 + $0xf08] sm:$0xff]  ;;  %v10779_v60 = vcombine.low %v2772_v49, %v2780_v50 }
 0x29c   :  { %8510 = vmatprep.subr.bf16.mxu0 %v10602_v3  ;;  %8674 = vmatprep.subr.bf16.mxu1 %v10604_v4  ;;  %v2716_v3 = vld [vmem:[#allocation11 + $0xf48] sm:$0xff]  ;;  %v10697_v4 = vcombine.low %v2691_v56, %v2699_v58  ;;  %v10714_v7 = vcombine.high %v2707_v63, %v2715_v1  ;;  %v10713_v16 = vcombine.low %v2707_v63, %v2715_v1 }
 0x29d   :  { %v10716_v9 = vcombine.high %v2708_v2, %v2716_v3  ;;  %v10715_v17 = vcombine.low %v2708_v2, %v2716_v3  ;;  %v2788_v56 = vld [vmem:[#allocation11 + $0x1188] sm:$0xff] }
 0x29e   :  { %v2796_v58 = vld [vmem:[#allocation11 + $0x11c8] sm:$0xff] }
 0x29f   :  { %8511 = vmatpush1.bf16.msra.mxu0 %v10601_v12  ;;  %8675 = vmatpush1.bf16.msra.mxu1 %v10603_v13  ;;  %v11267_v12 = vadd.f32 %v11818_v22, %v558_v0  ;;  %v2731_v13 = vld [vmem:[#allocation11 + $0xfc0] sm:$0xff]  ;;  %v2804_v63 = vld [vmem:[#allocation11 + $0x1208] sm:$0xff]  ;;  %v10795_v2 = vcombine.low %v2788_v56, %v2796_v58 }
 0x2a0   :  { %8512 = vmatprep.subr.bf16.mxu0 %v10618_v14  ;;  %8676 = vmatprep.subr.bf16.mxu1 %v10620_v15  ;;  %v2724_v14 = vld [vmem:[#allocation11 + $0xf88] sm:$0xff]  ;;  %v10730_v19 = vcombine.high %v2723_v10, %v2731_v13  ;;  %v10729_v22 = vcombine.low %v2723_v10, %v2731_v13 }
 0x2a1   :  { %v2732_v15 = vld [vmem:[#allocation11 + $0xfc8] sm:$0xff]  ;;  %vm2197_vm8 = vcmp.ge.f32.partialorder %v11267_v12, 0.0 }
 0x2a2   :  { %v10732_v24 = vcombine.high %v2724_v14, %v2732_v15  ;;  %v10731_v32 = vcombine.low %v2724_v14, %v2732_v15  ;;  %v2812_v0 = vld [vmem:[#allocation11 + $0x1248] sm:$0xff] }
 0x2a3   :  { %8513 = vmatpush1.bf16.msra.mxu0 %v10617_v26  ;;  %8677 = vmatpush1.bf16.msra.mxu1 %v10619_v27  ;;  %v2739_v26 = vld [vmem:[#allocation11 + $0x1000] sm:$0xff]  ;;  %v2205_v27 = vmul.f32 0.2, %v11267_v12  ;;  %v2828_v10 = vld [vmem:[#allocation11 + $0x12c8] sm:$0xff]  ;;  %v10811_v13 = vcombine.low %v2804_v63, %v2812_v0 }
 0x2a4   :  { %8514 = vmatprep.subr.bf16.mxu0 %v10634_v28  ;;  %8678 = vmatprep.subr.bf16.mxu1 %v10636_v30  ;;  %v2747_v28 = vld [vmem:[#allocation11 + $0x1040] sm:$0xff]  ;;  %v2740_v30 = vld [vmem:[#allocation11 + $0x1008] sm:$0xff] }
 0x2a5   :  { %v10746_v33 = vcombine.high %v2739_v26, %v2747_v28  ;;  %v10748_v34 = vcombine.high %v2740_v30, %v2748_v31  ;;  %v10745_v40 = vcombine.low %v2739_v26, %v2747_v28  ;;  %v10747_v41 = vcombine.low %v2740_v30, %v2748_v31  ;;  %v2851_v31 = vld [vmem:[#allocation11 + $0x1380] sm:$0xff] }
 0x2a7   :  { %8515 = vmatpush1.bf16.msra.mxu0 %v10633_v36  ;;  %8679 = vmatpush1.bf16.msra.mxu1 %v10635_v47  ;;  %v2755_v36 = vld [vmem:[#allocation11 + $0x1080] sm:$0xff]  ;;  %v2213_v47 = vsel %vm2197_vm8, %v11267_v12, %v2205_v27 }
 0x2a8   :  { %8516 = vmatprep.subr.bf16.mxu0 %v10650_v37  ;;  %8680 = vmatprep.subr.bf16.mxu1 %v10652_v38  ;;  %v2763_v37 = vld [vmem:[#allocation11 + $0x10c0] sm:$0xff]  ;;  %v2756_v38 = vld [vmem:[#allocation11 + $0x1088] sm:$0xff]  ;;  %v11835_v42 = vpack.c.bf16 %v2213_v47, %v2213_v47 }
 0x2a9   :  { %v10761_v51 = vcombine.low %v2755_v36, %v2763_v37  ;;  %v10763_v52 = vcombine.low %v2756_v38, %v2764_v39 }
 0x2ab   :  { %8517 = vmatpush1.bf16.msra.mxu0 %v10649_v43  ;;  %8681 = vmatpush1.bf16.msra.mxu1 %v10651_v44  ;;  %v10762_v43 = vcombine.high %v2755_v36, %v2763_v37  ;;  %v10764_v44 = vcombine.high %v2756_v38, %v2764_v39  ;;  %v2867_v38 = vld [vmem:[#allocation11 + $0x1400] sm:$0xff] }
 0x2ac   :  { %8518 = vmatprep.subr.bf16.mxu0 %v10666_v45  ;;  %8682 = vmatprep.subr.bf16.mxu1 %v10668_v46  ;;  %v2771_v45 = vld [vmem:[#allocation11 + $0x1100] sm:$0xff] }
 0x2ad   :  { %v2779_v46 = vld [vmem:[#allocation11 + $0x1140] sm:$0xff] }
 0x2ae   :  { %v10777_v59 = vcombine.low %v2771_v45, %v2779_v46  ;;  %v2875_v39 = vld [vmem:[#allocation11 + $0x1440] sm:$0xff] }
 0x2af   :  { %8519 = vmatpush1.bf16.msra.mxu0 %v10665_v53  ;;  %8683 = vmatpush1.bf16.msra.mxu1 %v10667_v57  ;;  %v10778_v53 = vcombine.high %v2771_v45, %v2779_v46  ;;  %v10780_v57 = vcombine.high %v2772_v49, %v2780_v50  ;;  %v10874_v45 = vcombine.high %v2867_v38, %v2875_v39  ;;  %v2883_v49 = vld [vmem:[#allocation11 + $0x1480] sm:$0xff] }
 0x2b0   :  { %8520 = vmatprep.subr.bf16.mxu0 %v10682_v54  ;;  %8684 = vmatprep.subr.bf16.mxu1 %v10684_v55  ;;  %v2787_v54 = vld [vmem:[#allocation11 + $0x1180] sm:$0xff] }
 0x2b1   :  { %v2795_v55 = vld [vmem:[#allocation11 + $0x11c0] sm:$0xff] }
 0x2b2   :  { %v10793_v1 = vcombine.low %v2787_v54, %v2795_v55  ;;  %v2891_v50 = vld [vmem:[#allocation11 + $0x14c0] sm:$0xff] }
 0x2b3   :  { %8521 = vmatpush1.bf16.msra.mxu0 %v10681_v8  ;;  %8685 = vmatpush1.bf16.msra.mxu1 %v10683_v61  ;;  %v10794_v8 = vcombine.high %v2787_v54, %v2795_v55  ;;  %v10796_v61 = vcombine.high %v2788_v56, %v2796_v58  ;;  %v10890_v54 = vcombine.high %v2883_v49, %v2891_v50  ;;  %v2899_v56 = vld [vmem:[#allocation11 + $0x1500] sm:$0xff] }
 0x2b4   :  { %8522 = vmatprep.subr.bf16.mxu0 %v10698_v62  ;;  %8686 = vmatprep.subr.bf16.mxu1 %v10700_v35  ;;  %v2803_v62 = vld [vmem:[#allocation11 + $0x1200] sm:$0xff] }
 0x2b5   :  { %v2811_v35 = vld [vmem:[#allocation11 + $0x1240] sm:$0xff] }
 0x2b6   :  { %v10810_v3 = vcombine.high %v2803_v62, %v2811_v35  ;;  %v10809_v12 = vcombine.low %v2803_v62, %v2811_v35  ;;  %v2907_v58 = vld [vmem:[#allocation11 + $0x1540] sm:$0xff] }
 0x2b7   :  { %8523 = vmatpush1.bf16.msra.mxu0 %v10697_v4  ;;  %8687 = vmatpush1.bf16.msra.mxu1 %v10699_v5  ;;  %v10812_v4 = vcombine.high %v2804_v63, %v2812_v0  ;;  %v2819_v5 = vld [vmem:[#allocation11 + $0x1280] sm:$0xff]  ;;  %v10906_v62 = vcombine.high %v2899_v56, %v2907_v58 }
 0x2b8   :  { %8524 = vmatprep.subr.bf16.mxu0 %v10714_v7  ;;  %8688 = vmatprep.subr.bf16.mxu1 %v10716_v9  ;;  %v2827_v7 = vld [vmem:[#allocation11 + $0x12c0] sm:$0xff]  ;;  %v2820_v9 = vld [vmem:[#allocation11 + $0x1288] sm:$0xff] }
 0x2b9   :  { %v10826_v14 = vcombine.high %v2819_v5, %v2827_v7  ;;  %v10828_v15 = vcombine.high %v2820_v9, %v2828_v10  ;;  %v10825_v26 = vcombine.low %v2819_v5, %v2827_v7  ;;  %v10827_v27 = vcombine.low %v2820_v9, %v2828_v10  ;;  %v2915_v63 = vld [vmem:[#allocation11 + $0x1580] sm:$0xff] }
 0x2ba   :  { %v2923_v0 = vld [vmem:[#allocation11 + $0x15c0] sm:$0xff] }
 0x2bb   :  { %8525 = vmatpush1.bf16.msra.mxu0 %v10713_v16  ;;  %8689 = vmatpush1.bf16.msra.mxu1 %v10715_v17  ;;  %v2835_v16 = vld [vmem:[#allocation11 + $0x1300] sm:$0xff]  ;;  %v10922_v5 = vcombine.high %v2915_v63, %v2923_v0 }
 0x2bc   :  { %8526 = vmatprep.subr.bf16.mxu0 %v10730_v19  ;;  %8690 = vmatprep.subr.bf16.mxu1 %v10732_v24  ;;  %v2843_v17 = vld [vmem:[#allocation11 + $0x1340] sm:$0xff]  ;;  %v2836_v19 = vld [vmem:[#allocation11 + $0x1308] sm:$0xff] }
 0x2bd   :  { %v2844_v24 = vld [vmem:[#allocation11 + $0x1348] sm:$0xff]  ;;  %v10842_v28 = vcombine.high %v2835_v16, %v2843_v17  ;;  %v2931_v9 = vld [vmem:[#allocation11 + $0x1600] sm:$0xff] }
 0x2be   :  { %v10844_v30 = vcombine.high %v2836_v19, %v2844_v24  ;;  %v10843_v36 = vcombine.low %v2836_v19, %v2844_v24  ;;  %v2939_v10 = vld [vmem:[#allocation11 + $0x1640] sm:$0xff] }
 0x2bf   :  { %8527 = vmatpush1.bf16.msra.mxu0 %v10729_v22  ;;  %8691 = vmatpush1.bf16.msra.mxu1 %v10731_v32  ;;  %v2859_v22 = vld [vmem:[#allocation11 + $0x13c0] sm:$0xff]  ;;  %v2852_v32 = vld [vmem:[#allocation11 + $0x1388] sm:$0xff] }
 0x2c0   :  { %8537 = vmatprep.subr.bf16.mxu0 %v10746_v33  ;;  %8701 = vmatprep.subr.bf16.mxu1 %v10748_v34  ;;  %v2860_v33 = vld [vmem:[#allocation11 + $0x13c8] sm:$0xff]  ;;  %v10841_v34 = vcombine.low %v2835_v16, %v2843_v17  ;;  %v10858_v47 = vcombine.high %v2851_v31, %v2859_v22  ;;  %v10938_v16 = vcombine.high %v2931_v9, %v2939_v10  ;;  %v2947_v19 = vld [vmem:[#allocation11 + $0x1680] sm:$0xff] }
 0x2c1   :  { %v10860_v37 = vcombine.high %v2852_v32, %v2860_v33  ;;  %v2955_v24 = vld [vmem:[#allocation11 + $0x16c0] sm:$0xff] }
 0x2c2   :  { %8529 = vmatmul.mubr.bf16.vlgmr.msra.gmra.mrb[12].mxu0 %v11835_v42  ;;  %8693 = vmatmul.mubr.bf16.vlgmr.msra.gmra.mrb[12].mxu1 %v11835_v42 }
 0x2c3   :  { %8538 = vmatpush1.bf16.msra.mxu0 %v10745_v40  ;;  %8702 = vmatpush1.bf16.msra.mxu1 %v10747_v41  ;;  %v2868_v40 = vld [vmem:[#allocation11 + $0x1408] sm:$0xff] }
 0x2c4   :  { %8539 = vmatprep.subr.bf16.mxu0 %v10762_v43  ;;  %8703 = vmatprep.subr.bf16.mxu1 %v10764_v44  ;;  %v2876_v41 = vld [vmem:[#allocation11 + $0x1448] sm:$0xff]  ;;  %v10857_v43 = vcombine.low %v2851_v31, %v2859_v22  ;;  %v10859_v44 = vcombine.low %v2852_v32, %v2860_v33  ;;  %v10954_v31 = vcombine.high %v2947_v19, %v2955_v24  ;;  %v2963_v32 = vld [vmem:[#allocation11 + $0x1700] sm:$0xff]  ;;  %v11840_v33 = vsub.s32 4, %v11759_v20 }
 0x2c5   :  { %v10876_v46 = vcombine.high %v2868_v40, %v2876_v41 }
 0x2c7   :  { %8540 = vmatpush1.bf16.msra.mxu0 %v10761_v51  ;;  %8704 = vmatpush1.bf16.msra.mxu1 %v10763_v52  ;;  %v2884_v51 = vld [vmem:[#allocation11 + $0x1488] sm:$0xff] }
 0x2c8   :  { %8541 = vmatprep.subr.bf16.mxu0 %v10778_v53  ;;  %8705 = vmatprep.subr.bf16.mxu1 %v10780_v57  ;;  %v2892_v52 = vld [vmem:[#allocation11 + $0x14c8] sm:$0xff]  ;;  %v10873_v53 = vcombine.low %v2867_v38, %v2875_v39  ;;  %v10875_v57 = vcombine.low %v2868_v40, %v2876_v41  ;;  %v10953_v38 = vcombine.low %v2947_v19, %v2955_v24  ;;  %v11846_v40 = vsub.s32 7, %v11759_v20  ;;  %v3019_v24 = vld [vmem:[#allocation11 + $0x18c0] sm:$0xff] }
 0x2c9   :  { %v10892_v55 = vcombine.high %v2884_v51, %v2892_v52 }
 0x2cb   :  { %8542 = vmatpush1.bf16.msra.mxu0 %v10777_v59  ;;  %8706 = vmatpush1.bf16.msra.mxu1 %v10779_v60  ;;  %v2900_v59 = vld [vmem:[#allocation11 + $0x1508] sm:$0xff] }
 0x2cc   :  { %8543 = vmatprep.subr.bf16.mxu0 %v10794_v8  ;;  %8707 = vmatprep.subr.bf16.mxu1 %v10796_v61  ;;  %v2908_v60 = vld [vmem:[#allocation11 + $0x1548] sm:$0xff]  ;;  %v10889_v8 = vcombine.low %v2883_v49, %v2891_v50  ;;  %v10891_v61 = vcombine.low %v2884_v51, %v2892_v52  ;;  %v578_v52 = vrot.slane %v11810_v48, %v11846_v40 }
 0x2cd   :  { %v10908_v35 = vcombine.high %v2900_v59, %v2908_v60  ;;  %v2980_v49 = vld [vmem:[#allocation11 + $0x1788] sm:$0xff] }
 0x2ce   :  { %v2988_v50 = vld [vmem:[#allocation11 + $0x17c8] sm:$0xff] }
 0x2cf   :  { %8544 = vmatpush1.bf16.msra.mxu0 %v10793_v1  ;;  %8708 = vmatpush1.bf16.msra.mxu1 %v10795_v2  ;;  %v2916_v1 = vld [vmem:[#allocation11 + $0x1588] sm:$0xff] }
 0x2d0   :  { %8545 = vmatprep.subr.bf16.mxu0 %v10810_v3  ;;  %8709 = vmatprep.subr.bf16.mxu1 %v10812_v4  ;;  %v2924_v2 = vld [vmem:[#allocation11 + $0x15c8] sm:$0xff]  ;;  %v10905_v3 = vcombine.low %v2899_v56, %v2907_v58  ;;  %v10907_v4 = vcombine.low %v2900_v59, %v2908_v60  ;;  %v10988_v56 = vcombine.high %v2980_v49, %v2988_v50  ;;  %v2995_v58 = vld [vmem:[#allocation11 + $0x1800] sm:$0xff] }
 0x2d1   :  { %v10924_v7 = vcombine.high %v2916_v1, %v2924_v2 }
 0x2d3   :  { %8546 = vmatpush1.bf16.msra.mxu0 %v10809_v12  ;;  %8710 = vmatpush1.bf16.msra.mxu1 %v10811_v13  ;;  %v2932_v12 = vld [vmem:[#allocation11 + $0x1608] sm:$0xff] }
 0x2d4   :  { %8547 = vmatprep.subr.bf16.mxu0 %v10826_v14  ;;  %8711 = vmatprep.subr.bf16.mxu1 %v10828_v15  ;;  %v2940_v13 = vld [vmem:[#allocation11 + $0x1648] sm:$0xff]  ;;  %v10921_v14 = vcombine.low %v2915_v63, %v2923_v0  ;;  %v10923_v15 = vcombine.low %v2916_v1, %v2924_v2 }
 0x2d5   :  { %v10940_v17 = vcombine.high %v2932_v12, %v2940_v13 }
 0x2d7   :  { %8548 = vmatpush1.bf16.msra.mxu0 %v10825_v26  ;;  %8712 = vmatpush1.bf16.msra.mxu1 %v10827_v27  ;;  %v2948_v26 = vld [vmem:[#allocation11 + $0x1688] sm:$0xff] }
 0x2d8   :  { %8549 = vmatprep.subr.bf16.mxu0 %v10842_v28  ;;  %8713 = vmatprep.subr.bf16.mxu1 %v10844_v30  ;;  %v2956_v27 = vld [vmem:[#allocation11 + $0x16c8] sm:$0xff]  ;;  %v10937_v28 = vcombine.low %v2931_v9, %v2939_v10  ;;  %v10939_v30 = vcombine.low %v2932_v12, %v2940_v13 }
 0x2d9   :  { %v10956_v22 = vcombine.high %v2948_v26, %v2956_v27  ;;  %v10955_v39 = vcombine.low %v2948_v26, %v2956_v27  ;;  %v3012_v26 = vld [vmem:[#allocation11 + $0x1888] sm:$0xff] }
 0x2da   :  { %v3020_v27 = vld [vmem:[#allocation11 + $0x18c8] sm:$0xff] }
 0x2db   :  { %8550 = vmatpush1.bf16.msra.mxu0 %v10841_v34  ;;  %8714 = vmatpush1.bf16.msra.mxu1 %v10843_v36  ;;  %v2971_v34 = vld [vmem:[#allocation11 + $0x1740] sm:$0xff]  ;;  %v2964_v36 = vld [vmem:[#allocation11 + $0x1708] sm:$0xff] }
 0x2dc   :  { %8551 = vmatprep.subr.bf16.mxu0 %v10858_v47  ;;  %8715 = vmatprep.subr.bf16.mxu1 %v10860_v37  ;;  %v2972_v47 = vld [vmem:[#allocation11 + $0x1748] sm:$0xff]  ;;  %v11843_v37 = vsub.s32 5, %v11759_v20  ;;  %v10970_v41 = vcombine.high %v2963_v32, %v2971_v34 }
 0x2de   :  { %v570_v51 = vrot.slane %v11810_v48, %v11843_v37 }
 0x2df   :  { %8552 = vmatpush1.bf16.msra.mxu0 %v10857_v43  ;;  %8716 = vmatpush1.bf16.msra.mxu1 %v10859_v44  ;;  %v10972_v43 = vcombine.high %v2964_v36, %v2972_v47  ;;  %v2979_v44 = vld [vmem:[#allocation11 + $0x1780] sm:$0xff] }
 0x2e0   :  { %8553 = vmatprep.subr.bf16.mxu0 %v10874_v45  ;;  %8717 = vmatprep.subr.bf16.mxu1 %v10876_v46  ;;  %v566_v45 = vrot.slane %v11810_v48, %v11840_v33  ;;  %v2987_v46 = vld [vmem:[#allocation11 + $0x17c0] sm:$0xff] }
 0x2e1   :  { %v10985_v2 = vcombine.low %v2979_v44, %v2987_v46 }
 0x2e3   :  { %8554 = vmatpush1.bf16.msra.mxu0 %v10873_v53  ;;  %8718 = vmatpush1.bf16.msra.mxu1 %v10875_v57  ;;  %v10969_v53 = vcombine.low %v2963_v32, %v2971_v34  ;;  %v10971_v57 = vcombine.low %v2964_v36, %v2972_v47  ;;  %v3027_v32 = vld [vmem:[#allocation11 + $0x1900] sm:$0xff]  ;;  %v11020_v36 = vcombine.high %v3012_v26, %v3020_v27 }
 0x2e4   :  { %8555 = vmatprep.subr.bf16.mxu0 %v10890_v54  ;;  %8719 = vmatprep.subr.bf16.mxu1 %v10892_v55  ;;  %v10986_v55 = vcombine.high %v2979_v44, %v2987_v46  ;;  %v3035_v47 = vld [vmem:[#allocation11 + $0x1940] sm:$0xff]  ;;  %v11019_v44 = vcombine.low %v3012_v26, %v3020_v27  ;;  %v3108_v26 = vld [vmem:[#allocation11 + $0x1b88] sm:$0xff] }
 0x2e5   :  { %v3116_v27 = vld [vmem:[#allocation11 + $0x1bc8] sm:$0xff] }
 0x2e7   :  { %8556 = vmatpush1.bf16.msra.mxu0 %v10889_v8  ;;  %8720 = vmatpush1.bf16.msra.mxu1 %v10891_v61  ;;  %v3003_v61 = vld [vmem:[#allocation11 + $0x1840] sm:$0xff] }
 0x2e8   :  { %8557 = vmatprep.subr.bf16.mxu0 %v10906_v62  ;;  %8721 = vmatprep.subr.bf16.mxu1 %v10908_v35  ;;  %v2996_v62 = vld [vmem:[#allocation11 + $0x1808] sm:$0xff]  ;;  %v11002_v10 = vcombine.high %v2995_v58, %v3003_v61  ;;  %v11001_v19 = vcombine.low %v2995_v58, %v3003_v61  ;;  %v3067_v58 = vld [vmem:[#allocation11 + $0x1a40] sm:$0xff] }
 0x2e9   :  { %v3004_v35 = vld [vmem:[#allocation11 + $0x1848] sm:$0xff] }
 0x2ea   :  { %v11004_v12 = vcombine.high %v2996_v62, %v3004_v35 }
 0x2eb   :  { %8558 = vmatpush1.bf16.msra.mxu0 %v10905_v3  ;;  %8722 = vmatpush1.bf16.msra.mxu1 %v10907_v4 }
 0x2ec   :  { %8559 = vmatprep.subr.bf16.mxu0 %v10922_v5  ;;  %8723 = vmatprep.subr.bf16.mxu1 %v10924_v7  ;;  %v10987_v7 = vcombine.low %v2980_v49, %v2988_v50  ;;  %v3043_v49 = vld [vmem:[#allocation11 + $0x1980] sm:$0xff] }
 0x2ed   :  { %v3051_v50 = vld [vmem:[#allocation11 + $0x19c0] sm:$0xff] }
 0x2ee   :  { %v11049_v61 = vcombine.low %v3043_v49, %v3051_v50 }
 0x2ef   :  { %8560 = vmatpush1.bf16.msra.mxu0 %v10921_v14  ;;  %8724 = vmatpush1.bf16.msra.mxu1 %v10923_v15 }
 0x2f0   :  { %8561 = vmatprep.subr.bf16.mxu0 %v10938_v16  ;;  %8725 = vmatprep.subr.bf16.mxu1 %v10940_v17  ;;  %v3011_v16 = vld [vmem:[#allocation11 + $0x1880] sm:$0xff] }
 0x2f1   :  { %v11018_v34 = vcombine.high %v3011_v16, %v3019_v24 }
 0x2f3   :  { %8562 = vmatpush1.bf16.msra.mxu0 %v10937_v28  ;;  %8726 = vmatpush1.bf16.msra.mxu1 %v10939_v30 }
 0x2f4   :  { %8563 = vmatprep.subr.bf16.mxu0 %v10954_v31  ;;  %8727 = vmatprep.subr.bf16.mxu1 %v10956_v22  ;;  %v11003_v31 = vcombine.low %v2996_v62, %v3004_v35 }
 0x2f7   :  { %8564 = vmatpush1.bf16.msra.mxu0 %v10953_v38  ;;  %8728 = vmatpush1.bf16.msra.mxu1 %v10955_v39  ;;  %v3028_v38 = vld [vmem:[#allocation11 + $0x1908] sm:$0xff] }
 0x2f8   :  { %v2106_v54 = vpop.f32.mrb[8].mxu0  ;;  %8565 = vmatprep.subr.bf16.mxu0 %v10970_v41  ;;  %8729 = vmatprep.subr.bf16.mxu1 %v10972_v43  ;;  %v3036_v39 = vld [vmem:[#allocation11 + $0x1948] sm:$0xff]  ;;  %v11017_v43 = vcombine.low %v3011_v16, %v3019_v24  ;;  %v3115_v24 = vld [vmem:[#allocation11 + $0x1bc0] sm:$0xff] }
 0x2f9   :  { %v11269_v59 = vadd.f32 %v2106_v54, %v566_v45  ;;  %v11854_v60 = vpop.f32.mrb[8].mxu1  ;;  %v2108_v8 = vpop.f32.mrb[9].mxu0  ;;  %v11034_v45 = vcombine.high %v3027_v32, %v3035_v47  ;;  %v11036_v46 = vcombine.high %v3028_v38, %v3036_v39  ;;  %v11050_v54 = vcombine.high %v3043_v49, %v3051_v50  ;;  %v3139_v49 = vld [vmem:[#allocation11 + $0x1c80] sm:$0xff] }
 0x2fa   :  { %v11270_v63 = vadd.f32 %v2108_v8, %v570_v51  ;;  %v2190_v0 = vpop.f32.mrb[9].mxu1  ;;  %v2110_v1 = vpop.f32.mrb[10].mxu0  ;;  %v3044_v51 = vld [vmem:[#allocation11 + $0x1988] sm:$0xff]  ;;  %v3147_v50 = vld [vmem:[#allocation11 + $0x1cc0] sm:$0xff] }
 0x2fb   :  { %vm2199_vm9 = vcmp.ge.f32.partialorder %v11269_v59, 0.0  ;;  %v2207_v48 = vmul.f32 0.2, %v11269_v59  ;;  %v11272_v3 = vadd.f32 %v2190_v0, %v578_v52  ;;  %v2192_v4 = vpop.f32.mrb[10].mxu1  ;;  %8566 = vmatpush1.bf16.msra.mxu0 %v10969_v53  ;;  %8730 = vmatpush1.bf16.msra.mxu1 %v10971_v57  ;;  %v2111_v5 = vpop.f32.mrb[11].mxu0  ;;  %v3052_v52 = vld [vmem:[#allocation11 + $0x19c8] sm:$0xff]  ;;  %v11033_v53 = vcombine.low %v3027_v32, %v3035_v47 }
 0x2fc   :  { %vm2200_vm10 = vcmp.ge.f32.partialorder %v11270_v63, 0.0  ;;  %v2208_v9 = vmul.f32 0.2, %v11270_v63  ;;  %8567 = vmatprep.subr.bf16.mxu0 %v10986_v55  ;;  %8731 = vmatprep.subr.bf16.mxu1 %v10988_v56  ;;  %v2193_v15 = vpop.f32.mrb[11].mxu1  ;;  %v11035_v57 = vcombine.low %v3028_v38, %v3036_v39  ;;  %v11052_v55 = vcombine.high %v3044_v51, %v3052_v52  ;;  %v3059_v56 = vld [vmem:[#allocation11 + $0x1a00] sm:$0xff]  ;;  %v3068_v8 = vld [vmem:[#allocation11 + $0x1a48] sm:$0xff] }
 0x2fd   :  { %v2215_v13 = vsel %vm2199_vm9, %v11269_v59, %v2207_v48  ;;  %vm2202_vm11 = vcmp.ge.f32.partialorder %v11272_v3, 0.0  ;;  %v2210_v14 = vmul.f32 0.2, %v11272_v3  ;;  %v3060_v59 = vld [vmem:[#allocation11 + $0x1a08] sm:$0xff]  ;;  %v11051_v62 = vcombine.low %v3044_v51, %v3052_v52  ;;  %v3075_v0 = vld [vmem:[#allocation11 + $0x1a80] sm:$0xff] }
 0x2fe   :  { %v2216_v17 = vsel %vm2200_vm10, %v11270_v63, %v2208_v9  ;;  %v11858_v22 = vpack.c.bf16 %v2215_v13, %v2215_v13  ;;  %v11066_v35 = vcombine.high %v3059_v56, %v3067_v58  ;;  %v11068_v63 = vcombine.high %v3060_v59, %v3068_v8  ;;  %v3083_v1 = vld [vmem:[#allocation11 + $0x1ac0] sm:$0xff]  ;;  %v3084_v48 = vld [vmem:[#allocation11 + $0x1ac8] sm:$0xff] }
 0x2ff   :  { %v11856_v28 = vpack.c.bf16 %v2216_v17, %v2216_v17  ;;  %v2218_v30 = vsel %vm2202_vm11, %v11272_v3, %v2210_v14  ;;  %8568 = vmatpush1.bf16.msra.mxu0 %v10985_v2  ;;  %8732 = vmatpush1.bf16.msra.mxu1 %v10987_v7  ;;  %v3076_v2 = vld [vmem:[#allocation11 + $0x1a88] sm:$0xff]  ;;  %v11065_v3 = vcombine.low %v3059_v56, %v3067_v58  ;;  %v3091_v9 = vld [vmem:[#allocation11 + $0x1b00] sm:$0xff] }
 0x300   :  { %8578 = vmatprep.subr.bf16.mxu0 %v11002_v10  ;;  %8742 = vmatprep.subr.bf16.mxu1 %v11004_v12  ;;  %v11862_v41 = vpack.c.bf16 %v2218_v30, %v2218_v30  ;;  %v11067_v4 = vcombine.low %v3060_v59, %v3068_v8  ;;  %v11082_v5 = vcombine.high %v3075_v0, %v3083_v1  ;;  %v3099_v10 = vld [vmem:[#allocation11 + $0x1b40] sm:$0xff]  ;;  %v3092_v12 = vld [vmem:[#allocation11 + $0x1b08] sm:$0xff] }
 0x301   :  { %8569 = vmatprep.mubr.bf16.mxu0 %v11856_v28  ;;  %8733 = vmatprep.mubr.bf16.mxu1 %v11856_v28  ;;  %v11084_v7 = vcombine.high %v3076_v2, %v3084_v48  ;;  %v3100_v13 = vld [vmem:[#allocation11 + $0x1b48] sm:$0xff]  ;;  %v11081_v14 = vcombine.low %v3075_v0, %v3083_v1  ;;  %v11083_v15 = vcombine.low %v3076_v2, %v3084_v48  ;;  %v3131_v47 = vld [vmem:[#allocation11 + $0x1c40] sm:$0xff] }
 0x302   :  { %8570 = vmatmul.mubr.bf16.vlgmr.msra.gmra.mrb[12].mxu0 %v11858_v22  ;;  %8734 = vmatmul.mubr.bf16.vlgmr.msra.gmra.mrb[12].mxu1 %v11858_v22  ;;  %v11098_v16 = vcombine.high %v3091_v9, %v3099_v10  ;;  %v11100_v17 = vcombine.high %v3092_v12, %v3100_v13  ;;  %v11097_v30 = vcombine.low %v3091_v9, %v3099_v10  ;;  %v3124_v38 = vld [vmem:[#allocation11 + $0x1c08] sm:$0xff]  ;;  %v3155_v56 = vld [vmem:[#allocation11 + $0x1d00] sm:$0xff] }
 0x303   :  { %8579 = vmatpush1.bf16.msra.mxu0 %v11001_v19  ;;  %8743 = vmatpush1.bf16.msra.mxu1 %v11003_v31  ;;  %v3107_v19 = vld [vmem:[#allocation11 + $0x1b80] sm:$0xff]  ;;  %v11099_v31 = vcombine.low %v3092_v12, %v3100_v13  ;;  %v3132_v39 = vld [vmem:[#allocation11 + $0x1c48] sm:$0xff] }
 0x304   :  { %8610 = vmatprep.mubr.bf16.mxu0 %v11862_v41  ;;  %8774 = vmatprep.mubr.bf16.mxu1 %v11862_v41  ;;  %v11114_v32 = vcombine.high %v3107_v19, %v3115_v24  ;;  %v3140_v51 = vld [vmem:[#allocation11 + $0x1c88] sm:$0xff]  ;;  %v3163_v58 = vld [vmem:[#allocation11 + $0x1d40] sm:$0xff] }
 0x305   :  { %8580 = vmatprep.subr.bf16.mxu0 %v11018_v34  ;;  %8744 = vmatprep.subr.bf16.mxu1 %v11020_v36  ;;  %v11116_v34 = vcombine.high %v3108_v26, %v3116_v27  ;;  %v3123_v36 = vld [vmem:[#allocation11 + $0x1c00] sm:$0xff]  ;;  %v3148_v52 = vld [vmem:[#allocation11 + $0x1cc8] sm:$0xff] }
 0x306   :  { %v3156_v59 = vld [vmem:[#allocation11 + $0x1d08] sm:$0xff]  ;;  %v3171_v0 = vld [vmem:[#allocation11 + $0x1d80] sm:$0xff] }
 0x307   :  { %8581 = vmatpush1.bf16.msra.mxu0 %v11017_v43  ;;  %8745 = vmatpush1.bf16.msra.mxu1 %v11019_v44  ;;  %v11113_v43 = vcombine.low %v3107_v19, %v3115_v24  ;;  %v11115_v44 = vcombine.low %v3108_v26, %v3116_v27  ;;  %v3164_v8 = vld [vmem:[#allocation11 + $0x1d48] sm:$0xff]  ;;  %v3179_v1 = vld [vmem:[#allocation11 + $0x1dc0] sm:$0xff]  ;;  %v11869_v24 = vsub.s32 6, %v11759_v20 }
 0x308   :  { %8582 = vmatprep.subr.bf16.mxu0 %v11034_v45  ;;  %8746 = vmatprep.subr.bf16.mxu1 %v11036_v46  ;;  %v11130_v45 = vcombine.high %v3123_v36, %v3131_v47  ;;  %v11132_v46 = vcombine.high %v3124_v38, %v3132_v39  ;;  %v3172_v2 = vld [vmem:[#allocation11 + $0x1d88] sm:$0xff]  ;;  %v3187_v9 = vld [vmem:[#allocation11 + $0x1e00] sm:$0xff] }
 0x309   :  { %v3180_v48 = vld [vmem:[#allocation11 + $0x1dc8] sm:$0xff]  ;;  %v3195_v10 = vld [vmem:[#allocation11 + $0x1e40] sm:$0xff] }
 0x30a   :  { %v3188_v12 = vld [vmem:[#allocation11 + $0x1e08] sm:$0xff]  ;;  %v3203_v19 = vld [vmem:[#allocation11 + $0x1e80] sm:$0xff] }
 0x30b   :  { %8583 = vmatpush1.bf16.msra.mxu0 %v11033_v53  ;;  %8747 = vmatpush1.bf16.msra.mxu1 %v11035_v57  ;;  %v11129_v53 = vcombine.low %v3123_v36, %v3131_v47  ;;  %v11131_v57 = vcombine.low %v3124_v38, %v3132_v39  ;;  %v3196_v13 = vld [vmem:[#allocation11 + $0x1e48] sm:$0xff]  ;;  %v3211_v26 = vld [vmem:[#allocation11 + $0x1ec0] sm:$0xff]  ;;  %v11429_v38 = vld [vmem:[#allocation10] sm:$0xff] }
 0x30c   :  { %8584 = vmatprep.subr.bf16.mxu0 %v11050_v54  ;;  %8748 = vmatprep.subr.bf16.mxu1 %v11052_v55  ;;  %v11146_v54 = vcombine.high %v3139_v49, %v3147_v50  ;;  %v11148_v55 = vcombine.high %v3140_v51, %v3148_v52  ;;  %v3204_v27 = vld [vmem:[#allocation11 + $0x1e88] sm:$0xff]  ;;  %v3219_v47 = vld [vmem:[#allocation11 + $0x1f00] sm:$0xff]  ;;  %v574_v39 = vrot.slane %v11429_v38, %v11869_v24  ;;  %v2286_v38 = vld [vmem:[#allocation11 + $0x1d8] sm:$0xff] }
 0x30f   :  { %8585 = vmatpush1.bf16.msra.mxu0 %v11049_v61  ;;  %8749 = vmatpush1.bf16.msra.mxu1 %v11051_v62  ;;  %v11145_v61 = vcombine.low %v3139_v49, %v3147_v50  ;;  %v11147_v62 = vcombine.low %v3140_v51, %v3148_v52  ;;  %v3235_v52 = vld [vmem:[#allocation11 + $0x1f80] sm:$0xff] }
 0x310   :  { %8586 = vmatprep.subr.bf16.mxu0 %v11066_v35  ;;  %8750 = vmatprep.subr.bf16.mxu1 %v11068_v63  ;;  %v11162_v35 = vcombine.high %v3155_v56, %v3163_v58  ;;  %v11164_v63 = vcombine.high %v3156_v59, %v3164_v8 }
 0x313   :  { %8587 = vmatpush1.bf16.msra.mxu0 %v11065_v3  ;;  %8751 = vmatpush1.bf16.msra.mxu1 %v11067_v4  ;;  %v11161_v3 = vcombine.low %v3155_v56, %v3163_v58  ;;  %v11163_v4 = vcombine.low %v3156_v59, %v3164_v8 }
 0x314   :  { %8588 = vmatprep.subr.bf16.mxu0 %v11082_v5  ;;  %8752 = vmatprep.subr.bf16.mxu1 %v11084_v7  ;;  %v11178_v5 = vcombine.high %v3171_v0, %v3179_v1  ;;  %v11180_v7 = vcombine.high %v3172_v2, %v3180_v48 }
 0x317   :  { %8589 = vmatpush1.bf16.msra.mxu0 %v11081_v14  ;;  %8753 = vmatpush1.bf16.msra.mxu1 %v11083_v15  ;;  %v11177_v14 = vcombine.low %v3171_v0, %v3179_v1  ;;  %v11179_v15 = vcombine.low %v3172_v2, %v3180_v48  ;;  %v2238_v0 = vld [vmem:[#allocation11 + $0x58] sm:$0xff] }
 0x318   :  { %8590 = vmatprep.subr.bf16.mxu0 %v11098_v16  ;;  %8754 = vmatprep.subr.bf16.mxu1 %v11100_v17  ;;  %v11194_v16 = vcombine.high %v3187_v9, %v3195_v10  ;;  %v11196_v17 = vcombine.high %v3188_v12, %v3196_v13 }
 0x31b   :  { %8591 = vmatpush1.bf16.msra.mxu0 %v11097_v30  ;;  %8755 = vmatpush1.bf16.msra.mxu1 %v11099_v31  ;;  %v3212_v30 = vld [vmem:[#allocation11 + $0x1ec8] sm:$0xff]  ;;  %v11193_v31 = vcombine.low %v3187_v9, %v3195_v10  ;;  %v2254_v9 = vld [vmem:[#allocation11 + $0xd8] sm:$0xff] }
 0x31c   :  { %8592 = vmatprep.subr.bf16.mxu0 %v11114_v32  ;;  %8756 = vmatprep.subr.bf16.mxu1 %v11116_v34  ;;  %v11195_v32 = vcombine.low %v3188_v12, %v3196_v13  ;;  %v11210_v34 = vcombine.high %v3203_v19, %v3211_v26  ;;  %v11212_v36 = vcombine.high %v3204_v27, %v3212_v30 }
 0x31d   :  { %v11211_v49 = vcombine.low %v3204_v27, %v3212_v30 }
 0x31f   :  { %8593 = vmatpush1.bf16.msra.mxu0 %v11113_v43  ;;  %8757 = vmatpush1.bf16.msra.mxu1 %v11115_v44  ;;  %v3227_v43 = vld [vmem:[#allocation11 + $0x1f40] sm:$0xff]  ;;  %v3220_v44 = vld [vmem:[#allocation11 + $0x1f08] sm:$0xff] }
 0x320   :  { %8594 = vmatprep.subr.bf16.mxu0 %v11130_v45  ;;  %8758 = vmatprep.subr.bf16.mxu1 %v11132_v46  ;;  %v3228_v45 = vld [vmem:[#allocation11 + $0x1f48] sm:$0xff]  ;;  %v11209_v46 = vcombine.low %v3203_v19, %v3211_v26  ;;  %v11226_v50 = vcombine.high %v3219_v47, %v3227_v43  ;;  %v11225_v56 = vcombine.low %v3219_v47, %v3227_v43  ;;  %v2262_v19 = vld [vmem:[#allocation11 + $0x118] sm:$0xff] }
 0x321   :  { %v11228_v51 = vcombine.high %v3220_v44, %v3228_v45  ;;  %v11227_v58 = vcombine.low %v3220_v44, %v3228_v45  ;;  %v2270_v26 = vld [vmem:[#allocation11 + $0x158] sm:$0xff] }
 0x322   :  { %v2278_v47 = vld [vmem:[#allocation11 + $0x198] sm:$0xff]  ;;  %v10271_v43 = vcombine.low %v2262_v19, %v2270_v26 }
 0x323   :  { %8595 = vmatpush1.bf16.msra.mxu0 %v11129_v53  ;;  %8759 = vmatpush1.bf16.msra.mxu1 %v11131_v57  ;;  %v11271_v53 = vadd.f32 %v11854_v60, %v574_v39  ;;  %v3243_v57 = vld [vmem:[#allocation11 + $0x1fc0] sm:$0xff]  ;;  %v10288_v45 = vcombine.high %v2278_v47, %v2286_v38 }
 0x324   :  { %8596 = vmatprep.subr.bf16.mxu0 %v11146_v54  ;;  %8760 = vmatprep.subr.bf16.mxu1 %v11148_v55  ;;  %v3236_v54 = vld [vmem:[#allocation11 + $0x1f88] sm:$0xff]  ;;  %v11242_v59 = vcombine.high %v3235_v52, %v3243_v57  ;;  %v11241_v60 = vcombine.low %v3235_v52, %v3243_v57 }
 0x325   :  { %v3244_v55 = vld [vmem:[#allocation11 + $0x1fc8] sm:$0xff]  ;;  %vm2201_vm12 = vcmp.ge.f32.partialorder %v11271_v53, 0.0 }
 0x326   :  { %v11244_v8 = vcombine.high %v3236_v54, %v3244_v55  ;;  %v11243_v1 = vcombine.low %v3236_v54, %v3244_v55  ;;  %v2309_v55 = vld [vmem:[#allocation11 + $0x290] sm:$0xff] }
 0x327   :  { %8597 = vmatpush1.bf16.msra.mxu0 %v11145_v61  ;;  %8761 = vmatpush1.bf16.msra.mxu1 %v11147_v62  ;;  %v2229_v61 = vld [vmem:[#allocation11 + $0x10] sm:$0xff]  ;;  %v2209_v62 = vmul.f32 0.2, %v11271_v53 }
 0x328   :  { %8598 = vmatprep.subr.bf16.mxu0 %v11162_v35  ;;  %8762 = vmatprep.subr.bf16.mxu1 %v11164_v63  ;;  %v2237_v35 = vld [vmem:[#allocation11 + $0x50] sm:$0xff]  ;;  %v2230_v63 = vld [vmem:[#allocation11 + $0x18] sm:$0xff] }
 0x329   :  { %v10238_v2 = vcombine.high %v2229_v61, %v2237_v35  ;;  %v10240_v48 = vcombine.high %v2230_v63, %v2238_v0  ;;  %v10237_v10 = vcombine.low %v2229_v61, %v2237_v35  ;;  %v10239_v13 = vcombine.low %v2230_v63, %v2238_v0  ;;  %v2325_v63 = vld [vmem:[#allocation11 + $0x310] sm:$0xff] }
 0x32a   :  { %v2333_v0 = vld [vmem:[#allocation11 + $0x350] sm:$0xff] }
 0x32b   :  { %8599 = vmatpush1.bf16.msra.mxu0 %v11161_v3  ;;  %8763 = vmatpush1.bf16.msra.mxu1 %v11163_v4  ;;  %v2217_v3 = vsel %vm2201_vm12, %v11271_v53, %v2209_v62  ;;  %v2245_v4 = vld [vmem:[#allocation11 + $0x90] sm:$0xff]  ;;  %v10287_v53 = vcombine.low %v2278_v47, %v2286_v38  ;;  %v2374_v38 = vld [vmem:[#allocation11 + $0x498] sm:$0xff] }
 0x32c   :  { %8600 = vmatprep.subr.bf16.mxu0 %v11178_v5  ;;  %8764 = vmatprep.subr.bf16.mxu1 %v11180_v7  ;;  %v2253_v5 = vld [vmem:[#allocation11 + $0xd0] sm:$0xff]  ;;  %v2246_v7 = vld [vmem:[#allocation11 + $0x98] sm:$0xff]  ;;  %v11873_v12 = vpack.c.bf16 %v2217_v3, %v2217_v3  ;;  %v10334_v3 = vcombine.high %v2325_v63, %v2333_v0 }
 0x32d   :  { %v10253_v27 = vcombine.low %v2245_v4, %v2253_v5  ;;  %v10255_v30 = vcombine.low %v2246_v7, %v2254_v9  ;;  %v2381_v47 = vld [vmem:[#allocation11 + $0x4d0] sm:$0xff] }
 0x32f   :  { %8601 = vmatpush1.bf16.msra.mxu0 %v11177_v14  ;;  %8765 = vmatpush1.bf16.msra.mxu1 %v11179_v15  ;;  %v10254_v14 = vcombine.high %v2245_v4, %v2253_v5  ;;  %v10256_v15 = vcombine.high %v2246_v7, %v2254_v9  ;;  %v2341_v5 = vld [vmem:[#allocation11 + $0x390] sm:$0xff]  ;;  %v2342_v9 = vld [vmem:[#allocation11 + $0x398] sm:$0xff] }
 0x330   :  { %8602 = vmatprep.subr.bf16.mxu0 %v11194_v16  ;;  %8766 = vmatprep.subr.bf16.mxu1 %v11196_v17  ;;  %v2261_v16 = vld [vmem:[#allocation11 + $0x110] sm:$0xff] }
 0x331   :  { %v2269_v17 = vld [vmem:[#allocation11 + $0x150] sm:$0xff] }
 0x332   :  { %v10269_v39 = vcombine.low %v2261_v16, %v2269_v17  ;;  %v2349_v7 = vld [vmem:[#allocation11 + $0x3d0] sm:$0xff] }
 0x333   :  { %8603 = vmatpush1.bf16.msra.mxu0 %v11193_v31  ;;  %8767 = vmatpush1.bf16.msra.mxu1 %v11195_v32  ;;  %v10270_v31 = vcombine.high %v2261_v16, %v2269_v17  ;;  %v10272_v32 = vcombine.high %v2262_v19, %v2270_v26  ;;  %v2357_v17 = vld [vmem:[#allocation11 + $0x410] sm:$0xff]  ;;  %v2358_v26 = vld [vmem:[#allocation11 + $0x418] sm:$0xff] }
 0x334   :  { %8604 = vmatprep.subr.bf16.mxu0 %v11210_v34  ;;  %8768 = vmatprep.subr.bf16.mxu1 %v11212_v36  ;;  %v2277_v34 = vld [vmem:[#allocation11 + $0x190] sm:$0xff] }
 0x335   :  { %v2285_v36 = vld [vmem:[#allocation11 + $0x1d0] sm:$0xff] }
 0x336   :  { %v10286_v44 = vcombine.high %v2277_v34, %v2285_v36  ;;  %v10285_v52 = vcombine.low %v2277_v34, %v2285_v36  ;;  %v2365_v19 = vld [vmem:[#allocation11 + $0x450] sm:$0xff] }
 0x337   :  { %8605 = vmatpush1.bf16.msra.mxu0 %v11209_v46  ;;  %8769 = vmatpush1.bf16.msra.mxu1 %v11211_v49  ;;  %v2293_v46 = vld [vmem:[#allocation11 + $0x210] sm:$0xff] }
 0x338   :  { %8606 = vmatprep.subr.bf16.mxu0 %v11226_v50  ;;  %8770 = vmatprep.subr.bf16.mxu1 %v11228_v51  ;;  %v2301_v49 = vld [vmem:[#allocation11 + $0x250] sm:$0xff]  ;;  %v2294_v50 = vld [vmem:[#allocation11 + $0x218] sm:$0xff] }
 0x339   :  { %v2302_v51 = vld [vmem:[#allocation11 + $0x258] sm:$0xff]  ;;  %v10302_v57 = vcombine.high %v2293_v46, %v2301_v49  ;;  %v2373_v36 = vld [vmem:[#allocation11 + $0x490] sm:$0xff] }
 0x33a   :  { %v10304_v54 = vcombine.high %v2294_v50, %v2302_v51  ;;  %v10303_v61 = vcombine.low %v2294_v50, %v2302_v51  ;;  %v2397_v50 = vld [vmem:[#allocation11 + $0x550] sm:$0xff]  ;;  %v2390_v51 = vld [vmem:[#allocation11 + $0x518] sm:$0xff] }
 0x33b   :  { %8607 = vmatpush1.bf16.msra.mxu0 %v11225_v56  ;;  %8771 = vmatpush1.bf16.msra.mxu1 %v11227_v58  ;;  %v2317_v56 = vld [vmem:[#allocation11 + $0x2d0] sm:$0xff]  ;;  %v2310_v58 = vld [vmem:[#allocation11 + $0x298] sm:$0xff] }
 0x33c   :  { %8608 = vmatprep.subr.bf16.mxu0 %v11242_v59  ;;  %8772 = vmatprep.subr.bf16.mxu1 %v11244_v8  ;;  %v2318_v59 = vld [vmem:[#allocation11 + $0x2d8] sm:$0xff]  ;;  %v10301_v8 = vcombine.low %v2293_v46, %v2301_v49  ;;  %v10318_v62 = vcombine.high %v2309_v55, %v2317_v56  ;;  %v2389_v49 = vld [vmem:[#allocation11 + $0x510] sm:$0xff] }
 0x33d   :  { %v10320_v35 = vcombine.high %v2310_v58, %v2318_v59 }
 0x33f   :  { %8609 = vmatpush1.bf16.msra.mxu0 %v11241_v60  ;;  %8773 = vmatpush1.bf16.msra.mxu1 %v11243_v1  ;;  %v2326_v60 = vld [vmem:[#allocation11 + $0x318] sm:$0xff] }
 0x340   :  { %8783 = vmatprep.subr.bf16.mxu0 %v10238_v2  ;;  %8947 = vmatprep.subr.bf16.mxu1 %v10240_v48  ;;  %v2334_v1 = vld [vmem:[#allocation11 + $0x358] sm:$0xff]  ;;  %v10317_v2 = vcombine.low %v2309_v55, %v2317_v56  ;;  %v10319_v48 = vcombine.low %v2310_v58, %v2318_v59  ;;  %v2405_v56 = vld [vmem:[#allocation11 + $0x590] sm:$0xff] }
 0x341   :  { %v10336_v4 = vcombine.high %v2326_v60, %v2334_v1  ;;  %v2413_v58 = vld [vmem:[#allocation11 + $0x5d0] sm:$0xff]  ;;  %v2406_v59 = vld [vmem:[#allocation11 + $0x598] sm:$0xff] }
 0x342   :  { %8611 = vmatmul.mubr.bf16.vlgmr.msra.gmra.mrb[12].mxu0 %v11873_v12  ;;  %8775 = vmatmul.mubr.bf16.vlgmr.msra.gmra.mrb[12].mxu1 %v11873_v12 }
 0x343   :  { %8784 = vmatpush1.bf16.msra.mxu0 %v10237_v10  ;;  %8815 = vmatprep.mubr.bf16.mxu0 %v11820_v6  ;;  %v2350_v10 = vld [vmem:[#allocation11 + $0x3d8] sm:$0xff] }
 0x344   :  { %8948 = vmatpush1.bf16.msra.mxu1 %v10239_v13  ;;  %8979 = vmatprep.mubr.bf16.mxu1 %v11820_v6  ;;  %v10333_v13 = vcombine.low %v2325_v63, %v2333_v0  ;;  %v10352_v16 = vcombine.high %v2342_v9, %v2350_v10  ;;  %v2421_v0 = vld [vmem:[#allocation11 + $0x610] sm:$0xff] }
 0x345   :  { %8785 = vmatprep.subr.bf16.mxu0 %v10254_v14  ;;  %8949 = vmatprep.subr.bf16.mxu1 %v10256_v15  ;;  %v10335_v14 = vcombine.low %v2326_v60, %v2334_v1  ;;  %v10350_v15 = vcombine.high %v2341_v5, %v2349_v7  ;;  %v2429_v60 = vld [vmem:[#allocation11 + $0x650] sm:$0xff]  ;;  %v2422_v1 = vld [vmem:[#allocation11 + $0x618] sm:$0xff] }
 0x347   :  { %8786 = vmatpush1.bf16.msra.mxu0 %v10253_v27  ;;  %v2366_v27 = vld [vmem:[#allocation11 + $0x458] sm:$0xff] }
 0x348   :  { %8950 = vmatpush1.bf16.msra.mxu1 %v10255_v30  ;;  %8787 = vmatprep.subr.bf16.mxu0 %v10270_v31  ;;  %v10349_v30 = vcombine.low %v2341_v5, %v2349_v7  ;;  %v10351_v31 = vcombine.low %v2342_v9, %v2350_v10  ;;  %v10368_v34 = vcombine.high %v2358_v26, %v2366_v27  ;;  %v2437_v7 = vld [vmem:[#allocation11 + $0x690] sm:$0xff]  ;;  %v2438_v10 = vld [vmem:[#allocation11 + $0x698] sm:$0xff] }
 0x349   :  { %8951 = vmatprep.subr.bf16.mxu1 %v10272_v32  ;;  %v10366_v32 = vcombine.high %v2357_v17, %v2365_v19  ;;  %v2445_v9 = vld [vmem:[#allocation11 + $0x6d0] sm:$0xff] }
 0x34b   :  { %8788 = vmatpush1.bf16.msra.mxu0 %v10269_v39  ;;  %v2382_v39 = vld [vmem:[#allocation11 + $0x4d8] sm:$0xff] }
 0x34c   :  { %8952 = vmatpush1.bf16.msra.mxu1 %v10271_v43  ;;  %8789 = vmatprep.subr.bf16.mxu0 %v10286_v44  ;;  %v10365_v43 = vcombine.low %v2357_v17, %v2365_v19  ;;  %v10367_v44 = vcombine.low %v2358_v26, %v2366_v27  ;;  %v10384_v46 = vcombine.high %v2374_v38, %v2382_v39  ;;  %v2453_v19 = vld [vmem:[#allocation11 + $0x710] sm:$0xff]  ;;  %v2454_v27 = vld [vmem:[#allocation11 + $0x718] sm:$0xff] }
 0x34d   :  { %8953 = vmatprep.subr.bf16.mxu1 %v10288_v45  ;;  %v10382_v45 = vcombine.high %v2373_v36, %v2381_v47  ;;  %v2461_v26 = vld [vmem:[#allocation11 + $0x750] sm:$0xff] }
 0x34f   :  { %8790 = vmatpush1.bf16.msra.mxu0 %v10285_v52  ;;  %v2398_v52 = vld [vmem:[#allocation11 + $0x558] sm:$0xff] }
 0x350   :  { %8954 = vmatpush1.bf16.msra.mxu1 %v10287_v53  ;;  %8791 = vmatprep.subr.bf16.mxu0 %v10302_v57  ;;  %v10381_v53 = vcombine.low %v2373_v36, %v2381_v47  ;;  %v10383_v57 = vcombine.low %v2374_v38, %v2382_v39  ;;  %v10400_v55 = vcombine.high %v2390_v51, %v2398_v52  ;;  %v2469_v47 = vld [vmem:[#allocation11 + $0x790] sm:$0xff]  ;;  %v2470_v39 = vld [vmem:[#allocation11 + $0x798] sm:$0xff] }
 0x351   :  { %8955 = vmatprep.subr.bf16.mxu1 %v10304_v54  ;;  %v10398_v54 = vcombine.high %v2389_v49, %v2397_v50  ;;  %v2477_v38 = vld [vmem:[#allocation11 + $0x7d0] sm:$0xff] }
 0x353   :  { %8792 = vmatpush1.bf16.msra.mxu0 %v10301_v8  ;;  %v2414_v8 = vld [vmem:[#allocation11 + $0x5d8] sm:$0xff] }
 0x354   :  { %8956 = vmatpush1.bf16.msra.mxu1 %v10303_v61  ;;  %8793 = vmatprep.subr.bf16.mxu0 %v10318_v62  ;;  %v10397_v61 = vcombine.low %v2389_v49, %v2397_v50  ;;  %v10399_v62 = vcombine.low %v2390_v51, %v2398_v52  ;;  %v10416_v63 = vcombine.high %v2406_v59, %v2414_v8  ;;  %v2485_v50 = vld [vmem:[#allocation11 + $0x810] sm:$0xff]  ;;  %v2486_v52 = vld [vmem:[#allocation11 + $0x818] sm:$0xff] }
 0x355   :  { %8957 = vmatprep.subr.bf16.mxu1 %v10320_v35  ;;  %v10414_v35 = vcombine.high %v2405_v56, %v2413_v58  ;;  %v2493_v51 = vld [vmem:[#allocation11 + $0x850] sm:$0xff] }
 0x357   :  { %8794 = vmatpush1.bf16.msra.mxu0 %v10317_v2  ;;  %v2430_v2 = vld [vmem:[#allocation11 + $0x658] sm:$0xff] }
 0x358   :  { %8958 = vmatpush1.bf16.msra.mxu1 %v10319_v48  ;;  %8795 = vmatprep.subr.bf16.mxu0 %v10334_v3  ;;  %v10413_v48 = vcombine.low %v2405_v56, %v2413_v58  ;;  %v10415_v3 = vcombine.low %v2406_v59, %v2414_v8  ;;  %v10432_v5 = vcombine.high %v2422_v1, %v2430_v2  ;;  %v2501_v58 = vld [vmem:[#allocation11 + $0x890] sm:$0xff] }
 0x359   :  { %8959 = vmatprep.subr.bf16.mxu1 %v10336_v4  ;;  %v10430_v4 = vcombine.high %v2421_v0, %v2429_v60  ;;  %v2509_v59 = vld [vmem:[#allocation11 + $0x8d0] sm:$0xff]  ;;  %v10493_v8 = vcombine.low %v2485_v50, %v2493_v51 }
 0x35b   :  { %8796 = vmatpush1.bf16.msra.mxu0 %v10333_v13  ;;  %v2446_v13 = vld [vmem:[#allocation11 + $0x6d8] sm:$0xff] }
 0x35c   :  { %8960 = vmatpush1.bf16.msra.mxu1 %v10335_v14  ;;  %8797 = vmatprep.subr.bf16.mxu0 %v10350_v15  ;;  %v10429_v14 = vcombine.low %v2421_v0, %v2429_v60  ;;  %v10431_v15 = vcombine.low %v2422_v1, %v2430_v2  ;;  %v10448_v17 = vcombine.high %v2438_v10, %v2446_v13  ;;  %v2517_v0 = vld [vmem:[#allocation11 + $0x910] sm:$0xff]  ;;  %v2518_v2 = vld [vmem:[#allocation11 + $0x918] sm:$0xff] }
 0x35d   :  { %8961 = vmatprep.subr.bf16.mxu1 %v10352_v16  ;;  %v10446_v16 = vcombine.high %v2437_v7, %v2445_v9  ;;  %v2525_v60 = vld [vmem:[#allocation11 + $0x950] sm:$0xff] }
 0x35f   :  { %8798 = vmatpush1.bf16.msra.mxu0 %v10349_v30  ;;  %v2462_v30 = vld [vmem:[#allocation11 + $0x758] sm:$0xff] }
 0x360   :  { %8962 = vmatpush1.bf16.msra.mxu1 %v10351_v31  ;;  %8799 = vmatprep.subr.bf16.mxu0 %v10366_v32  ;;  %v10445_v31 = vcombine.low %v2437_v7, %v2445_v9  ;;  %v10447_v32 = vcombine.low %v2438_v10, %v2446_v13  ;;  %v10464_v36 = vcombine.high %v2454_v27, %v2462_v30  ;;  %v2533_v9 = vld [vmem:[#allocation11 + $0x990] sm:$0xff]  ;;  %v2534_v13 = vld [vmem:[#allocation11 + $0x998] sm:$0xff] }
 0x361   :  { %8963 = vmatprep.subr.bf16.mxu1 %v10368_v34  ;;  %v10462_v34 = vcombine.high %v2453_v19, %v2461_v26  ;;  %v2541_v10 = vld [vmem:[#allocation11 + $0x9d0] sm:$0xff] }
 0x363   :  { %8800 = vmatpush1.bf16.msra.mxu0 %v10365_v43  ;;  %v2478_v43 = vld [vmem:[#allocation11 + $0x7d8] sm:$0xff] }
 0x364   :  { %8964 = vmatpush1.bf16.msra.mxu1 %v10367_v44  ;;  %8801 = vmatprep.subr.bf16.mxu0 %v10382_v45  ;;  %v10461_v44 = vcombine.low %v2453_v19, %v2461_v26  ;;  %v10463_v45 = vcombine.low %v2454_v27, %v2462_v30  ;;  %v10480_v49 = vcombine.high %v2470_v39, %v2478_v43  ;;  %v2549_v26 = vld [vmem:[#allocation11 + $0xa10] sm:$0xff]  ;;  %v2550_v30 = vld [vmem:[#allocation11 + $0xa18] sm:$0xff] }
 0x365   :  { %8965 = vmatprep.subr.bf16.mxu1 %v10384_v46  ;;  %v10478_v46 = vcombine.high %v2469_v47, %v2477_v38  ;;  %v2557_v27 = vld [vmem:[#allocation11 + $0xa50] sm:$0xff] }
 0x367   :  { %8802 = vmatpush1.bf16.msra.mxu0 %v10381_v53  ;;  %v2494_v53 = vld [vmem:[#allocation11 + $0x858] sm:$0xff] }
 0x368   :  { %8966 = vmatpush1.bf16.msra.mxu1 %v10383_v57  ;;  %8803 = vmatprep.subr.bf16.mxu0 %v10398_v54  ;;  %v10477_v57 = vcombine.low %v2469_v47, %v2477_v38  ;;  %v10479_v54 = vcombine.low %v2470_v39, %v2478_v43  ;;  %v10496_v56 = vcombine.high %v2486_v52, %v2494_v53  ;;  %v2565_v38 = vld [vmem:[#allocation11 + $0xa90] sm:$0xff]  ;;  %v2566_v43 = vld [vmem:[#allocation11 + $0xa98] sm:$0xff] }
 0x369   :  { %8967 = vmatprep.subr.bf16.mxu1 %v10400_v55  ;;  %v10494_v55 = vcombine.high %v2485_v50, %v2493_v51  ;;  %v2573_v39 = vld [vmem:[#allocation11 + $0xad0] sm:$0xff] }
 0x36a   :  { %v2581_v51 = vld [vmem:[#allocation11 + $0xb10] sm:$0xff] }
 0x36b   :  { %8804 = vmatpush1.bf16.msra.mxu0 %v10397_v61  ;;  %v2502_v61 = vld [vmem:[#allocation11 + $0x898] sm:$0xff] }
 0x36c   :  { %8968 = vmatpush1.bf16.msra.mxu1 %v10399_v62  ;;  %8805 = vmatprep.subr.bf16.mxu0 %v10414_v35  ;;  %v2510_v62 = vld [vmem:[#allocation11 + $0x8d8] sm:$0xff]  ;;  %v10495_v35 = vcombine.low %v2486_v52, %v2494_v53  ;;  %v2589_v52 = vld [vmem:[#allocation11 + $0xb50] sm:$0xff] }
 0x36d   :  { %8969 = vmatprep.subr.bf16.mxu1 %v10416_v63  ;;  %v10510_v63 = vcombine.high %v2501_v58, %v2509_v59  ;;  %v10512_v1 = vcombine.high %v2502_v61, %v2510_v62  ;;  %v2582_v53 = vld [vmem:[#allocation11 + $0xb18] sm:$0xff] }
 0x36f   :  { %8806 = vmatpush1.bf16.msra.mxu0 %v10413_v48  ;;  %v2526_v48 = vld [vmem:[#allocation11 + $0x958] sm:$0xff] }
 0x370   :  { %8970 = vmatpush1.bf16.msra.mxu1 %v10415_v3  ;;  %8807 = vmatprep.subr.bf16.mxu0 %v10430_v4  ;;  %v10509_v3 = vcombine.low %v2501_v58, %v2509_v59  ;;  %v10511_v4 = vcombine.low %v2502_v61, %v2510_v62  ;;  %v10528_v7 = vcombine.high %v2518_v2, %v2526_v48  ;;  %v2597_v59 = vld [vmem:[#allocation11 + $0xb90] sm:$0xff]  ;;  %v2598_v61 = vld [vmem:[#allocation11 + $0xb98] sm:$0xff] }
 0x371   :  { %8971 = vmatprep.subr.bf16.mxu1 %v10432_v5  ;;  %v10526_v5 = vcombine.high %v2517_v0, %v2525_v60  ;;  %v2606_v62 = vld [vmem:[#allocation11 + $0xbd8] sm:$0xff] }
 0x373   :  { %8808 = vmatpush1.bf16.msra.mxu0 %v10429_v14  ;;  %v2542_v14 = vld [vmem:[#allocation11 + $0x9d8] sm:$0xff] }
 0x374   :  { %8972 = vmatpush1.bf16.msra.mxu1 %v10431_v15  ;;  %8809 = vmatprep.subr.bf16.mxu0 %v10446_v16  ;;  %v10525_v15 = vcombine.low %v2517_v0, %v2525_v60  ;;  %v10527_v16 = vcombine.low %v2518_v2, %v2526_v48  ;;  %v10544_v19 = vcombine.high %v2534_v13, %v2542_v14  ;;  %v2621_v2 = vld [vmem:[#allocation11 + $0xc50] sm:$0xff]  ;;  %v2614_v48 = vld [vmem:[#allocation11 + $0xc18] sm:$0xff] }
 0x375   :  { %8973 = vmatprep.subr.bf16.mxu1 %v10448_v17  ;;  %v10542_v17 = vcombine.high %v2533_v9, %v2541_v10  ;;  %v10608_v60 = vcombine.high %v2598_v61, %v2606_v62 }
 0x377   :  { %8810 = vmatpush1.bf16.msra.mxu0 %v10445_v31  ;;  %v2558_v31 = vld [vmem:[#allocation11 + $0xa58] sm:$0xff] }
 0x378   :  { %8974 = vmatpush1.bf16.msra.mxu1 %v10447_v32  ;;  %8811 = vmatprep.subr.bf16.mxu0 %v10462_v34  ;;  %v10541_v32 = vcombine.low %v2533_v9, %v2541_v10  ;;  %v10543_v34 = vcombine.low %v2534_v13, %v2542_v14  ;;  %v10560_v47 = vcombine.high %v2550_v30, %v2558_v31  ;;  %v2629_v10 = vld [vmem:[#allocation11 + $0xc90] sm:$0xff]  ;;  %v2630_v14 = vld [vmem:[#allocation11 + $0xc98] sm:$0xff] }
 0x379   :  { %8975 = vmatprep.subr.bf16.mxu1 %v10464_v36  ;;  %v10558_v36 = vcombine.high %v2549_v26, %v2557_v27  ;;  %v2637_v13 = vld [vmem:[#allocation11 + $0xcd0] sm:$0xff] }
 0x37b   :  { %8812 = vmatpush1.bf16.msra.mxu0 %v10461_v44  ;;  %v2574_v44 = vld [vmem:[#allocation11 + $0xad8] sm:$0xff] }
 0x37c   :  { %8976 = vmatpush1.bf16.msra.mxu1 %v10463_v45  ;;  %8813 = vmatprep.subr.bf16.mxu0 %v10478_v46  ;;  %v10557_v45 = vcombine.low %v2549_v26, %v2557_v27  ;;  %v10559_v46 = vcombine.low %v2550_v30, %v2558_v31  ;;  %v10576_v50 = vcombine.high %v2566_v43, %v2574_v44  ;;  %v2645_v27 = vld [vmem:[#allocation11 + $0xd10] sm:$0xff]  ;;  %v2646_v31 = vld [vmem:[#allocation11 + $0xd18] sm:$0xff] }
 0x37d   :  { %8977 = vmatprep.subr.bf16.mxu1 %v10480_v49  ;;  %v10574_v49 = vcombine.high %v2565_v38, %v2573_v39  ;;  %v2653_v30 = vld [vmem:[#allocation11 + $0xd50] sm:$0xff] }
 0x37f   :  { %8814 = vmatpush1.bf16.msra.mxu0 %v10477_v57  ;;  %v2590_v57 = vld [vmem:[#allocation11 + $0xb58] sm:$0xff] }
 0x380   :  { %8978 = vmatpush1.bf16.msra.mxu1 %v10479_v54  ;;  %8824 = vmatprep.subr.bf16.mxu0 %v10494_v55  ;;  %v10573_v54 = vcombine.low %v2565_v38, %v2573_v39  ;;  %v10575_v55 = vcombine.low %v2566_v43, %v2574_v44  ;;  %v10592_v58 = vcombine.high %v2582_v53, %v2590_v57  ;;  %v2661_v39 = vld [vmem:[#allocation11 + $0xd90] sm:$0xff]  ;;  %v2662_v44 = vld [vmem:[#allocation11 + $0xd98] sm:$0xff] }
 0x381   :  { %8988 = vmatprep.subr.bf16.mxu1 %v10496_v56  ;;  %v10590_v56 = vcombine.high %v2581_v51, %v2589_v52  ;;  %v2669_v43 = vld [vmem:[#allocation11 + $0xdd0] sm:$0xff] }
 0x382   :  { %8816 = vmatmul.mubr.bf16.vlgmr.msra.gmra.mrb[16].mxu0 %v11822_v11 }
 0x383   :  { %8980 = vmatmul.mubr.bf16.vlgmr.msra.gmra.mrb[16].mxu1 %v11822_v11  ;;  %8825 = vmatpush1.bf16.msra.mxu0 %v10493_v8  ;;  %v2605_v8 = vld [vmem:[#allocation11 + $0xbd0] sm:$0xff] }
 0x384   :  { %8856 = vmatprep.mubr.bf16.mxu0 %v11826_v18  ;;  %8989 = vmatpush1.bf16.msra.mxu1 %v10495_v35  ;;  %v10589_v35 = vcombine.low %v2581_v51, %v2589_v52  ;;  %v10606_v0 = vcombine.high %v2597_v59, %v2605_v8  ;;  %v2677_v52 = vld [vmem:[#allocation11 + $0xe10] sm:$0xff] }
 0x385   :  { %9020 = vmatprep.mubr.bf16.mxu1 %v11826_v18  ;;  %8826 = vmatprep.subr.bf16.mxu0 %v10510_v63  ;;  %v10591_v63 = vcombine.low %v2582_v53, %v2590_v57  ;;  %v2685_v53 = vld [vmem:[#allocation11 + $0xe50] sm:$0xff]  ;;  %v2678_v57 = vld [vmem:[#allocation11 + $0xe18] sm:$0xff] }
 0x386   :  { %8990 = vmatprep.subr.bf16.mxu1 %v10512_v1  ;;  %v2613_v1 = vld [vmem:[#allocation11 + $0xc10] sm:$0xff] }
 0x387   :  { %8827 = vmatpush1.bf16.msra.mxu0 %v10509_v3  ;;  %v2622_v3 = vld [vmem:[#allocation11 + $0xc58] sm:$0xff] }
 0x388   :  { %8991 = vmatpush1.bf16.msra.mxu1 %v10511_v4  ;;  %8828 = vmatprep.subr.bf16.mxu0 %v10526_v5  ;;  %v10605_v4 = vcombine.low %v2597_v59, %v2605_v8  ;;  %v10607_v5 = vcombine.low %v2598_v61, %v2606_v62  ;;  %v10624_v9 = vcombine.high %v2614_v48, %v2622_v3  ;;  %v2693_v8 = vld [vmem:[#allocation11 + $0xe90] sm:$0xff]  ;;  %v2694_v62 = vld [vmem:[#allocation11 + $0xe98] sm:$0xff] }
 0x389   :  { %8992 = vmatprep.subr.bf16.mxu1 %v10528_v7  ;;  %v10622_v7 = vcombine.high %v2613_v1, %v2621_v2  ;;  %v2701_v61 = vld [vmem:[#allocation11 + $0xed0] sm:$0xff] }
 0x38b   :  { %8829 = vmatpush1.bf16.msra.mxu0 %v10525_v15  ;;  %v2638_v15 = vld [vmem:[#allocation11 + $0xcd8] sm:$0xff] }
 0x38c   :  { %8993 = vmatpush1.bf16.msra.mxu1 %v10527_v16  ;;  %8830 = vmatprep.subr.bf16.mxu0 %v10542_v17  ;;  %v10621_v16 = vcombine.low %v2613_v1, %v2621_v2  ;;  %v10623_v17 = vcombine.low %v2614_v48, %v2622_v3  ;;  %v10640_v26 = vcombine.high %v2630_v14, %v2638_v15  ;;  %v2709_v2 = vld [vmem:[#allocation11 + $0xf10] sm:$0xff]  ;;  %v2710_v3 = vld [vmem:[#allocation11 + $0xf18] sm:$0xff] }
 0x38d   :  { %8994 = vmatprep.subr.bf16.mxu1 %v10544_v19  ;;  %v10638_v19 = vcombine.high %v2629_v10, %v2637_v13  ;;  %v2717_v48 = vld [vmem:[#allocation11 + $0xf50] sm:$0xff] }
 0x38f   :  { %8831 = vmatpush1.bf16.msra.mxu0 %v10541_v32  ;;  %v2654_v32 = vld [vmem:[#allocation11 + $0xd58] sm:$0xff] }
 0x390   :  { %8995 = vmatpush1.bf16.msra.mxu1 %v10543_v34  ;;  %8832 = vmatprep.subr.bf16.mxu0 %v10558_v36  ;;  %v10637_v34 = vcombine.low %v2629_v10, %v2637_v13  ;;  %v10639_v36 = vcombine.low %v2630_v14, %v2638_v15  ;;  %v10656_v38 = vcombine.high %v2646_v31, %v2654_v32  ;;  %v2725_v13 = vld [vmem:[#allocation11 + $0xf90] sm:$0xff]  ;;  %v2726_v15 = vld [vmem:[#allocation11 + $0xf98] sm:$0xff] }
 0x391   :  { %8996 = vmatprep.subr.bf16.mxu1 %v10560_v47  ;;  %v10654_v47 = vcombine.high %v2645_v27, %v2653_v30  ;;  %v2733_v14 = vld [vmem:[#allocation11 + $0xfd0] sm:$0xff] }
 0x393   :  { %8833 = vmatpush1.bf16.msra.mxu0 %v10557_v45  ;;  %v2670_v45 = vld [vmem:[#allocation11 + $0xdd8] sm:$0xff] }
 0x394   :  { %8997 = vmatpush1.bf16.msra.mxu1 %v10559_v46  ;;  %8834 = vmatprep.subr.bf16.mxu0 %v10574_v49  ;;  %v10653_v46 = vcombine.low %v2645_v27, %v2653_v30  ;;  %v10655_v49 = vcombine.low %v2646_v31, %v2654_v32  ;;  %v10672_v51 = vcombine.high %v2662_v44, %v2670_v45  ;;  %v2741_v30 = vld [vmem:[#allocation11 + $0x1010] sm:$0xff]  ;;  %v2742_v32 = vld [vmem:[#allocation11 + $0x1018] sm:$0xff] }
 0x395   :  { %8998 = vmatprep.subr.bf16.mxu1 %v10576_v50  ;;  %v10670_v50 = vcombine.high %v2661_v39, %v2669_v43  ;;  %v2749_v31 = vld [vmem:[#allocation11 + $0x1050] sm:$0xff] }
 0x397   :  { %8835 = vmatpush1.bf16.msra.mxu0 %v10573_v54  ;;  %v2686_v54 = vld [vmem:[#allocation11 + $0xe58] sm:$0xff] }
 0x398   :  { %8999 = vmatpush1.bf16.msra.mxu1 %v10575_v55  ;;  %8836 = vmatprep.subr.bf16.mxu0 %v10590_v56  ;;  %v10669_v55 = vcombine.low %v2661_v39, %v2669_v43  ;;  %v10671_v56 = vcombine.low %v2662_v44, %v2670_v45  ;;  %v10688_v59 = vcombine.high %v2678_v57, %v2686_v54  ;;  %v2757_v43 = vld [vmem:[#allocation11 + $0x1090] sm:$0xff] }
 0x399   :  { %9000 = vmatprep.subr.bf16.mxu1 %v10592_v58  ;;  %v10686_v58 = vcombine.high %v2677_v52, %v2685_v53  ;;  %v2765_v44 = vld [vmem:[#allocation11 + $0x10d0] sm:$0xff]  ;;  %v10749_v45 = vcombine.low %v2741_v30, %v2749_v31 }
 0x39b   :  { %8837 = vmatpush1.bf16.msra.mxu0 %v10589_v35  ;;  %v2702_v35 = vld [vmem:[#allocation11 + $0xed8] sm:$0xff] }
 0x39c   :  { %9001 = vmatpush1.bf16.msra.mxu1 %v10591_v63  ;;  %8838 = vmatprep.subr.bf16.mxu0 %v10606_v0  ;;  %v10685_v63 = vcombine.low %v2677_v52, %v2685_v53  ;;  %v10687_v0 = vcombine.low %v2678_v57, %v2686_v54  ;;  %v10704_v1 = vcombine.high %v2694_v62, %v2702_v35  ;;  %v2773_v52 = vld [vmem:[#allocation11 + $0x1110] sm:$0xff]  ;;  %v2774_v54 = vld [vmem:[#allocation11 + $0x1118] sm:$0xff] }
 0x39d   :  { %9002 = vmatprep.subr.bf16.mxu1 %v10608_v60  ;;  %v10702_v60 = vcombine.high %v2693_v8, %v2701_v61  ;;  %v2781_v53 = vld [vmem:[#allocation11 + $0x1150] sm:$0xff] }
 0x39f   :  { %8839 = vmatpush1.bf16.msra.mxu0 %v10605_v4  ;;  %v2718_v4 = vld [vmem:[#allocation11 + $0xf58] sm:$0xff] }
 0x3a0   :  { %9003 = vmatpush1.bf16.msra.mxu1 %v10607_v5  ;;  %8840 = vmatprep.subr.bf16.mxu0 %v10622_v7  ;;  %v10701_v5 = vcombine.low %v2693_v8, %v2701_v61  ;;  %v10703_v7 = vcombine.low %v2694_v62, %v2702_v35  ;;  %v10720_v10 = vcombine.high %v2710_v3, %v2718_v4  ;;  %v2789_v61 = vld [vmem:[#allocation11 + $0x1190] sm:$0xff]  ;;  %v2790_v35 = vld [vmem:[#allocation11 + $0x1198] sm:$0xff] }
 0x3a1   :  { %9004 = vmatprep.subr.bf16.mxu1 %v10624_v9  ;;  %v10718_v9 = vcombine.high %v2709_v2, %v2717_v48  ;;  %v2797_v62 = vld [vmem:[#allocation11 + $0x11d0] sm:$0xff] }
 0x3a3   :  { %8841 = vmatpush1.bf16.msra.mxu0 %v10621_v16  ;;  %v2734_v16 = vld [vmem:[#allocation11 + $0xfd8] sm:$0xff] }
 0x3a4   :  { %9005 = vmatpush1.bf16.msra.mxu1 %v10623_v17  ;;  %8842 = vmatprep.subr.bf16.mxu0 %v10638_v19  ;;  %v10717_v17 = vcombine.low %v2709_v2, %v2717_v48  ;;  %v10719_v19 = vcombine.low %v2710_v3, %v2718_v4  ;;  %v10736_v27 = vcombine.high %v2726_v15, %v2734_v16  ;;  %v2805_v48 = vld [vmem:[#allocation11 + $0x1210] sm:$0xff]  ;;  %v2806_v4 = vld [vmem:[#allocation11 + $0x1218] sm:$0xff] }
 0x3a5   :  { %9006 = vmatprep.subr.bf16.mxu1 %v10640_v26  ;;  %v10734_v26 = vcombine.high %v2725_v13, %v2733_v14  ;;  %v2813_v3 = vld [vmem:[#allocation11 + $0x1250] sm:$0xff] }
 0x3a7   :  { %8843 = vmatpush1.bf16.msra.mxu0 %v10637_v34  ;;  %v2750_v34 = vld [vmem:[#allocation11 + $0x1058] sm:$0xff] }
 0x3a8   :  { %9007 = vmatpush1.bf16.msra.mxu1 %v10639_v36  ;;  %8844 = vmatprep.subr.bf16.mxu0 %v10654_v47  ;;  %v10733_v36 = vcombine.low %v2725_v13, %v2733_v14  ;;  %v10735_v47 = vcombine.low %v2726_v15, %v2734_v16  ;;  %v10752_v39 = vcombine.high %v2742_v32, %v2750_v34  ;;  %v2821_v14 = vld [vmem:[#allocation11 + $0x1290] sm:$0xff]  ;;  %v2822_v16 = vld [vmem:[#allocation11 + $0x1298] sm:$0xff] }
 0x3a9   :  { %9008 = vmatprep.subr.bf16.mxu1 %v10656_v38  ;;  %v10750_v38 = vcombine.high %v2741_v30, %v2749_v31  ;;  %v2829_v15 = vld [vmem:[#allocation11 + $0x12d0] sm:$0xff] }
 0x3aa   :  { %v2837_v31 = vld [vmem:[#allocation11 + $0x1310] sm:$0xff] }
 0x3ab   :  { %8845 = vmatpush1.bf16.msra.mxu0 %v10653_v46  ;;  %v2758_v46 = vld [vmem:[#allocation11 + $0x1098] sm:$0xff] }
 0x3ac   :  { %9009 = vmatpush1.bf16.msra.mxu1 %v10655_v49  ;;  %8846 = vmatprep.subr.bf16.mxu0 %v10670_v50  ;;  %v2766_v49 = vld [vmem:[#allocation11 + $0x10d8] sm:$0xff]  ;;  %v10751_v50 = vcombine.low %v2742_v32, %v2750_v34  ;;  %v2845_v32 = vld [vmem:[#allocation11 + $0x1350] sm:$0xff] }
 0x3ad   :  { %9010 = vmatprep.subr.bf16.mxu1 %v10672_v51  ;;  %v10766_v51 = vcombine.high %v2757_v43, %v2765_v44  ;;  %v10768_v57 = vcombine.high %v2758_v46, %v2766_v49  ;;  %v2838_v34 = vld [vmem:[#allocation11 + $0x1318] sm:$0xff] }
 0x3af   :  { %8847 = vmatpush1.bf16.msra.mxu0 %v10669_v55  ;;  %v2782_v55 = vld [vmem:[#allocation11 + $0x1158] sm:$0xff] }
 0x3b0   :  { %9011 = vmatpush1.bf16.msra.mxu1 %v10671_v56  ;;  %8848 = vmatprep.subr.bf16.mxu0 %v10686_v58  ;;  %v10765_v56 = vcombine.low %v2757_v43, %v2765_v44  ;;  %v10767_v58 = vcombine.low %v2758_v46, %v2766_v49  ;;  %v10784_v8 = vcombine.high %v2774_v54, %v2782_v55  ;;  %v2853_v44 = vld [vmem:[#allocation11 + $0x1390] sm:$0xff]  ;;  %v2854_v46 = vld [vmem:[#allocation11 + $0x1398] sm:$0xff] }
 0x3b1   :  { %9012 = vmatprep.subr.bf16.mxu1 %v10688_v59  ;;  %v10782_v59 = vcombine.high %v2773_v52, %v2781_v53  ;;  %v2862_v49 = vld [vmem:[#allocation11 + $0x13d8] sm:$0xff] }
 0x3b3   :  { %8849 = vmatpush1.bf16.msra.mxu0 %v10685_v63  ;;  %v2798_v63 = vld [vmem:[#allocation11 + $0x11d8] sm:$0xff] }
 0x3b4   :  { %9013 = vmatpush1.bf16.msra.mxu1 %v10687_v0  ;;  %8850 = vmatprep.subr.bf16.mxu0 %v10702_v60  ;;  %v10781_v0 = vcombine.low %v2773_v52, %v2781_v53  ;;  %v10783_v60 = vcombine.low %v2774_v54, %v2782_v55  ;;  %v10800_v2 = vcombine.high %v2790_v35, %v2798_v63  ;;  %v2877_v54 = vld [vmem:[#allocation11 + $0x1450] sm:$0xff]  ;;  %v2870_v55 = vld [vmem:[#allocation11 + $0x1418] sm:$0xff] }
 0x3b5   :  { %9014 = vmatprep.subr.bf16.mxu1 %v10704_v1  ;;  %v10798_v1 = vcombine.high %v2789_v61, %v2797_v62  ;;  %v10864_v53 = vcombine.high %v2854_v46, %v2862_v49 }
 0x3b7   :  { %8851 = vmatpush1.bf16.msra.mxu0 %v10701_v5  ;;  %v2814_v5 = vld [vmem:[#allocation11 + $0x1258] sm:$0xff] }
 0x3b8   :  { %9015 = vmatpush1.bf16.msra.mxu1 %v10703_v7  ;;  %8852 = vmatprep.subr.bf16.mxu0 %v10718_v9  ;;  %v10797_v7 = vcombine.low %v2789_v61, %v2797_v62  ;;  %v10799_v9 = vcombine.low %v2790_v35, %v2798_v63  ;;  %v10816_v13 = vcombine.high %v2806_v4, %v2814_v5  ;;  %v2885_v62 = vld [vmem:[#allocation11 + $0x1490] sm:$0xff]  ;;  %v2886_v63 = vld [vmem:[#allocation11 + $0x1498] sm:$0xff] }
 0x3b9   :  { %9016 = vmatprep.subr.bf16.mxu1 %v10720_v10  ;;  %v10814_v10 = vcombine.high %v2805_v48, %v2813_v3  ;;  %v2893_v35 = vld [vmem:[#allocation11 + $0x14d0] sm:$0xff] }
 0x3bb   :  { %8853 = vmatpush1.bf16.msra.mxu0 %v10717_v17  ;;  %v2830_v17 = vld [vmem:[#allocation11 + $0x12d8] sm:$0xff] }
 0x3bc   :  { %9017 = vmatpush1.bf16.msra.mxu1 %v10719_v19  ;;  %8854 = vmatprep.subr.bf16.mxu0 %v10734_v26  ;;  %v10813_v19 = vcombine.low %v2805_v48, %v2813_v3  ;;  %v10815_v26 = vcombine.low %v2806_v4, %v2814_v5  ;;  %v10832_v30 = vcombine.high %v2822_v16, %v2830_v17  ;;  %v2901_v3 = vld [vmem:[#allocation11 + $0x1510] sm:$0xff]  ;;  %v2902_v5 = vld [vmem:[#allocation11 + $0x1518] sm:$0xff] }
 0x3bd   :  { %9018 = vmatprep.subr.bf16.mxu1 %v10736_v27  ;;  %v10830_v27 = vcombine.high %v2821_v14, %v2829_v15  ;;  %v2909_v4 = vld [vmem:[#allocation11 + $0x1550] sm:$0xff] }
 0x3bf   :  { %8855 = vmatpush1.bf16.msra.mxu0 %v10733_v36  ;;  %v2846_v36 = vld [vmem:[#allocation11 + $0x1358] sm:$0xff] }
 0x3c0   :  { %9019 = vmatpush1.bf16.msra.mxu1 %v10735_v47  ;;  %8865 = vmatprep.subr.bf16.mxu0 %v10750_v38  ;;  %v10829_v47 = vcombine.low %v2821_v14, %v2829_v15  ;;  %v10831_v38 = vcombine.low %v2822_v16, %v2830_v17  ;;  %v10848_v43 = vcombine.high %v2838_v34, %v2846_v36  ;;  %v2917_v15 = vld [vmem:[#allocation11 + $0x1590] sm:$0xff]  ;;  %v2918_v17 = vld [vmem:[#allocation11 + $0x1598] sm:$0xff] }
 0x3c1   :  { %9029 = vmatprep.subr.bf16.mxu1 %v10752_v39  ;;  %v10846_v39 = vcombine.high %v2837_v31, %v2845_v32  ;;  %v2925_v16 = vld [vmem:[#allocation11 + $0x15d0] sm:$0xff] }
 0x3c2   :  { %8857 = vmatmul.mubr.bf16.vlgmr.msra.gmra.mrb[16].mxu0 %v11835_v42 }
 0x3c3   :  { %9021 = vmatmul.mubr.bf16.vlgmr.msra.gmra.mrb[16].mxu1 %v11835_v42  ;;  %8866 = vmatpush1.bf16.msra.mxu0 %v10749_v45  ;;  %v2861_v45 = vld [vmem:[#allocation11 + $0x13d0] sm:$0xff] }
 0x3c4   :  { %8897 = vmatprep.mubr.bf16.mxu0 %v11856_v28  ;;  %9030 = vmatpush1.bf16.msra.mxu1 %v10751_v50  ;;  %v10845_v50 = vcombine.low %v2837_v31, %v2845_v32  ;;  %v10862_v52 = vcombine.high %v2853_v44, %v2861_v45  ;;  %v2933_v32 = vld [vmem:[#allocation11 + $0x1610] sm:$0xff] }
 0x3c5   :  { %9061 = vmatprep.mubr.bf16.mxu1 %v11856_v28  ;;  %8867 = vmatprep.subr.bf16.mxu0 %v10766_v51  ;;  %v10847_v51 = vcombine.low %v2838_v34, %v2846_v36  ;;  %v2941_v34 = vld [vmem:[#allocation11 + $0x1650] sm:$0xff]  ;;  %v2934_v36 = vld [vmem:[#allocation11 + $0x1618] sm:$0xff] }
 0x3c6   :  { %9031 = vmatprep.subr.bf16.mxu1 %v10768_v57  ;;  %v2869_v57 = vld [vmem:[#allocation11 + $0x1410] sm:$0xff] }
 0x3c7   :  { %8868 = vmatpush1.bf16.msra.mxu0 %v10765_v56  ;;  %v2878_v56 = vld [vmem:[#allocation11 + $0x1458] sm:$0xff] }
 0x3c8   :  { %9032 = vmatpush1.bf16.msra.mxu1 %v10767_v58  ;;  %8869 = vmatprep.subr.bf16.mxu0 %v10782_v59  ;;  %v10861_v58 = vcombine.low %v2853_v44, %v2861_v45  ;;  %v10863_v59 = vcombine.low %v2854_v46, %v2862_v49  ;;  %v10880_v61 = vcombine.high %v2870_v55, %v2878_v56  ;;  %v2949_v45 = vld [vmem:[#allocation11 + $0x1690] sm:$0xff]  ;;  %v2950_v49 = vld [vmem:[#allocation11 + $0x1698] sm:$0xff] }
 0x3c9   :  { %9033 = vmatprep.subr.bf16.mxu1 %v10784_v8  ;;  %v10878_v8 = vcombine.high %v2869_v57, %v2877_v54  ;;  %v2957_v46 = vld [vmem:[#allocation11 + $0x16d0] sm:$0xff] }
 0x3cb   :  { %8870 = vmatpush1.bf16.msra.mxu0 %v10781_v0  ;;  %v2894_v0 = vld [vmem:[#allocation11 + $0x14d8] sm:$0xff] }
 0x3cc   :  { %9034 = vmatpush1.bf16.msra.mxu1 %v10783_v60  ;;  %8871 = vmatprep.subr.bf16.mxu0 %v10798_v1  ;;  %v10877_v60 = vcombine.low %v2869_v57, %v2877_v54  ;;  %v10879_v1 = vcombine.low %v2870_v55, %v2878_v56  ;;  %v10896_v48 = vcombine.high %v2886_v63, %v2894_v0  ;;  %v2965_v54 = vld [vmem:[#allocation11 + $0x1710] sm:$0xff]  ;;  %v2966_v56 = vld [vmem:[#allocation11 + $0x1718] sm:$0xff] }
 0x3cd   :  { %9035 = vmatprep.subr.bf16.mxu1 %v10800_v2  ;;  %v10894_v2 = vcombine.high %v2885_v62, %v2893_v35  ;;  %v2973_v55 = vld [vmem:[#allocation11 + $0x1750] sm:$0xff] }
 0x3cf   :  { %8872 = vmatpush1.bf16.msra.mxu0 %v10797_v7  ;;  %v2910_v7 = vld [vmem:[#allocation11 + $0x1558] sm:$0xff] }
 0x3d0   :  { %9036 = vmatpush1.bf16.msra.mxu1 %v10799_v9  ;;  %8873 = vmatprep.subr.bf16.mxu0 %v10814_v10  ;;  %v10893_v9 = vcombine.low %v2885_v62, %v2893_v35  ;;  %v10895_v10 = vcombine.low %v2886_v63, %v2894_v0  ;;  %v10912_v14 = vcombine.high %v2902_v5, %v2910_v7  ;;  %v2981_v35 = vld [vmem:[#allocation11 + $0x1790] sm:$0xff]  ;;  %v2982_v0 = vld [vmem:[#allocation11 + $0x1798] sm:$0xff] }
 0x3d1   :  { %9037 = vmatprep.subr.bf16.mxu1 %v10816_v13  ;;  %v10910_v13 = vcombine.high %v2901_v3, %v2909_v4  ;;  %v2989_v63 = vld [vmem:[#allocation11 + $0x17d0] sm:$0xff] }
 0x3d3   :  { %8874 = vmatpush1.bf16.msra.mxu0 %v10813_v19  ;;  %v2926_v19 = vld [vmem:[#allocation11 + $0x15d8] sm:$0xff] }
 0x3d4   :  { %9038 = vmatpush1.bf16.msra.mxu1 %v10815_v26  ;;  %8875 = vmatprep.subr.bf16.mxu0 %v10830_v27  ;;  %v10909_v26 = vcombine.low %v2901_v3, %v2909_v4  ;;  %v10911_v27 = vcombine.low %v2902_v5, %v2910_v7  ;;  %v10928_v31 = vcombine.high %v2918_v17, %v2926_v19  ;;  %v2997_v4 = vld [vmem:[#allocation11 + $0x1810] sm:$0xff]  ;;  %v2998_v7 = vld [vmem:[#allocation11 + $0x1818] sm:$0xff] }
 0x3d5   :  { %9039 = vmatprep.subr.bf16.mxu1 %v10832_v30  ;;  %v10926_v30 = vcombine.high %v2917_v15, %v2925_v16  ;;  %v3005_v5 = vld [vmem:[#allocation11 + $0x1850] sm:$0xff] }
 0x3d7   :  { %8876 = vmatpush1.bf16.msra.mxu0 %v10829_v47  ;;  %v2942_v47 = vld [vmem:[#allocation11 + $0x1658] sm:$0xff] }
 0x3d8   :  { %9040 = vmatpush1.bf16.msra.mxu1 %v10831_v38  ;;  %8877 = vmatprep.subr.bf16.mxu0 %v10846_v39  ;;  %v10925_v38 = vcombine.low %v2917_v15, %v2925_v16  ;;  %v10927_v39 = vcombine.low %v2918_v17, %v2926_v19  ;;  %v10944_v44 = vcombine.high %v2934_v36, %v2942_v47  ;;  %v3013_v16 = vld [vmem:[#allocation11 + $0x1890] sm:$0xff] }
 0x3d9   :  { %9041 = vmatprep.subr.bf16.mxu1 %v10848_v43  ;;  %v10942_v43 = vcombine.high %v2933_v32, %v2941_v34  ;;  %v3021_v17 = vld [vmem:[#allocation11 + $0x18d0] sm:$0xff]  ;;  %v11005_v19 = vcombine.low %v2997_v4, %v3005_v5 }
 0x3db   :  { %8878 = vmatpush1.bf16.msra.mxu0 %v10845_v50  ;;  %v2958_v50 = vld [vmem:[#allocation11 + $0x16d8] sm:$0xff] }
 0x3dc   :  { %9042 = vmatpush1.bf16.msra.mxu1 %v10847_v51  ;;  %8879 = vmatprep.subr.bf16.mxu0 %v10862_v52  ;;  %v10941_v51 = vcombine.low %v2933_v32, %v2941_v34  ;;  %v10943_v52 = vcombine.low %v2934_v36, %v2942_v47  ;;  %v10960_v57 = vcombine.high %v2950_v49, %v2958_v50  ;;  %v3029_v32 = vld [vmem:[#allocation11 + $0x1910] sm:$0xff]  ;;  %v3030_v47 = vld [vmem:[#allocation11 + $0x1918] sm:$0xff] }
 0x3dd   :  { %9043 = vmatprep.subr.bf16.mxu1 %v10864_v53  ;;  %v10958_v53 = vcombine.high %v2949_v45, %v2957_v46  ;;  %v3037_v34 = vld [vmem:[#allocation11 + $0x1950] sm:$0xff] }
 0x3df   :  { %8880 = vmatpush1.bf16.msra.mxu0 %v10861_v58  ;;  %v2974_v58 = vld [vmem:[#allocation11 + $0x1758] sm:$0xff] }
 0x3e0   :  { %9044 = vmatpush1.bf16.msra.mxu1 %v10863_v59  ;;  %8881 = vmatprep.subr.bf16.mxu0 %v10878_v8  ;;  %v10957_v59 = vcombine.low %v2949_v45, %v2957_v46  ;;  %v10959_v8 = vcombine.low %v2950_v49, %v2958_v50  ;;  %v10976_v62 = vcombine.high %v2966_v56, %v2974_v58  ;;  %v3045_v46 = vld [vmem:[#allocation11 + $0x1990] sm:$0xff]  ;;  %v3046_v50 = vld [vmem:[#allocation11 + $0x1998] sm:$0xff] }
 0x3e1   :  { %9045 = vmatprep.subr.bf16.mxu1 %v10880_v61  ;;  %v10974_v61 = vcombine.high %v2965_v54, %v2973_v55  ;;  %v3053_v49 = vld [vmem:[#allocation11 + $0x19d0] sm:$0xff] }
 0x3e3   :  { %8882 = vmatpush1.bf16.msra.mxu0 %v10877_v60  ;;  %v2990_v60 = vld [vmem:[#allocation11 + $0x17d8] sm:$0xff] }
 0x3e4   :  { %9046 = vmatpush1.bf16.msra.mxu1 %v10879_v1  ;;  %8883 = vmatprep.subr.bf16.mxu0 %v10894_v2  ;;  %v10973_v1 = vcombine.low %v2965_v54, %v2973_v55  ;;  %v10975_v2 = vcombine.low %v2966_v56, %v2974_v58  ;;  %v10992_v3 = vcombine.high %v2982_v0, %v2990_v60  ;;  %v3061_v55 = vld [vmem:[#allocation11 + $0x1a10] sm:$0xff]  ;;  %v3062_v58 = vld [vmem:[#allocation11 + $0x1a18] sm:$0xff] }
 0x3e5   :  { %9047 = vmatprep.subr.bf16.mxu1 %v10896_v48  ;;  %v10990_v48 = vcombine.high %v2981_v35, %v2989_v63  ;;  %v3069_v56 = vld [vmem:[#allocation11 + $0x1a50] sm:$0xff] }
 0x3e7   :  { %8884 = vmatpush1.bf16.msra.mxu0 %v10893_v9  ;;  %v3006_v9 = vld [vmem:[#allocation11 + $0x1858] sm:$0xff] }
 0x3e8   :  { %9048 = vmatpush1.bf16.msra.mxu1 %v10895_v10  ;;  %8885 = vmatprep.subr.bf16.mxu0 %v10910_v13  ;;  %v10989_v10 = vcombine.low %v2981_v35, %v2989_v63  ;;  %v10991_v13 = vcombine.low %v2982_v0, %v2990_v60  ;;  %v11008_v15 = vcombine.high %v2998_v7, %v3006_v9  ;;  %v3077_v63 = vld [vmem:[#allocation11 + $0x1a90] sm:$0xff]  ;;  %v3078_v60 = vld [vmem:[#allocation11 + $0x1a98] sm:$0xff] }
 0x3e9   :  { %9049 = vmatprep.subr.bf16.mxu1 %v10912_v14  ;;  %v11006_v14 = vcombine.high %v2997_v4, %v3005_v5  ;;  %v3085_v0 = vld [vmem:[#allocation11 + $0x1ad0] sm:$0xff] }
 0x3ea   :  { %v11086_v4 = vcombine.high %v3077_v63, %v3085_v0 }
 0x3eb   :  { %8886 = vmatpush1.bf16.msra.mxu0 %v10909_v26  ;;  %v3014_v26 = vld [vmem:[#allocation11 + $0x1898] sm:$0xff] }
 0x3ec   :  { %9050 = vmatpush1.bf16.msra.mxu1 %v10911_v27  ;;  %8887 = vmatprep.subr.bf16.mxu0 %v10926_v30  ;;  %v3022_v27 = vld [vmem:[#allocation11 + $0x18d8] sm:$0xff]  ;;  %v11007_v30 = vcombine.low %v2998_v7, %v3006_v9  ;;  %v3093_v7 = vld [vmem:[#allocation11 + $0x1b10] sm:$0xff] }
 0x3ed   :  { %9051 = vmatprep.subr.bf16.mxu1 %v10928_v31  ;;  %v11022_v31 = vcombine.high %v3013_v16, %v3021_v17  ;;  %v11024_v36 = vcombine.high %v3014_v26, %v3022_v27  ;;  %v3101_v9 = vld [vmem:[#allocation11 + $0x1b50] sm:$0xff] }
 0x3ef   :  { %8888 = vmatpush1.bf16.msra.mxu0 %v10925_v38  ;;  %v3038_v38 = vld [vmem:[#allocation11 + $0x1958] sm:$0xff] }
 0x3f0   :  { %9052 = vmatpush1.bf16.msra.mxu1 %v10927_v39  ;;  %8889 = vmatprep.subr.bf16.mxu0 %v10942_v43  ;;  %v11021_v39 = vcombine.low %v3013_v16, %v3021_v17  ;;  %v11023_v43 = vcombine.low %v3014_v26, %v3022_v27  ;;  %v11040_v45 = vcombine.high %v3030_v47, %v3038_v38  ;;  %v3094_v16 = vld [vmem:[#allocation11 + $0x1b18] sm:$0xff] }
 0x3f1   :  { %9053 = vmatprep.subr.bf16.mxu1 %v10944_v44  ;;  %v11038_v44 = vcombine.high %v3029_v32, %v3037_v34  ;;  %v3102_v17 = vld [vmem:[#allocation11 + $0x1b58] sm:$0xff]  ;;  %v11085_v27 = vcombine.low %v3077_v63, %v3085_v0 }
 0x3f3   :  { %8890 = vmatpush1.bf16.msra.mxu0 %v10941_v51  ;;  %v3054_v51 = vld [vmem:[#allocation11 + $0x19d8] sm:$0xff] }
 0x3f4   :  { %9054 = vmatpush1.bf16.msra.mxu1 %v10943_v52  ;;  %8891 = vmatprep.subr.bf16.mxu0 %v10958_v53  ;;  %v11037_v52 = vcombine.low %v3029_v32, %v3037_v34  ;;  %v11039_v53 = vcombine.low %v3030_v47, %v3038_v38  ;;  %v11056_v54 = vcombine.high %v3046_v50, %v3054_v51  ;;  %v3117_v34 = vld [vmem:[#allocation11 + $0x1bd0] sm:$0xff]  ;;  %v3118_v47 = vld [vmem:[#allocation11 + $0x1bd8] sm:$0xff] }
 0x3f5   :  { %9055 = vmatprep.subr.bf16.mxu1 %v10960_v57  ;;  %v11054_v57 = vcombine.high %v3045_v46, %v3053_v49  ;;  %v11102_v32 = vcombine.high %v3093_v7, %v3101_v9 }
 0x3f7   :  { %8892 = vmatpush1.bf16.msra.mxu0 %v10957_v59  ;;  %v3070_v59 = vld [vmem:[#allocation11 + $0x1a58] sm:$0xff] }
 0x3f8   :  { %9056 = vmatpush1.bf16.msra.mxu1 %v10959_v8  ;;  %8893 = vmatprep.subr.bf16.mxu0 %v10974_v61  ;;  %v11053_v8 = vcombine.low %v3045_v46, %v3053_v49  ;;  %v11055_v61 = vcombine.low %v3046_v50, %v3054_v51  ;;  %v11072_v35 = vcombine.high %v3062_v58, %v3070_v59 }
 0x3f9   :  { %9057 = vmatprep.subr.bf16.mxu1 %v10976_v62  ;;  %v11070_v62 = vcombine.high %v3061_v55, %v3069_v56 }
 0x3fb   :  { %8894 = vmatpush1.bf16.msra.mxu0 %v10973_v1  ;;  %v3086_v1 = vld [vmem:[#allocation11 + $0x1ad8] sm:$0xff] }
 0x3fc   :  { %9058 = vmatpush1.bf16.msra.mxu1 %v10975_v2  ;;  %8895 = vmatprep.subr.bf16.mxu0 %v10990_v48  ;;  %v11069_v2 = vcombine.low %v3061_v55, %v3069_v56  ;;  %v3251_v48 = vld [vmem:[#allocation13] sm:$0xff]  ;;  %v11088_v5 = vcombine.high %v3078_v60, %v3086_v1 }
 0x3fd   :  { %9059 = vmatprep.subr.bf16.mxu1 %v10992_v3  ;;  %v11071_v3 = vcombine.low %v3062_v58, %v3070_v59  ;;  %v3270_v26 = vrot.slane %v3251_v48, %v11772_v25  ;;  %v3125_v59 = vld [vmem:[#allocation11 + $0x1c10] sm:$0xff] }
 0x3ff   :  { %8896 = vmatpush1.bf16.msra.mxu0 %v10989_v10  ;;  %v3258_v10 = vrot.slane %v3251_v48, %v11762_v21 }
 0x400   :  { %9060 = vmatpush1.bf16.msra.mxu1 %v10991_v13  ;;  %8906 = vmatprep.subr.bf16.mxu0 %v11006_v14  ;;  %v3266_v13 = vrot.slane %v3251_v48, %v11793_v29  ;;  %v11631_v14 = vmov 1966171168  }
 0x401   :  { %9070 = vmatprep.subr.bf16.mxu1 %v11008_v15  ;;  %v9852_v15 = vunpack.c.l.s4 %v11631_v14 }
 0x402   :  { %8898 = vmatmul.mubr.bf16.vlgmr.msra.gmra.mrb[16].mxu0 %v11858_v22 }
 0x403   :  { %9062 = vmatmul.mubr.bf16.vlgmr.msra.gmra.mrb[16].mxu1 %v11858_v22  ;;  %8907 = vmatpush1.bf16.msra.mxu0 %v11005_v19  ;;  %v3262_v19 = vrot.slane %v3251_v48, %v11767_v23  ;;  %v9853_v50 = vunpack.c.0.s8 %v9852_v15 }
 0x404   :  { %8938 = vmatprep.mubr.bf16.mxu0 %v11862_v41  ;;  %9071 = vmatpush1.bf16.msra.mxu1 %v11007_v30  ;;  %v11895_v30 = vld [vmem:[#allocation11 + $0x1b90] sm:$0xff] }
 0x405   :  { %9102 = vmatprep.mubr.bf16.mxu1 %v11862_v41  ;;  %8908 = vmatprep.subr.bf16.mxu0 %v11022_v31  ;;  %v11087_v31 = vcombine.low %v3078_v60, %v3086_v1  ;;  %v11118_v56 = vcombine.high %v11895_v30, %v3117_v34  ;;  %v11899_v1 = vsub.s32 %v9853_v50, %v11759_v20  ;;  %v3149_v20 = vld [vmem:[#allocation11 + $0x1cd0] sm:$0xff] }
 0x406   :  { %9072 = vmatprep.subr.bf16.mxu1 %v11024_v36  ;;  %v3110_v36 = vld [vmem:[#allocation11 + $0x1b98] sm:$0xff] }
 0x407   :  { %8909 = vmatpush1.bf16.msra.mxu0 %v11021_v39  ;;  %v11120_v58 = vcombine.high %v3110_v36, %v3118_v47 }
 0x408   :  { %9073 = vmatpush1.bf16.msra.mxu1 %v11023_v43  ;;  %8910 = vmatprep.subr.bf16.mxu0 %v11038_v44  ;;  %v11101_v43 = vcombine.low %v3093_v7, %v3101_v9  ;;  %v11104_v44 = vcombine.high %v3094_v16, %v3102_v17  ;;  %v11117_v9 = vcombine.low %v11895_v30, %v3117_v34 }
 0x409   :  { %9074 = vmatprep.subr.bf16.mxu1 %v11040_v45 }
 0x40b   :  { %8911 = vmatpush1.bf16.msra.mxu0 %v11037_v52  ;;  %v11103_v52 = vcombine.low %v3094_v16, %v3102_v17  ;;  %v3141_v17 = vld [vmem:[#allocation11 + $0x1c90] sm:$0xff] }
 0x40c   :  { %9075 = vmatpush1.bf16.msra.mxu1 %v11039_v53  ;;  %8912 = vmatprep.subr.bf16.mxu0 %v11054_v57  ;;  %v11150_v34 = vcombine.high %v3141_v17, %v3149_v20 }
 0x40d   :  { %9076 = vmatprep.subr.bf16.mxu1 %v11056_v54 }
 0x40f   :  { %8913 = vmatpush1.bf16.msra.mxu0 %v11053_v8  ;;  %v3133_v8 = vld [vmem:[#allocation11 + $0x1c50] sm:$0xff] }
 0x410   :  { %9077 = vmatpush1.bf16.msra.mxu1 %v11055_v61  ;;  %8914 = vmatprep.subr.bf16.mxu0 %v11070_v62  ;;  %v11134_v15 = vcombine.high %v3125_v59, %v3133_v8  ;;  %v11133_v30 = vcombine.low %v3125_v59, %v3133_v8  ;;  %v3189_v59 = vld [vmem:[#allocation11 + $0x1e10] sm:$0xff] }
 0x411   :  { %9078 = vmatprep.subr.bf16.mxu1 %v11072_v35  ;;  %v3197_v8 = vld [vmem:[#allocation11 + $0x1e50] sm:$0xff] }
 0x413   :  { %8915 = vmatpush1.bf16.msra.mxu0 %v11069_v2 }
 0x414   :  { %9079 = vmatpush1.bf16.msra.mxu1 %v11071_v3  ;;  %8916 = vmatprep.subr.bf16.mxu0 %v11086_v4  ;;  %v3126_v3 = vld [vmem:[#allocation11 + $0x1c18] sm:$0xff] }
 0x415   :  { %v8612_v38 = vpop.f32.mrb[12].mxu0  ;;  %v8776_v39 = vpop.f32.mrb[12].mxu1  ;;  %9080 = vmatprep.subr.bf16.mxu1 %v11088_v5  ;;  %v3134_v4 = vld [vmem:[#allocation11 + $0x1c58] sm:$0xff] }
 0x416   :  { %v11273_v45 = vadd.f32 %v8612_v38, %v3258_v10  ;;  %v11275_v46 = vadd.f32 %v8776_v39, %v3266_v13  ;;  %v8614_v49 = vpop.f32.mrb[13].mxu0  ;;  %v8778_v51 = vpop.f32.mrb[13].mxu1  ;;  %v11119_v10 = vcombine.low %v3110_v36, %v3118_v47  ;;  %v11136_v16 = vcombine.high %v3126_v3, %v3134_v4  ;;  %v3157_v38 = vld [vmem:[#allocation11 + $0x1d10] sm:$0xff] }
 0x417   :  { %v11274_v53 = vadd.f32 %v8614_v49, %v3262_v19  ;;  %v11276_v57 = vadd.f32 %v8778_v51, %v3270_v26  ;;  %v8616_v54 = vpop.f32.mrb[14].mxu0  ;;  %v8780_v55 = vpop.f32.mrb[14].mxu1  ;;  %8917 = vmatpush1.bf16.msra.mxu0 %v11085_v27  ;;  %v3142_v27 = vld [vmem:[#allocation11 + $0x1c98] sm:$0xff]  ;;  %v3165_v39 = vld [vmem:[#allocation11 + $0x1d50] sm:$0xff] }
 0x418   :  { %vm9767_vm13 = vcmp.ge.f32.partialorder %v11273_v45, 0.0  ;;  %v9783_v61 = vmul.f32 0.2, %v11273_v45  ;;  %vm9769_vm14 = vcmp.ge.f32.partialorder %v11275_v46, 0.0  ;;  %v9785_v62 = vmul.f32 0.2, %v11275_v46  ;;  %9081 = vmatpush1.bf16.msra.mxu1 %v11087_v31  ;;  %8918 = vmatprep.subr.bf16.mxu0 %v11102_v32 }
 0x419   :  { %vm9768_vm15 = vcmp.ge.f32.partialorder %v11274_v53, 0.0  ;;  %v9784_v35 = vmul.f32 0.2, %v11274_v53  ;;  %vm9770_vm0 = vcmp.ge.f32.partialorder %v11276_v57, 0.0  ;;  %v9786_v63 = vmul.f32 0.2, %v11276_v57  ;;  %9082 = vmatprep.subr.bf16.mxu1 %v11104_v44 }
 0x41a   :  { %v9799_v0 = vsel %vm9767_vm13, %v11273_v45, %v9783_v61  ;;  %v9801_v60 = vsel %vm9769_vm14, %v11275_v46, %v9785_v62  ;;  %v8617_v2 = vpop.f32.mrb[15].mxu0  ;;  %v8781_v48 = vpop.f32.mrb[15].mxu1  ;;  %v3150_v31 = vld [vmem:[#allocation11 + $0x1cd8] sm:$0xff]  ;;  %v11135_v32 = vcombine.low %v3126_v3, %v3134_v4  ;;  %v11149_v45 = vcombine.low %v3141_v17, %v3149_v20  ;;  %v3173_v51 = vld [vmem:[#allocation11 + $0x1d90] sm:$0xff] }
 0x41b   :  { %v9800_v5 = vsel %vm9768_vm15, %v11274_v53, %v9784_v35  ;;  %v9802_v7 = vsel %vm9770_vm0, %v11276_v57, %v9786_v63  ;;  %8919 = vmatpush1.bf16.msra.mxu0 %v11101_v43  ;;  %v11152_v47 = vcombine.high %v3142_v27, %v3150_v31  ;;  %v3158_v43 = vld [vmem:[#allocation11 + $0x1d18] sm:$0xff]  ;;  %v11151_v46 = vcombine.low %v3142_v27, %v3150_v31  ;;  %v3205_v2 = vld [vmem:[#allocation11 + $0x1e90] sm:$0xff] }
 0x41c   :  { %v11257_v13 = vpack.c.bf16 %v9800_v5, %v9799_v0  ;;  %v11258_v14 = vpack.c.bf16 %v9802_v7, %v9801_v60  ;;  %9083 = vmatpush1.bf16.msra.mxu1 %v11103_v52  ;;  %8920 = vmatprep.subr.bf16.mxu0 %v11118_v56  ;;  %v3166_v44 = vld [vmem:[#allocation11 + $0x1d58] sm:$0xff]  ;;  %v11166_v49 = vcombine.high %v3157_v38, %v3165_v39  ;;  %v3181_v52 = vld [vmem:[#allocation11 + $0x1dd0] sm:$0xff] }
 0x41d   :  { %9084 = vmatprep.subr.bf16.mxu1 %v11120_v58  ;;  %v11168_v50 = vcombine.high %v3158_v43, %v3166_v44  ;;  %v3174_v53 = vld [vmem:[#allocation11 + $0x1d98] sm:$0xff]  ;;  %v11165_v54 = vcombine.low %v3157_v38, %v3165_v39  ;;  %v11167_v55 = vcombine.low %v3158_v43, %v3166_v44  ;;  %v11182_v56 = vcombine.high %v3173_v51, %v3181_v52  ;;  %v3213_v48 = vld [vmem:[#allocation11 + $0x1ed0] sm:$0xff] }
 0x41e   :  { %v11903_v19 = vrot.slane %v11257_v13, %v11899_v1  ;;  %v11906_v26 = vrot.slane %v11258_v14, %v11899_v1  ;;  %v3182_v57 = vld [vmem:[#allocation11 + $0x1dd8] sm:$0xff]  ;;  %v11181_v35 = vcombine.low %v3173_v51, %v3181_v52  ;;  %v11198_v0 = vcombine.high %v3189_v59, %v3197_v8  ;;  %v3221_v13 = vld [vmem:[#allocation11 + $0x1f10] sm:$0xff] }
 0x41f   :  { %8921 = vmatpush1.bf16.msra.mxu0 %v11117_v9  ;;  %v11184_v58 = vcombine.high %v3174_v53, %v3182_v57  ;;  %v3190_v61 = vld [vmem:[#allocation11 + $0x1e18] sm:$0xff]  ;;  %v11183_v63 = vcombine.low %v3174_v53, %v3182_v57  ;;  %v11197_v5 = vcombine.low %v3189_v59, %v3197_v8  ;;  %v11214_v9 = vcombine.high %v3205_v2, %v3213_v48  ;;  %v3229_v14 = vld [vmem:[#allocation11 + $0x1f50] sm:$0xff]  ;;  %v2256_v59 = vld [vmem:[#allocation11 + $0xe8] sm:$0xff] }
 0x420   :  { %9085 = vmatpush1.bf16.msra.mxu1 %v11119_v10  ;;  %8922 = vmatprep.subr.bf16.mxu0 %v11134_v15  ;;  %v9879_v36 = vcombine.low %v11903_v19, %v11906_v26  ;;  %v3198_v62 = vld [vmem:[#allocation11 + $0x1e58] sm:$0xff]  ;;  %v11213_v17 = vcombine.low %v3205_v2, %v3213_v48  ;;  %v11230_v27 = vcombine.high %v3221_v13, %v3229_v14 }
 0x421   :  { %9086 = vmatprep.subr.bf16.mxu1 %v11136_v16  ;;  %v11200_v60 = vcombine.high %v3190_v61, %v3198_v62  ;;  %v3206_v3 = vld [vmem:[#allocation11 + $0x1e98] sm:$0xff]  ;;  %v11199_v7 = vcombine.low %v3190_v61, %v3198_v62  ;;  %v11229_v38 = vcombine.low %v3221_v13, %v3229_v14  ;;  %v2263_v62 = vld [vmem:[#allocation11 + $0x120] sm:$0xff] }
 0x422   :  { %v3214_v4 = vld [vmem:[#allocation11 + $0x1ed8] sm:$0xff] }
 0x423   :  { %8923 = vmatpush1.bf16.msra.mxu0 %v11133_v30  ;;  %v11216_v10 = vcombine.high %v3206_v3, %v3214_v4  ;;  %v3222_v15 = vld [vmem:[#allocation11 + $0x1f18] sm:$0xff]  ;;  %v11215_v20 = vcombine.low %v3206_v3, %v3214_v4  ;;  %v3237_v30 = vld [vmem:[#allocation11 + $0x1f90] sm:$0xff] }
 0x424   :  { %9087 = vmatpush1.bf16.msra.mxu1 %v11135_v32  ;;  %8924 = vmatprep.subr.bf16.mxu0 %v11150_v34  ;;  %v3230_v16 = vld [vmem:[#allocation11 + $0x1f58] sm:$0xff]  ;;  %v3245_v32 = vld [vmem:[#allocation11 + $0x1fd0] sm:$0xff] }
 0x425   :  { %9088 = vmatprep.subr.bf16.mxu1 %v11152_v47  ;;  %v11232_v31 = vcombine.high %v3222_v15, %v3230_v16  ;;  %v3238_v34 = vld [vmem:[#allocation11 + $0x1f98] sm:$0xff]  ;;  %v11231_v39 = vcombine.low %v3222_v15, %v3230_v16  ;;  %v11246_v43 = vcombine.high %v3237_v30, %v3245_v32  ;;  %v11245_v51 = vcombine.low %v3237_v30, %v3245_v32 }
 0x426   :  { %v3246_v47 = vld [vmem:[#allocation11 + $0x1fd8] sm:$0xff] }
 0x427   :  { %8925 = vmatpush1.bf16.msra.mxu0 %v11149_v45  ;;  %v11248_v44 = vcombine.high %v3238_v34, %v3246_v47  ;;  %v2231_v45 = vld [vmem:[#allocation11 + $0x20] sm:$0xff]  ;;  %v11247_v52 = vcombine.low %v3238_v34, %v3246_v47 }
 0x428   :  { %9089 = vmatpush1.bf16.msra.mxu1 %v11151_v46  ;;  %8926 = vmatprep.subr.bf16.mxu0 %v11166_v49  ;;  %v2239_v46 = vld [vmem:[#allocation11 + $0x60] sm:$0xff]  ;;  %v2232_v49 = vld [vmem:[#allocation11 + $0x28] sm:$0xff] }
 0x429   :  { %9090 = vmatprep.subr.bf16.mxu1 %v11168_v50  ;;  %v2240_v50 = vld [vmem:[#allocation11 + $0x68] sm:$0xff]  ;;  %v10242_v53 = vcombine.high %v2231_v45, %v2239_v46 }
 0x42a   :  { %v10244_v57 = vcombine.high %v2232_v49, %v2240_v50  ;;  %v10243_v8 = vcombine.low %v2232_v49, %v2240_v50 }
 0x42b   :  { %8927 = vmatpush1.bf16.msra.mxu0 %v11165_v54  ;;  %v2247_v54 = vld [vmem:[#allocation11 + $0xa0] sm:$0xff] }
 0x42c   :  { %9091 = vmatpush1.bf16.msra.mxu1 %v11167_v55  ;;  %8928 = vmatprep.subr.bf16.mxu0 %v11182_v56  ;;  %v2255_v55 = vld [vmem:[#allocation11 + $0xe0] sm:$0xff]  ;;  %v10241_v56 = vcombine.low %v2231_v45, %v2239_v46 }
 0x42d   :  { %9092 = vmatprep.subr.bf16.mxu1 %v11184_v58  ;;  %v2248_v58 = vld [vmem:[#allocation11 + $0xa8] sm:$0xff]  ;;  %v10258_v61 = vcombine.high %v2247_v54, %v2255_v55  ;;  %v10257_v2 = vcombine.low %v2247_v54, %v2255_v55 }
 0x42e   :  { %v10259_v48 = vcombine.low %v2248_v58, %v2256_v59 }
 0x42f   :  { %8929 = vmatpush1.bf16.msra.mxu0 %v11181_v35  ;;  %v2271_v35 = vld [vmem:[#allocation11 + $0x160] sm:$0xff] }
 0x430   :  { %9093 = vmatpush1.bf16.msra.mxu1 %v11183_v63  ;;  %8930 = vmatprep.subr.bf16.mxu0 %v11198_v0  ;;  %v10260_v63 = vcombine.high %v2248_v58, %v2256_v59  ;;  %v2264_v0 = vld [vmem:[#allocation11 + $0x128] sm:$0xff]  ;;  %v10274_v3 = vcombine.high %v2263_v62, %v2271_v35  ;;  %v10273_v13 = vcombine.low %v2263_v62, %v2271_v35  ;;  %v2343_v59 = vld [vmem:[#allocation11 + $0x3a0] sm:$0xff] }
 0x431   :  { %9094 = vmatprep.subr.bf16.mxu1 %v11200_v60  ;;  %v2272_v60 = vld [vmem:[#allocation11 + $0x168] sm:$0xff] }
 0x432   :  { %v10276_v4 = vcombine.high %v2264_v0, %v2272_v60  ;;  %v10275_v14 = vcombine.low %v2264_v0, %v2272_v60  ;;  %v2352_v62 = vld [vmem:[#allocation11 + $0x3e8] sm:$0xff] }
 0x433   :  { %8931 = vmatpush1.bf16.msra.mxu0 %v11197_v5  ;;  %v2279_v5 = vld [vmem:[#allocation11 + $0x1a0] sm:$0xff] }
 0x434   :  { %9095 = vmatpush1.bf16.msra.mxu1 %v11199_v7  ;;  %8932 = vmatprep.subr.bf16.mxu0 %v11214_v9  ;;  %v2287_v7 = vld [vmem:[#allocation11 + $0x1e0] sm:$0xff]  ;;  %v2280_v9 = vld [vmem:[#allocation11 + $0x1a8] sm:$0xff] }
 0x435   :  { %9096 = vmatprep.subr.bf16.mxu1 %v11216_v10  ;;  %v2288_v10 = vld [vmem:[#allocation11 + $0x1e8] sm:$0xff]  ;;  %v10290_v15 = vcombine.high %v2279_v5, %v2287_v7  ;;  %v10289_v30 = vcombine.low %v2279_v5, %v2287_v7 }
 0x436   :  { %v10292_v16 = vcombine.high %v2280_v9, %v2288_v10  ;;  %v10291_v32 = vcombine.low %v2280_v9, %v2288_v10 }
 0x437   :  { %8933 = vmatpush1.bf16.msra.mxu0 %v11213_v17  ;;  %v2295_v17 = vld [vmem:[#allocation11 + $0x220] sm:$0xff] }
 0x438   :  { %9097 = vmatpush1.bf16.msra.mxu1 %v11215_v20  ;;  %8934 = vmatprep.subr.bf16.mxu0 %v11230_v27  ;;  %v2303_v20 = vld [vmem:[#allocation11 + $0x260] sm:$0xff]  ;;  %v2296_v27 = vld [vmem:[#allocation11 + $0x228] sm:$0xff] }
 0x439   :  { %9098 = vmatprep.subr.bf16.mxu1 %v11232_v31  ;;  %v2304_v31 = vld [vmem:[#allocation11 + $0x268] sm:$0xff]  ;;  %v10306_v34 = vcombine.high %v2295_v17, %v2303_v20  ;;  %v10305_v45 = vcombine.low %v2295_v17, %v2303_v20 }
 0x43a   :  { %v10308_v47 = vcombine.high %v2296_v27, %v2304_v31  ;;  %v10307_v46 = vcombine.low %v2296_v27, %v2304_v31 }
 0x43b   :  { %8935 = vmatpush1.bf16.msra.mxu0 %v11229_v38  ;;  %v2311_v38 = vld [vmem:[#allocation11 + $0x2a0] sm:$0xff] }
 0x43c   :  { %9099 = vmatpush1.bf16.msra.mxu1 %v11231_v39  ;;  %8936 = vmatprep.subr.bf16.mxu0 %v11246_v43  ;;  %v2319_v39 = vld [vmem:[#allocation11 + $0x2e0] sm:$0xff]  ;;  %v2312_v43 = vld [vmem:[#allocation11 + $0x2a8] sm:$0xff] }
 0x43d   :  { %9100 = vmatprep.subr.bf16.mxu1 %v11248_v44  ;;  %v2320_v44 = vld [vmem:[#allocation11 + $0x2e8] sm:$0xff]  ;;  %v10322_v49 = vcombine.high %v2311_v38, %v2319_v39  ;;  %v10321_v54 = vcombine.low %v2311_v38, %v2319_v39 }
 0x43e   :  { %v10324_v50 = vcombine.high %v2312_v43, %v2320_v44  ;;  %v10323_v55 = vcombine.low %v2312_v43, %v2320_v44 }
 0x43f   :  { %8937 = vmatpush1.bf16.msra.mxu0 %v11245_v51  ;;  %v2327_v51 = vld [vmem:[#allocation11 + $0x320] sm:$0xff] }
 0x440   :  { %9101 = vmatpush1.bf16.msra.mxu1 %v11247_v52  ;;  %9111 = vmatprep.subr.bf16.mxu0 %v10242_v53  ;;  %v2335_v52 = vld [vmem:[#allocation11 + $0x360] sm:$0xff]  ;;  %v2328_v53 = vld [vmem:[#allocation11 + $0x328] sm:$0xff] }
 0x441   :  { %9275 = vmatprep.subr.bf16.mxu1 %v10244_v57  ;;  %v2336_v57 = vld [vmem:[#allocation11 + $0x368] sm:$0xff]  ;;  %v10337_v35 = vcombine.low %v2327_v51, %v2335_v52 }
 0x442   :  { %8939 = vmatmul.mubr.bf16.vlgmr.msra.gmra.mrb[16].mxu0 %v11873_v12  ;;  %v10340_v58 = vcombine.high %v2328_v53, %v2336_v57 }
 0x443   :  { %9103 = vmatmul.mubr.bf16.vlgmr.msra.gmra.mrb[16].mxu1 %v11873_v12  ;;  %9112 = vmatpush1.bf16.msra.mxu0 %v10241_v56  ;;  %v10338_v56 = vcombine.high %v2327_v51, %v2335_v52 }
 0x444   :  { %9143 = vmatprep.mubr.bf16.mxu0 %v11820_v6  ;;  %9276 = vmatpush1.bf16.msra.mxu1 %v10243_v8  ;;  %v2351_v8 = vld [vmem:[#allocation11 + $0x3e0] sm:$0xff] }
 0x445   :  { %9307 = vmatprep.mubr.bf16.mxu1 %v11820_v6  ;;  %9113 = vmatprep.subr.bf16.mxu0 %v10258_v61  ;;  %v2344_v61 = vld [vmem:[#allocation11 + $0x3a8] sm:$0xff]  ;;  %v10354_v0 = vcombine.high %v2343_v59, %v2351_v8  ;;  %v10353_v5 = vcombine.low %v2343_v59, %v2351_v8 }
 0x446   :  { %9277 = vmatprep.subr.bf16.mxu1 %v10260_v63  ;;  %v10339_v63 = vcombine.low %v2328_v53, %v2336_v57  ;;  %v10356_v60 = vcombine.high %v2344_v61, %v2352_v62  ;;  %v10355_v7 = vcombine.low %v2344_v61, %v2352_v62 }
 0x447   :  { %9114 = vmatpush1.bf16.msra.mxu0 %v10257_v2  ;;  %v2359_v2 = vld [vmem:[#allocation11 + $0x420] sm:$0xff] }
 0x448   :  { %9278 = vmatpush1.bf16.msra.mxu1 %v10259_v48  ;;  %9115 = vmatprep.subr.bf16.mxu0 %v10274_v3  ;;  %v2367_v48 = vld [vmem:[#allocation11 + $0x460] sm:$0xff]  ;;  %v2360_v3 = vld [vmem:[#allocation11 + $0x428] sm:$0xff] }
 0x449   :  { %9279 = vmatprep.subr.bf16.mxu1 %v10276_v4  ;;  %v2368_v4 = vld [vmem:[#allocation11 + $0x468] sm:$0xff]  ;;  %v10370_v9 = vcombine.high %v2359_v2, %v2367_v48  ;;  %v10369_v17 = vcombine.low %v2359_v2, %v2367_v48 }
 0x44a   :  { %v10372_v10 = vcombine.high %v2360_v3, %v2368_v4  ;;  %v10371_v20 = vcombine.low %v2360_v3, %v2368_v4 }
 0x44b   :  { %9116 = vmatpush1.bf16.msra.mxu0 %v10273_v13  ;;  %v2375_v13 = vld [vmem:[#allocation11 + $0x4a0] sm:$0xff] }
 0x44c   :  { %9280 = vmatpush1.bf16.msra.mxu1 %v10275_v14  ;;  %9117 = vmatprep.subr.bf16.mxu0 %v10290_v15  ;;  %v2383_v14 = vld [vmem:[#allocation11 + $0x4e0] sm:$0xff]  ;;  %v2376_v15 = vld [vmem:[#allocation11 + $0x4a8] sm:$0xff] }
 0x44d   :  { %9281 = vmatprep.subr.bf16.mxu1 %v10292_v16  ;;  %v2384_v16 = vld [vmem:[#allocation11 + $0x4e8] sm:$0xff]  ;;  %v10386_v27 = vcombine.high %v2375_v13, %v2383_v14  ;;  %v10385_v38 = vcombine.low %v2375_v13, %v2383_v14 }
 0x44e   :  { %v10388_v31 = vcombine.high %v2376_v15, %v2384_v16  ;;  %v10387_v39 = vcombine.low %v2376_v15, %v2384_v16 }
 0x44f   :  { %9118 = vmatpush1.bf16.msra.mxu0 %v10289_v30  ;;  %v2391_v30 = vld [vmem:[#allocation11 + $0x520] sm:$0xff] }
 0x450   :  { %9282 = vmatpush1.bf16.msra.mxu1 %v10291_v32  ;;  %9119 = vmatprep.subr.bf16.mxu0 %v10306_v34  ;;  %v2399_v32 = vld [vmem:[#allocation11 + $0x560] sm:$0xff]  ;;  %v2392_v34 = vld [vmem:[#allocation11 + $0x528] sm:$0xff] }
 0x451   :  { %9283 = vmatprep.subr.bf16.mxu1 %v10308_v47  ;;  %v2400_v47 = vld [vmem:[#allocation11 + $0x568] sm:$0xff]  ;;  %v10402_v43 = vcombine.high %v2391_v30, %v2399_v32  ;;  %v10401_v51 = vcombine.low %v2391_v30, %v2399_v32 }
 0x452   :  { %v10404_v44 = vcombine.high %v2392_v34, %v2400_v47  ;;  %v10403_v52 = vcombine.low %v2392_v34, %v2400_v47 }
 0x453   :  { %9120 = vmatpush1.bf16.msra.mxu0 %v10305_v45  ;;  %v2407_v45 = vld [vmem:[#allocation11 + $0x5a0] sm:$0xff] }
 0x454   :  { %9284 = vmatpush1.bf16.msra.mxu1 %v10307_v46  ;;  %9121 = vmatprep.subr.bf16.mxu0 %v10322_v49  ;;  %v2415_v46 = vld [vmem:[#allocation11 + $0x5e0] sm:$0xff]  ;;  %v2408_v49 = vld [vmem:[#allocation11 + $0x5a8] sm:$0xff] }
 0x455   :  { %9285 = vmatprep.subr.bf16.mxu1 %v10324_v50  ;;  %v2416_v50 = vld [vmem:[#allocation11 + $0x5e8] sm:$0xff]  ;;  %v10418_v53 = vcombine.high %v2407_v45, %v2415_v46  ;;  %v10417_v59 = vcombine.low %v2407_v45, %v2415_v46 }
 0x456   :  { %v10420_v57 = vcombine.high %v2408_v49, %v2416_v50  ;;  %v10419_v8 = vcombine.low %v2408_v49, %v2416_v50 }
 0x457   :  { %9122 = vmatpush1.bf16.msra.mxu0 %v10321_v54  ;;  %v2423_v54 = vld [vmem:[#allocation11 + $0x620] sm:$0xff] }
 0x458   :  { %9286 = vmatpush1.bf16.msra.mxu1 %v10323_v55  ;;  %9123 = vmatprep.subr.bf16.mxu0 %v10338_v56  ;;  %v2431_v55 = vld [vmem:[#allocation11 + $0x660] sm:$0xff]  ;;  %v2424_v56 = vld [vmem:[#allocation11 + $0x628] sm:$0xff] }
 0x459   :  { %9287 = vmatprep.subr.bf16.mxu1 %v10340_v58  ;;  %v2432_v58 = vld [vmem:[#allocation11 + $0x668] sm:$0xff]  ;;  %v10434_v61 = vcombine.high %v2423_v54, %v2431_v55  ;;  %v10433_v2 = vcombine.low %v2423_v54, %v2431_v55 }
 0x45a   :  { %v10436_v62 = vcombine.high %v2424_v56, %v2432_v58  ;;  %v10435_v48 = vcombine.low %v2424_v56, %v2432_v58  ;;  %v2512_v54 = vld [vmem:[#allocation11 + $0x8e8] sm:$0xff]  ;;  %v2519_v58 = vld [vmem:[#allocation11 + $0x920] sm:$0xff] }
 0x45b   :  { %9124 = vmatpush1.bf16.msra.mxu0 %v10337_v35  ;;  %v2439_v35 = vld [vmem:[#allocation11 + $0x6a0] sm:$0xff] }
 0x45c   :  { %9288 = vmatpush1.bf16.msra.mxu1 %v10339_v63  ;;  %9125 = vmatprep.subr.bf16.mxu0 %v10354_v0  ;;  %v2447_v63 = vld [vmem:[#allocation11 + $0x6e0] sm:$0xff]  ;;  %v2440_v0 = vld [vmem:[#allocation11 + $0x6a8] sm:$0xff] }
 0x45d   :  { %9289 = vmatprep.subr.bf16.mxu1 %v10356_v60  ;;  %v2448_v60 = vld [vmem:[#allocation11 + $0x6e8] sm:$0xff]  ;;  %v10450_v3 = vcombine.high %v2439_v35, %v2447_v63  ;;  %v10449_v13 = vcombine.low %v2439_v35, %v2447_v63 }
 0x45e   :  { %v10452_v4 = vcombine.high %v2440_v0, %v2448_v60  ;;  %v10451_v14 = vcombine.low %v2440_v0, %v2448_v60 }
 0x45f   :  { %9126 = vmatpush1.bf16.msra.mxu0 %v10353_v5  ;;  %v2455_v5 = vld [vmem:[#allocation11 + $0x720] sm:$0xff] }
 0x460   :  { %9290 = vmatpush1.bf16.msra.mxu1 %v10355_v7  ;;  %9127 = vmatprep.subr.bf16.mxu0 %v10370_v9  ;;  %v2463_v7 = vld [vmem:[#allocation11 + $0x760] sm:$0xff]  ;;  %v2456_v9 = vld [vmem:[#allocation11 + $0x728] sm:$0xff] }
 0x461   :  { %9291 = vmatprep.subr.bf16.mxu1 %v10372_v10  ;;  %v2464_v10 = vld [vmem:[#allocation11 + $0x768] sm:$0xff]  ;;  %v10466_v15 = vcombine.high %v2455_v5, %v2463_v7  ;;  %v10465_v30 = vcombine.low %v2455_v5, %v2463_v7 }
 0x462   :  { %v10468_v16 = vcombine.high %v2456_v9, %v2464_v10  ;;  %v10467_v32 = vcombine.low %v2456_v9, %v2464_v10 }
 0x463   :  { %9128 = vmatpush1.bf16.msra.mxu0 %v10369_v17  ;;  %v2471_v17 = vld [vmem:[#allocation11 + $0x7a0] sm:$0xff] }
 0x464   :  { %9292 = vmatpush1.bf16.msra.mxu1 %v10371_v20  ;;  %9129 = vmatprep.subr.bf16.mxu0 %v10386_v27  ;;  %v2479_v20 = vld [vmem:[#allocation11 + $0x7e0] sm:$0xff]  ;;  %v2472_v27 = vld [vmem:[#allocation11 + $0x7a8] sm:$0xff] }
 0x465   :  { %9293 = vmatprep.subr.bf16.mxu1 %v10388_v31  ;;  %v2480_v31 = vld [vmem:[#allocation11 + $0x7e8] sm:$0xff]  ;;  %v10482_v34 = vcombine.high %v2471_v17, %v2479_v20  ;;  %v10481_v45 = vcombine.low %v2471_v17, %v2479_v20 }
 0x466   :  { %v10484_v47 = vcombine.high %v2472_v27, %v2480_v31  ;;  %v10483_v46 = vcombine.low %v2472_v27, %v2480_v31 }
 0x467   :  { %9130 = vmatpush1.bf16.msra.mxu0 %v10385_v38  ;;  %v2487_v38 = vld [vmem:[#allocation11 + $0x820] sm:$0xff] }
 0x468   :  { %9294 = vmatpush1.bf16.msra.mxu1 %v10387_v39  ;;  %9131 = vmatprep.subr.bf16.mxu0 %v10402_v43  ;;  %v2495_v39 = vld [vmem:[#allocation11 + $0x860] sm:$0xff]  ;;  %v2488_v43 = vld [vmem:[#allocation11 + $0x828] sm:$0xff] }
 0x469   :  { %9295 = vmatprep.subr.bf16.mxu1 %v10404_v44  ;;  %v2496_v44 = vld [vmem:[#allocation11 + $0x868] sm:$0xff]  ;;  %v10498_v49 = vcombine.high %v2487_v38, %v2495_v39 }
 0x46a   :  { %v10500_v50 = vcombine.high %v2488_v43, %v2496_v44  ;;  %v10499_v55 = vcombine.low %v2488_v43, %v2496_v44 }
 0x46b   :  { %9132 = vmatpush1.bf16.msra.mxu0 %v10401_v51  ;;  %v2503_v51 = vld [vmem:[#allocation11 + $0x8a0] sm:$0xff] }
 0x46c   :  { %9296 = vmatpush1.bf16.msra.mxu1 %v10403_v52  ;;  %9133 = vmatprep.subr.bf16.mxu0 %v10418_v53  ;;  %v2511_v52 = vld [vmem:[#allocation11 + $0x8e0] sm:$0xff]  ;;  %v10497_v53 = vcombine.low %v2487_v38, %v2495_v39 }
 0x46d   :  { %9297 = vmatprep.subr.bf16.mxu1 %v10420_v57  ;;  %v2504_v57 = vld [vmem:[#allocation11 + $0x8a8] sm:$0xff]  ;;  %v10514_v56 = vcombine.high %v2503_v51, %v2511_v52  ;;  %v10513_v35 = vcombine.low %v2503_v51, %v2511_v52 }
 0x46e   :  { %v10515_v63 = vcombine.low %v2504_v57, %v2512_v54 }
 0x46f   :  { %9134 = vmatpush1.bf16.msra.mxu0 %v10417_v59  ;;  %v2527_v59 = vld [vmem:[#allocation11 + $0x960] sm:$0xff] }
 0x470   :  { %9298 = vmatpush1.bf16.msra.mxu1 %v10419_v8  ;;  %9135 = vmatprep.subr.bf16.mxu0 %v10434_v61  ;;  %v10516_v8 = vcombine.high %v2504_v57, %v2512_v54  ;;  %v2520_v61 = vld [vmem:[#allocation11 + $0x928] sm:$0xff]  ;;  %v10530_v0 = vcombine.high %v2519_v58, %v2527_v59  ;;  %v10529_v5 = vcombine.low %v2519_v58, %v2527_v59  ;;  %v2599_v54 = vld [vmem:[#allocation11 + $0xba0] sm:$0xff] }
 0x471   :  { %9299 = vmatprep.subr.bf16.mxu1 %v10436_v62  ;;  %v2528_v62 = vld [vmem:[#allocation11 + $0x968] sm:$0xff] }
 0x472   :  { %v10532_v60 = vcombine.high %v2520_v61, %v2528_v62  ;;  %v10531_v7 = vcombine.low %v2520_v61, %v2528_v62  ;;  %v2608_v58 = vld [vmem:[#allocation11 + $0xbe8] sm:$0xff] }
 0x473   :  { %9136 = vmatpush1.bf16.msra.mxu0 %v10433_v2  ;;  %v2535_v2 = vld [vmem:[#allocation11 + $0x9a0] sm:$0xff] }
 0x474   :  { %9300 = vmatpush1.bf16.msra.mxu1 %v10435_v48  ;;  %9137 = vmatprep.subr.bf16.mxu0 %v10450_v3  ;;  %v2543_v48 = vld [vmem:[#allocation11 + $0x9e0] sm:$0xff]  ;;  %v2536_v3 = vld [vmem:[#allocation11 + $0x9a8] sm:$0xff] }
 0x475   :  { %9301 = vmatprep.subr.bf16.mxu1 %v10452_v4  ;;  %v2544_v4 = vld [vmem:[#allocation11 + $0x9e8] sm:$0xff]  ;;  %v10546_v9 = vcombine.high %v2535_v2, %v2543_v48  ;;  %v10545_v17 = vcombine.low %v2535_v2, %v2543_v48 }
 0x476   :  { %v10548_v10 = vcombine.high %v2536_v3, %v2544_v4  ;;  %v10547_v20 = vcombine.low %v2536_v3, %v2544_v4 }
 0x477   :  { %9138 = vmatpush1.bf16.msra.mxu0 %v10449_v13  ;;  %v2551_v13 = vld [vmem:[#allocation11 + $0xa20] sm:$0xff] }
 0x478   :  { %9302 = vmatpush1.bf16.msra.mxu1 %v10451_v14  ;;  %9139 = vmatprep.subr.bf16.mxu0 %v10466_v15  ;;  %v2559_v14 = vld [vmem:[#allocation11 + $0xa60] sm:$0xff]  ;;  %v2552_v15 = vld [vmem:[#allocation11 + $0xa28] sm:$0xff] }
 0x479   :  { %9303 = vmatprep.subr.bf16.mxu1 %v10468_v16  ;;  %v2560_v16 = vld [vmem:[#allocation11 + $0xa68] sm:$0xff]  ;;  %v10562_v27 = vcombine.high %v2551_v13, %v2559_v14  ;;  %v10561_v38 = vcombine.low %v2551_v13, %v2559_v14 }
 0x47a   :  { %v10564_v31 = vcombine.high %v2552_v15, %v2560_v16  ;;  %v10563_v39 = vcombine.low %v2552_v15, %v2560_v16 }
 0x47b   :  { %9140 = vmatpush1.bf16.msra.mxu0 %v10465_v30  ;;  %v2567_v30 = vld [vmem:[#allocation11 + $0xaa0] sm:$0xff] }
 0x47c   :  { %9304 = vmatpush1.bf16.msra.mxu1 %v10467_v32  ;;  %9141 = vmatprep.subr.bf16.mxu0 %v10482_v34  ;;  %v2575_v32 = vld [vmem:[#allocation11 + $0xae0] sm:$0xff]  ;;  %v2568_v34 = vld [vmem:[#allocation11 + $0xaa8] sm:$0xff] }
 0x47d   :  { %9305 = vmatprep.subr.bf16.mxu1 %v10484_v47  ;;  %v2576_v47 = vld [vmem:[#allocation11 + $0xae8] sm:$0xff]  ;;  %v10578_v43 = vcombine.high %v2567_v30, %v2575_v32  ;;  %v10577_v51 = vcombine.low %v2567_v30, %v2575_v32 }
 0x47e   :  { %v10580_v44 = vcombine.high %v2568_v34, %v2576_v47  ;;  %v10579_v52 = vcombine.low %v2568_v34, %v2576_v47 }
 0x47f   :  { %9142 = vmatpush1.bf16.msra.mxu0 %v10481_v45  ;;  %v2583_v45 = vld [vmem:[#allocation11 + $0xb20] sm:$0xff] }
 0x480   :  { %9306 = vmatpush1.bf16.msra.mxu1 %v10483_v46  ;;  %9152 = vmatprep.subr.bf16.mxu0 %v10498_v49  ;;  %v2591_v46 = vld [vmem:[#allocation11 + $0xb60] sm:$0xff]  ;;  %v2584_v49 = vld [vmem:[#allocation11 + $0xb28] sm:$0xff] }
 0x481   :  { %9316 = vmatprep.subr.bf16.mxu1 %v10500_v50  ;;  %v2592_v50 = vld [vmem:[#allocation11 + $0xb68] sm:$0xff]  ;;  %v10593_v59 = vcombine.low %v2583_v45, %v2591_v46 }
 0x482   :  { %9144 = vmatmul.mubr.bf16.vlgmr.msra.gmra.mrb[20].mxu0 %v11822_v11  ;;  %v10596_v57 = vcombine.high %v2584_v49, %v2592_v50 }
 0x483   :  { %9308 = vmatmul.mubr.bf16.vlgmr.msra.gmra.mrb[20].mxu1 %v11822_v11  ;;  %9153 = vmatpush1.bf16.msra.mxu0 %v10497_v53  ;;  %v10594_v53 = vcombine.high %v2583_v45, %v2591_v46 }
 0x484   :  { %9184 = vmatprep.mubr.bf16.mxu0 %v11826_v18  ;;  %9317 = vmatpush1.bf16.msra.mxu1 %v10499_v55  ;;  %v2607_v55 = vld [vmem:[#allocation11 + $0xbe0] sm:$0xff] }
 0x485   :  { %9348 = vmatprep.mubr.bf16.mxu1 %v11826_v18  ;;  %9154 = vmatprep.subr.bf16.mxu0 %v10514_v56  ;;  %v2600_v56 = vld [vmem:[#allocation11 + $0xba8] sm:$0xff]  ;;  %v10610_v61 = vcombine.high %v2599_v54, %v2607_v55  ;;  %v10609_v2 = vcombine.low %v2599_v54, %v2607_v55 }
 0x486   :  { %9318 = vmatprep.subr.bf16.mxu1 %v10516_v8  ;;  %v10595_v8 = vcombine.low %v2584_v49, %v2592_v50  ;;  %v10612_v62 = vcombine.high %v2600_v56, %v2608_v58  ;;  %v10611_v48 = vcombine.low %v2600_v56, %v2608_v58 }
 0x487   :  { %9155 = vmatpush1.bf16.msra.mxu0 %v10513_v35  ;;  %v2615_v35 = vld [vmem:[#allocation11 + $0xc20] sm:$0xff] }
 0x488   :  { %9319 = vmatpush1.bf16.msra.mxu1 %v10515_v63  ;;  %9156 = vmatprep.subr.bf16.mxu0 %v10530_v0  ;;  %v2623_v63 = vld [vmem:[#allocation11 + $0xc60] sm:$0xff]  ;;  %v2616_v0 = vld [vmem:[#allocation11 + $0xc28] sm:$0xff] }
 0x489   :  { %9320 = vmatprep.subr.bf16.mxu1 %v10532_v60  ;;  %v2624_v60 = vld [vmem:[#allocation11 + $0xc68] sm:$0xff]  ;;  %v10626_v3 = vcombine.high %v2615_v35, %v2623_v63  ;;  %v10625_v13 = vcombine.low %v2615_v35, %v2623_v63 }
 0x48a   :  { %v10628_v4 = vcombine.high %v2616_v0, %v2624_v60  ;;  %v10627_v14 = vcombine.low %v2616_v0, %v2624_v60 }
 0x48b   :  { %9157 = vmatpush1.bf16.msra.mxu0 %v10529_v5  ;;  %v2631_v5 = vld [vmem:[#allocation11 + $0xca0] sm:$0xff] }
 0x48c   :  { %9321 = vmatpush1.bf16.msra.mxu1 %v10531_v7  ;;  %9158 = vmatprep.subr.bf16.mxu0 %v10546_v9  ;;  %v2639_v7 = vld [vmem:[#allocation11 + $0xce0] sm:$0xff]  ;;  %v2632_v9 = vld [vmem:[#allocation11 + $0xca8] sm:$0xff] }
 0x48d   :  { %9322 = vmatprep.subr.bf16.mxu1 %v10548_v10  ;;  %v2640_v10 = vld [vmem:[#allocation11 + $0xce8] sm:$0xff]  ;;  %v10642_v15 = vcombine.high %v2631_v5, %v2639_v7  ;;  %v10641_v30 = vcombine.low %v2631_v5, %v2639_v7 }
 0x48e   :  { %v10644_v16 = vcombine.high %v2632_v9, %v2640_v10  ;;  %v10643_v32 = vcombine.low %v2632_v9, %v2640_v10 }
 0x48f   :  { %9159 = vmatpush1.bf16.msra.mxu0 %v10545_v17  ;;  %v2647_v17 = vld [vmem:[#allocation11 + $0xd20] sm:$0xff] }
 0x490   :  { %9323 = vmatpush1.bf16.msra.mxu1 %v10547_v20  ;;  %9160 = vmatprep.subr.bf16.mxu0 %v10562_v27  ;;  %v2655_v20 = vld [vmem:[#allocation11 + $0xd60] sm:$0xff]  ;;  %v2648_v27 = vld [vmem:[#allocation11 + $0xd28] sm:$0xff] }
 0x491   :  { %9324 = vmatprep.subr.bf16.mxu1 %v10564_v31  ;;  %v2656_v31 = vld [vmem:[#allocation11 + $0xd68] sm:$0xff]  ;;  %v10658_v34 = vcombine.high %v2647_v17, %v2655_v20  ;;  %v10657_v45 = vcombine.low %v2647_v17, %v2655_v20 }
 0x492   :  { %v10660_v47 = vcombine.high %v2648_v27, %v2656_v31  ;;  %v10659_v46 = vcombine.low %v2648_v27, %v2656_v31 }
 0x493   :  { %9161 = vmatpush1.bf16.msra.mxu0 %v10561_v38  ;;  %v2663_v38 = vld [vmem:[#allocation11 + $0xda0] sm:$0xff] }
 0x494   :  { %9325 = vmatpush1.bf16.msra.mxu1 %v10563_v39  ;;  %9162 = vmatprep.subr.bf16.mxu0 %v10578_v43  ;;  %v2671_v39 = vld [vmem:[#allocation11 + $0xde0] sm:$0xff]  ;;  %v2664_v43 = vld [vmem:[#allocation11 + $0xda8] sm:$0xff] }
 0x495   :  { %9326 = vmatprep.subr.bf16.mxu1 %v10580_v44  ;;  %v2672_v44 = vld [vmem:[#allocation11 + $0xde8] sm:$0xff]  ;;  %v10674_v49 = vcombine.high %v2663_v38, %v2671_v39  ;;  %v10673_v54 = vcombine.low %v2663_v38, %v2671_v39 }
 0x496   :  { %v10676_v50 = vcombine.high %v2664_v43, %v2672_v44  ;;  %v10675_v55 = vcombine.low %v2664_v43, %v2672_v44 }
 0x497   :  { %9163 = vmatpush1.bf16.msra.mxu0 %v10577_v51  ;;  %v2679_v51 = vld [vmem:[#allocation11 + $0xe20] sm:$0xff] }
 0x498   :  { %9327 = vmatpush1.bf16.msra.mxu1 %v10579_v52  ;;  %9164 = vmatprep.subr.bf16.mxu0 %v10594_v53  ;;  %v2687_v52 = vld [vmem:[#allocation11 + $0xe60] sm:$0xff]  ;;  %v2680_v53 = vld [vmem:[#allocation11 + $0xe28] sm:$0xff] }
 0x499   :  { %9328 = vmatprep.subr.bf16.mxu1 %v10596_v57  ;;  %v2688_v57 = vld [vmem:[#allocation11 + $0xe68] sm:$0xff]  ;;  %v10690_v56 = vcombine.high %v2679_v51, %v2687_v52  ;;  %v10689_v35 = vcombine.low %v2679_v51, %v2687_v52 }
 0x49a   :  { %v10692_v58 = vcombine.high %v2680_v53, %v2688_v57  ;;  %v10691_v63 = vcombine.low %v2680_v53, %v2688_v57  ;;  %v2768_v51 = vld [vmem:[#allocation11 + $0x10e8] sm:$0xff]  ;;  %v2775_v57 = vld [vmem:[#allocation11 + $0x1120] sm:$0xff] }
 0x49b   :  { %9165 = vmatpush1.bf16.msra.mxu0 %v10593_v59  ;;  %v2695_v59 = vld [vmem:[#allocation11 + $0xea0] sm:$0xff] }
 0x49c   :  { %9329 = vmatpush1.bf16.msra.mxu1 %v10595_v8  ;;  %9166 = vmatprep.subr.bf16.mxu0 %v10610_v61  ;;  %v2703_v8 = vld [vmem:[#allocation11 + $0xee0] sm:$0xff]  ;;  %v2696_v61 = vld [vmem:[#allocation11 + $0xea8] sm:$0xff] }
 0x49d   :  { %9330 = vmatprep.subr.bf16.mxu1 %v10612_v62  ;;  %v2704_v62 = vld [vmem:[#allocation11 + $0xee8] sm:$0xff]  ;;  %v10706_v0 = vcombine.high %v2695_v59, %v2703_v8  ;;  %v10705_v5 = vcombine.low %v2695_v59, %v2703_v8 }
 0x49e   :  { %v10708_v60 = vcombine.high %v2696_v61, %v2704_v62  ;;  %v10707_v7 = vcombine.low %v2696_v61, %v2704_v62 }
 0x49f   :  { %9167 = vmatpush1.bf16.msra.mxu0 %v10609_v2  ;;  %v2711_v2 = vld [vmem:[#allocation11 + $0xf20] sm:$0xff] }
 0x4a0   :  { %9331 = vmatpush1.bf16.msra.mxu1 %v10611_v48  ;;  %9168 = vmatprep.subr.bf16.mxu0 %v10626_v3  ;;  %v2719_v48 = vld [vmem:[#allocation11 + $0xf60] sm:$0xff]  ;;  %v2712_v3 = vld [vmem:[#allocation11 + $0xf28] sm:$0xff] }
 0x4a1   :  { %9332 = vmatprep.subr.bf16.mxu1 %v10628_v4  ;;  %v2720_v4 = vld [vmem:[#allocation11 + $0xf68] sm:$0xff]  ;;  %v10722_v9 = vcombine.high %v2711_v2, %v2719_v48  ;;  %v10721_v17 = vcombine.low %v2711_v2, %v2719_v48 }
 0x4a2   :  { %v10724_v10 = vcombine.high %v2712_v3, %v2720_v4  ;;  %v10723_v20 = vcombine.low %v2712_v3, %v2720_v4 }
 0x4a3   :  { %9169 = vmatpush1.bf16.msra.mxu0 %v10625_v13  ;;  %v2727_v13 = vld [vmem:[#allocation11 + $0xfa0] sm:$0xff] }
 0x4a4   :  { %9333 = vmatpush1.bf16.msra.mxu1 %v10627_v14  ;;  %9170 = vmatprep.subr.bf16.mxu0 %v10642_v15  ;;  %v2735_v14 = vld [vmem:[#allocation11 + $0xfe0] sm:$0xff]  ;;  %v2728_v15 = vld [vmem:[#allocation11 + $0xfa8] sm:$0xff] }
 0x4a5   :  { %9334 = vmatprep.subr.bf16.mxu1 %v10644_v16  ;;  %v2736_v16 = vld [vmem:[#allocation11 + $0xfe8] sm:$0xff]  ;;  %v10738_v27 = vcombine.high %v2727_v13, %v2735_v14  ;;  %v10737_v38 = vcombine.low %v2727_v13, %v2735_v14 }
 0x4a6   :  { %v10740_v31 = vcombine.high %v2728_v15, %v2736_v16  ;;  %v10739_v39 = vcombine.low %v2728_v15, %v2736_v16 }
 0x4a7   :  { %9171 = vmatpush1.bf16.msra.mxu0 %v10641_v30  ;;  %v2743_v30 = vld [vmem:[#allocation11 + $0x1020] sm:$0xff] }
 0x4a8   :  { %9335 = vmatpush1.bf16.msra.mxu1 %v10643_v32  ;;  %9172 = vmatprep.subr.bf16.mxu0 %v10658_v34  ;;  %v2751_v32 = vld [vmem:[#allocation11 + $0x1060] sm:$0xff]  ;;  %v2744_v34 = vld [vmem:[#allocation11 + $0x1028] sm:$0xff] }
 0x4a9   :  { %9336 = vmatprep.subr.bf16.mxu1 %v10660_v47  ;;  %v2752_v47 = vld [vmem:[#allocation11 + $0x1068] sm:$0xff]  ;;  %v10754_v43 = vcombine.high %v2743_v30, %v2751_v32 }
 0x4aa   :  { %v10756_v44 = vcombine.high %v2744_v34, %v2752_v47  ;;  %v10755_v52 = vcombine.low %v2744_v34, %v2752_v47 }
 0x4ab   :  { %9173 = vmatpush1.bf16.msra.mxu0 %v10657_v45  ;;  %v2759_v45 = vld [vmem:[#allocation11 + $0x10a0] sm:$0xff] }
 0x4ac   :  { %9337 = vmatpush1.bf16.msra.mxu1 %v10659_v46  ;;  %9174 = vmatprep.subr.bf16.mxu0 %v10674_v49  ;;  %v2767_v46 = vld [vmem:[#allocation11 + $0x10e0] sm:$0xff]  ;;  %v10753_v49 = vcombine.low %v2743_v30, %v2751_v32 }
 0x4ad   :  { %9338 = vmatprep.subr.bf16.mxu1 %v10676_v50  ;;  %v2760_v50 = vld [vmem:[#allocation11 + $0x10a8] sm:$0xff]  ;;  %v10770_v53 = vcombine.high %v2759_v45, %v2767_v46  ;;  %v10769_v59 = vcombine.low %v2759_v45, %v2767_v46 }
 0x4ae   :  { %v10771_v8 = vcombine.low %v2760_v50, %v2768_v51 }
 0x4af   :  { %9175 = vmatpush1.bf16.msra.mxu0 %v10673_v54  ;;  %v2783_v54 = vld [vmem:[#allocation11 + $0x1160] sm:$0xff] }
 0x4b0   :  { %9339 = vmatpush1.bf16.msra.mxu1 %v10675_v55  ;;  %9176 = vmatprep.subr.bf16.mxu0 %v10690_v56  ;;  %v10772_v55 = vcombine.high %v2760_v50, %v2768_v51  ;;  %v2776_v56 = vld [vmem:[#allocation11 + $0x1128] sm:$0xff]  ;;  %v10786_v61 = vcombine.high %v2775_v57, %v2783_v54  ;;  %v10785_v2 = vcombine.low %v2775_v57, %v2783_v54  ;;  %v2855_v51 = vld [vmem:[#allocation11 + $0x13a0] sm:$0xff] }
 0x4b1   :  { %9340 = vmatprep.subr.bf16.mxu1 %v10692_v58  ;;  %v2784_v58 = vld [vmem:[#allocation11 + $0x1168] sm:$0xff] }
 0x4b2   :  { %v10788_v62 = vcombine.high %v2776_v56, %v2784_v58  ;;  %v10787_v48 = vcombine.low %v2776_v56, %v2784_v58  ;;  %v2864_v57 = vld [vmem:[#allocation11 + $0x13e8] sm:$0xff] }
 0x4b3   :  { %9177 = vmatpush1.bf16.msra.mxu0 %v10689_v35  ;;  %v2791_v35 = vld [vmem:[#allocation11 + $0x11a0] sm:$0xff] }
 0x4b4   :  { %9341 = vmatpush1.bf16.msra.mxu1 %v10691_v63  ;;  %9178 = vmatprep.subr.bf16.mxu0 %v10706_v0  ;;  %v2799_v63 = vld [vmem:[#allocation11 + $0x11e0] sm:$0xff]  ;;  %v2792_v0 = vld [vmem:[#allocation11 + $0x11a8] sm:$0xff] }
 0x4b5   :  { %9342 = vmatprep.subr.bf16.mxu1 %v10708_v60  ;;  %v2800_v60 = vld [vmem:[#allocation11 + $0x11e8] sm:$0xff]  ;;  %v10802_v3 = vcombine.high %v2791_v35, %v2799_v63  ;;  %v10801_v13 = vcombine.low %v2791_v35, %v2799_v63 }
 0x4b6   :  { %v10804_v4 = vcombine.high %v2792_v0, %v2800_v60  ;;  %v10803_v14 = vcombine.low %v2792_v0, %v2800_v60 }
 0x4b7   :  { %9179 = vmatpush1.bf16.msra.mxu0 %v10705_v5  ;;  %v2807_v5 = vld [vmem:[#allocation11 + $0x1220] sm:$0xff] }
 0x4b8   :  { %9343 = vmatpush1.bf16.msra.mxu1 %v10707_v7  ;;  %9180 = vmatprep.subr.bf16.mxu0 %v10722_v9  ;;  %v2815_v7 = vld [vmem:[#allocation11 + $0x1260] sm:$0xff]  ;;  %v2808_v9 = vld [vmem:[#allocation11 + $0x1228] sm:$0xff] }
 0x4b9   :  { %9344 = vmatprep.subr.bf16.mxu1 %v10724_v10  ;;  %v2816_v10 = vld [vmem:[#allocation11 + $0x1268] sm:$0xff]  ;;  %v10818_v15 = vcombine.high %v2807_v5, %v2815_v7  ;;  %v10817_v30 = vcombine.low %v2807_v5, %v2815_v7 }
 0x4ba   :  { %v10820_v16 = vcombine.high %v2808_v9, %v2816_v10  ;;  %v10819_v32 = vcombine.low %v2808_v9, %v2816_v10 }
 0x4bb   :  { %9181 = vmatpush1.bf16.msra.mxu0 %v10721_v17  ;;  %v2823_v17 = vld [vmem:[#allocation11 + $0x12a0] sm:$0xff] }
 0x4bc   :  { %9345 = vmatpush1.bf16.msra.mxu1 %v10723_v20  ;;  %9182 = vmatprep.subr.bf16.mxu0 %v10738_v27  ;;  %v2831_v20 = vld [vmem:[#allocation11 + $0x12e0] sm:$0xff]  ;;  %v2824_v27 = vld [vmem:[#allocation11 + $0x12a8] sm:$0xff] }
 0x4bd   :  { %9346 = vmatprep.subr.bf16.mxu1 %v10740_v31  ;;  %v2832_v31 = vld [vmem:[#allocation11 + $0x12e8] sm:$0xff]  ;;  %v10834_v34 = vcombine.high %v2823_v17, %v2831_v20  ;;  %v10833_v45 = vcombine.low %v2823_v17, %v2831_v20 }
 0x4be   :  { %v10836_v47 = vcombine.high %v2824_v27, %v2832_v31  ;;  %v10835_v46 = vcombine.low %v2824_v27, %v2832_v31 }
 0x4bf   :  { %9183 = vmatpush1.bf16.msra.mxu0 %v10737_v38  ;;  %v2839_v38 = vld [vmem:[#allocation11 + $0x1320] sm:$0xff] }
 0x4c0   :  { %9347 = vmatpush1.bf16.msra.mxu1 %v10739_v39  ;;  %9193 = vmatprep.subr.bf16.mxu0 %v10754_v43  ;;  %v2847_v39 = vld [vmem:[#allocation11 + $0x1360] sm:$0xff]  ;;  %v2840_v43 = vld [vmem:[#allocation11 + $0x1328] sm:$0xff] }
 0x4c1   :  { %9357 = vmatprep.subr.bf16.mxu1 %v10756_v44  ;;  %v2848_v44 = vld [vmem:[#allocation11 + $0x1368] sm:$0xff]  ;;  %v10849_v54 = vcombine.low %v2839_v38, %v2847_v39 }
 0x4c2   :  { %9185 = vmatmul.mubr.bf16.vlgmr.msra.gmra.mrb[20].mxu0 %v11835_v42  ;;  %v10852_v50 = vcombine.high %v2840_v43, %v2848_v44 }
 0x4c3   :  { %9349 = vmatmul.mubr.bf16.vlgmr.msra.gmra.mrb[20].mxu1 %v11835_v42  ;;  %9194 = vmatpush1.bf16.msra.mxu0 %v10753_v49  ;;  %v10850_v49 = vcombine.high %v2839_v38, %v2847_v39 }
 0x4c4   :  { %9225 = vmatprep.mubr.bf16.mxu0 %v11856_v28  ;;  %9358 = vmatpush1.bf16.msra.mxu1 %v10755_v52  ;;  %v2863_v52 = vld [vmem:[#allocation11 + $0x13e0] sm:$0xff] }
 0x4c5   :  { %9389 = vmatprep.mubr.bf16.mxu1 %v11856_v28  ;;  %9195 = vmatprep.subr.bf16.mxu0 %v10770_v53  ;;  %v2856_v53 = vld [vmem:[#allocation11 + $0x13a8] sm:$0xff]  ;;  %v10866_v56 = vcombine.high %v2855_v51, %v2863_v52  ;;  %v10865_v35 = vcombine.low %v2855_v51, %v2863_v52 }
 0x4c6   :  { %9359 = vmatprep.subr.bf16.mxu1 %v10772_v55  ;;  %v10851_v55 = vcombine.low %v2840_v43, %v2848_v44  ;;  %v10868_v58 = vcombine.high %v2856_v53, %v2864_v57  ;;  %v10867_v63 = vcombine.low %v2856_v53, %v2864_v57 }
 0x4c7   :  { %9196 = vmatpush1.bf16.msra.mxu0 %v10769_v59  ;;  %v2871_v59 = vld [vmem:[#allocation11 + $0x1420] sm:$0xff] }
 0x4c8   :  { %9360 = vmatpush1.bf16.msra.mxu1 %v10771_v8  ;;  %9197 = vmatprep.subr.bf16.mxu0 %v10786_v61  ;;  %v2879_v8 = vld [vmem:[#allocation11 + $0x1460] sm:$0xff]  ;;  %v2872_v61 = vld [vmem:[#allocation11 + $0x1428] sm:$0xff] }
 0x4c9   :  { %9361 = vmatprep.subr.bf16.mxu1 %v10788_v62  ;;  %v2880_v62 = vld [vmem:[#allocation11 + $0x1468] sm:$0xff]  ;;  %v10882_v0 = vcombine.high %v2871_v59, %v2879_v8  ;;  %v10881_v5 = vcombine.low %v2871_v59, %v2879_v8 }
 0x4ca   :  { %v10884_v60 = vcombine.high %v2872_v61, %v2880_v62  ;;  %v10883_v7 = vcombine.low %v2872_v61, %v2880_v62 }
 0x4cb   :  { %9198 = vmatpush1.bf16.msra.mxu0 %v10785_v2  ;;  %v2887_v2 = vld [vmem:[#allocation11 + $0x14a0] sm:$0xff] }
 0x4cc   :  { %9362 = vmatpush1.bf16.msra.mxu1 %v10787_v48  ;;  %9199 = vmatprep.subr.bf16.mxu0 %v10802_v3  ;;  %v2895_v48 = vld [vmem:[#allocation11 + $0x14e0] sm:$0xff]  ;;  %v2888_v3 = vld [vmem:[#allocation11 + $0x14a8] sm:$0xff] }
 0x4cd   :  { %9363 = vmatprep.subr.bf16.mxu1 %v10804_v4  ;;  %v2896_v4 = vld [vmem:[#allocation11 + $0x14e8] sm:$0xff]  ;;  %v10898_v9 = vcombine.high %v2887_v2, %v2895_v48  ;;  %v10897_v17 = vcombine.low %v2887_v2, %v2895_v48 }
 0x4ce   :  { %v10900_v10 = vcombine.high %v2888_v3, %v2896_v4  ;;  %v10899_v20 = vcombine.low %v2888_v3, %v2896_v4 }
 0x4cf   :  { %9200 = vmatpush1.bf16.msra.mxu0 %v10801_v13  ;;  %v2903_v13 = vld [vmem:[#allocation11 + $0x1520] sm:$0xff] }
 0x4d0   :  { %9364 = vmatpush1.bf16.msra.mxu1 %v10803_v14  ;;  %9201 = vmatprep.subr.bf16.mxu0 %v10818_v15  ;;  %v2911_v14 = vld [vmem:[#allocation11 + $0x1560] sm:$0xff]  ;;  %v2904_v15 = vld [vmem:[#allocation11 + $0x1528] sm:$0xff] }
 0x4d1   :  { %9365 = vmatprep.subr.bf16.mxu1 %v10820_v16  ;;  %v2912_v16 = vld [vmem:[#allocation11 + $0x1568] sm:$0xff]  ;;  %v10914_v27 = vcombine.high %v2903_v13, %v2911_v14  ;;  %v10913_v38 = vcombine.low %v2903_v13, %v2911_v14 }
 0x4d2   :  { %v10916_v31 = vcombine.high %v2904_v15, %v2912_v16  ;;  %v10915_v39 = vcombine.low %v2904_v15, %v2912_v16 }
 0x4d3   :  { %9202 = vmatpush1.bf16.msra.mxu0 %v10817_v30  ;;  %v2919_v30 = vld [vmem:[#allocation11 + $0x15a0] sm:$0xff] }
 0x4d4   :  { %9366 = vmatpush1.bf16.msra.mxu1 %v10819_v32  ;;  %9203 = vmatprep.subr.bf16.mxu0 %v10834_v34  ;;  %v2927_v32 = vld [vmem:[#allocation11 + $0x15e0] sm:$0xff]  ;;  %v2920_v34 = vld [vmem:[#allocation11 + $0x15a8] sm:$0xff] }
 0x4d5   :  { %9367 = vmatprep.subr.bf16.mxu1 %v10836_v47  ;;  %v2928_v47 = vld [vmem:[#allocation11 + $0x15e8] sm:$0xff]  ;;  %v10930_v43 = vcombine.high %v2919_v30, %v2927_v32  ;;  %v10929_v51 = vcombine.low %v2919_v30, %v2927_v32 }
 0x4d6   :  { %v10932_v44 = vcombine.high %v2920_v34, %v2928_v47  ;;  %v10931_v52 = vcombine.low %v2920_v34, %v2928_v47 }
 0x4d7   :  { %9204 = vmatpush1.bf16.msra.mxu0 %v10833_v45  ;;  %v2935_v45 = vld [vmem:[#allocation11 + $0x1620] sm:$0xff] }
 0x4d8   :  { %9368 = vmatpush1.bf16.msra.mxu1 %v10835_v46  ;;  %9205 = vmatprep.subr.bf16.mxu0 %v10850_v49  ;;  %v2943_v46 = vld [vmem:[#allocation11 + $0x1660] sm:$0xff]  ;;  %v2936_v49 = vld [vmem:[#allocation11 + $0x1628] sm:$0xff] }
 0x4d9   :  { %9369 = vmatprep.subr.bf16.mxu1 %v10852_v50  ;;  %v2944_v50 = vld [vmem:[#allocation11 + $0x1668] sm:$0xff]  ;;  %v10946_v53 = vcombine.high %v2935_v45, %v2943_v46  ;;  %v10945_v59 = vcombine.low %v2935_v45, %v2943_v46 }
 0x4da   :  { %v10948_v57 = vcombine.high %v2936_v49, %v2944_v50  ;;  %v10947_v8 = vcombine.low %v2936_v49, %v2944_v50  ;;  %v3024_v45 = vld [vmem:[#allocation11 + $0x18e8] sm:$0xff]  ;;  %v3031_v50 = vld [vmem:[#allocation11 + $0x1920] sm:$0xff] }
 0x4db   :  { %9206 = vmatpush1.bf16.msra.mxu0 %v10849_v54  ;;  %v2951_v54 = vld [vmem:[#allocation11 + $0x16a0] sm:$0xff] }
 0x4dc   :  { %9370 = vmatpush1.bf16.msra.mxu1 %v10851_v55  ;;  %9207 = vmatprep.subr.bf16.mxu0 %v10866_v56  ;;  %v2959_v55 = vld [vmem:[#allocation11 + $0x16e0] sm:$0xff]  ;;  %v2952_v56 = vld [vmem:[#allocation11 + $0x16a8] sm:$0xff] }
 0x4dd   :  { %9371 = vmatprep.subr.bf16.mxu1 %v10868_v58  ;;  %v2960_v58 = vld [vmem:[#allocation11 + $0x16e8] sm:$0xff]  ;;  %v10962_v61 = vcombine.high %v2951_v54, %v2959_v55  ;;  %v10961_v2 = vcombine.low %v2951_v54, %v2959_v55 }
 0x4de   :  { %v10964_v62 = vcombine.high %v2952_v56, %v2960_v58  ;;  %v10963_v48 = vcombine.low %v2952_v56, %v2960_v58 }
 0x4df   :  { %9208 = vmatpush1.bf16.msra.mxu0 %v10865_v35  ;;  %v2967_v35 = vld [vmem:[#allocation11 + $0x1720] sm:$0xff] }
 0x4e0   :  { %9372 = vmatpush1.bf16.msra.mxu1 %v10867_v63  ;;  %9209 = vmatprep.subr.bf16.mxu0 %v10882_v0  ;;  %v2975_v63 = vld [vmem:[#allocation11 + $0x1760] sm:$0xff]  ;;  %v2968_v0 = vld [vmem:[#allocation11 + $0x1728] sm:$0xff] }
 0x4e1   :  { %9373 = vmatprep.subr.bf16.mxu1 %v10884_v60  ;;  %v2976_v60 = vld [vmem:[#allocation11 + $0x1768] sm:$0xff]  ;;  %v10978_v3 = vcombine.high %v2967_v35, %v2975_v63  ;;  %v10977_v13 = vcombine.low %v2967_v35, %v2975_v63 }
 0x4e2   :  { %v10980_v4 = vcombine.high %v2968_v0, %v2976_v60  ;;  %v10979_v14 = vcombine.low %v2968_v0, %v2976_v60 }
 0x4e3   :  { %9210 = vmatpush1.bf16.msra.mxu0 %v10881_v5  ;;  %v2983_v5 = vld [vmem:[#allocation11 + $0x17a0] sm:$0xff] }
 0x4e4   :  { %9374 = vmatpush1.bf16.msra.mxu1 %v10883_v7  ;;  %9211 = vmatprep.subr.bf16.mxu0 %v10898_v9  ;;  %v2991_v7 = vld [vmem:[#allocation11 + $0x17e0] sm:$0xff]  ;;  %v2984_v9 = vld [vmem:[#allocation11 + $0x17a8] sm:$0xff] }
 0x4e5   :  { %9375 = vmatprep.subr.bf16.mxu1 %v10900_v10  ;;  %v2992_v10 = vld [vmem:[#allocation11 + $0x17e8] sm:$0xff]  ;;  %v10994_v15 = vcombine.high %v2983_v5, %v2991_v7  ;;  %v10993_v30 = vcombine.low %v2983_v5, %v2991_v7 }
 0x4e6   :  { %v10996_v16 = vcombine.high %v2984_v9, %v2992_v10  ;;  %v10995_v32 = vcombine.low %v2984_v9, %v2992_v10 }
 0x4e7   :  { %9212 = vmatpush1.bf16.msra.mxu0 %v10897_v17  ;;  %v2999_v17 = vld [vmem:[#allocation11 + $0x1820] sm:$0xff] }
 0x4e8   :  { %9376 = vmatpush1.bf16.msra.mxu1 %v10899_v20  ;;  %9213 = vmatprep.subr.bf16.mxu0 %v10914_v27  ;;  %v3007_v20 = vld [vmem:[#allocation11 + $0x1860] sm:$0xff]  ;;  %v3000_v27 = vld [vmem:[#allocation11 + $0x1828] sm:$0xff] }
 0x4e9   :  { %9377 = vmatprep.subr.bf16.mxu1 %v10916_v31  ;;  %v3008_v31 = vld [vmem:[#allocation11 + $0x1868] sm:$0xff]  ;;  %v11010_v34 = vcombine.high %v2999_v17, %v3007_v20 }
 0x4ea   :  { %v11012_v47 = vcombine.high %v3000_v27, %v3008_v31  ;;  %v11011_v46 = vcombine.low %v3000_v27, %v3008_v31 }
 0x4eb   :  { %9214 = vmatpush1.bf16.msra.mxu0 %v10913_v38  ;;  %v3015_v38 = vld [vmem:[#allocation11 + $0x18a0] sm:$0xff] }
 0x4ec   :  { %9378 = vmatpush1.bf16.msra.mxu1 %v10915_v39  ;;  %9215 = vmatprep.subr.bf16.mxu0 %v10930_v43  ;;  %v3023_v39 = vld [vmem:[#allocation11 + $0x18e0] sm:$0xff]  ;;  %v11009_v43 = vcombine.low %v2999_v17, %v3007_v20 }
 0x4ed   :  { %9379 = vmatprep.subr.bf16.mxu1 %v10932_v44  ;;  %v3016_v44 = vld [vmem:[#allocation11 + $0x18a8] sm:$0xff]  ;;  %v11026_v49 = vcombine.high %v3015_v38, %v3023_v39  ;;  %v11025_v54 = vcombine.low %v3015_v38, %v3023_v39 }
 0x4ee   :  { %v11027_v55 = vcombine.low %v3016_v44, %v3024_v45  ;;  %v3096_v38 = vld [vmem:[#allocation11 + $0x1b28] sm:$0xff] }
 0x4ef   :  { %9216 = vmatpush1.bf16.msra.mxu0 %v10929_v51  ;;  %v3039_v51 = vld [vmem:[#allocation11 + $0x1960] sm:$0xff]  ;;  %v3104_v39 = vld [vmem:[#allocation11 + $0x1b68] sm:$0xff] }
 0x4f0   :  { %9380 = vmatpush1.bf16.msra.mxu1 %v10931_v52  ;;  %9217 = vmatprep.subr.bf16.mxu0 %v10946_v53  ;;  %v11028_v52 = vcombine.high %v3016_v44, %v3024_v45  ;;  %v3032_v53 = vld [vmem:[#allocation11 + $0x1928] sm:$0xff]  ;;  %v11042_v56 = vcombine.high %v3031_v50, %v3039_v51  ;;  %v11041_v35 = vcombine.low %v3031_v50, %v3039_v51  ;;  %v3111_v51 = vld [vmem:[#allocation11 + $0x1ba0] sm:$0xff] }
 0x4f1   :  { %9381 = vmatprep.subr.bf16.mxu1 %v10948_v57  ;;  %v3040_v57 = vld [vmem:[#allocation11 + $0x1968] sm:$0xff] }
 0x4f2   :  { %v11044_v58 = vcombine.high %v3032_v53, %v3040_v57  ;;  %v11043_v63 = vcombine.low %v3032_v53, %v3040_v57  ;;  %v11108_v57 = vcombine.high %v3096_v38, %v3104_v39 }
 0x4f3   :  { %9218 = vmatpush1.bf16.msra.mxu0 %v10945_v59  ;;  %v3047_v59 = vld [vmem:[#allocation11 + $0x19a0] sm:$0xff] }
 0x4f4   :  { %9382 = vmatpush1.bf16.msra.mxu1 %v10947_v8  ;;  %9219 = vmatprep.subr.bf16.mxu0 %v10962_v61  ;;  %v3055_v8 = vld [vmem:[#allocation11 + $0x19e0] sm:$0xff]  ;;  %v3048_v61 = vld [vmem:[#allocation11 + $0x19a8] sm:$0xff] }
 0x4f5   :  { %9383 = vmatprep.subr.bf16.mxu1 %v10964_v62  ;;  %v3056_v62 = vld [vmem:[#allocation11 + $0x19e8] sm:$0xff]  ;;  %v11058_v0 = vcombine.high %v3047_v59, %v3055_v8  ;;  %v11057_v5 = vcombine.low %v3047_v59, %v3055_v8 }
 0x4f6   :  { %v11060_v60 = vcombine.high %v3048_v61, %v3056_v62  ;;  %v11059_v7 = vcombine.low %v3048_v61, %v3056_v62 }
 0x4f7   :  { %9220 = vmatpush1.bf16.msra.mxu0 %v10961_v2  ;;  %v3063_v2 = vld [vmem:[#allocation11 + $0x1a20] sm:$0xff] }
 0x4f8   :  { %9384 = vmatpush1.bf16.msra.mxu1 %v10963_v48  ;;  %9221 = vmatprep.subr.bf16.mxu0 %v10978_v3  ;;  %v3071_v48 = vld [vmem:[#allocation11 + $0x1a60] sm:$0xff]  ;;  %v3064_v3 = vld [vmem:[#allocation11 + $0x1a28] sm:$0xff] }
 0x4f9   :  { %9385 = vmatprep.subr.bf16.mxu1 %v10980_v4  ;;  %v3072_v4 = vld [vmem:[#allocation11 + $0x1a68] sm:$0xff]  ;;  %v11074_v9 = vcombine.high %v3063_v2, %v3071_v48  ;;  %v11073_v17 = vcombine.low %v3063_v2, %v3071_v48  ;;  %v3127_v2 = vld [vmem:[#allocation11 + $0x1c20] sm:$0xff] }
 0x4fa   :  { %v11076_v10 = vcombine.high %v3064_v3, %v3072_v4  ;;  %v11075_v20 = vcombine.low %v3064_v3, %v3072_v4 }
 0x4fb   :  { %9222 = vmatpush1.bf16.msra.mxu0 %v10977_v13  ;;  %v3079_v13 = vld [vmem:[#allocation11 + $0x1aa0] sm:$0xff] }
 0x4fc   :  { %9386 = vmatpush1.bf16.msra.mxu1 %v10979_v14  ;;  %9223 = vmatprep.subr.bf16.mxu0 %v10994_v15  ;;  %v3087_v14 = vld [vmem:[#allocation11 + $0x1ae0] sm:$0xff]  ;;  %v3080_v15 = vld [vmem:[#allocation11 + $0x1aa8] sm:$0xff] }
 0x4fd   :  { %9387 = vmatprep.subr.bf16.mxu1 %v10996_v16  ;;  %v3088_v16 = vld [vmem:[#allocation11 + $0x1ae8] sm:$0xff]  ;;  %v11090_v27 = vcombine.high %v3079_v13, %v3087_v14  ;;  %v11089_v45 = vcombine.low %v3079_v13, %v3087_v14 }
 0x4fe   :  { %v11092_v31 = vcombine.high %v3080_v15, %v3088_v16 }
 0x4ff   :  { %9224 = vmatpush1.bf16.msra.mxu0 %v10993_v30  ;;  %v3095_v30 = vld [vmem:[#allocation11 + $0x1b20] sm:$0xff] }
 0x500   :  { %9388 = vmatpush1.bf16.msra.mxu1 %v10995_v32  ;;  %9234 = vmatprep.subr.bf16.mxu0 %v11010_v34  ;;  %v3103_v32 = vld [vmem:[#allocation11 + $0x1b60] sm:$0xff] }
 0x501   :  { %9398 = vmatprep.subr.bf16.mxu1 %v11012_v47  ;;  %v11430_v34 = vld [vmem:[#allocation13] sm:$0xff]  ;;  %v11106_v50 = vcombine.high %v3095_v30, %v3103_v32  ;;  %v11105_v8 = vcombine.low %v3095_v30, %v3103_v32 }
 0x502   :  { %9226 = vmatmul.mubr.bf16.vlgmr.msra.gmra.mrb[20].mxu0 %v11858_v22  ;;  %v3274_v47 = vrot.slane %v11430_v34, %v11840_v33  ;;  %v3278_v44 = vrot.slane %v11430_v34, %v11843_v37 }
 0x503   :  { %9390 = vmatmul.mubr.bf16.vlgmr.msra.gmra.mrb[20].mxu1 %v11858_v22  ;;  %9235 = vmatpush1.bf16.msra.mxu0 %v11009_v43  ;;  %v3282_v43 = vrot.slane %v11430_v34, %v11869_v24 }
 0x504   :  { %9266 = vmatprep.mubr.bf16.mxu0 %v11862_v41  ;;  %9399 = vmatpush1.bf16.msra.mxu1 %v11011_v46  ;;  %v3286_v46 = vrot.slane %v11430_v34, %v11846_v40 }
 0x505   :  { %9430 = vmatprep.mubr.bf16.mxu1 %v11862_v41  ;;  %9236 = vmatprep.subr.bf16.mxu0 %v11026_v49  ;;  %v11091_v49 = vcombine.low %v3080_v15, %v3088_v16 }
 0x506   :  { %9400 = vmatprep.subr.bf16.mxu1 %v11028_v52  ;;  %v3119_v52 = vld [vmem:[#allocation11 + $0x1be0] sm:$0xff] }
 0x507   :  { %9237 = vmatpush1.bf16.msra.mxu0 %v11025_v54  ;;  %v3112_v54 = vld [vmem:[#allocation11 + $0x1ba8] sm:$0xff]  ;;  %v11121_v30 = vcombine.low %v3111_v51, %v3119_v52 }
 0x508   :  { %9401 = vmatpush1.bf16.msra.mxu1 %v11027_v55  ;;  %9238 = vmatprep.subr.bf16.mxu0 %v11042_v56  ;;  %v3120_v55 = vld [vmem:[#allocation11 + $0x1be8] sm:$0xff] }
 0x509   :  { %9402 = vmatprep.subr.bf16.mxu1 %v11044_v58  ;;  %v11123_v32 = vcombine.low %v3112_v54, %v3120_v55 }
 0x50b   :  { %9239 = vmatpush1.bf16.msra.mxu0 %v11041_v35 }
 0x50c   :  { %9403 = vmatpush1.bf16.msra.mxu1 %v11043_v63  ;;  %9240 = vmatprep.subr.bf16.mxu0 %v11058_v0  ;;  %v11107_v0 = vcombine.low %v3096_v38, %v3104_v39 }
 0x50d   :  { %9404 = vmatprep.subr.bf16.mxu1 %v11060_v60  ;;  %v11122_v60 = vcombine.high %v3111_v51, %v3119_v52 }
 0x50f   :  { %9241 = vmatpush1.bf16.msra.mxu0 %v11057_v5 }
 0x510   :  { %9405 = vmatpush1.bf16.msra.mxu1 %v11059_v7  ;;  %9242 = vmatprep.subr.bf16.mxu0 %v11074_v9  ;;  %v11124_v7 = vcombine.high %v3112_v54, %v3120_v55  ;;  %v3135_v9 = vld [vmem:[#allocation11 + $0x1c60] sm:$0xff] }
 0x511   :  { %9406 = vmatprep.subr.bf16.mxu1 %v11076_v10  ;;  %v11138_v38 = vcombine.high %v3127_v2, %v3135_v9  ;;  %v3159_v55 = vld [vmem:[#allocation11 + $0x1d20] sm:$0xff] }
 0x513   :  { %9243 = vmatpush1.bf16.msra.mxu0 %v11073_v17  ;;  %v3128_v17 = vld [vmem:[#allocation11 + $0x1c28] sm:$0xff] }
 0x514   :  { %9407 = vmatpush1.bf16.msra.mxu1 %v11075_v20  ;;  %9244 = vmatprep.subr.bf16.mxu0 %v11090_v27  ;;  %v3136_v20 = vld [vmem:[#allocation11 + $0x1c68] sm:$0xff] }
 0x515   :  { %v8940_v53 = vpop.f32.mrb[16].mxu0  ;;  %9408 = vmatprep.subr.bf16.mxu1 %v11092_v31  ;;  %v11139_v51 = vcombine.low %v3128_v17, %v3136_v20 }
 0x516   :  { %v11277_v56 = vadd.f32 %v8940_v53, %v3274_v47  ;;  %v9104_v58 = vpop.f32.mrb[16].mxu1  ;;  %v8942_v59 = vpop.f32.mrb[17].mxu0 }
 0x517   :  { %v11279_v61 = vadd.f32 %v9104_v58, %v3282_v43  ;;  %v11278_v62 = vadd.f32 %v8942_v59, %v3278_v44  ;;  %v9106_v35 = vpop.f32.mrb[17].mxu1  ;;  %v8944_v63 = vpop.f32.mrb[18].mxu0  ;;  %9245 = vmatpush1.bf16.msra.mxu0 %v11089_v45  ;;  %v11140_v43 = vcombine.high %v3128_v17, %v3136_v20  ;;  %v3143_v44 = vld [vmem:[#allocation11 + $0x1ca0] sm:$0xff]  ;;  %v3160_v59 = vld [vmem:[#allocation11 + $0x1d28] sm:$0xff] }
 0x518   :  { %vm9771_vm1 = vcmp.ge.f32.partialorder %v11277_v56, 0.0  ;;  %v9787_v48 = vmul.f32 0.2, %v11277_v56  ;;  %v11280_v3 = vadd.f32 %v9106_v35, %v3286_v46  ;;  %v9108_v4 = vpop.f32.mrb[18].mxu1  ;;  %9409 = vmatpush1.bf16.msra.mxu1 %v11091_v49  ;;  %v8945_v5 = vpop.f32.mrb[19].mxu0  ;;  %9246 = vmatprep.subr.bf16.mxu0 %v11106_v50  ;;  %v3151_v45 = vld [vmem:[#allocation11 + $0x1ce0] sm:$0xff] }
 0x519   :  { %vm9773_vm2 = vcmp.ge.f32.partialorder %v11279_v61, 0.0  ;;  %v9789_v10 = vmul.f32 0.2, %v11279_v61  ;;  %vm9772_vm3 = vcmp.ge.f32.partialorder %v11278_v62, 0.0  ;;  %v9788_v13 = vmul.f32 0.2, %v11278_v62  ;;  %9410 = vmatprep.subr.bf16.mxu1 %v11108_v57 }
 0x51a   :  { %v9803_v14 = vsel %vm9771_vm1, %v11277_v56, %v9787_v48  ;;  %vm9774_vm4 = vcmp.ge.f32.partialorder %v11280_v3, 0.0  ;;  %v9790_v15 = vmul.f32 0.2, %v11280_v3  ;;  %v9109_v16 = vpop.f32.mrb[19].mxu1  ;;  %v3144_v49 = vld [vmem:[#allocation11 + $0x1ca8] sm:$0xff]  ;;  %v11137_v57 = vcombine.low %v3127_v2, %v3135_v9  ;;  %v3167_v56 = vld [vmem:[#allocation11 + $0x1d60] sm:$0xff] }
 0x51b   :  { %v9805_v27 = vsel %vm9773_vm2, %v11279_v61, %v9789_v10  ;;  %v9804_v31 = vsel %vm9772_vm3, %v11278_v62, %v9788_v13  ;;  %9247 = vmatpush1.bf16.msra.mxu0 %v11105_v8  ;;  %v3152_v50 = vld [vmem:[#allocation11 + $0x1ce8] sm:$0xff]  ;;  %v11154_v52 = vcombine.high %v3143_v44, %v3151_v45  ;;  %v11153_v61 = vcombine.low %v3143_v44, %v3151_v45  ;;  %v3175_v2 = vld [vmem:[#allocation11 + $0x1da0] sm:$0xff] }
 0x51c   :  { %v11259_v34 = vpack.c.bf16 %v9804_v31, %v9803_v14  ;;  %v9806_v47 = vsel %vm9774_vm4, %v11280_v3, %v9790_v15  ;;  %9411 = vmatpush1.bf16.msra.mxu1 %v11107_v0  ;;  %9248 = vmatprep.subr.bf16.mxu0 %v11122_v60  ;;  %v11156_v54 = vcombine.high %v3144_v49, %v3152_v50  ;;  %v3168_v8 = vld [vmem:[#allocation11 + $0x1d68] sm:$0xff]  ;;  %v3183_v48 = vld [vmem:[#allocation11 + $0x1de0] sm:$0xff] }
 0x51d   :  { %v11260_v39 = vpack.c.bf16 %v9806_v47, %v9805_v27  ;;  %9412 = vmatprep.subr.bf16.mxu1 %v11124_v7  ;;  %v9887_v62 = vrot.slane %v9879_v36, %v11899_v1  ;;  %v11155_v63 = vcombine.low %v3144_v49, %v3152_v50  ;;  %v11170_v0 = vcombine.high %v3159_v55, %v3167_v56  ;;  %v3176_v4 = vld [vmem:[#allocation11 + $0x1da8] sm:$0xff]  ;;  %v3191_v9 = vld [vmem:[#allocation11 + $0x1e20] sm:$0xff] }
 0x51e   :  { %v9871_v46 = vrot.slane %v11259_v34, %v11899_v1  ;;  %v11172_v60 = vcombine.high %v3160_v59, %v3168_v8  ;;  %v3184_v5 = vld [vmem:[#allocation11 + $0x1de8] sm:$0xff]  ;;  %v11169_v7 = vcombine.low %v3159_v55, %v3167_v56  ;;  %v11171_v19 = vcombine.low %v3160_v59, %v3168_v8  ;;  %v3199_v10 = vld [vmem:[#allocation11 + $0x1e60] sm:$0xff] }
 0x51f   :  { %v9878_v53 = vrot.slane %v11260_v39, %v11899_v1  ;;  %9249 = vmatpush1.bf16.msra.mxu0 %v11121_v30  ;;  %v11186_v26 = vcombine.high %v3175_v2, %v3183_v48  ;;  %v11188_v36 = vcombine.high %v3176_v4, %v3184_v5  ;;  %v3192_v13 = vld [vmem:[#allocation11 + $0x1e28] sm:$0xff]  ;;  %v11185_v15 = vcombine.low %v3175_v2, %v3183_v48  ;;  %v3207_v27 = vld [vmem:[#allocation11 + $0x1ea0] sm:$0xff] }
 0x520   :  { %9413 = vmatpush1.bf16.msra.mxu1 %v11123_v32  ;;  %9250 = vmatprep.subr.bf16.mxu0 %v11138_v38  ;;  %v3200_v14 = vld [vmem:[#allocation11 + $0x1e68] sm:$0xff]  ;;  %v11187_v16 = vcombine.low %v3176_v4, %v3184_v5  ;;  %v11202_v17 = vcombine.high %v3191_v9, %v3199_v10  ;;  %v3215_v31 = vld [vmem:[#allocation11 + $0x1ee0] sm:$0xff]  ;;  %v11201_v34 = vcombine.low %v3191_v9, %v3199_v10  ;;  %v2257_v4 = vld [vmem:[#allocation11 + $0xf0] sm:$0xff] }
 0x521   :  { %9414 = vmatprep.subr.bf16.mxu1 %v11140_v43  ;;  %v9880_v58 = vcombine.low %v9871_v46, %v9878_v53  ;;  %v11204_v20 = vcombine.high %v3192_v13, %v3200_v14  ;;  %v3208_v30 = vld [vmem:[#allocation11 + $0x1ea8] sm:$0xff]  ;;  %v11203_v47 = vcombine.low %v3192_v13, %v3200_v14  ;;  %v11218_v38 = vcombine.high %v3207_v27, %v3215_v31  ;;  %v3223_v43 = vld [vmem:[#allocation11 + $0x1f20] sm:$0xff]  ;;  %v2265_v9 = vld [vmem:[#allocation11 + $0x130] sm:$0xff] }
 0x522   :  { %v3216_v32 = vld [vmem:[#allocation11 + $0x1ee8] sm:$0xff]  ;;  %v3231_v44 = vld [vmem:[#allocation11 + $0x1f60] sm:$0xff]  ;;  %v11217_v49 = vcombine.low %v3207_v27, %v3215_v31  ;;  %v2273_v10 = vld [vmem:[#allocation11 + $0x170] sm:$0xff] }
 0x523   :  { %9251 = vmatpush1.bf16.msra.mxu0 %v11137_v57  ;;  %v9894_v35 = vrot.slane %v9880_v58, %v11899_v1  ;;  %v11220_v39 = vcombine.high %v3208_v30, %v3216_v32  ;;  %v3224_v45 = vld [vmem:[#allocation11 + $0x1f28] sm:$0xff]  ;;  %v11219_v50 = vcombine.low %v3208_v30, %v3216_v32  ;;  %v11234_v53 = vcombine.high %v3223_v43, %v3231_v44  ;;  %v2266_v14 = vld [vmem:[#allocation11 + $0x138] sm:$0xff]  ;;  %v2281_v31 = vld [vmem:[#allocation11 + $0x1b0] sm:$0xff] }
 0x524   :  { %9415 = vmatpush1.bf16.msra.mxu1 %v11139_v51  ;;  %9252 = vmatprep.subr.bf16.mxu0 %v11154_v52  ;;  %v3232_v46 = vld [vmem:[#allocation11 + $0x1f68] sm:$0xff]  ;;  %v3239_v51 = vld [vmem:[#allocation11 + $0x1fa0] sm:$0xff]  ;;  %v11233_v56 = vcombine.low %v3223_v43, %v3231_v44  ;;  %v2289_v30 = vld [vmem:[#allocation11 + $0x1f0] sm:$0xff] }
 0x525   :  { %9416 = vmatprep.subr.bf16.mxu1 %v11156_v54  ;;  %v9895_v3 = vcombine.low %v9887_v62, %v9894_v35  ;;  %v11236_v57 = vcombine.high %v3224_v45, %v3232_v46  ;;  %v3247_v52 = vld [vmem:[#allocation11 + $0x1fe0] sm:$0xff]  ;;  %v3240_v54 = vld [vmem:[#allocation11 + $0x1fa8] sm:$0xff]  ;;  %v11235_v58 = vcombine.low %v3224_v45, %v3232_v46  ;;  %v2241_v62 = vld [vmem:[#allocation11 + $0x70] sm:$0xff] }
 0x526   :  { %v3248_v55 = vld [vmem:[#allocation11 + $0x1fe8] sm:$0xff]  ;;  %v11250_v59 = vcombine.high %v3239_v51, %v3247_v52  ;;  %v2234_v35 = vld [vmem:[#allocation11 + $0x38] sm:$0xff]  ;;  %v2297_v44 = vld [vmem:[#allocation11 + $0x230] sm:$0xff] }
 0x527   :  { %9253 = vmatpush1.bf16.msra.mxu0 %v11153_v61  ;;  %9947 = vst [vmem:[#allocation14] sm:$0xff] %v9895_v3  ;;  %v11252_v8 = vcombine.high %v3240_v54, %v3248_v55  ;;  %v2233_v61 = vld [vmem:[#allocation11 + $0x30] sm:$0xff]  ;;  %v2282_v32 = vld [vmem:[#allocation11 + $0x1b8] sm:$0xff] }
 0x528   :  { %9417 = vmatpush1.bf16.msra.mxu1 %v11155_v63  ;;  %9254 = vmatprep.subr.bf16.mxu0 %v11170_v0  ;;  %v2242_v63 = vld [vmem:[#allocation11 + $0x78] sm:$0xff]  ;;  %v11249_v0 = vcombine.low %v3239_v51, %v3247_v52  ;;  %v10246_v2 = vcombine.high %v2233_v61, %v2241_v62  ;;  %v2249_v3 = vld [vmem:[#allocation11 + $0xb0] sm:$0xff]  ;;  %v10245_v5 = vcombine.low %v2233_v61, %v2241_v62 }
 0x529   :  { %9418 = vmatprep.subr.bf16.mxu1 %v11172_v60  ;;  %v11251_v60 = vcombine.low %v3240_v54, %v3248_v55  ;;  %v10248_v48 = vcombine.high %v2234_v35, %v2242_v63  ;;  %v2305_v45 = vld [vmem:[#allocation11 + $0x270] sm:$0xff]  ;;  %v2298_v46 = vld [vmem:[#allocation11 + $0x238] sm:$0xff] }
 0x52a   :  { %v2313_v51 = vld [vmem:[#allocation11 + $0x2b0] sm:$0xff]  ;;  %v2314_v54 = vld [vmem:[#allocation11 + $0x2b8] sm:$0xff] }
 0x52b   :  { %9255 = vmatpush1.bf16.msra.mxu0 %v11169_v7  ;;  %v2250_v7 = vld [vmem:[#allocation11 + $0xb8] sm:$0xff]  ;;  %v2321_v52 = vld [vmem:[#allocation11 + $0x2f0] sm:$0xff] }
 0x52c   :  { %9419 = vmatpush1.bf16.msra.mxu1 %v11171_v19  ;;  %9256 = vmatprep.subr.bf16.mxu0 %v11186_v26  ;;  %v2258_v19 = vld [vmem:[#allocation11 + $0xf8] sm:$0xff]  ;;  %v10247_v26 = vcombine.low %v2234_v35, %v2242_v63  ;;  %v2329_v61 = vld [vmem:[#allocation11 + $0x330] sm:$0xff] }
 0x52d   :  { %9420 = vmatprep.subr.bf16.mxu1 %v11188_v36  ;;  %v10262_v36 = vcombine.high %v2249_v3, %v2257_v4  ;;  %v10264_v13 = vcombine.high %v2250_v7, %v2258_v19  ;;  %v2322_v55 = vld [vmem:[#allocation11 + $0x2f8] sm:$0xff]  ;;  %v2337_v62 = vld [vmem:[#allocation11 + $0x370] sm:$0xff] }
 0x52e   :  { %v2330_v35 = vld [vmem:[#allocation11 + $0x338] sm:$0xff] }
 0x52f   :  { %9257 = vmatpush1.bf16.msra.mxu0 %v11185_v15  ;;  %v2274_v15 = vld [vmem:[#allocation11 + $0x178] sm:$0xff] }
 0x530   :  { %9421 = vmatpush1.bf16.msra.mxu1 %v11187_v16  ;;  %9258 = vmatprep.subr.bf16.mxu0 %v11202_v17  ;;  %v10261_v16 = vcombine.low %v2249_v3, %v2257_v4  ;;  %v10263_v17 = vcombine.low %v2250_v7, %v2258_v19  ;;  %v10280_v27 = vcombine.high %v2266_v14, %v2274_v15  ;;  %v2338_v63 = vld [vmem:[#allocation11 + $0x378] sm:$0xff]  ;;  %v2345_v3 = vld [vmem:[#allocation11 + $0x3b0] sm:$0xff] }
 0x531   :  { %9422 = vmatprep.subr.bf16.mxu1 %v11204_v20  ;;  %v10278_v20 = vcombine.high %v2265_v9, %v2273_v10  ;;  %v2353_v4 = vld [vmem:[#allocation11 + $0x3f0] sm:$0xff]  ;;  %v2354_v7 = vld [vmem:[#allocation11 + $0x3f8] sm:$0xff]  ;;  %v10341_v19 = vcombine.low %v2329_v61, %v2337_v62 }
 0x533   :  { %9259 = vmatpush1.bf16.msra.mxu0 %v11201_v34  ;;  %v2290_v34 = vld [vmem:[#allocation11 + $0x1f8] sm:$0xff] }
 0x534   :  { %9423 = vmatpush1.bf16.msra.mxu1 %v11203_v47  ;;  %9260 = vmatprep.subr.bf16.mxu0 %v11218_v38  ;;  %v10277_v47 = vcombine.low %v2265_v9, %v2273_v10  ;;  %v10279_v38 = vcombine.low %v2266_v14, %v2274_v15  ;;  %v10296_v43 = vcombine.high %v2282_v32, %v2290_v34  ;;  %v2361_v10 = vld [vmem:[#allocation11 + $0x430] sm:$0xff]  ;;  %v2362_v14 = vld [vmem:[#allocation11 + $0x438] sm:$0xff] }
 0x535   :  { %9424 = vmatprep.subr.bf16.mxu1 %v11220_v39  ;;  %v10294_v39 = vcombine.high %v2281_v31, %v2289_v30  ;;  %v2370_v15 = vld [vmem:[#allocation11 + $0x478] sm:$0xff] }
 0x537   :  { %9261 = vmatpush1.bf16.msra.mxu0 %v11217_v49  ;;  %v2306_v49 = vld [vmem:[#allocation11 + $0x278] sm:$0xff] }
 0x538   :  { %9425 = vmatpush1.bf16.msra.mxu1 %v11219_v50  ;;  %9262 = vmatprep.subr.bf16.mxu0 %v11234_v53  ;;  %v10295_v50 = vcombine.low %v2282_v32, %v2290_v34  ;;  %v10310_v53 = vcombine.high %v2297_v44, %v2305_v45  ;;  %v2378_v32 = vld [vmem:[#allocation11 + $0x4b8] sm:$0xff] }
 0x539   :  { %9426 = vmatprep.subr.bf16.mxu1 %v11236_v57  ;;  %v10312_v57 = vcombine.high %v2298_v46, %v2306_v49  ;;  %v2386_v34 = vld [vmem:[#allocation11 + $0x4f8] sm:$0xff] }
 0x53b   :  { %9263 = vmatpush1.bf16.msra.mxu0 %v11233_v56  ;;  %v10309_v56 = vcombine.low %v2297_v44, %v2305_v45  ;;  %v2393_v44 = vld [vmem:[#allocation11 + $0x530] sm:$0xff] }
 0x53c   :  { %9427 = vmatpush1.bf16.msra.mxu1 %v11235_v58  ;;  %9264 = vmatprep.subr.bf16.mxu0 %v11250_v59  ;;  %v10311_v58 = vcombine.low %v2298_v46, %v2306_v49  ;;  %v10326_v59 = vcombine.high %v2313_v51, %v2321_v52  ;;  %v2401_v45 = vld [vmem:[#allocation11 + $0x570] sm:$0xff]  ;;  %v2394_v46 = vld [vmem:[#allocation11 + $0x538] sm:$0xff] }
 0x53d   :  { %9428 = vmatprep.subr.bf16.mxu1 %v11252_v8  ;;  %v10328_v8 = vcombine.high %v2314_v54, %v2322_v55  ;;  %v2402_v49 = vld [vmem:[#allocation11 + $0x578] sm:$0xff] }
 0x53f   :  { %9265 = vmatpush1.bf16.msra.mxu0 %v11249_v0  ;;  %v10325_v0 = vcombine.low %v2313_v51, %v2321_v52  ;;  %v2409_v51 = vld [vmem:[#allocation11 + $0x5b0] sm:$0xff] }
 0x540   :  { %9429 = vmatpush1.bf16.msra.mxu1 %v11251_v60  ;;  %9439 = vmatprep.subr.bf16.mxu0 %v10246_v2  ;;  %v10327_v60 = vcombine.low %v2314_v54, %v2322_v55  ;;  %v10342_v2 = vcombine.high %v2329_v61, %v2337_v62  ;;  %v2417_v52 = vld [vmem:[#allocation11 + $0x5f0] sm:$0xff]  ;;  %v2410_v54 = vld [vmem:[#allocation11 + $0x5b8] sm:$0xff] }
 0x541   :  { %9603 = vmatprep.subr.bf16.mxu1 %v10248_v48  ;;  %v10344_v48 = vcombine.high %v2330_v35, %v2338_v63  ;;  %v2418_v55 = vld [vmem:[#allocation11 + $0x5f8] sm:$0xff]  ;;  %v2425_v61 = vld [vmem:[#allocation11 + $0x630] sm:$0xff] }
 0x542   :  { %9267 = vmatmul.mubr.bf16.vlgmr.msra.gmra.mrb[20].mxu0 %v11873_v12  ;;  %v2433_v62 = vld [vmem:[#allocation11 + $0x670] sm:$0xff] }
 0x543   :  { %9431 = vmatmul.mubr.bf16.vlgmr.msra.gmra.mrb[20].mxu1 %v11873_v12  ;;  %9440 = vmatpush1.bf16.msra.mxu0 %v10245_v5  ;;  %v2346_v5 = vld [vmem:[#allocation11 + $0x3b8] sm:$0xff] }
 0x544   :  { %9471 = vmatprep.mubr.bf16.mxu0 %v11820_v6  ;;  %9604 = vmatpush1.bf16.msra.mxu1 %v10247_v26  ;;  %v10343_v26 = vcombine.low %v2330_v35, %v2338_v63  ;;  %v10360_v9 = vcombine.high %v2346_v5, %v2354_v7  ;;  %v2426_v35 = vld [vmem:[#allocation11 + $0x638] sm:$0xff] }
 0x545   :  { %9635 = vmatprep.mubr.bf16.mxu1 %v11820_v6  ;;  %9441 = vmatprep.subr.bf16.mxu0 %v10262_v36  ;;  %v10293_v6 = vcombine.low %v2281_v31, %v2289_v30  ;;  %v10358_v36 = vcombine.high %v2345_v3, %v2353_v4  ;;  %v2377_v31 = vld [vmem:[#allocation11 + $0x4b0] sm:$0xff]  ;;  %v2434_v63 = vld [vmem:[#allocation11 + $0x678] sm:$0xff] }
 0x546   :  { %9605 = vmatprep.subr.bf16.mxu1 %v10264_v13  ;;  %v2369_v13 = vld [vmem:[#allocation11 + $0x470] sm:$0xff] }
 0x547   :  { %9442 = vmatpush1.bf16.msra.mxu0 %v10261_v16  ;;  %v10357_v16 = vcombine.low %v2345_v3, %v2353_v4  ;;  %v2385_v30 = vld [vmem:[#allocation11 + $0x4f0] sm:$0xff] }
 0x548   :  { %9606 = vmatpush1.bf16.msra.mxu1 %v10263_v17  ;;  %9443 = vmatprep.subr.bf16.mxu0 %v10278_v20  ;;  %v10359_v17 = vcombine.low %v2346_v5, %v2354_v7  ;;  %v10374_v20 = vcombine.high %v2361_v10, %v2369_v13  ;;  %v2441_v3 = vld [vmem:[#allocation11 + $0x6b0] sm:$0xff]  ;;  %v2442_v5 = vld [vmem:[#allocation11 + $0x6b8] sm:$0xff] }
 0x549   :  { %9607 = vmatprep.subr.bf16.mxu1 %v10280_v27  ;;  %v10376_v27 = vcombine.high %v2362_v14, %v2370_v15  ;;  %v2449_v4 = vld [vmem:[#allocation11 + $0x6f0] sm:$0xff]  ;;  %v2450_v7 = vld [vmem:[#allocation11 + $0x6f8] sm:$0xff] }
 0x54b   :  { %9444 = vmatpush1.bf16.msra.mxu0 %v10277_v47  ;;  %v10373_v47 = vcombine.low %v2361_v10, %v2369_v13  ;;  %v2457_v10 = vld [vmem:[#allocation11 + $0x730] sm:$0xff] }
 0x54c   :  { %9608 = vmatpush1.bf16.msra.mxu1 %v10279_v38  ;;  %9445 = vmatprep.subr.bf16.mxu0 %v10294_v39  ;;  %v10375_v38 = vcombine.low %v2362_v14, %v2370_v15  ;;  %v10390_v39 = vcombine.high %v2377_v31, %v2385_v30  ;;  %v2465_v13 = vld [vmem:[#allocation11 + $0x770] sm:$0xff]  ;;  %v2458_v14 = vld [vmem:[#allocation11 + $0x738] sm:$0xff] }
 0x54d   :  { %9609 = vmatprep.subr.bf16.mxu1 %v10296_v43  ;;  %v10392_v43 = vcombine.high %v2378_v32, %v2386_v34  ;;  %v2466_v15 = vld [vmem:[#allocation11 + $0x778] sm:$0xff] }
 0x54f   :  { %9446 = vmatpush1.bf16.msra.mxu0 %v10293_v6  ;;  %v10389_v6 = vcombine.low %v2377_v31, %v2385_v30  ;;  %v2473_v31 = vld [vmem:[#allocation11 + $0x7b0] sm:$0xff] }
 0x550   :  { %9610 = vmatpush1.bf16.msra.mxu1 %v10295_v50  ;;  %9447 = vmatprep.subr.bf16.mxu0 %v10310_v53  ;;  %v10391_v50 = vcombine.low %v2378_v32, %v2386_v34  ;;  %v10406_v53 = vcombine.high %v2393_v44, %v2401_v45  ;;  %v2481_v30 = vld [vmem:[#allocation11 + $0x7f0] sm:$0xff]  ;;  %v2474_v32 = vld [vmem:[#allocation11 + $0x7b8] sm:$0xff] }
 0x551   :  { %9611 = vmatprep.subr.bf16.mxu1 %v10312_v57  ;;  %v10408_v57 = vcombine.high %v2394_v46, %v2402_v49  ;;  %v2482_v34 = vld [vmem:[#allocation11 + $0x7f8] sm:$0xff] }
 0x553   :  { %9448 = vmatpush1.bf16.msra.mxu0 %v10309_v56  ;;  %v10405_v56 = vcombine.low %v2393_v44, %v2401_v45  ;;  %v2489_v44 = vld [vmem:[#allocation11 + $0x830] sm:$0xff] }
 0x554   :  { %9612 = vmatpush1.bf16.msra.mxu1 %v10311_v58  ;;  %9449 = vmatprep.subr.bf16.mxu0 %v10326_v59  ;;  %v10407_v58 = vcombine.low %v2394_v46, %v2402_v49  ;;  %v10422_v59 = vcombine.high %v2409_v51, %v2417_v52  ;;  %v2497_v45 = vld [vmem:[#allocation11 + $0x870] sm:$0xff]  ;;  %v2490_v46 = vld [vmem:[#allocation11 + $0x838] sm:$0xff] }
 0x555   :  { %9613 = vmatprep.subr.bf16.mxu1 %v10328_v8  ;;  %v10424_v8 = vcombine.high %v2410_v54, %v2418_v55  ;;  %v2498_v49 = vld [vmem:[#allocation11 + $0x878] sm:$0xff] }
 0x557   :  { %9450 = vmatpush1.bf16.msra.mxu0 %v10325_v0  ;;  %v10421_v0 = vcombine.low %v2409_v51, %v2417_v52  ;;  %v2505_v51 = vld [vmem:[#allocation11 + $0x8b0] sm:$0xff] }
 0x558   :  { %9614 = vmatpush1.bf16.msra.mxu1 %v10327_v60  ;;  %9451 = vmatprep.subr.bf16.mxu0 %v10342_v2  ;;  %v10423_v60 = vcombine.low %v2410_v54, %v2418_v55  ;;  %v10438_v2 = vcombine.high %v2425_v61, %v2433_v62  ;;  %v2513_v52 = vld [vmem:[#allocation11 + $0x8f0] sm:$0xff]  ;;  %v10501_v54 = vcombine.low %v2489_v44, %v2497_v45  ;;  %v2506_v55 = vld [vmem:[#allocation11 + $0x8b8] sm:$0xff] }
 0x559   :  { %9615 = vmatprep.subr.bf16.mxu1 %v10344_v48  ;;  %v10440_v48 = vcombine.high %v2426_v35, %v2434_v63 }
 0x55b   :  { %9452 = vmatpush1.bf16.msra.mxu0 %v10341_v19  ;;  %v10437_v19 = vcombine.low %v2425_v61, %v2433_v62  ;;  %v2529_v61 = vld [vmem:[#allocation11 + $0x970] sm:$0xff] }
 0x55c   :  { %9616 = vmatpush1.bf16.msra.mxu1 %v10343_v26  ;;  %9453 = vmatprep.subr.bf16.mxu0 %v10358_v36  ;;  %v10439_v26 = vcombine.low %v2426_v35, %v2434_v63  ;;  %v10454_v36 = vcombine.high %v2441_v3, %v2449_v4  ;;  %v2522_v35 = vld [vmem:[#allocation11 + $0x938] sm:$0xff] }
 0x55d   :  { %9617 = vmatprep.subr.bf16.mxu1 %v10360_v9  ;;  %v10456_v9 = vcombine.high %v2442_v5, %v2450_v7  ;;  %v2530_v63 = vld [vmem:[#allocation11 + $0x978] sm:$0xff] }
 0x55f   :  { %9454 = vmatpush1.bf16.msra.mxu0 %v10357_v16  ;;  %v10453_v16 = vcombine.low %v2441_v3, %v2449_v4  ;;  %v2537_v3 = vld [vmem:[#allocation11 + $0x9b0] sm:$0xff] }
 0x560   :  { %9618 = vmatpush1.bf16.msra.mxu1 %v10359_v17  ;;  %9455 = vmatprep.subr.bf16.mxu0 %v10374_v20  ;;  %v10455_v17 = vcombine.low %v2442_v5, %v2450_v7  ;;  %v10470_v20 = vcombine.high %v2457_v10, %v2465_v13  ;;  %v2545_v4 = vld [vmem:[#allocation11 + $0x9f0] sm:$0xff]  ;;  %v2538_v5 = vld [vmem:[#allocation11 + $0x9b8] sm:$0xff] }
 0x561   :  { %9619 = vmatprep.subr.bf16.mxu1 %v10376_v27  ;;  %v10472_v27 = vcombine.high %v2458_v14, %v2466_v15  ;;  %v2546_v7 = vld [vmem:[#allocation11 + $0x9f8] sm:$0xff] }
 0x563   :  { %9456 = vmatpush1.bf16.msra.mxu0 %v10373_v47  ;;  %v10469_v47 = vcombine.low %v2457_v10, %v2465_v13  ;;  %v2561_v10 = vld [vmem:[#allocation11 + $0xa70] sm:$0xff]  ;;  %v2554_v13 = vld [vmem:[#allocation11 + $0xa38] sm:$0xff] }
 0x564   :  { %9620 = vmatpush1.bf16.msra.mxu1 %v10375_v38  ;;  %9457 = vmatprep.subr.bf16.mxu0 %v10390_v39  ;;  %v10471_v38 = vcombine.low %v2458_v14, %v2466_v15  ;;  %v10486_v39 = vcombine.high %v2473_v31, %v2481_v30  ;;  %v2562_v14 = vld [vmem:[#allocation11 + $0xa78] sm:$0xff]  ;;  %v10551_v15 = vcombine.low %v2538_v5, %v2546_v7 }
 0x565   :  { %9621 = vmatprep.subr.bf16.mxu1 %v10392_v43  ;;  %v10488_v43 = vcombine.high %v2474_v32, %v2482_v34 }
 0x567   :  { %9458 = vmatpush1.bf16.msra.mxu0 %v10389_v6  ;;  %v10485_v6 = vcombine.low %v2473_v31, %v2481_v30  ;;  %v2570_v31 = vld [vmem:[#allocation11 + $0xab8] sm:$0xff] }
 0x568   :  { %9622 = vmatpush1.bf16.msra.mxu1 %v10391_v50  ;;  %9459 = vmatprep.subr.bf16.mxu0 %v10406_v53  ;;  %v10487_v50 = vcombine.low %v2474_v32, %v2482_v34  ;;  %v10502_v53 = vcombine.high %v2489_v44, %v2497_v45  ;;  %v2578_v30 = vld [vmem:[#allocation11 + $0xaf8] sm:$0xff]  ;;  %v10567_v34 = vcombine.low %v2554_v13, %v2562_v14 }
 0x569   :  { %9623 = vmatprep.subr.bf16.mxu1 %v10408_v57  ;;  %v10504_v57 = vcombine.high %v2490_v46, %v2498_v49  ;;  %v2586_v44 = vld [vmem:[#allocation11 + $0xb38] sm:$0xff] }
 0x56a   :  { %v2594_v45 = vld [vmem:[#allocation11 + $0xb78] sm:$0xff] }
 0x56b   :  { %9460 = vmatpush1.bf16.msra.mxu0 %v10405_v56  ;;  %v2514_v56 = vld [vmem:[#allocation11 + $0x8f8] sm:$0xff] }
 0x56c   :  { %9624 = vmatpush1.bf16.msra.mxu1 %v10407_v58  ;;  %9461 = vmatprep.subr.bf16.mxu0 %v10422_v59  ;;  %v10503_v58 = vcombine.low %v2490_v46, %v2498_v49  ;;  %v10518_v59 = vcombine.high %v2505_v51, %v2513_v52  ;;  %v10520_v62 = vcombine.high %v2506_v55, %v2514_v56 }
 0x56d   :  { %9625 = vmatprep.subr.bf16.mxu1 %v10424_v8  ;;  %v2521_v8 = vld [vmem:[#allocation11 + $0x930] sm:$0xff]  ;;  %v10583_v49 = vcombine.low %v2570_v31, %v2578_v30 }
 0x56f   :  { %9462 = vmatpush1.bf16.msra.mxu0 %v10421_v0  ;;  %v10517_v0 = vcombine.low %v2505_v51, %v2513_v52  ;;  %v2602_v51 = vld [vmem:[#allocation11 + $0xbb8] sm:$0xff] }
 0x570   :  { %9626 = vmatpush1.bf16.msra.mxu1 %v10423_v60  ;;  %9463 = vmatprep.subr.bf16.mxu0 %v10438_v2  ;;  %v10519_v60 = vcombine.low %v2506_v55, %v2514_v56  ;;  %v10534_v2 = vcombine.high %v2521_v8, %v2529_v61  ;;  %v2610_v52 = vld [vmem:[#allocation11 + $0xbf8] sm:$0xff]  ;;  %v10599_v55 = vcombine.low %v2586_v44, %v2594_v45 }
 0x571   :  { %9627 = vmatprep.subr.bf16.mxu1 %v10440_v48  ;;  %v10536_v48 = vcombine.high %v2522_v35, %v2530_v63 }
 0x573   :  { %9464 = vmatpush1.bf16.msra.mxu0 %v10437_v19  ;;  %v10533_v19 = vcombine.low %v2521_v8, %v2529_v61  ;;  %v2625_v8 = vld [vmem:[#allocation11 + $0xc70] sm:$0xff]  ;;  %v2618_v61 = vld [vmem:[#allocation11 + $0xc38] sm:$0xff] }
 0x574   :  { %9628 = vmatpush1.bf16.msra.mxu1 %v10439_v26  ;;  %9465 = vmatprep.subr.bf16.mxu0 %v10454_v36  ;;  %v10550_v26 = vcombine.high %v2537_v3, %v2545_v4  ;;  %v10552_v36 = vcombine.high %v2538_v5, %v2546_v7 }
 0x575   :  { %9629 = vmatprep.subr.bf16.mxu1 %v10456_v9  ;;  %v2553_v9 = vld [vmem:[#allocation11 + $0xa30] sm:$0xff] }
 0x576   :  { %v10565_v32 = vcombine.low %v2553_v9, %v2561_v10 }
 0x577   :  { %9466 = vmatpush1.bf16.msra.mxu0 %v10453_v16  ;;  %v10566_v16 = vcombine.high %v2553_v9, %v2561_v10  ;;  %v2650_v9 = vld [vmem:[#allocation11 + $0xd38] sm:$0xff] }
 0x578   :  { %9630 = vmatpush1.bf16.msra.mxu1 %v10455_v17  ;;  %9467 = vmatprep.subr.bf16.mxu0 %v10470_v20  ;;  %v10568_v17 = vcombine.high %v2554_v13, %v2562_v14  ;;  %v2569_v20 = vld [vmem:[#allocation11 + $0xab0] sm:$0xff]  ;;  %v2658_v10 = vld [vmem:[#allocation11 + $0xd78] sm:$0xff] }
 0x579   :  { %9631 = vmatprep.subr.bf16.mxu1 %v10472_v27  ;;  %v2577_v27 = vld [vmem:[#allocation11 + $0xaf0] sm:$0xff] }
 0x57a   :  { %v10581_v46 = vcombine.low %v2569_v20, %v2577_v27 }
 0x57b   :  { %9468 = vmatpush1.bf16.msra.mxu0 %v10469_v47  ;;  %v10582_v47 = vcombine.high %v2569_v20, %v2577_v27  ;;  %v2666_v20 = vld [vmem:[#allocation11 + $0xdb8] sm:$0xff] }
 0x57c   :  { %9632 = vmatpush1.bf16.msra.mxu1 %v10471_v38  ;;  %9469 = vmatprep.subr.bf16.mxu0 %v10486_v39  ;;  %v10584_v38 = vcombine.high %v2570_v31, %v2578_v30  ;;  %v2585_v39 = vld [vmem:[#allocation11 + $0xb30] sm:$0xff]  ;;  %v2674_v27 = vld [vmem:[#allocation11 + $0xdf8] sm:$0xff]  ;;  %v10663_v30 = vcombine.low %v2650_v9, %v2658_v10 }
 0x57d   :  { %9633 = vmatprep.subr.bf16.mxu1 %v10488_v43  ;;  %v2593_v43 = vld [vmem:[#allocation11 + $0xb70] sm:$0xff] }
 0x57f   :  { %9470 = vmatpush1.bf16.msra.mxu0 %v10485_v6  ;;  %v10598_v6 = vcombine.high %v2585_v39, %v2593_v43 }
 0x580   :  { %9634 = vmatpush1.bf16.msra.mxu1 %v10487_v50  ;;  %9480 = vmatprep.subr.bf16.mxu0 %v10502_v53  ;;  %v10600_v50 = vcombine.high %v2586_v44, %v2594_v45  ;;  %v2601_v53 = vld [vmem:[#allocation11 + $0xbb0] sm:$0xff]  ;;  %v10679_v45 = vcombine.low %v2666_v20, %v2674_v27 }
 0x581   :  { %9644 = vmatprep.subr.bf16.mxu1 %v10504_v57  ;;  %v2609_v57 = vld [vmem:[#allocation11 + $0xbf0] sm:$0xff] }
 0x582   :  { %9472 = vmatmul.mubr.bf16.vlgmr.msra.gmra.mrb[24].mxu0 %v11822_v11  ;;  %v10614_v56 = vcombine.high %v2601_v53, %v2609_v57 }
 0x583   :  { %9636 = vmatmul.mubr.bf16.vlgmr.msra.gmra.mrb[24].mxu1 %v11822_v11  ;;  %9481 = vmatpush1.bf16.msra.mxu0 %v10501_v54  ;;  %v10535_v11 = vcombine.low %v2522_v35, %v2530_v63  ;;  %v10597_v54 = vcombine.low %v2585_v39, %v2593_v43  ;;  %v10613_v35 = vcombine.low %v2601_v53, %v2609_v57  ;;  %v2682_v39 = vld [vmem:[#allocation11 + $0xe38] sm:$0xff] }
 0x584   :  { %9512 = vmatprep.mubr.bf16.mxu0 %v11826_v18  ;;  %9645 = vmatpush1.bf16.msra.mxu1 %v10503_v58  ;;  %v10616_v58 = vcombine.high %v2602_v51, %v2610_v52  ;;  %v10615_v63 = vcombine.low %v2602_v51, %v2610_v52  ;;  %v2690_v43 = vld [vmem:[#allocation11 + $0xe78] sm:$0xff] }
 0x585   :  { %9676 = vmatprep.mubr.bf16.mxu1 %v11826_v18  ;;  %9482 = vmatprep.subr.bf16.mxu0 %v10518_v59  ;;  %v10549_v18 = vcombine.low %v2537_v3, %v2545_v4  ;;  %v2617_v59 = vld [vmem:[#allocation11 + $0xc30] sm:$0xff]  ;;  %v2634_v3 = vld [vmem:[#allocation11 + $0xcb8] sm:$0xff]  ;;  %v10695_v52 = vcombine.low %v2682_v39, %v2690_v43 }
 0x586   :  { %9646 = vmatprep.subr.bf16.mxu1 %v10520_v62  ;;  %v2626_v62 = vld [vmem:[#allocation11 + $0xc78] sm:$0xff]  ;;  %v10629_v5 = vcombine.low %v2617_v59, %v2625_v8 }
 0x587   :  { %9483 = vmatpush1.bf16.msra.mxu0 %v10517_v0  ;;  %v10630_v0 = vcombine.high %v2617_v59, %v2625_v8  ;;  %v2642_v4 = vld [vmem:[#allocation11 + $0xcf8] sm:$0xff]  ;;  %v10631_v7 = vcombine.low %v2618_v61, %v2626_v62 }
 0x588   :  { %9647 = vmatpush1.bf16.msra.mxu1 %v10519_v60  ;;  %9484 = vmatprep.subr.bf16.mxu0 %v10534_v2  ;;  %v10632_v60 = vcombine.high %v2618_v61, %v2626_v62  ;;  %v2633_v2 = vld [vmem:[#allocation11 + $0xcb0] sm:$0xff]  ;;  %v10647_v14 = vcombine.low %v2634_v3, %v2642_v4  ;;  %v2698_v53 = vld [vmem:[#allocation11 + $0xeb8] sm:$0xff] }
 0x589   :  { %9648 = vmatprep.subr.bf16.mxu1 %v10536_v48  ;;  %v2641_v48 = vld [vmem:[#allocation11 + $0xcf0] sm:$0xff]  ;;  %v2706_v57 = vld [vmem:[#allocation11 + $0xef8] sm:$0xff] }
 0x58a   :  { %v10645_v13 = vcombine.low %v2633_v2, %v2641_v48  ;;  %v2714_v59 = vld [vmem:[#allocation11 + $0xf38] sm:$0xff]  ;;  %v10711_v62 = vcombine.low %v2698_v53, %v2706_v57 }
 0x58b   :  { %9485 = vmatpush1.bf16.msra.mxu0 %v10533_v19  ;;  %v10646_v19 = vcombine.high %v2633_v2, %v2641_v48  ;;  %v2722_v8 = vld [vmem:[#allocation11 + $0xf78] sm:$0xff] }
 0x58c   :  { %9649 = vmatpush1.bf16.msra.mxu1 %v10535_v11  ;;  %9486 = vmatprep.subr.bf16.mxu0 %v10550_v26  ;;  %v10648_v11 = vcombine.high %v2634_v3, %v2642_v4  ;;  %v2649_v26 = vld [vmem:[#allocation11 + $0xd30] sm:$0xff]  ;;  %v2730_v2 = vld [vmem:[#allocation11 + $0xfb8] sm:$0xff]  ;;  %v10727_v4 = vcombine.low %v2714_v59, %v2722_v8 }
 0x58d   :  { %9650 = vmatprep.subr.bf16.mxu1 %v10552_v36  ;;  %v2657_v36 = vld [vmem:[#allocation11 + $0xd70] sm:$0xff]  ;;  %v2738_v48 = vld [vmem:[#allocation11 + $0xff8] sm:$0xff] }
 0x58e   :  { %v10661_v31 = vcombine.low %v2649_v26, %v2657_v36 }
 0x58f   :  { %9487 = vmatpush1.bf16.msra.mxu0 %v10549_v18  ;;  %v10662_v18 = vcombine.high %v2649_v26, %v2657_v36  ;;  %v2746_v26 = vld [vmem:[#allocation11 + $0x1038] sm:$0xff] }
 0x590   :  { %9651 = vmatpush1.bf16.msra.mxu1 %v10551_v15  ;;  %9488 = vmatprep.subr.bf16.mxu0 %v10566_v16  ;;  %v10664_v15 = vcombine.high %v2650_v9, %v2658_v10  ;;  %v2665_v16 = vld [vmem:[#allocation11 + $0xdb0] sm:$0xff]  ;;  %v2754_v36 = vld [vmem:[#allocation11 + $0x1078] sm:$0xff]  ;;  %v10743_v10 = vcombine.low %v2730_v2, %v2738_v48 }
 0x591   :  { %9652 = vmatprep.subr.bf16.mxu1 %v10568_v17  ;;  %v2673_v17 = vld [vmem:[#allocation11 + $0xdf0] sm:$0xff] }
 0x592   :  { %v10677_v44 = vcombine.low %v2665_v16, %v2673_v17 }
 0x593   :  { %9489 = vmatpush1.bf16.msra.mxu0 %v10565_v32  ;;  %v10678_v32 = vcombine.high %v2665_v16, %v2673_v17  ;;  %v2762_v17 = vld [vmem:[#allocation11 + $0x10b8] sm:$0xff] }
 0x594   :  { %9653 = vmatpush1.bf16.msra.mxu1 %v10567_v34  ;;  %9490 = vmatprep.subr.bf16.mxu0 %v10582_v47  ;;  %v10680_v34 = vcombine.high %v2666_v20, %v2674_v27  ;;  %v2681_v47 = vld [vmem:[#allocation11 + $0xe30] sm:$0xff]  ;;  %v2770_v20 = vld [vmem:[#allocation11 + $0x10f8] sm:$0xff]  ;;  %v10759_v27 = vcombine.low %v2746_v26, %v2754_v36 }
 0x595   :  { %9654 = vmatprep.subr.bf16.mxu1 %v10584_v38  ;;  %v2689_v38 = vld [vmem:[#allocation11 + $0xe70] sm:$0xff] }
 0x596   :  { %v10693_v51 = vcombine.low %v2681_v47, %v2689_v38 }
 0x597   :  { %9491 = vmatpush1.bf16.msra.mxu0 %v10581_v46  ;;  %v10694_v46 = vcombine.high %v2681_v47, %v2689_v38  ;;  %v2778_v47 = vld [vmem:[#allocation11 + $0x1138] sm:$0xff] }
 0x598   :  { %9655 = vmatpush1.bf16.msra.mxu1 %v10583_v49  ;;  %9492 = vmatprep.subr.bf16.mxu0 %v10598_v6  ;;  %v10696_v49 = vcombine.high %v2682_v39, %v2690_v43  ;;  %v2697_v6 = vld [vmem:[#allocation11 + $0xeb0] sm:$0xff]  ;;  %v2786_v38 = vld [vmem:[#allocation11 + $0x1178] sm:$0xff]  ;;  %v10775_v43 = vcombine.low %v2762_v17, %v2770_v20 }
 0x599   :  { %9656 = vmatprep.subr.bf16.mxu1 %v10600_v50  ;;  %v2705_v50 = vld [vmem:[#allocation11 + $0xef0] sm:$0xff] }
 0x59a   :  { %v10709_v61 = vcombine.low %v2697_v6, %v2705_v50 }
 0x59b   :  { %9493 = vmatpush1.bf16.msra.mxu0 %v10597_v54  ;;  %v10710_v54 = vcombine.high %v2697_v6, %v2705_v50  ;;  %v2794_v6 = vld [vmem:[#allocation11 + $0x11b8] sm:$0xff] }
 0x59c   :  { %9657 = vmatpush1.bf16.msra.mxu1 %v10599_v55  ;;  %9494 = vmatprep.subr.bf16.mxu0 %v10614_v56  ;;  %v10712_v55 = vcombine.high %v2698_v53, %v2706_v57  ;;  %v2713_v56 = vld [vmem:[#allocation11 + $0xf30] sm:$0xff]  ;;  %v2802_v50 = vld [vmem:[#allocation11 + $0x11f8] sm:$0xff] }
 0x59d   :  { %9658 = vmatprep.subr.bf16.mxu1 %v10616_v58  ;;  %v2721_v58 = vld [vmem:[#allocation11 + $0xf70] sm:$0xff] }
 0x59e   :  { %v10725_v3 = vcombine.low %v2713_v56, %v2721_v58 }
 0x59f   :  { %9495 = vmatpush1.bf16.msra.mxu0 %v10613_v35  ;;  %v10726_v35 = vcombine.high %v2713_v56, %v2721_v58  ;;  %v2818_v56 = vld [vmem:[#allocation11 + $0x1278] sm:$0xff]  ;;  %v10807_v58 = vcombine.low %v2794_v6, %v2802_v50 }
 0x5a0   :  { %9659 = vmatpush1.bf16.msra.mxu1 %v10615_v63  ;;  %9496 = vmatprep.subr.bf16.mxu0 %v10630_v0  ;;  %v10728_v63 = vcombine.high %v2714_v59, %v2722_v8  ;;  %v2729_v0 = vld [vmem:[#allocation11 + $0xfb0] sm:$0xff] }
 0x5a1   :  { %9660 = vmatprep.subr.bf16.mxu1 %v10632_v60  ;;  %v2737_v60 = vld [vmem:[#allocation11 + $0xff0] sm:$0xff] }
 0x5a2   :  { %v10741_v9 = vcombine.low %v2729_v0, %v2737_v60 }
 0x5a3   :  { %9497 = vmatpush1.bf16.msra.mxu0 %v10629_v5  ;;  %v10742_v5 = vcombine.high %v2729_v0, %v2737_v60 }
 0x5a4   :  { %9661 = vmatpush1.bf16.msra.mxu1 %v10631_v7  ;;  %9498 = vmatprep.subr.bf16.mxu0 %v10646_v19  ;;  %v10744_v7 = vcombine.high %v2730_v2, %v2738_v48  ;;  %v2745_v19 = vld [vmem:[#allocation11 + $0x1030] sm:$0xff] }
 0x5a5   :  { %9662 = vmatprep.subr.bf16.mxu1 %v10648_v11  ;;  %v2753_v11 = vld [vmem:[#allocation11 + $0x1070] sm:$0xff] }
 0x5a6   :  { %v10757_v16 = vcombine.low %v2745_v19, %v2753_v11 }
 0x5a7   :  { %9499 = vmatpush1.bf16.msra.mxu0 %v10645_v13  ;;  %v10758_v13 = vcombine.high %v2745_v19, %v2753_v11 }
 0x5a8   :  { %9663 = vmatpush1.bf16.msra.mxu1 %v10647_v14  ;;  %9500 = vmatprep.subr.bf16.mxu0 %v10662_v18  ;;  %v10760_v14 = vcombine.high %v2746_v26, %v2754_v36  ;;  %v2761_v18 = vld [vmem:[#allocation11 + $0x10b0] sm:$0xff] }
 0x5a9   :  { %9664 = vmatprep.subr.bf16.mxu1 %v10664_v15  ;;  %v2769_v15 = vld [vmem:[#allocation11 + $0x10f0] sm:$0xff] }
 0x5aa   :  { %v10773_v39 = vcombine.low %v2761_v18, %v2769_v15 }
 0x5ab   :  { %9501 = vmatpush1.bf16.msra.mxu0 %v10661_v31  ;;  %v10774_v31 = vcombine.high %v2761_v18, %v2769_v15 }
 0x5ac   :  { %9665 = vmatpush1.bf16.msra.mxu1 %v10663_v30  ;;  %9502 = vmatprep.subr.bf16.mxu0 %v10678_v32  ;;  %v2777_v30 = vld [vmem:[#allocation11 + $0x1130] sm:$0xff] }
 0x5ad   :  { %9666 = vmatprep.subr.bf16.mxu1 %v10680_v34  ;;  %v2785_v32 = vld [vmem:[#allocation11 + $0x1170] sm:$0xff]  ;;  %v10776_v34 = vcombine.high %v2762_v17, %v2770_v20 }
 0x5ae   :  { %v10789_v53 = vcombine.low %v2777_v30, %v2785_v32  ;;  %v2873_v20 = vld [vmem:[#allocation11 + $0x1430] sm:$0xff] }
 0x5af   :  { %9503 = vmatpush1.bf16.msra.mxu0 %v10677_v44  ;;  %v10790_v44 = vcombine.high %v2777_v30, %v2785_v32  ;;  %v2882_v30 = vld [vmem:[#allocation11 + $0x1478] sm:$0xff] }
 0x5b0   :  { %9667 = vmatpush1.bf16.msra.mxu1 %v10679_v45  ;;  %9504 = vmatprep.subr.bf16.mxu0 %v10694_v46  ;;  %v10792_v45 = vcombine.high %v2778_v47, %v2786_v38  ;;  %v2793_v46 = vld [vmem:[#allocation11 + $0x11b0] sm:$0xff] }
 0x5b1   :  { %9668 = vmatprep.subr.bf16.mxu1 %v10696_v49  ;;  %v2801_v49 = vld [vmem:[#allocation11 + $0x11f0] sm:$0xff] }
 0x5b2   :  { %v10806_v57 = vcombine.high %v2793_v46, %v2801_v49 }
 0x5b3   :  { %9505 = vmatpush1.bf16.msra.mxu0 %v10693_v51  ;;  %v10808_v51 = vcombine.high %v2794_v6, %v2802_v50 }
 0x5b4   :  { %9669 = vmatpush1.bf16.msra.mxu1 %v10695_v52  ;;  %9506 = vmatprep.subr.bf16.mxu0 %v10710_v54  ;;  %v2809_v52 = vld [vmem:[#allocation11 + $0x1230] sm:$0xff] }
 0x5b5   :  { %9670 = vmatprep.subr.bf16.mxu1 %v10712_v55  ;;  %v2817_v54 = vld [vmem:[#allocation11 + $0x1270] sm:$0xff]  ;;  %v2810_v55 = vld [vmem:[#allocation11 + $0x1238] sm:$0xff] }
 0x5b6   :  { %v10822_v59 = vcombine.high %v2809_v52, %v2817_v54  ;;  %v10824_v8 = vcombine.high %v2810_v55, %v2818_v56  ;;  %v10821_v0 = vcombine.low %v2809_v52, %v2817_v54  ;;  %v10823_v60 = vcombine.low %v2810_v55, %v2818_v56 }
 0x5b7   :  { %9507 = vmatpush1.bf16.msra.mxu0 %v10709_v61  ;;  %v2825_v61 = vld [vmem:[#allocation11 + $0x12b0] sm:$0xff] }
 0x5b8   :  { %9671 = vmatpush1.bf16.msra.mxu1 %v10711_v62  ;;  %9508 = vmatprep.subr.bf16.mxu0 %v10726_v35  ;;  %v2833_v62 = vld [vmem:[#allocation11 + $0x12f0] sm:$0xff]  ;;  %v2826_v35 = vld [vmem:[#allocation11 + $0x12b8] sm:$0xff] }
 0x5b9   :  { %9672 = vmatprep.subr.bf16.mxu1 %v10728_v63  ;;  %v2834_v63 = vld [vmem:[#allocation11 + $0x12f8] sm:$0xff]  ;;  %v10838_v2 = vcombine.high %v2825_v61, %v2833_v62  ;;  %v10837_v19 = vcombine.low %v2825_v61, %v2833_v62 }
 0x5ba   :  { %v10840_v48 = vcombine.high %v2826_v35, %v2834_v63  ;;  %v10839_v11 = vcombine.low %v2826_v35, %v2834_v63 }
 0x5bb   :  { %9509 = vmatpush1.bf16.msra.mxu0 %v10725_v3  ;;  %v2841_v3 = vld [vmem:[#allocation11 + $0x1330] sm:$0xff] }
 0x5bc   :  { %9673 = vmatpush1.bf16.msra.mxu1 %v10727_v4  ;;  %9510 = vmatprep.subr.bf16.mxu0 %v10742_v5  ;;  %v2849_v4 = vld [vmem:[#allocation11 + $0x1370] sm:$0xff]  ;;  %v2842_v5 = vld [vmem:[#allocation11 + $0x1338] sm:$0xff] }
 0x5bd   :  { %9674 = vmatprep.subr.bf16.mxu1 %v10744_v7  ;;  %v2850_v7 = vld [vmem:[#allocation11 + $0x1378] sm:$0xff]  ;;  %v10854_v26 = vcombine.high %v2841_v3, %v2849_v4  ;;  %v10853_v18 = vcombine.low %v2841_v3, %v2849_v4 }
 0x5be   :  { %v10856_v36 = vcombine.high %v2842_v5, %v2850_v7  ;;  %v10855_v15 = vcombine.low %v2842_v5, %v2850_v7 }
 0x5bf   :  { %9511 = vmatpush1.bf16.msra.mxu0 %v10741_v9  ;;  %v2857_v9 = vld [vmem:[#allocation11 + $0x13b0] sm:$0xff] }
 0x5c0   :  { %9675 = vmatpush1.bf16.msra.mxu1 %v10743_v10  ;;  %9521 = vmatprep.subr.bf16.mxu0 %v10758_v13  ;;  %v2865_v10 = vld [vmem:[#allocation11 + $0x13f0] sm:$0xff]  ;;  %v2858_v13 = vld [vmem:[#allocation11 + $0x13b8] sm:$0xff] }
 0x5c1   :  { %9685 = vmatprep.subr.bf16.mxu1 %v10760_v14  ;;  %v2866_v14 = vld [vmem:[#allocation11 + $0x13f8] sm:$0xff]  ;;  %v10869_v32 = vcombine.low %v2857_v9, %v2865_v10 }
 0x5c2   :  { %9513 = vmatmul.mubr.bf16.vlgmr.msra.gmra.mrb[24].mxu0 %v11835_v42  ;;  %v10872_v17 = vcombine.high %v2858_v13, %v2866_v14 }
 0x5c3   :  { %9677 = vmatmul.mubr.bf16.vlgmr.msra.gmra.mrb[24].mxu1 %v11835_v42  ;;  %9522 = vmatpush1.bf16.msra.mxu0 %v10757_v16  ;;  %v10791_v42 = vcombine.low %v2778_v47, %v2786_v38  ;;  %v10870_v16 = vcombine.high %v2857_v9, %v2865_v10 }
 0x5c4   :  { %9553 = vmatprep.mubr.bf16.mxu0 %v11856_v28  ;;  %9686 = vmatpush1.bf16.msra.mxu1 %v10759_v27  ;;  %v2881_v27 = vld [vmem:[#allocation11 + $0x1470] sm:$0xff] }
 0x5c5   :  { %9717 = vmatprep.mubr.bf16.mxu1 %v11856_v28  ;;  %9523 = vmatprep.subr.bf16.mxu0 %v10774_v31  ;;  %v10805_v28 = vcombine.low %v2793_v46, %v2801_v49  ;;  %v2874_v31 = vld [vmem:[#allocation11 + $0x1438] sm:$0xff]  ;;  %v10886_v47 = vcombine.high %v2873_v20, %v2881_v27  ;;  %v10885_v46 = vcombine.low %v2873_v20, %v2881_v27 }
 0x5c6   :  { %9687 = vmatprep.subr.bf16.mxu1 %v10776_v34  ;;  %v10871_v34 = vcombine.low %v2858_v13, %v2866_v14  ;;  %v10888_v38 = vcombine.high %v2874_v31, %v2882_v30  ;;  %v10887_v49 = vcombine.low %v2874_v31, %v2882_v30 }
 0x5c7   :  { %9524 = vmatpush1.bf16.msra.mxu0 %v10773_v39  ;;  %v2889_v39 = vld [vmem:[#allocation11 + $0x14b0] sm:$0xff] }
 0x5c8   :  { %9688 = vmatpush1.bf16.msra.mxu1 %v10775_v43  ;;  %9525 = vmatprep.subr.bf16.mxu0 %v10790_v44  ;;  %v2897_v43 = vld [vmem:[#allocation11 + $0x14f0] sm:$0xff]  ;;  %v2890_v44 = vld [vmem:[#allocation11 + $0x14b8] sm:$0xff] }
 0x5c9   :  { %9689 = vmatprep.subr.bf16.mxu1 %v10792_v45  ;;  %v2898_v45 = vld [vmem:[#allocation11 + $0x14f8] sm:$0xff]  ;;  %v10902_v6 = vcombine.high %v2889_v39, %v2897_v43  ;;  %v10901_v52 = vcombine.low %v2889_v39, %v2897_v43 }
 0x5ca   :  { %v10904_v50 = vcombine.high %v2890_v44, %v2898_v45  ;;  %v10903_v54 = vcombine.low %v2890_v44, %v2898_v45 }
 0x5cb   :  { %9526 = vmatpush1.bf16.msra.mxu0 %v10789_v53  ;;  %v2905_v53 = vld [vmem:[#allocation11 + $0x1530] sm:$0xff] }
 0x5cc   :  { %9690 = vmatpush1.bf16.msra.mxu1 %v10791_v42  ;;  %9527 = vmatprep.subr.bf16.mxu0 %v10806_v57  ;;  %v2913_v42 = vld [vmem:[#allocation11 + $0x1570] sm:$0xff]  ;;  %v2906_v57 = vld [vmem:[#allocation11 + $0x1538] sm:$0xff] }
 0x5cd   :  { %9691 = vmatprep.subr.bf16.mxu1 %v10808_v51  ;;  %v2914_v51 = vld [vmem:[#allocation11 + $0x1578] sm:$0xff]  ;;  %v10918_v55 = vcombine.high %v2905_v53, %v2913_v42  ;;  %v10917_v61 = vcombine.low %v2905_v53, %v2913_v42 }
 0x5ce   :  { %v10920_v56 = vcombine.high %v2906_v57, %v2914_v51  ;;  %v10919_v62 = vcombine.low %v2906_v57, %v2914_v51 }
 0x5cf   :  { %9528 = vmatpush1.bf16.msra.mxu0 %v10805_v28  ;;  %v2921_v28 = vld [vmem:[#allocation11 + $0x15b0] sm:$0xff] }
 0x5d0   :  { %9692 = vmatpush1.bf16.msra.mxu1 %v10807_v58  ;;  %9529 = vmatprep.subr.bf16.mxu0 %v10822_v59  ;;  %v2929_v58 = vld [vmem:[#allocation11 + $0x15f0] sm:$0xff]  ;;  %v2922_v59 = vld [vmem:[#allocation11 + $0x15b8] sm:$0xff] }
 0x5d1   :  { %9693 = vmatprep.subr.bf16.mxu1 %v10824_v8  ;;  %v2930_v8 = vld [vmem:[#allocation11 + $0x15f8] sm:$0xff]  ;;  %v10934_v35 = vcombine.high %v2921_v28, %v2929_v58  ;;  %v10933_v3 = vcombine.low %v2921_v28, %v2929_v58 }
 0x5d2   :  { %v10936_v63 = vcombine.high %v2922_v59, %v2930_v8  ;;  %v10935_v4 = vcombine.low %v2922_v59, %v2930_v8  ;;  %v3026_v28 = vld [vmem:[#allocation11 + $0x18f8] sm:$0xff]  ;;  %v3033_v8 = vld [vmem:[#allocation11 + $0x1930] sm:$0xff] }
 0x5d3   :  { %9530 = vmatpush1.bf16.msra.mxu0 %v10821_v0  ;;  %v2937_v0 = vld [vmem:[#allocation11 + $0x1630] sm:$0xff] }
 0x5d4   :  { %9694 = vmatpush1.bf16.msra.mxu1 %v10823_v60  ;;  %9531 = vmatprep.subr.bf16.mxu0 %v10838_v2  ;;  %v2945_v60 = vld [vmem:[#allocation11 + $0x1670] sm:$0xff]  ;;  %v2938_v2 = vld [vmem:[#allocation11 + $0x1638] sm:$0xff] }
 0x5d5   :  { %9695 = vmatprep.subr.bf16.mxu1 %v10840_v48  ;;  %v2946_v48 = vld [vmem:[#allocation11 + $0x1678] sm:$0xff]  ;;  %v10950_v5 = vcombine.high %v2937_v0, %v2945_v60  ;;  %v10949_v9 = vcombine.low %v2937_v0, %v2945_v60 }
 0x5d6   :  { %v10952_v7 = vcombine.high %v2938_v2, %v2946_v48  ;;  %v10951_v10 = vcombine.low %v2938_v2, %v2946_v48 }
 0x5d7   :  { %9532 = vmatpush1.bf16.msra.mxu0 %v10837_v19  ;;  %v2953_v19 = vld [vmem:[#allocation11 + $0x16b0] sm:$0xff] }
 0x5d8   :  { %9696 = vmatpush1.bf16.msra.mxu1 %v10839_v11  ;;  %9533 = vmatprep.subr.bf16.mxu0 %v10854_v26  ;;  %v2961_v11 = vld [vmem:[#allocation11 + $0x16f0] sm:$0xff]  ;;  %v2954_v26 = vld [vmem:[#allocation11 + $0x16b8] sm:$0xff] }
 0x5d9   :  { %9697 = vmatprep.subr.bf16.mxu1 %v10856_v36  ;;  %v2962_v36 = vld [vmem:[#allocation11 + $0x16f8] sm:$0xff]  ;;  %v10966_v13 = vcombine.high %v2953_v19, %v2961_v11  ;;  %v10965_v20 = vcombine.low %v2953_v19, %v2961_v11 }
 0x5da   :  { %v10968_v14 = vcombine.high %v2954_v26, %v2962_v36  ;;  %v10967_v27 = vcombine.low %v2954_v26, %v2962_v36  ;;  %v3065_v36 = vld [vmem:[#allocation11 + $0x1a30] sm:$0xff] }
 0x5db   :  { %9534 = vmatpush1.bf16.msra.mxu0 %v10853_v18  ;;  %v2969_v18 = vld [vmem:[#allocation11 + $0x1730] sm:$0xff] }
 0x5dc   :  { %9698 = vmatpush1.bf16.msra.mxu1 %v10855_v15  ;;  %9535 = vmatprep.subr.bf16.mxu0 %v10870_v16  ;;  %v2977_v15 = vld [vmem:[#allocation11 + $0x1770] sm:$0xff]  ;;  %v2970_v16 = vld [vmem:[#allocation11 + $0x1738] sm:$0xff] }
 0x5dd   :  { %9699 = vmatprep.subr.bf16.mxu1 %v10872_v17  ;;  %v2978_v17 = vld [vmem:[#allocation11 + $0x1778] sm:$0xff]  ;;  %v10982_v31 = vcombine.high %v2969_v18, %v2977_v15  ;;  %v10981_v39 = vcombine.low %v2969_v18, %v2977_v15 }
 0x5de   :  { %v10984_v30 = vcombine.high %v2970_v16, %v2978_v17  ;;  %v10983_v43 = vcombine.low %v2970_v16, %v2978_v17  ;;  %v3081_v16 = vld [vmem:[#allocation11 + $0x1ab0] sm:$0xff] }
 0x5df   :  { %9536 = vmatpush1.bf16.msra.mxu0 %v10869_v32  ;;  %v2985_v32 = vld [vmem:[#allocation11 + $0x17b0] sm:$0xff] }
 0x5e0   :  { %9700 = vmatpush1.bf16.msra.mxu1 %v10871_v34  ;;  %9537 = vmatprep.subr.bf16.mxu0 %v10886_v47  ;;  %v2993_v34 = vld [vmem:[#allocation11 + $0x17f0] sm:$0xff]  ;;  %v2986_v47 = vld [vmem:[#allocation11 + $0x17b8] sm:$0xff] }
 0x5e1   :  { %9701 = vmatprep.subr.bf16.mxu1 %v10888_v38  ;;  %v2994_v38 = vld [vmem:[#allocation11 + $0x17f8] sm:$0xff]  ;;  %v10998_v44 = vcombine.high %v2985_v32, %v2993_v34  ;;  %v10997_v53 = vcombine.low %v2985_v32, %v2993_v34  ;;  %v3089_v17 = vld [vmem:[#allocation11 + $0x1af0] sm:$0xff] }
 0x5e2   :  { %v11000_v45 = vcombine.high %v2986_v47, %v2994_v38  ;;  %v10999_v42 = vcombine.low %v2986_v47, %v2994_v38  ;;  %v11094_v34 = vcombine.high %v3081_v16, %v3089_v17  ;;  %v3097_v38 = vld [vmem:[#allocation11 + $0x1b30] sm:$0xff] }
 0x5e3   :  { %9538 = vmatpush1.bf16.msra.mxu0 %v10885_v46  ;;  %v3001_v46 = vld [vmem:[#allocation11 + $0x1830] sm:$0xff] }
 0x5e4   :  { %9702 = vmatpush1.bf16.msra.mxu1 %v10887_v49  ;;  %9539 = vmatprep.subr.bf16.mxu0 %v10902_v6  ;;  %v3009_v49 = vld [vmem:[#allocation11 + $0x1870] sm:$0xff]  ;;  %v3002_v6 = vld [vmem:[#allocation11 + $0x1838] sm:$0xff] }
 0x5e5   :  { %9703 = vmatprep.subr.bf16.mxu1 %v10904_v50  ;;  %v3010_v50 = vld [vmem:[#allocation11 + $0x1878] sm:$0xff]  ;;  %v11014_v57 = vcombine.high %v3001_v46, %v3009_v49 }
 0x5e6   :  { %v11016_v51 = vcombine.high %v3002_v6, %v3010_v50  ;;  %v11015_v58 = vcombine.low %v3002_v6, %v3010_v50  ;;  %v11093_v6 = vcombine.low %v3081_v16, %v3089_v17  ;;  %v3145_v17 = vld [vmem:[#allocation11 + $0x1cb0] sm:$0xff] }
 0x5e7   :  { %9540 = vmatpush1.bf16.msra.mxu0 %v10901_v52  ;;  %v3017_v52 = vld [vmem:[#allocation11 + $0x18b0] sm:$0xff] }
 0x5e8   :  { %9704 = vmatpush1.bf16.msra.mxu1 %v10903_v54  ;;  %9541 = vmatprep.subr.bf16.mxu0 %v10918_v55  ;;  %v3025_v54 = vld [vmem:[#allocation11 + $0x18f0] sm:$0xff]  ;;  %v11013_v55 = vcombine.low %v3001_v46, %v3009_v49 }
 0x5e9   :  { %9705 = vmatprep.subr.bf16.mxu1 %v10920_v56  ;;  %v3018_v56 = vld [vmem:[#allocation11 + $0x18b8] sm:$0xff]  ;;  %v11030_v59 = vcombine.high %v3017_v52, %v3025_v54  ;;  %v11029_v0 = vcombine.low %v3017_v52, %v3025_v54 }
 0x5ea   :  { %v11031_v60 = vcombine.low %v3018_v56, %v3026_v28  ;;  %v3114_v54 = vld [vmem:[#allocation11 + $0x1bb8] sm:$0xff] }
 0x5eb   :  { %9542 = vmatpush1.bf16.msra.mxu0 %v10917_v61  ;;  %v3041_v61 = vld [vmem:[#allocation11 + $0x1970] sm:$0xff] }
 0x5ec   :  { %9706 = vmatpush1.bf16.msra.mxu1 %v10919_v62  ;;  %9543 = vmatprep.subr.bf16.mxu0 %v10934_v35  ;;  %v11032_v62 = vcombine.high %v3018_v56, %v3026_v28  ;;  %v3034_v35 = vld [vmem:[#allocation11 + $0x1938] sm:$0xff]  ;;  %v11046_v2 = vcombine.high %v3033_v8, %v3041_v61  ;;  %v11045_v19 = vcombine.low %v3033_v8, %v3041_v61 }
 0x5ed   :  { %9707 = vmatprep.subr.bf16.mxu1 %v10936_v63  ;;  %v3042_v63 = vld [vmem:[#allocation11 + $0x1978] sm:$0xff] }
 0x5ee   :  { %v11048_v48 = vcombine.high %v3034_v35, %v3042_v63 }
 0x5ef   :  { %9544 = vmatpush1.bf16.msra.mxu0 %v10933_v3  ;;  %v3049_v3 = vld [vmem:[#allocation11 + $0x19b0] sm:$0xff] }
 0x5f0   :  { %9708 = vmatpush1.bf16.msra.mxu1 %v10935_v4  ;;  %9545 = vmatprep.subr.bf16.mxu0 %v10950_v5  ;;  %v3057_v4 = vld [vmem:[#allocation11 + $0x19f0] sm:$0xff]  ;;  %v3050_v5 = vld [vmem:[#allocation11 + $0x19b8] sm:$0xff] }
 0x5f1   :  { %9709 = vmatprep.subr.bf16.mxu1 %v10952_v7  ;;  %v3058_v7 = vld [vmem:[#allocation11 + $0x19f8] sm:$0xff]  ;;  %v11062_v11 = vcombine.high %v3049_v3, %v3057_v4 }
 0x5f2   :  { %v11064_v26 = vcombine.high %v3050_v5, %v3058_v7 }
 0x5f3   :  { %9546 = vmatpush1.bf16.msra.mxu0 %v10949_v9  ;;  %v3073_v9 = vld [vmem:[#allocation11 + $0x1a70] sm:$0xff] }
 0x5f4   :  { %9710 = vmatpush1.bf16.msra.mxu1 %v10951_v10  ;;  %9547 = vmatprep.subr.bf16.mxu0 %v10966_v13  ;;  %v3066_v10 = vld [vmem:[#allocation11 + $0x1a38] sm:$0xff]  ;;  %v11078_v18 = vcombine.high %v3065_v36, %v3073_v9 }
 0x5f5   :  { %9711 = vmatprep.subr.bf16.mxu1 %v10968_v14  ;;  %v3074_v13 = vld [vmem:[#allocation11 + $0x1a78] sm:$0xff]  ;;  %v11063_v14 = vcombine.low %v3050_v5, %v3058_v7 }
 0x5f6   :  { %v11080_v15 = vcombine.high %v3066_v10, %v3074_v13  ;;  %v11079_v32 = vcombine.low %v3066_v10, %v3074_v13 }
 0x5f7   :  { %9548 = vmatpush1.bf16.msra.mxu0 %v10965_v20  ;;  %v3082_v20 = vld [vmem:[#allocation11 + $0x1ab8] sm:$0xff] }
 0x5f8   :  { %9712 = vmatpush1.bf16.msra.mxu1 %v10967_v27  ;;  %9549 = vmatprep.subr.bf16.mxu0 %v10982_v31  ;;  %v3090_v27 = vld [vmem:[#allocation11 + $0x1af8] sm:$0xff]  ;;  %v11077_v31 = vcombine.low %v3065_v36, %v3073_v9 }
 0x5f9   :  { %9713 = vmatprep.subr.bf16.mxu1 %v10984_v30  ;;  %v11953_v30 = vld [vmem:[#allocation13 + $0x8] sm:$0xff]  ;;  %v11096_v47 = vcombine.high %v3082_v20, %v3090_v27 }
 0x5fa   :  { %v3298_v46 = vrot.slane %v11953_v30, %v11793_v29  ;;  %v3294_v49 = vrot.slane %v11953_v30, %v11767_v23  ;;  %v3302_v50 = vrot.slane %v11953_v30, %v11772_v25 }
 0x5fb   :  { %9550 = vmatpush1.bf16.msra.mxu0 %v10981_v39  ;;  %v3105_v39 = vld [vmem:[#allocation11 + $0x1b70] sm:$0xff] }
 0x5fc   :  { %9714 = vmatpush1.bf16.msra.mxu1 %v10983_v43  ;;  %9551 = vmatprep.subr.bf16.mxu0 %v10998_v44  ;;  %v3290_v43 = vrot.slane %v11953_v30, %v11762_v21  ;;  %v3098_v44 = vld [vmem:[#allocation11 + $0x1b38] sm:$0xff] }
 0x5fd   :  { %9715 = vmatprep.subr.bf16.mxu1 %v11000_v45  ;;  %v3106_v45 = vld [vmem:[#allocation11 + $0x1b78] sm:$0xff] }
 0x5fe   :  { %v11112_v52 = vcombine.high %v3098_v44, %v3106_v45  ;;  %v11111_v25 = vcombine.low %v3098_v44, %v3106_v45  ;;  %v3161_v44 = vld [vmem:[#allocation11 + $0x1d30] sm:$0xff] }
 0x5ff   :  { %9552 = vmatpush1.bf16.msra.mxu0 %v10997_v53  ;;  %v11095_v53 = vcombine.low %v3082_v20, %v3090_v27  ;;  %v3153_v20 = vld [vmem:[#allocation11 + $0x1cf0] sm:$0xff] }
 0x600   :  { %9716 = vmatpush1.bf16.msra.mxu1 %v10999_v42  ;;  %9562 = vmatprep.subr.bf16.mxu0 %v11014_v57  ;;  %v11110_v42 = vcombine.high %v3097_v38, %v3105_v39  ;;  %v3113_v57 = vld [vmem:[#allocation11 + $0x1bb0] sm:$0xff] }
 0x601   :  { %9726 = vmatprep.subr.bf16.mxu1 %v11016_v51  ;;  %v3121_v51 = vld [vmem:[#allocation11 + $0x1bf0] sm:$0xff] }
 0x602   :  { %9554 = vmatmul.mubr.bf16.vlgmr.msra.gmra.mrb[24].mxu0 %v11858_v22  ;;  %v11125_v10 = vcombine.low %v3113_v57, %v3121_v51  ;;  %v3169_v45 = vld [vmem:[#allocation11 + $0x1d70] sm:$0xff] }
 0x603   :  { %9718 = vmatmul.mubr.bf16.vlgmr.msra.gmra.mrb[24].mxu1 %v11858_v22  ;;  %9563 = vmatpush1.bf16.msra.mxu0 %v11013_v55  ;;  %v11047_v22 = vcombine.low %v3034_v35, %v3042_v63  ;;  %v3122_v55 = vld [vmem:[#allocation11 + $0x1bf8] sm:$0xff]  ;;  %v3129_v35 = vld [vmem:[#allocation11 + $0x1c30] sm:$0xff] }
 0x604   :  { %9594 = vmatprep.mubr.bf16.mxu0 %v11862_v41  ;;  %9727 = vmatpush1.bf16.msra.mxu1 %v11015_v58  ;;  %v11109_v58 = vcombine.low %v3097_v38, %v3105_v39  ;;  %v11127_v13 = vcombine.low %v3114_v54, %v3122_v55  ;;  %v11158_v39 = vcombine.high %v3145_v17, %v3153_v20 }
 0x605   :  { %9758 = vmatprep.mubr.bf16.mxu1 %v11862_v41  ;;  %9564 = vmatprep.subr.bf16.mxu0 %v11030_v59  ;;  %v11061_v41 = vcombine.low %v3049_v3, %v3057_v4  ;;  %v3137_v3 = vld [vmem:[#allocation11 + $0x1c70] sm:$0xff] }
 0x606   :  { %9728 = vmatprep.subr.bf16.mxu1 %v11032_v62  ;;  %v11126_v62 = vcombine.high %v3113_v57, %v3121_v51  ;;  %v3177_v51 = vld [vmem:[#allocation11 + $0x1db0] sm:$0xff] }
 0x607   :  { %9565 = vmatpush1.bf16.msra.mxu0 %v11029_v0 }
 0x608   :  { %9729 = vmatpush1.bf16.msra.mxu1 %v11031_v60  ;;  %9566 = vmatprep.subr.bf16.mxu0 %v11046_v2 }
 0x609   :  { %9730 = vmatprep.subr.bf16.mxu1 %v11048_v48  ;;  %v11128_v48 = vcombine.high %v3114_v54, %v3122_v55  ;;  %v3186_v54 = vld [vmem:[#allocation11 + $0x1df8] sm:$0xff]  ;;  %v11173_v55 = vcombine.low %v3161_v44, %v3169_v45 }
 0x60b   :  { %9567 = vmatpush1.bf16.msra.mxu0 %v11045_v19 }
 0x60c   :  { %9731 = vmatpush1.bf16.msra.mxu1 %v11047_v22  ;;  %9568 = vmatprep.subr.bf16.mxu0 %v11062_v11  ;;  %v3130_v11 = vld [vmem:[#allocation11 + $0x1c38] sm:$0xff] }
 0x60d   :  { %9732 = vmatprep.subr.bf16.mxu1 %v11064_v26  ;;  %v3138_v26 = vld [vmem:[#allocation11 + $0x1c78] sm:$0xff] }
 0x60e   :  { %v11144_v16 = vcombine.high %v3130_v11, %v3138_v26  ;;  %v11143_v38 = vcombine.low %v3130_v11, %v3138_v26  ;;  %v3234_v11 = vld [vmem:[#allocation11 + $0x1f78] sm:$0xff] }
 0x60f   :  { %9569 = vmatpush1.bf16.msra.mxu0 %v11061_v41 }
 0x610   :  { %9733 = vmatpush1.bf16.msra.mxu1 %v11063_v14  ;;  %9570 = vmatprep.subr.bf16.mxu0 %v11078_v18  ;;  %v11142_v18 = vcombine.high %v3129_v35, %v3137_v3 }
 0x611   :  { %9734 = vmatprep.subr.bf16.mxu1 %v11080_v15 }
 0x613   :  { %9571 = vmatpush1.bf16.msra.mxu0 %v11077_v31  ;;  %v3146_v31 = vld [vmem:[#allocation11 + $0x1cb8] sm:$0xff] }
 0x614   :  { %9735 = vmatpush1.bf16.msra.mxu1 %v11079_v32  ;;  %9572 = vmatprep.subr.bf16.mxu0 %v11094_v34  ;;  %v3154_v32 = vld [vmem:[#allocation11 + $0x1cf8] sm:$0xff] }
 0x615   :  { %v9268_v21 = vpop.f32.mrb[20].mxu0  ;;  %9736 = vmatprep.subr.bf16.mxu1 %v11096_v47  ;;  %v11141_v47 = vcombine.low %v3129_v35, %v3137_v3 }
 0x616   :  { %v11281_v56 = vadd.f32 %v9268_v21, %v3290_v43  ;;  %v9432_v29 = vpop.f32.mrb[20].mxu1  ;;  %v9270_v28 = vpop.f32.mrb[21].mxu0  ;;  %v11160_v43 = vcombine.high %v3146_v31, %v3154_v32  ;;  %v3185_v21 = vld [vmem:[#allocation11 + $0x1df0] sm:$0xff] }
 0x617   :  { %v11283_v23 = vadd.f32 %v9432_v29, %v3298_v46  ;;  %v11282_v59 = vadd.f32 %v9270_v28, %v3294_v49  ;;  %v9434_v8 = vpop.f32.mrb[21].mxu1  ;;  %v9272_v61 = vpop.f32.mrb[22].mxu0  ;;  %9573 = vmatpush1.bf16.msra.mxu0 %v11093_v6  ;;  %v3162_v49 = vld [vmem:[#allocation11 + $0x1d38] sm:$0xff]  ;;  %v11190_v29 = vcombine.high %v3177_v51, %v3185_v21 }
 0x618   :  { %vm9775_vm5 = vcmp.ge.f32.partialorder %v11281_v56, 0.0  ;;  %v9791_v63 = vmul.f32 0.2, %v11281_v56  ;;  %v11284_v0 = vadd.f32 %v9434_v8, %v3302_v50  ;;  %v9436_v60 = vpop.f32.mrb[22].mxu1  ;;  %9737 = vmatpush1.bf16.msra.mxu1 %v11095_v53  ;;  %v9273_v2 = vpop.f32.mrb[23].mxu0  ;;  %9574 = vmatprep.subr.bf16.mxu0 %v11110_v42  ;;  %v3170_v6 = vld [vmem:[#allocation11 + $0x1d78] sm:$0xff]  ;;  %v11157_v50 = vcombine.low %v3145_v17, %v3153_v20 }
 0x619   :  { %vm9777_vm6 = vcmp.ge.f32.partialorder %v11283_v23, 0.0  ;;  %v9793_v4 = vmul.f32 0.2, %v11283_v23  ;;  %vm9776_vm7 = vcmp.ge.f32.partialorder %v11282_v59, 0.0  ;;  %v9792_v5 = vmul.f32 0.2, %v11282_v59  ;;  %9738 = vmatprep.subr.bf16.mxu1 %v11112_v52 }
 0x61a   :  { %v9807_v7 = vsel %vm9775_vm5, %v11281_v56, %v9791_v63  ;;  %vm9778_vm8 = vcmp.ge.f32.partialorder %v11284_v0, 0.0  ;;  %v9794_v19 = vmul.f32 0.2, %v11284_v0  ;;  %v9437_v22 = vpop.f32.mrb[23].mxu1  ;;  %v11159_v53 = vcombine.low %v3146_v31, %v3154_v32  ;;  %v3178_v52 = vld [vmem:[#allocation11 + $0x1db8] sm:$0xff]  ;;  %v3209_v63 = vld [vmem:[#allocation11 + $0x1eb0] sm:$0xff] }
 0x61b   :  { %v9809_v36 = vsel %vm9777_vm6, %v11283_v23, %v9793_v4  ;;  %v9808_v9 = vsel %vm9776_vm7, %v11282_v59, %v9792_v5  ;;  %9575 = vmatpush1.bf16.msra.mxu0 %v11109_v58  ;;  %v11174_v42 = vcombine.high %v3161_v44, %v3169_v45  ;;  %v11176_v57 = vcombine.high %v3162_v49, %v3170_v6  ;;  %v3193_v58 = vld [vmem:[#allocation11 + $0x1e30] sm:$0xff]  ;;  %v3194_v59 = vld [vmem:[#allocation11 + $0x1e38] sm:$0xff] }
 0x61c   :  { %v11261_v41 = vpack.c.bf16 %v9808_v9, %v9807_v7  ;;  %v9810_v14 = vsel %vm9778_vm8, %v11284_v0, %v9794_v19  ;;  %9739 = vmatpush1.bf16.msra.mxu1 %v11111_v25  ;;  %9576 = vmatprep.subr.bf16.mxu0 %v11126_v62  ;;  %v11175_v56 = vcombine.low %v3162_v49, %v3170_v6  ;;  %v3201_v23 = vld [vmem:[#allocation11 + $0x1e70] sm:$0xff]  ;;  %v3202_v8 = vld [vmem:[#allocation11 + $0x1e78] sm:$0xff] }
 0x61d   :  { %v11262_v15 = vpack.c.bf16 %v9810_v14, %v9809_v36  ;;  %9740 = vmatprep.subr.bf16.mxu1 %v11128_v48  ;;  %v11192_v28 = vcombine.high %v3178_v52, %v3186_v54  ;;  %v11189_v61 = vcombine.low %v3177_v51, %v3185_v21  ;;  %v11191_v25 = vcombine.low %v3178_v52, %v3186_v54  ;;  %v3217_v0 = vld [vmem:[#allocation11 + $0x1ef0] sm:$0xff]  ;;  %v3210_v60 = vld [vmem:[#allocation11 + $0x1eb8] sm:$0xff] }
 0x61e   :  { %v11964_v27 = vrot.slane %v11261_v41, %v11899_v1  ;;  %v11206_v62 = vcombine.high %v3193_v58, %v3201_v23  ;;  %v11208_v35 = vcombine.high %v3194_v59, %v3202_v8  ;;  %v3218_v2 = vld [vmem:[#allocation11 + $0x1ef8] sm:$0xff]  ;;  %v11205_v48 = vcombine.low %v3193_v58, %v3201_v23  ;;  %v3225_v7 = vld [vmem:[#allocation11 + $0x1f30] sm:$0xff] }
 0x61f   :  { %v11967_v34 = vrot.slane %v11262_v15, %v11899_v1  ;;  %9577 = vmatpush1.bf16.msra.mxu0 %v11125_v10  ;;  %v11207_v3 = vcombine.low %v3194_v59, %v3202_v8  ;;  %v11222_v4 = vcombine.high %v3209_v63, %v3217_v0  ;;  %v11224_v5 = vcombine.high %v3210_v60, %v3218_v2  ;;  %v3233_v19 = vld [vmem:[#allocation11 + $0x1f70] sm:$0xff]  ;;  %v3226_v22 = vld [vmem:[#allocation11 + $0x1f38] sm:$0xff] }
 0x620   :  { %9741 = vmatpush1.bf16.msra.mxu1 %v11127_v13  ;;  %9578 = vmatprep.subr.bf16.mxu0 %v11142_v18  ;;  %v11221_v26 = vcombine.low %v3209_v63, %v3217_v0  ;;  %v11223_v36 = vcombine.low %v3210_v60, %v3218_v2  ;;  %v11238_v9 = vcombine.high %v3225_v7, %v3233_v19  ;;  %v3241_v13 = vld [vmem:[#allocation11 + $0x1fb0] sm:$0xff]  ;;  %v3242_v14 = vld [vmem:[#allocation11 + $0x1fb8] sm:$0xff] }
 0x621   :  { %9742 = vmatprep.subr.bf16.mxu1 %v11144_v16  ;;  %v9928_v46 = vcombine.low %v11964_v27, %v11967_v34  ;;  %v11240_v10 = vcombine.high %v3226_v22, %v3234_v11  ;;  %v3249_v41 = vld [vmem:[#allocation11 + $0x1ff0] sm:$0xff]  ;;  %v3250_v18 = vld [vmem:[#allocation11 + $0x1ff8] sm:$0xff]  ;;  %v11237_v15 = vcombine.low %v3225_v7, %v3233_v19  ;;  %v11239_v16 = vcombine.low %v3226_v22, %v3234_v11 }
 0x622   :  { %v11254_v17 = vcombine.high %v3241_v13, %v3249_v41  ;;  %v11256_v20 = vcombine.high %v3242_v14, %v3250_v18  ;;  %v11253_v31 = vcombine.low %v3241_v13, %v3249_v41  ;;  %v11255_v32 = vcombine.low %v3242_v14, %v3250_v18 }
 0x623   :  { %9579 = vmatpush1.bf16.msra.mxu0 %v11141_v47  ;;  %v3306_v47 = vrot.slane %v11953_v30, %v11840_v33  ;;  %v9936_v8 = vrot.slane %v9928_v46, %v11899_v1 }
 0x624   :  { %9743 = vmatpush1.bf16.msra.mxu1 %v11143_v38  ;;  %9580 = vmatprep.subr.bf16.mxu0 %v11158_v39  ;;  %v3314_v38 = vrot.slane %v11953_v30, %v11869_v24  ;;  %v3310_v39 = vrot.slane %v11953_v30, %v11843_v37 }
 0x625   :  { %9744 = vmatprep.subr.bf16.mxu1 %v11160_v43  ;;  %v3318_v43 = vrot.slane %v11953_v30, %v11846_v40 }
 0x627   :  { %9581 = vmatpush1.bf16.msra.mxu0 %v11157_v50 }
 0x628   :  { %9745 = vmatpush1.bf16.msra.mxu1 %v11159_v53  ;;  %9582 = vmatprep.subr.bf16.mxu0 %v11174_v42 }
 0x629   :  { %9746 = vmatprep.subr.bf16.mxu1 %v11176_v57 }
 0x62b   :  { %9583 = vmatpush1.bf16.msra.mxu0 %v11173_v55 }
 0x62c   :  { %9747 = vmatpush1.bf16.msra.mxu1 %v11175_v56  ;;  %9584 = vmatprep.subr.bf16.mxu0 %v11190_v29 }
 0x62d   :  { %9748 = vmatprep.subr.bf16.mxu1 %v11192_v28 }
 0x62f   :  { %9585 = vmatpush1.bf16.msra.mxu0 %v11189_v61 }
 0x630   :  { %9749 = vmatpush1.bf16.msra.mxu1 %v11191_v25  ;;  %9586 = vmatprep.subr.bf16.mxu0 %v11206_v62 }
 0x631   :  { %9750 = vmatprep.subr.bf16.mxu1 %v11208_v35 }
 0x633   :  { %9587 = vmatpush1.bf16.msra.mxu0 %v11205_v48 }
 0x634   :  { %9751 = vmatpush1.bf16.msra.mxu1 %v11207_v3  ;;  %9588 = vmatprep.subr.bf16.mxu0 %v11222_v4 }
 0x635   :  { %9752 = vmatprep.subr.bf16.mxu1 %v11224_v5 }
 0x637   :  { %9589 = vmatpush1.bf16.msra.mxu0 %v11221_v26 }
 0x638   :  { %9753 = vmatpush1.bf16.msra.mxu1 %v11223_v36  ;;  %9590 = vmatprep.subr.bf16.mxu0 %v11238_v9 }
 0x639   :  { %9754 = vmatprep.subr.bf16.mxu1 %v11240_v10 }
 0x63b   :  { %9591 = vmatpush1.bf16.msra.mxu0 %v11237_v15 }
 0x63c   :  { %9755 = vmatpush1.bf16.msra.mxu1 %v11239_v16  ;;  %9592 = vmatprep.subr.bf16.mxu0 %v11254_v17 }
 0x63d   :  { %9756 = vmatprep.subr.bf16.mxu1 %v11256_v20 }
 0x63f   :  { %9593 = vmatpush1.bf16.msra.mxu0 %v11253_v31 }
 0x640   :  { %9757 = vmatpush1.bf16.msra.mxu1 %v11255_v32 }
 0x642   :  { %9595 = vmatmul.mubr.bf16.vlgmr.msra.gmra.mrb[24].mxu0 %v11873_v12 }
 0x643   :  { %9759 = vmatmul.mubr.bf16.vlgmr.msra.gmra.mrb[24].mxu1 %v11873_v12 }
 0x715   :  { %v9596_v44 = vpop.f32.mrb[24].mxu0 }
 0x716   :  { %v11285_v45 = vadd.f32 %v9596_v44, %v3306_v47  ;;  %v9760_v49 = vpop.f32.mrb[24].mxu1  ;;  %v9598_v6 = vpop.f32.mrb[25].mxu0 }
 0x717   :  { %v11287_v50 = vadd.f32 %v9760_v49, %v3314_v38  ;;  %v11286_v53 = vadd.f32 %v9598_v6, %v3310_v39  ;;  %v9762_v42 = vpop.f32.mrb[25].mxu1  ;;  %v9600_v12 = vpop.f32.mrb[26].mxu0 }
 0x718   :  { %vm9779_vm9 = vcmp.ge.f32.partialorder %v11285_v45, 0.0  ;;  %v9795_v57 = vmul.f32 0.2, %v11285_v45  ;;  %v11288_v33 = vadd.f32 %v9762_v42, %v3318_v43  ;;  %v9764_v51 = vpop.f32.mrb[26].mxu1  ;;  %v9601_v21 = vpop.f32.mrb[27].mxu0 }
 0x719   :  { %vm9781_vm10 = vcmp.ge.f32.partialorder %v11287_v50, 0.0  ;;  %v9797_v24 = vmul.f32 0.2, %v11287_v50  ;;  %vm9780_vm11 = vcmp.ge.f32.partialorder %v11286_v53, 0.0  ;;  %v9796_v37 = vmul.f32 0.2, %v11286_v53 }
 0x71a   :  { %v9811_v52 = vsel %vm9779_vm9, %v11285_v45, %v9795_v57  ;;  %vm9782_vm12 = vcmp.ge.f32.partialorder %v11288_v33, 0.0  ;;  %v9798_v40 = vmul.f32 0.2, %v11288_v33  ;;  %v9765_v30 = vpop.f32.mrb[27].mxu1 }
 0x71b   :  { %v9813_v54 = vsel %vm9781_vm10, %v11287_v50, %v9797_v24  ;;  %v9812_v55 = vsel %vm9780_vm11, %v11286_v53, %v9796_v37 }
 0x71c   :  { %v11263_v56 = vpack.c.bf16 %v9812_v55, %v9811_v52  ;;  %v9814_v29 = vsel %vm9782_vm12, %v11288_v33, %v9798_v40 }
 0x71d   :  { %v11264_v28 = vpack.c.bf16 %v9814_v29, %v9813_v54 }
 0x71e   :  { %v9920_v58 = vrot.slane %v11263_v56, %v11899_v1 }
 0x71f   :  { %v9927_v23 = vrot.slane %v11264_v28, %v11899_v1 }
 0x721   :  { %v9929_v59 = vcombine.low %v9920_v58, %v9927_v23 }
 0x723   :  { %v9943_v61 = vrot.slane %v9929_v59, %v11899_v1 }
 0x725   :  { %v9944_v25 = vcombine.low %v9936_v8, %v9943_v61 }
 0x727   :  { %9948 = vst [vmem:[#allocation14 + $0x8] sm:$0xff] %v9944_v25 }
 0x728   :  { %11596 = shalt.err (!%p11593_p4)
}
 0x729   :  { %s11597_s3 = scalar_lea.hbm %s12007_s7, 256 }
 0x72a   :  { %p11598_p5 = scmp.ne.s32.totalorder %s12007_s7, %s11597_s3  ;;  %p11601_p6 = scmp.lt.u32.totalorder %s11597_s3, %s12007_s7 }
 0x72c   :  { %p11603_p7 = pnand %p11601_p6, %p11598_p5 }
 0x72e   :  { %11606 = shalt.err (!%p11603_p7)
}
 0x72f   :  { %9958 = dma.vmem_to_hbm [thread:$0]  %s9956_s12, 256, %s12007_s7, [#allocation4]  }
 0x730   :  { %11615 = dma.done.wait [#allocation4], 256  }
 0x731   :  { %11616 = vsyncadd [#allocation4], 4294967040 }
 0x732   :  { %9962 = vsyncpa [#allocation3], 1 }
 0x733   :  { %9963 = vsyncpa [#allocation6], 1 }
 0x734   :  { %9964 = vsyncpa [#allocation9], 1 }
 0x735   :  { %9965 = vsyncpa [#allocation12], 1 }
 0x736   :  { %9966 = vsyncpa [#allocation4], 1 }

</bundles_post_ra>
